<compile_context>
chip_gen: v5e
topology: v5e:2x2
jax: 0.10.0
libtpu: 0.0.40
codegen_flags: <defaults>
</compile_context>

<pallas_src>
import jax
import jax.numpy as jnp
from jax.experimental import pallas as pl
from jax.experimental.pallas import tpu as pltpu

INPUT_SIZE = 904
HIDDEN = 100          # real hidden size (PyTorch)
HP = 128              # padded hidden size (one lane tile)
NBLK = 8              # gate-column blocks: i_f|i_r|f_f|f_r|o_f|o_r|g_f|g_r
GW = NBLK * HP        # fused gate width = 1024


def bilstm_recurrence_kernel(sched_ref, whh_ref, out_ref):
    """Fused bidirectional LSTM recurrence.

    sched_ref : [T, 1024]  time-aligned gate pre-activations (x @ W_ih + b);
                columns interleaved as i_f|i_r|f_f|f_r|o_f|o_r|g_f|g_r (128 lanes
                each). Forward blocks of row s were computed from x[s], backward
                blocks from x[T-1-s].
    whh_ref   : [256, 1024] block-diagonal recurrent weights in the same column
                layout; rows 0:128 feed from forward h, rows 128:256 from backward h.
    out_ref   : [T, 256]   lanes 0:128 = forward h(t), lanes 128:256 = backward h(t).
    """
    T = sched_ref.shape[0]
    whh = whh_ref[...]                                   # stays VMEM-resident
    h = jnp.zeros((1, 2 * HP), jnp.float32)              # [h_fwd | h_bwd]
    c = jnp.zeros((1, 2 * HP), jnp.float32)              # [c_fwd | c_bwd]

    for s in range(T):                                   # static unroll; serial recurrence
        # One MXU launch per step covers both directions (block-diagonal W_hh).
        gates = sched_ref[s:s + 1, :] + jnp.dot(
            h, whh, preferred_element_type=jnp.float32)  # [1, 1024]

        # i|f|o occupy the first 768 lanes: a single EUP tanh pass covers all
        # three sigmoids via sigmoid(x) == 0.5 * tanh(0.5 * x) + 0.5.
        sig = 0.5 * jnp.tanh(0.5 * gates[:, 0:6 * HP]) + 0.5
        i = sig[:, 0 * HP:2 * HP]                        # [i_f | i_r]
        f = sig[:, 2 * HP:4 * HP]                        # [f_f | f_r]
        o = sig[:, 4 * HP:6 * HP]                        # [o_f | o_r]
        g = jnp.tanh(gates[:, 6 * HP:8 * HP])            # [g_f | g_r]

        c = f * c + i * g
        h = o * jnp.tanh(c)

        # Forward half belongs to output row s, backward half to row T-1-s.
        # Static, lane-aligned [1,128] stores; they hide under the next step.
        out_ref[s:s + 1, 0:HP] = h[:, 0:HP]
        out_ref[T - 1 - s:T - s, HP:2 * HP] = h[:, HP:2 * HP]


def _forward_impl(x, wih_all, b_all, whh_fused, proj_dtype):
    """x: [T, 904] float32 -> [T, 200] (concat of fwd/bwd hidden states)."""
    T = x.shape[0]
    if proj_dtype == "bf16":
        xp = x.astype(jnp.bfloat16)
        wp = wih_all.astype(jnp.bfloat16)
        prec = None
    else:
        xp, wp = x, wih_all
        prec = jax.lax.Precision.HIGHEST

    # Input projection hoisted to XLA (keeps the 3.7 MB W_ih DMA out of the
    # single-grid-point kernel and lets XLA overlap it with surrounding ops).
    # bf16 operands, f32 accumulation; bias (already gate-padded) fused here.
    proj = jnp.dot(xp, wp, preferred_element_type=jnp.float32,
                   precision=prec) + b_all                          # [T, 1024]

    # Time-align once, outside the serial recurrence: forward blocks (even
    # 128-lane blocks) read time s, backward blocks (odd) read time T-1-s.
    bwd_mask = ((jnp.arange(GW) // HP) % 2 == 1)[None, :]
    sched = jnp.where(bwd_mask, proj[::-1, :], proj)                # [T, 1024]

    out = pl.pallas_call(
        bilstm_recurrence_kernel,
        out_shape=jax.ShapeDtypeStruct((T, 2 * HP), jnp.float32),
        in_specs=[pl.BlockSpec(memory_space=pltpu.MemorySpace.VMEM)] * 2,
        out_specs=pl.BlockSpec(memory_space=pltpu.MemorySpace.VMEM),
    )(sched, whh_fused)

    # Drop the padded lanes (100:128 per direction) and build [T, 200].
    return jnp.concatenate([out[:, :HIDDEN], out[:, HP:HP + HIDDEN]], axis=-1)


prediction_bilstm_forward = jax.jit(_forward_impl, static_argnames=("proj_dtype",))


def init_params(key):
    """Deterministic synthetic init matching nn.LSTM parameter shapes.

    PyTorch shapes: weight_ih_l0 [4H, 904], weight_hh_l0 [4H, H],
                    bias_ih_l0 [4H], bias_hh_l0 [4H]  (+ _reverse copies).
    weight_hh is uniform(-0.05, 0.05) per the module's __init__; the rest use
    the default uniform(-1/sqrt(H), 1/sqrt(H)).
    """
    H = HIDDEN
    k = 1.0 / jnp.sqrt(jnp.float32(H))
    keys = jax.random.split(key, 8)

    def u(kk, shape, lo, hi):
        return jax.random.uniform(kk, shape, jnp.float32, lo, hi)

    params = {}
    for direction, base in (("f", 0), ("r", 4)):
        w_ih = u(keys[base + 0], (4 * H, INPUT_SIZE), -k, k)
        w_hh = u(keys[base + 1], (4 * H, H), -0.05, 0.05)
        b_ih = u(keys[base + 2], (4 * H,), -k, k)
        b_hh = u(keys[base + 3], (4 * H,), -k, k)
        params[direction] = (w_ih, w_hh, b_ih, b_hh)
    return params


def pack_params_for_kernel(params):
    """Pad each gate 100 -> 128, reorder gates to i|f|o|g, interleave directions,
    and build the block-diagonal fused recurrent weight.

    Returns:
      wih_all   : [904, 1024]  input->gate weights, columns i_f|i_r|f_f|f_r|o_f|o_r|g_f|g_r
      b_all     : [1, 1024]    merged (b_ih + b_hh) in the same column layout
      whh_fused : [256, 1024]  block-diagonal recurrent weights (rows: h_f | h_r)
    """
    H = HIDDEN
    GATE_ORDER = (0, 1, 3, 2)   # torch gate order is [i; f; g; o] -> take i, f, o, g

    def gate_blocks(w_t):
        # w_t: [in_dim, 4H] with columns i|f|g|o -> four zero-padded [in_dim, HP] blocks.
        return [jnp.pad(w_t[:, g * H:(g + 1) * H], ((0, 0), (0, HP - H)))
                for g in range(4)]

    w_ih_f, w_hh_f, b_ih_f, b_hh_f = params["f"]
    w_ih_r, w_hh_r, b_ih_r, b_hh_r = params["r"]

    ih_f = gate_blocks(jnp.asarray(w_ih_f).T)                     # 4 x [904, 128]
    ih_r = gate_blocks(jnp.asarray(w_ih_r).T)
    bb_f = gate_blocks((b_ih_f + b_hh_f).reshape(1, 4 * H))       # 4 x [1, 128]
    bb_r = gate_blocks((b_ih_r + b_hh_r).reshape(1, 4 * H))
    hh_f = [jnp.pad(b, ((0, HP - H), (0, 0)))                     # 4 x [128, 128]
            for b in gate_blocks(jnp.asarray(w_hh_f).T)]
    hh_r = [jnp.pad(b, ((0, HP - H), (0, 0)))
            for b in gate_blocks(jnp.asarray(w_hh_r).T)]

    zero = jnp.zeros((HP, HP), jnp.float32)
    wih_cols, b_cols, whh_cols = [], [], []
    for g in GATE_ORDER:
        wih_cols += [ih_f[g], ih_r[g]]
        b_cols += [bb_f[g], bb_r[g]]
        whh_cols.append(jnp.concatenate([hh_f[g], zero], axis=0))  # fwd column block
        whh_cols.append(jnp.concatenate([zero, hh_r[g]], axis=0))  # bwd column block

    wih_all = jnp.concatenate(wih_cols, axis=1)                    # [904, 1024]
    b_all = jnp.concatenate(b_cols, axis=1)                        # [1, 1024]
    whh_fused = jnp.concatenate(whh_cols, axis=1)                  # [256, 1024]
    return wih_all, b_all, whh_fused


def lstm_reference(x, params):
    """Pure-JAX reference mirroring torch.nn.LSTM (gate order i, f, g, o)."""
    H = HIDDEN
    T = x.shape[0]
    hi = jax.lax.Precision.HIGHEST

    def run(w_ih, w_hh, b_ih, b_hh, reverse):
        h = jnp.zeros((H,), jnp.float32)
        c = jnp.zeros((H,), jnp.float32)
        outs = [None] * T
        order = range(T - 1, -1, -1) if reverse else range(T)
        for t in order:
            gates = (jnp.dot(x[t], w_ih.T, precision=hi) + b_ih
                     + jnp.dot(h, w_hh.T, precision=hi) + b_hh)
            i = jax.nn.sigmoid(gates[0 * H:1 * H])
            f = jax.nn.sigmoid(gates[1 * H:2 * H])
            g = jnp.tanh(gates[2 * H:3 * H])
            o = jax.nn.sigmoid(gates[3 * H:4 * H])
            c = f * c + i * g
            h = o * jnp.tanh(c)
            outs[t] = h
        return jnp.stack(outs)

    fwd = run(*params["f"], reverse=False)
    bwd = run(*params["r"], reverse=True)
    return jnp.concatenate([fwd, bwd], axis=-1)


if __name__ == "__main__":
    key = jax.random.PRNGKey(0)
    k_param, k_data = jax.random.split(key)

    # V_cells: list of T=8 feature vectors of size 904 (as in the PyTorch forward).
    T = 8
    V_cells = [jax.random.normal(jax.random.fold_in(k_data, i), (INPUT_SIZE,), jnp.float32)
               for i in range(T)]
    # cell_tensor[:, idx, :] = cell -> stack along time, batch of 1 (squeezed at the end).
    x = jnp.stack(V_cells, axis=0)                            # [T, 904]

    params = init_params(k_param)
    wih_all, b_all, whh_fused = pack_params_for_kernel(params)

    ref = lstm_reference(x, params)

    # Performance path: bf16 projection operands, f32 accumulation.
    out_bf16 = prediction_bilstm_forward(x, wih_all, b_all, whh_fused, proj_dtype="bf16")
    out_bf16 = jax.block_until_ready(out_bf16)
    assert out_bf16.shape == (T, 2 * HIDDEN), out_bf16.shape
    if not jnp.allclose(out_bf16, ref, atol=2e-2, rtol=2e-2):
        raise AssertionError("Pallas BiLSTM (bf16 projection) does not match JAX reference")

    # Tighter f32-projection check guarding the packed/interleaved layout
    # (per review: the loose bf16 tolerance could mask a layout bug).
    out_f32 = prediction_bilstm_forward(x, wih_all, b_all, whh_fused, proj_dtype="f32")
    out_f32 = jax.block_until_ready(out_f32)
    if not jnp.allclose(out_f32, ref, atol=5e-3, rtol=5e-3):
        raise AssertionError("Pallas BiLSTM (f32 projection) does not match JAX reference")

    print("KERNEL_OK")
</pallas_src>

<mosaic_0001>
module attributes {stable_mosaic.version = 11 : i64} {
  func.func @bilstm_recurrence_kernel(%arg0: memref<8x1024xf32, #tpu.memory_space<vmem>>, %arg1: memref<256x1024xf32, #tpu.memory_space<vmem>>, %arg2: memref<8x256xf32, #tpu.memory_space<vmem>>) attributes {dimension_semantics = [], scalar_prefetch = 0 : i64, scratch_operands = 0 : i64, tpu.core_type = #tpu.core_type<tc>} {
    %c0 = arith.constant 0 : index
    %c0_0 = arith.constant 0 : index
    %0 = vector.load %arg1[%c0, %c0_0] : memref<256x1024xf32, #tpu.memory_space<vmem>>, vector<256x1024xf32>
    %cst = arith.constant 0.000000e+00 : f32
    %1 = vector.broadcast %cst : f32 to vector<1x256xf32>
    %cst_1 = arith.constant 0.000000e+00 : f32
    %2 = vector.broadcast %cst_1 : f32 to vector<1x256xf32>
    %c0_2 = arith.constant 0 : index
    %c0_3 = arith.constant 0 : index
    %3 = vector.load %arg0[%c0_2, %c0_3] : memref<8x1024xf32, #tpu.memory_space<vmem>>, vector<1x1024xf32>
    %cst_4 = arith.constant dense<0.000000e+00> : vector<1x1024xf32>
    %4 = tpu.matmul %1, %0, %cst_4 {dimension_numbers = #tpu.dot_dimension_numbers<[1], [0], [0], [1], [0, 0, 1, 1], [], []>} : vector<1x256xf32>, vector<256x1024xf32>, vector<1x1024xf32> -> vector<1x1024xf32>
    %5 = arith.addf %3, %4 : vector<1x1024xf32>
    %6 = vector.extract_strided_slice %5 {offsets = [0, 0], sizes = [1, 768], strides = [1, 1]} : vector<1x1024xf32> to vector<1x768xf32>
    %cst_5 = arith.constant 5.000000e-01 : f32
    %7 = vector.broadcast %cst_5 : f32 to vector<1x768xf32>
    %8 = arith.mulf %7, %6 : vector<1x768xf32>
    %9 = math.tanh %8 : vector<1x768xf32>
    %cst_6 = arith.constant 5.000000e-01 : f32
    %10 = vector.broadcast %cst_6 : f32 to vector<1x768xf32>
    %11 = arith.mulf %10, %9 : vector<1x768xf32>
    %cst_7 = arith.constant 5.000000e-01 : f32
    %12 = vector.broadcast %cst_7 : f32 to vector<1x768xf32>
    %13 = arith.addf %11, %12 : vector<1x768xf32>
    %14 = vector.extract_strided_slice %13 {offsets = [0, 0], sizes = [1, 256], strides = [1, 1]} : vector<1x768xf32> to vector<1x256xf32>
    %15 = vector.extract_strided_slice %13 {offsets = [0, 256], sizes = [1, 256], strides = [1, 1]} : vector<1x768xf32> to vector<1x256xf32>
    %16 = vector.extract_strided_slice %13 {offsets = [0, 512], sizes = [1, 256], strides = [1, 1]} : vector<1x768xf32> to vector<1x256xf32>
    %17 = vector.extract_strided_slice %5 {offsets = [0, 768], sizes = [1, 256], strides = [1, 1]} : vector<1x1024xf32> to vector<1x256xf32>
    %18 = math.tanh %17 : vector<1x256xf32>
    %19 = arith.mulf %15, %2 : vector<1x256xf32>
    %20 = arith.mulf %14, %18 : vector<1x256xf32>
    %21 = arith.addf %19, %20 : vector<1x256xf32>
    %22 = math.tanh %21 : vector<1x256xf32>
    %23 = arith.mulf %16, %22 : vector<1x256xf32>
    %24 = vector.extract_strided_slice %23 {offsets = [0, 0], sizes = [1, 128], strides = [1, 1]} : vector<1x256xf32> to vector<1x128xf32>
    %c0_8 = arith.constant 0 : index
    %c0_9 = arith.constant 0 : index
    %25 = vector.load %arg2[%c0_8, %c0_9] : memref<8x256xf32, #tpu.memory_space<vmem>>, vector<1x128xf32>
    tpu.vector_store %arg2[%c0_8, %c0_9], %24 {strides = array<i32>} : memref<8x256xf32, #tpu.memory_space<vmem>>, vector<1x128xf32>,
    %26 = vector.extract_strided_slice %23 {offsets = [0, 128], sizes = [1, 128], strides = [1, 1]} : vector<1x256xf32> to vector<1x128xf32>
    %c7 = arith.constant 7 : index
    %c128 = arith.constant 128 : index
    %27 = vector.load %arg2[%c7, %c128] : memref<8x256xf32, #tpu.memory_space<vmem>>, vector<1x128xf32>
    tpu.vector_store %arg2[%c7, %c128], %26 {strides = array<i32>} : memref<8x256xf32, #tpu.memory_space<vmem>>, vector<1x128xf32>,
    %c1 = arith.constant 1 : index
    %c0_10 = arith.constant 0 : index
    %28 = vector.load %arg0[%c1, %c0_10] : memref<8x1024xf32, #tpu.memory_space<vmem>>, vector<1x1024xf32>
    %cst_11 = arith.constant dense<0.000000e+00> : vector<1x1024xf32>
    %29 = tpu.matmul %23, %0, %cst_11 {dimension_numbers = #tpu.dot_dimension_numbers<[1], [0], [0], [1], [0, 0, 1, 1], [], []>} : vector<1x256xf32>, vector<256x1024xf32>, vector<1x1024xf32> -> vector<1x1024xf32>
    %30 = arith.addf %28, %29 : vector<1x1024xf32>
    %31 = vector.extract_strided_slice %30 {offsets = [0, 0], sizes = [1, 768], strides = [1, 1]} : vector<1x1024xf32> to vector<1x768xf32>
    %cst_12 = arith.constant 5.000000e-01 : f32
    %32 = vector.broadcast %cst_12 : f32 to vector<1x768xf32>
    %33 = arith.mulf %32, %31 : vector<1x768xf32>
    %34 = math.tanh %33 : vector<1x768xf32>
    %cst_13 = arith.constant 5.000000e-01 : f32
    %35 = vector.broadcast %cst_13 : f32 to vector<1x768xf32>
    %36 = arith.mulf %35, %34 : vector<1x768xf32>
    %cst_14 = arith.constant 5.000000e-01 : f32
    %37 = vector.broadcast %cst_14 : f32 to vector<1x768xf32>
    %38 = arith.addf %36, %37 : vector<1x768xf32>
    %39 = vector.extract_strided_slice %38 {offsets = [0, 0], sizes = [1, 256], strides = [1, 1]} : vector<1x768xf32> to vector<1x256xf32>
    %40 = vector.extract_strided_slice %38 {offsets = [0, 256], sizes = [1, 256], strides = [1, 1]} : vector<1x768xf32> to vector<1x256xf32>
    %41 = vector.extract_strided_slice %38 {offsets = [0, 512], sizes = [1, 256], strides = [1, 1]} : vector<1x768xf32> to vector<1x256xf32>
    %42 = vector.extract_strided_slice %30 {offsets = [0, 768], sizes = [1, 256], strides = [1, 1]} : vector<1x1024xf32> to vector<1x256xf32>
    %43 = math.tanh %42 : vector<1x256xf32>
    %44 = arith.mulf %40, %21 : vector<1x256xf32>
    %45 = arith.mulf %39, %43 : vector<1x256xf32>
    %46 = arith.addf %44, %45 : vector<1x256xf32>
    %47 = math.tanh %46 : vector<1x256xf32>
    %48 = arith.mulf %41, %47 : vector<1x256xf32>
    %49 = vector.extract_strided_slice %48 {offsets = [0, 0], sizes = [1, 128], strides = [1, 1]} : vector<1x256xf32> to vector<1x128xf32>
    %c1_15 = arith.constant 1 : index
    %c0_16 = arith.constant 0 : index
    %50 = vector.load %arg2[%c1_15, %c0_16] : memref<8x256xf32, #tpu.memory_space<vmem>>, vector<1x128xf32>
    tpu.vector_store %arg2[%c1_15, %c0_16], %49 {strides = array<i32>} : memref<8x256xf32, #tpu.memory_space<vmem>>, vector<1x128xf32>,
    %51 = vector.extract_strided_slice %48 {offsets = [0, 128], sizes = [1, 128], strides = [1, 1]} : vector<1x256xf32> to vector<1x128xf32>
    %c6 = arith.constant 6 : index
    %c128_17 = arith.constant 128 : index
    %52 = vector.load %arg2[%c6, %c128_17] : memref<8x256xf32, #tpu.memory_space<vmem>>, vector<1x128xf32>
    tpu.vector_store %arg2[%c6, %c128_17], %51 {strides = array<i32>} : memref<8x256xf32, #tpu.memory_space<vmem>>, vector<1x128xf32>,
    %c2 = arith.constant 2 : index
    %c0_18 = arith.constant 0 : index
    %53 = vector.load %arg0[%c2, %c0_18] : memref<8x1024xf32, #tpu.memory_space<vmem>>, vector<1x1024xf32>
    %cst_19 = arith.constant dense<0.000000e+00> : vector<1x1024xf32>
    %54 = tpu.matmul %48, %0, %cst_19 {dimension_numbers = #tpu.dot_dimension_numbers<[1], [0], [0], [1], [0, 0, 1, 1], [], []>} : vector<1x256xf32>, vector<256x1024xf32>, vector<1x1024xf32> -> vector<1x1024xf32>
    %55 = arith.addf %53, %54 : vector<1x1024xf32>
    %56 = vector.extract_strided_slice %55 {offsets = [0, 0], sizes = [1, 768], strides = [1, 1]} : vector<1x1024xf32> to vector<1x768xf32>
    %cst_20 = arith.constant 5.000000e-01 : f32
    %57 = vector.broadcast %cst_20 : f32 to vector<1x768xf32>
    %58 = arith.mulf %57, %56 : vector<1x768xf32>
    %59 = math.tanh %58 : vector<1x768xf32>
    %cst_21 = arith.constant 5.000000e-01 : f32
    %60 = vector.broadcast %cst_21 : f32 to vector<1x768xf32>
    %61 = arith.mulf %60, %59 : vector<1x768xf32>
    %cst_22 = arith.constant 5.000000e-01 : f32
    %62 = vector.broadcast %cst_22 : f32 to vector<1x768xf32>
    %63 = arith.addf %61, %62 : vector<1x768xf32>
    %64 = vector.extract_strided_slice %63 {offsets = [0, 0], sizes = [1, 256], strides = [1, 1]} : vector<1x768xf32> to vector<1x256xf32>
    %65 = vector.extract_strided_slice %63 {offsets = [0, 256], sizes = [1, 256], strides = [1, 1]} : vector<1x768xf32> to vector<1x256xf32>
    %66 = vector.extract_strided_slice %63 {offsets = [0, 512], sizes = [1, 256], strides = [1, 1]} : vector<1x768xf32> to vector<1x256xf32>
    %67 = vector.extract_strided_slice %55 {offsets = [0, 768], sizes = [1, 256], strides = [1, 1]} : vector<1x1024xf32> to vector<1x256xf32>
    %68 = math.tanh %67 : vector<1x256xf32>
    %69 = arith.mulf %65, %46 : vector<1x256xf32>
    %70 = arith.mulf %64, %68 : vector<1x256xf32>
    %71 = arith.addf %69, %70 : vector<1x256xf32>
    %72 = math.tanh %71 : vector<1x256xf32>
    %73 = arith.mulf %66, %72 : vector<1x256xf32>
    %74 = vector.extract_strided_slice %73 {offsets = [0, 0], sizes = [1, 128], strides = [1, 1]} : vector<1x256xf32> to vector<1x128xf32>
    %c2_23 = arith.constant 2 : index
    %c0_24 = arith.constant 0 : index
    %75 = vector.load %arg2[%c2_23, %c0_24] : memref<8x256xf32, #tpu.memory_space<vmem>>, vector<1x128xf32>
    tpu.vector_store %arg2[%c2_23, %c0_24], %74 {strides = array<i32>} : memref<8x256xf32, #tpu.memory_space<vmem>>, vector<1x128xf32>,
    %76 = vector.extract_strided_slice %73 {offsets = [0, 128], sizes = [1, 128], strides = [1, 1]} : vector<1x256xf32> to vector<1x128xf32>
    %c5 = arith.constant 5 : index
    %c128_25 = arith.constant 128 : index
    %77 = vector.load %arg2[%c5, %c128_25] : memref<8x256xf32, #tpu.memory_space<vmem>>, vector<1x128xf32>
    tpu.vector_store %arg2[%c5, %c128_25], %76 {strides = array<i32>} : memref<8x256xf32, #tpu.memory_space<vmem>>, vector<1x128xf32>,
    %c3 = arith.constant 3 : index
    %c0_26 = arith.constant 0 : index
    %78 = vector.load %arg0[%c3, %c0_26] : memref<8x1024xf32, #tpu.memory_space<vmem>>, vector<1x1024xf32>
    %cst_27 = arith.constant dense<0.000000e+00> : vector<1x1024xf32>
    %79 = tpu.matmul %73, %0, %cst_27 {dimension_numbers = #tpu.dot_dimension_numbers<[1], [0], [0], [1], [0, 0, 1, 1], [], []>} : vector<1x256xf32>, vector<256x1024xf32>, vector<1x1024xf32> -> vector<1x1024xf32>
    %80 = arith.addf %78, %79 : vector<1x1024xf32>
    %81 = vector.extract_strided_slice %80 {offsets = [0, 0], sizes = [1, 768], strides = [1, 1]} : vector<1x1024xf32> to vector<1x768xf32>
    %cst_28 = arith.constant 5.000000e-01 : f32
    %82 = vector.broadcast %cst_28 : f32 to vector<1x768xf32>
    %83 = arith.mulf %82, %81 : vector<1x768xf32>
    %84 = math.tanh %83 : vector<1x768xf32>
    %cst_29 = arith.constant 5.000000e-01 : f32
    %85 = vector.broadcast %cst_29 : f32 to vector<1x768xf32>
    %86 = arith.mulf %85, %84 : vector<1x768xf32>
    %cst_30 = arith.constant 5.000000e-01 : f32
    %87 = vector.broadcast %cst_30 : f32 to vector<1x768xf32>
    %88 = arith.addf %86, %87 : vector<1x768xf32>
    %89 = vector.extract_strided_slice %88 {offsets = [0, 0], sizes = [1, 256], strides = [1, 1]} : vector<1x768xf32> to vector<1x256xf32>
    %90 = vector.extract_strided_slice %88 {offsets = [0, 256], sizes = [1, 256], strides = [1, 1]} : vector<1x768xf32> to vector<1x256xf32>
    %91 = vector.extract_strided_slice %88 {offsets = [0, 512], sizes = [1, 256], strides = [1, 1]} : vector<1x768xf32> to vector<1x256xf32>
    %92 = vector.extract_strided_slice %80 {offsets = [0, 768], sizes = [1, 256], strides = [1, 1]} : vector<1x1024xf32> to vector<1x256xf32>
    %93 = math.tanh %92 : vector<1x256xf32>
    %94 = arith.mulf %90, %71 : vector<1x256xf32>
    %95 = arith.mulf %89, %93 : vector<1x256xf32>
    %96 = arith.addf %94, %95 : vector<1x256xf32>
    %97 = math.tanh %96 : vector<1x256xf32>
    %98 = arith.mulf %91, %97 : vector<1x256xf32>
    %99 = vector.extract_strided_slice %98 {offsets = [0, 0], sizes = [1, 128], strides = [1, 1]} : vector<1x256xf32> to vector<1x128xf32>
    %c3_31 = arith.constant 3 : index
    %c0_32 = arith.constant 0 : index
    %100 = vector.load %arg2[%c3_31, %c0_32] : memref<8x256xf32, #tpu.memory_space<vmem>>, vector<1x128xf32>
    tpu.vector_store %arg2[%c3_31, %c0_32], %99 {strides = array<i32>} : memref<8x256xf32, #tpu.memory_space<vmem>>, vector<1x128xf32>,
    %101 = vector.extract_strided_slice %98 {offsets = [0, 128], sizes = [1, 128], strides = [1, 1]} : vector<1x256xf32> to vector<1x128xf32>
    %c4 = arith.constant 4 : index
    %c128_33 = arith.constant 128 : index
    %102 = vector.load %arg2[%c4, %c128_33] : memref<8x256xf32, #tpu.memory_space<vmem>>, vector<1x128xf32>
    tpu.vector_store %arg2[%c4, %c128_33], %101 {strides = array<i32>} : memref<8x256xf32, #tpu.memory_space<vmem>>, vector<1x128xf32>,
    %c4_34 = arith.constant 4 : index
    %c0_35 = arith.constant 0 : index
    %103 = vector.load %arg0[%c4_34, %c0_35] : memref<8x1024xf32, #tpu.memory_space<vmem>>, vector<1x1024xf32>
    %cst_36 = arith.constant dense<0.000000e+00> : vector<1x1024xf32>
    %104 = tpu.matmul %98, %0, %cst_36 {dimension_numbers = #tpu.dot_dimension_numbers<[1], [0], [0], [1], [0, 0, 1, 1], [], []>} : vector<1x256xf32>, vector<256x1024xf32>, vector<1x1024xf32> -> vector<1x1024xf32>
    %105 = arith.addf %103, %104 : vector<1x1024xf32>
    %106 = vector.extract_strided_slice %105 {offsets = [0, 0], sizes = [1, 768], strides = [1, 1]} : vector<1x1024xf32> to vector<1x768xf32>
    %cst_37 = arith.constant 5.000000e-01 : f32
    %107 = vector.broadcast %cst_37 : f32 to vector<1x768xf32>
    %108 = arith.mulf %107, %106 : vector<1x768xf32>
    %109 = math.tanh %108 : vector<1x768xf32>
    %cst_38 = arith.constant 5.000000e-01 : f32
    %110 = vector.broadcast %cst_38 : f32 to vector<1x768xf32>
    %111 = arith.mulf %110, %109 : vector<1x768xf32>
    %cst_39 = arith.constant 5.000000e-01 : f32
    %112 = vector.broadcast %cst_39 : f32 to vector<1x768xf32>
    %113 = arith.addf %111, %112 : vector<1x768xf32>
    %114 = vector.extract_strided_slice %113 {offsets = [0, 0], sizes = [1, 256], strides = [1, 1]} : vector<1x768xf32> to vector<1x256xf32>
    %115 = vector.extract_strided_slice %113 {offsets = [0, 256], sizes = [1, 256], strides = [1, 1]} : vector<1x768xf32> to vector<1x256xf32>
    %116 = vector.extract_strided_slice %113 {offsets = [0, 512], sizes = [1, 256], strides = [1, 1]} : vector<1x768xf32> to vector<1x256xf32>
    %117 = vector.extract_strided_slice %105 {offsets = [0, 768], sizes = [1, 256], strides = [1, 1]} : vector<1x1024xf32> to vector<1x256xf32>
    %118 = math.tanh %117 : vector<1x256xf32>
    %119 = arith.mulf %115, %96 : vector<1x256xf32>
    %120 = arith.mulf %114, %118 : vector<1x256xf32>
    %121 = arith.addf %119, %120 : vector<1x256xf32>
    %122 = math.tanh %121 : vector<1x256xf32>
    %123 = arith.mulf %116, %122 : vector<1x256xf32>
    %124 = vector.extract_strided_slice %123 {offsets = [0, 0], sizes = [1, 128], strides = [1, 1]} : vector<1x256xf32> to vector<1x128xf32>
    %c4_40 = arith.constant 4 : index
    %c0_41 = arith.constant 0 : index
    %125 = vector.load %arg2[%c4_40, %c0_41] : memref<8x256xf32, #tpu.memory_space<vmem>>, vector<1x128xf32>
    tpu.vector_store %arg2[%c4_40, %c0_41], %124 {strides = array<i32>} : memref<8x256xf32, #tpu.memory_space<vmem>>, vector<1x128xf32>,
    %126 = vector.extract_strided_slice %123 {offsets = [0, 128], sizes = [1, 128], strides = [1, 1]} : vector<1x256xf32> to vector<1x128xf32>
    %c3_42 = arith.constant 3 : index
    %c128_43 = arith.constant 128 : index
    %127 = vector.load %arg2[%c3_42, %c128_43] : memref<8x256xf32, #tpu.memory_space<vmem>>, vector<1x128xf32>
    tpu.vector_store %arg2[%c3_42, %c128_43], %126 {strides = array<i32>} : memref<8x256xf32, #tpu.memory_space<vmem>>, vector<1x128xf32>,
    %c5_44 = arith.constant 5 : index
    %c0_45 = arith.constant 0 : index
    %128 = vector.load %arg0[%c5_44, %c0_45] : memref<8x1024xf32, #tpu.memory_space<vmem>>, vector<1x1024xf32>
    %cst_46 = arith.constant dense<0.000000e+00> : vector<1x1024xf32>
    %129 = tpu.matmul %123, %0, %cst_46 {dimension_numbers = #tpu.dot_dimension_numbers<[1], [0], [0], [1], [0, 0, 1, 1], [], []>} : vector<1x256xf32>, vector<256x1024xf32>, vector<1x1024xf32> -> vector<1x1024xf32>
    %130 = arith.addf %128, %129 : vector<1x1024xf32>
    %131 = vector.extract_strided_slice %130 {offsets = [0, 0], sizes = [1, 768], strides = [1, 1]} : vector<1x1024xf32> to vector<1x768xf32>
    %cst_47 = arith.constant 5.000000e-01 : f32
    %132 = vector.broadcast %cst_47 : f32 to vector<1x768xf32>
    %133 = arith.mulf %132, %131 : vector<1x768xf32>
    %134 = math.tanh %133 : vector<1x768xf32>
    %cst_48 = arith.constant 5.000000e-01 : f32
    %135 = vector.broadcast %cst_48 : f32 to vector<1x768xf32>
    %136 = arith.mulf %135, %134 : vector<1x768xf32>
    %cst_49 = arith.constant 5.000000e-01 : f32
    %137 = vector.broadcast %cst_49 : f32 to vector<1x768xf32>
    %138 = arith.addf %136, %137 : vector<1x768xf32>
    %139 = vector.extract_strided_slice %138 {offsets = [0, 0], sizes = [1, 256], strides = [1, 1]} : vector<1x768xf32> to vector<1x256xf32>
    %140 = vector.extract_strided_slice %138 {offsets = [0, 256], sizes = [1, 256], strides = [1, 1]} : vector<1x768xf32> to vector<1x256xf32>
    %141 = vector.extract_strided_slice %138 {offsets = [0, 512], sizes = [1, 256], strides = [1, 1]} : vector<1x768xf32> to vector<1x256xf32>
    %142 = vector.extract_strided_slice %130 {offsets = [0, 768], sizes = [1, 256], strides = [1, 1]} : vector<1x1024xf32> to vector<1x256xf32>
    %143 = math.tanh %142 : vector<1x256xf32>
    %144 = arith.mulf %140, %121 : vector<1x256xf32>
    %145 = arith.mulf %139, %143 : vector<1x256xf32>
    %146 = arith.addf %144, %145 : vector<1x256xf32>
    %147 = math.tanh %146 : vector<1x256xf32>
    %148 = arith.mulf %141, %147 : vector<1x256xf32>
    %149 = vector.extract_strided_slice %148 {offsets = [0, 0], sizes = [1, 128], strides = [1, 1]} : vector<1x256xf32> to vector<1x128xf32>
    %c5_50 = arith.constant 5 : index
    %c0_51 = arith.constant 0 : index
    %150 = vector.load %arg2[%c5_50, %c0_51] : memref<8x256xf32, #tpu.memory_space<vmem>>, vector<1x128xf32>
    tpu.vector_store %arg2[%c5_50, %c0_51], %149 {strides = array<i32>} : memref<8x256xf32, #tpu.memory_space<vmem>>, vector<1x128xf32>,
    %151 = vector.extract_strided_slice %148 {offsets = [0, 128], sizes = [1, 128], strides = [1, 1]} : vector<1x256xf32> to vector<1x128xf32>
    %c2_52 = arith.constant 2 : index
    %c128_53 = arith.constant 128 : index
    %152 = vector.load %arg2[%c2_52, %c128_53] : memref<8x256xf32, #tpu.memory_space<vmem>>, vector<1x128xf32>
    tpu.vector_store %arg2[%c2_52, %c128_53], %151 {strides = array<i32>} : memref<8x256xf32, #tpu.memory_space<vmem>>, vector<1x128xf32>,
    %c6_54 = arith.constant 6 : index
    %c0_55 = arith.constant 0 : index
    %153 = vector.load %arg0[%c6_54, %c0_55] : memref<8x1024xf32, #tpu.memory_space<vmem>>, vector<1x1024xf32>
    %cst_56 = arith.constant dense<0.000000e+00> : vector<1x1024xf32>
    %154 = tpu.matmul %148, %0, %cst_56 {dimension_numbers = #tpu.dot_dimension_numbers<[1], [0], [0], [1], [0, 0, 1, 1], [], []>} : vector<1x256xf32>, vector<256x1024xf32>, vector<1x1024xf32> -> vector<1x1024xf32>
    %155 = arith.addf %153, %154 : vector<1x1024xf32>
    %156 = vector.extract_strided_slice %155 {offsets = [0, 0], sizes = [1, 768], strides = [1, 1]} : vector<1x1024xf32> to vector<1x768xf32>
    %cst_57 = arith.constant 5.000000e-01 : f32
    %157 = vector.broadcast %cst_57 : f32 to vector<1x768xf32>
    %158 = arith.mulf %157, %156 : vector<1x768xf32>
    %159 = math.tanh %158 : vector<1x768xf32>
    %cst_58 = arith.constant 5.000000e-01 : f32
    %160 = vector.broadcast %cst_58 : f32 to vector<1x768xf32>
    %161 = arith.mulf %160, %159 : vector<1x768xf32>
    %cst_59 = arith.constant 5.000000e-01 : f32
    %162 = vector.broadcast %cst_59 : f32 to vector<1x768xf32>
    %163 = arith.addf %161, %162 : vector<1x768xf32>
    %164 = vector.extract_strided_slice %163 {offsets = [0, 0], sizes = [1, 256], strides = [1, 1]} : vector<1x768xf32> to vector<1x256xf32>
    %165 = vector.extract_strided_slice %163 {offsets = [0, 256], sizes = [1, 256], strides = [1, 1]} : vector<1x768xf32> to vector<1x256xf32>
    %166 = vector.extract_strided_slice %163 {offsets = [0, 512], sizes = [1, 256], strides = [1, 1]} : vector<1x768xf32> to vector<1x256xf32>
    %167 = vector.extract_strided_slice %155 {offsets = [0, 768], sizes = [1, 256], strides = [1, 1]} : vector<1x1024xf32> to vector<1x256xf32>
    %168 = math.tanh %167 : vector<1x256xf32>
    %169 = arith.mulf %165, %146 : vector<1x256xf32>
    %170 = arith.mulf %164, %168 : vector<1x256xf32>
    %171 = arith.addf %169, %170 : vector<1x256xf32>
    %172 = math.tanh %171 : vector<1x256xf32>
    %173 = arith.mulf %166, %172 : vector<1x256xf32>
    %174 = vector.extract_strided_slice %173 {offsets = [0, 0], sizes = [1, 128], strides = [1, 1]} : vector<1x256xf32> to vector<1x128xf32>
    %c6_60 = arith.constant 6 : index
    %c0_61 = arith.constant 0 : index
    %175 = vector.load %arg2[%c6_60, %c0_61] : memref<8x256xf32, #tpu.memory_space<vmem>>, vector<1x128xf32>
    tpu.vector_store %arg2[%c6_60, %c0_61], %174 {strides = array<i32>} : memref<8x256xf32, #tpu.memory_space<vmem>>, vector<1x128xf32>,
    %176 = vector.extract_strided_slice %173 {offsets = [0, 128], sizes = [1, 128], strides = [1, 1]} : vector<1x256xf32> to vector<1x128xf32>
    %c1_62 = arith.constant 1 : index
    %c128_63 = arith.constant 128 : index
    %177 = vector.load %arg2[%c1_62, %c128_63] : memref<8x256xf32, #tpu.memory_space<vmem>>, vector<1x128xf32>
    tpu.vector_store %arg2[%c1_62, %c128_63], %176 {strides = array<i32>} : memref<8x256xf32, #tpu.memory_space<vmem>>, vector<1x128xf32>,
    %c7_64 = arith.constant 7 : index
    %c0_65 = arith.constant 0 : index
    %178 = vector.load %arg0[%c7_64, %c0_65] : memref<8x1024xf32, #tpu.memory_space<vmem>>, vector<1x1024xf32>
    %cst_66 = arith.constant dense<0.000000e+00> : vector<1x1024xf32>
    %179 = tpu.matmul %173, %0, %cst_66 {dimension_numbers = #tpu.dot_dimension_numbers<[1], [0], [0], [1], [0, 0, 1, 1], [], []>} : vector<1x256xf32>, vector<256x1024xf32>, vector<1x1024xf32> -> vector<1x1024xf32>
    %180 = arith.addf %178, %179 : vector<1x1024xf32>
    %181 = vector.extract_strided_slice %180 {offsets = [0, 0], sizes = [1, 768], strides = [1, 1]} : vector<1x1024xf32> to vector<1x768xf32>
    %cst_67 = arith.constant 5.000000e-01 : f32
    %182 = vector.broadcast %cst_67 : f32 to vector<1x768xf32>
    %183 = arith.mulf %182, %181 : vector<1x768xf32>
    %184 = math.tanh %183 : vector<1x768xf32>
    %cst_68 = arith.constant 5.000000e-01 : f32
    %185 = vector.broadcast %cst_68 : f32 to vector<1x768xf32>
    %186 = arith.mulf %185, %184 : vector<1x768xf32>
    %cst_69 = arith.constant 5.000000e-01 : f32
    %187 = vector.broadcast %cst_69 : f32 to vector<1x768xf32>
    %188 = arith.addf %186, %187 : vector<1x768xf32>
    %189 = vector.extract_strided_slice %188 {offsets = [0, 0], sizes = [1, 256], strides = [1, 1]} : vector<1x768xf32> to vector<1x256xf32>
    %190 = vector.extract_strided_slice %188 {offsets = [0, 256], sizes = [1, 256], strides = [1, 1]} : vector<1x768xf32> to vector<1x256xf32>
    %191 = vector.extract_strided_slice %188 {offsets = [0, 512], sizes = [1, 256], strides = [1, 1]} : vector<1x768xf32> to vector<1x256xf32>
    %192 = vector.extract_strided_slice %180 {offsets = [0, 768], sizes = [1, 256], strides = [1, 1]} : vector<1x1024xf32> to vector<1x256xf32>
    %193 = math.tanh %192 : vector<1x256xf32>
    %194 = arith.mulf %190, %171 : vector<1x256xf32>
    %195 = arith.mulf %189, %193 : vector<1x256xf32>
    %196 = arith.addf %194, %195 : vector<1x256xf32>
    %197 = math.tanh %196 : vector<1x256xf32>
    %198 = arith.mulf %191, %197 : vector<1x256xf32>
    %199 = vector.extract_strided_slice %198 {offsets = [0, 0], sizes = [1, 128], strides = [1, 1]} : vector<1x256xf32> to vector<1x128xf32>
    %c7_70 = arith.constant 7 : index
    %c0_71 = arith.constant 0 : index
    %200 = vector.load %arg2[%c7_70, %c0_71] : memref<8x256xf32, #tpu.memory_space<vmem>>, vector<1x128xf32>
    tpu.vector_store %arg2[%c7_70, %c0_71], %199 {strides = array<i32>} : memref<8x256xf32, #tpu.memory_space<vmem>>, vector<1x128xf32>,
    %201 = vector.extract_strided_slice %198 {offsets = [0, 128], sizes = [1, 128], strides = [1, 1]} : vector<1x256xf32> to vector<1x128xf32>
    %c0_72 = arith.constant 0 : index
    %c128_73 = arith.constant 128 : index
    %202 = vector.load %arg2[%c0_72, %c128_73] : memref<8x256xf32, #tpu.memory_space<vmem>>, vector<1x128xf32>
    tpu.vector_store %arg2[%c0_72, %c128_73], %201 {strides = array<i32>} : memref<8x256xf32, #tpu.memory_space<vmem>>, vector<1x128xf32>,
    return
  }
}

</mosaic_0001>

<bundles_post_ra>
// kernel: _forward_impl.1
= control target key start
LH: loop header
LB: loop body
LE: loop exit
PB: predicated region body
PF: predicated region fallthrough
CT: control target
= control target key end

     0   :  { %vm607_vm0 = vcmask 1042434   ;;  %vm605_vm1 = vcmask 1040384   ;;  %vm611_vm2 = vcmask 1044484   ;;  %vm613_vm3 = vcmask 1046534   ;;  %s11617_s1 = inlined_call_operand.vmem [shape: f32[256,1024], index: 1, kind: input, shape index: {}]   ;;  %s11618_s0 = inlined_call_operand.vmem [shape: f32[8,1024], index: 0, kind: input, shape index: {}]   ;;  %s11619_s2 = inlined_call_operand.vmem [shape: f32[8,256], index: 2, kind: output, shape index: {}]  }
   0x1   :  { %v132_v0 = vld [vmem:[%s11617_s1 + $0x3c8] sm:$0xff]  ;;  %v131_v6 = vld [vmem:[%s11617_s1 + $0x3c0] sm:$0xff]  ;;  %v4421_v60 = vld [vmem:[%s11617_s1 + $0x3d8] sm:$0xff]  ;;  %vm609_vm4 = vcmask 1041408   ;;  %vm615_vm5 = vcmask 1045508   ;;  %vm617_vm6 = vcmask 1043456  }
   0x2   :  { %v260_v1 = vld [vmem:[%s11617_s1 + $0x7c8] sm:$0xff]  ;;  %310 = vmatpush.msra.mxu2 %v132_v0  ;;  %v259_v7 = vld [vmem:[%s11617_s1 + $0x7c0] sm:$0xff]  ;;  %270 = vmatpush.msra.mxu0 %v131_v6  ;;  %v4426_v61 = vld [vmem:[%s11617_s1 + $0x7d8] sm:$0xff] }
   0x3   :  { %v124_v2 = vld [vmem:[%s11617_s1 + $0x388] sm:$0xff]  ;;  %330 = vmatpush.msra.mxu3 %v260_v1  ;;  %v123_v8 = vld [vmem:[%s11617_s1 + $0x380] sm:$0xff]  ;;  %290 = vmatpush.msra.mxu1 %v259_v7  ;;  %v4445_v0 = vld [vmem:[%s11617_s1 + $0x398] sm:$0xff] }
   0x4   :  { %v252_v3 = vld [vmem:[%s11617_s1 + $0x788] sm:$0xff]  ;;  %311 = vmatpush.msra.mxu2 %v124_v2  ;;  %v251_v9 = vld [vmem:[%s11617_s1 + $0x780] sm:$0xff]  ;;  %271 = vmatpush.msra.mxu0 %v123_v8  ;;  %v4450_v1 = vld [vmem:[%s11617_s1 + $0x798] sm:$0xff] }
   0x5   :  { %v116_v4 = vld [vmem:[%s11617_s1 + $0x348] sm:$0xff]  ;;  %331 = vmatpush.msra.mxu3 %v252_v3  ;;  %v115_v12 = vld [vmem:[%s11617_s1 + $0x340] sm:$0xff]  ;;  %291 = vmatpush.msra.mxu1 %v251_v9  ;;  %v4481_v6 = vld [vmem:[%s11617_s1 + $0x3d0] sm:$0xff] }
   0x6   :  { %v244_v5 = vld [vmem:[%s11617_s1 + $0x748] sm:$0xff]  ;;  %312 = vmatpush.msra.mxu2 %v116_v4  ;;  %v243_v13 = vld [vmem:[%s11617_s1 + $0x740] sm:$0xff]  ;;  %272 = vmatpush.msra.mxu0 %v115_v12  ;;  %v4469_v4 = vld [vmem:[%s11617_s1 + $0x358] sm:$0xff] }
   0x7   :  { %v108_v10 = vld [vmem:[%s11617_s1 + $0x308] sm:$0xff]  ;;  %332 = vmatpush.msra.mxu3 %v244_v5  ;;  %v107_v16 = vld [vmem:[%s11617_s1 + $0x300] sm:$0xff]  ;;  %292 = vmatpush.msra.mxu1 %v243_v13  ;;  %v4474_v5 = vld [vmem:[%s11617_s1 + $0x758] sm:$0xff] }
   0x8   :  { %v236_v11 = vld [vmem:[%s11617_s1 + $0x708] sm:$0xff]  ;;  %313 = vmatpush.msra.mxu2 %v108_v10  ;;  %v235_v17 = vld [vmem:[%s11617_s1 + $0x700] sm:$0xff]  ;;  %273 = vmatpush.msra.mxu0 %v107_v16  ;;  %v4486_v7 = vld [vmem:[%s11617_s1 + $0x7d0] sm:$0xff] }
   0x9   :  { %v100_v14 = vld [vmem:[%s11617_s1 + $0x2c8] sm:$0xff]  ;;  %333 = vmatpush.msra.mxu3 %v236_v11  ;;  %v99_v20 = vld [vmem:[%s11617_s1 + $0x2c0] sm:$0xff]  ;;  %293 = vmatpush.msra.mxu1 %v235_v17  ;;  %v4493_v8 = vld [vmem:[%s11617_s1 + $0x318] sm:$0xff] }
   0xa   :  { %v228_v15 = vld [vmem:[%s11617_s1 + $0x6c8] sm:$0xff]  ;;  %314 = vmatpush.msra.mxu2 %v100_v14  ;;  %v227_v21 = vld [vmem:[%s11617_s1 + $0x6c0] sm:$0xff]  ;;  %274 = vmatpush.msra.mxu0 %v99_v20  ;;  %v4498_v9 = vld [vmem:[%s11617_s1 + $0x718] sm:$0xff] }
   0xb   :  { %v92_v18 = vld [vmem:[%s11617_s1 + $0x288] sm:$0xff]  ;;  %334 = vmatpush.msra.mxu3 %v228_v15  ;;  %v4207_v24 = vld [vmem:[%s11617_s1 + $0x280] sm:$0xff]  ;;  %294 = vmatpush.msra.mxu1 %v227_v21  ;;  %12376 = vst [vmem:[#allocation2_spill] sm:$0xff] %v4498_v9  ;;  %v4505_v10 = vld [vmem:[%s11617_s1 + $0x390] sm:$0xff] }
   0xc   :  { %v220_v19 = vld [vmem:[%s11617_s1 + $0x688] sm:$0xff]  ;;  %315 = vmatpush.msra.mxu2 %v92_v18  ;;  %v4212_v25 = vld [vmem:[%s11617_s1 + $0x680] sm:$0xff]  ;;  %275 = vmatpush.msra.mxu0 %v4207_v24  ;;  %v4510_v11 = vld [vmem:[%s11617_s1 + $0x790] sm:$0xff] }
   0xd   :  { %v4197_v22 = vld [vmem:[%s11617_s1 + $0x248] sm:$0xff]  ;;  %335 = vmatpush.msra.mxu3 %v220_v19  ;;  %v4229_v28 = vld [vmem:[%s11617_s1 + $0x240] sm:$0xff]  ;;  %295 = vmatpush.msra.mxu1 %v4212_v25  ;;  %v4517_v12 = vld [vmem:[%s11617_s1 + $0x2d8] sm:$0xff] }
   0xe   :  { %v4202_v23 = vld [vmem:[%s11617_s1 + $0x648] sm:$0xff]  ;;  %316 = vmatpush.msra.mxu2 %v4197_v22  ;;  %v4234_v29 = vld [vmem:[%s11617_s1 + $0x640] sm:$0xff]  ;;  %276 = vmatpush.msra.mxu0 %v4229_v28  ;;  %12377 = vst [vmem:[#allocation3_spill] sm:$0xff] %v4517_v12  ;;  %v4522_v13 = vld [vmem:[%s11617_s1 + $0x6d8] sm:$0xff] }
   0xf   :  { %v4217_v26 = vld [vmem:[%s11617_s1 + $0x208] sm:$0xff]  ;;  %336 = vmatpush.msra.mxu3 %v4202_v23  ;;  %v4253_v32 = vld [vmem:[%s11617_s1 + $0x200] sm:$0xff]  ;;  %296 = vmatpush.msra.mxu1 %v4234_v29  ;;  %12378 = vst [vmem:[#allocation4_spill] sm:$0xff] %v4522_v13  ;;  %v4529_v14 = vld [vmem:[%s11617_s1 + $0x350] sm:$0xff] }
  0x10   :  { %v4222_v27 = vld [vmem:[%s11617_s1 + $0x608] sm:$0xff]  ;;  %317 = vmatpush.msra.mxu2 %v4217_v26  ;;  %v4258_v33 = vld [vmem:[%s11617_s1 + $0x600] sm:$0xff]  ;;  %277 = vmatpush.msra.mxu0 %v4253_v32  ;;  %v4534_v15 = vld [vmem:[%s11617_s1 + $0x750] sm:$0xff] }
  0x11   :  { %v4241_v30 = vld [vmem:[%s11617_s1 + $0x1c8] sm:$0xff]  ;;  %337 = vmatpush.msra.mxu3 %v4222_v27  ;;  %v4277_v36 = vld [vmem:[%s11617_s1 + $0x1c0] sm:$0xff]  ;;  %297 = vmatpush.msra.mxu1 %v4258_v33  ;;  %v4541_v16 = vld [vmem:[%s11617_s1 + $0x298] sm:$0xff] }
  0x12   :  { %v4246_v31 = vld [vmem:[%s11617_s1 + $0x5c8] sm:$0xff]  ;;  %318 = vmatpush.msra.mxu2 %v4241_v30  ;;  %v4282_v37 = vld [vmem:[%s11617_s1 + $0x5c0] sm:$0xff]  ;;  %278 = vmatpush.msra.mxu0 %v4277_v36  ;;  %12379 = vst [vmem:[#allocation5_spill] sm:$0xff] %v4541_v16  ;;  %v4546_v17 = vld [vmem:[%s11617_s1 + $0x698] sm:$0xff] }
  0x13   :  { %v4265_v34 = vld [vmem:[%s11617_s1 + $0x188] sm:$0xff]  ;;  %338 = vmatpush.msra.mxu3 %v4246_v31  ;;  %v4301_v40 = vld [vmem:[%s11617_s1 + $0x180] sm:$0xff]  ;;  %298 = vmatpush.msra.mxu1 %v4282_v37  ;;  %12380 = vst [vmem:[#allocation6_spill] sm:$0xff] %v4546_v17  ;;  %v4553_v18 = vld [vmem:[%s11617_s1 + $0x310] sm:$0xff] }
  0x14   :  { %v4270_v35 = vld [vmem:[%s11617_s1 + $0x588] sm:$0xff]  ;;  %319 = vmatpush.msra.mxu2 %v4265_v34  ;;  %v4306_v41 = vld [vmem:[%s11617_s1 + $0x580] sm:$0xff]  ;;  %279 = vmatpush.msra.mxu0 %v4301_v40  ;;  %12381 = vst [vmem:[#allocation7_spill] sm:$0xff] %v4553_v18  ;;  %v4558_v19 = vld [vmem:[%s11617_s1 + $0x710] sm:$0xff] }
  0x15   :  { %v4289_v38 = vld [vmem:[%s11617_s1 + $0x148] sm:$0xff]  ;;  %339 = vmatpush.msra.mxu3 %v4270_v35  ;;  %v4325_v44 = vld [vmem:[%s11617_s1 + $0x140] sm:$0xff]  ;;  %299 = vmatpush.msra.mxu1 %v4306_v41  ;;  %12382 = vst [vmem:[#allocation8_spill] sm:$0xff] %v4558_v19  ;;  %v4565_v20 = vld [vmem:[%s11617_s1 + $0x258] sm:$0xff] }
  0x16   :  { %v4294_v39 = vld [vmem:[%s11617_s1 + $0x548] sm:$0xff]  ;;  %320 = vmatpush.msra.mxu2 %v4289_v38  ;;  %v4330_v45 = vld [vmem:[%s11617_s1 + $0x540] sm:$0xff]  ;;  %280 = vmatpush.msra.mxu0 %v4325_v44  ;;  %12383 = vst [vmem:[#allocation9_spill] sm:$0xff] %v4565_v20  ;;  %v4570_v21 = vld [vmem:[%s11617_s1 + $0x658] sm:$0xff] }
  0x17   :  { %v4313_v42 = vld [vmem:[%s11617_s1 + $0x108] sm:$0xff]  ;;  %340 = vmatpush.msra.mxu3 %v4294_v39  ;;  %v4349_v48 = vld [vmem:[%s11617_s1 + $0x100] sm:$0xff]  ;;  %300 = vmatpush.msra.mxu1 %v4330_v45  ;;  %12384 = vst [vmem:[#allocation10_spill] sm:$0xff] %v4570_v21 }
  0x18   :  { %v4318_v43 = vld [vmem:[%s11617_s1 + $0x508] sm:$0xff]  ;;  %321 = vmatpush.msra.mxu2 %v4313_v42  ;;  %v4354_v49 = vld [vmem:[%s11617_s1 + $0x500] sm:$0xff]  ;;  %281 = vmatpush.msra.mxu0 %v4349_v48 }
  0x19   :  { %v4337_v46 = vld [vmem:[%s11617_s1 + $0xc8] sm:$0xff]  ;;  %341 = vmatpush.msra.mxu3 %v4318_v43  ;;  %v4373_v52 = vld [vmem:[%s11617_s1 + $0xc0] sm:$0xff]  ;;  %301 = vmatpush.msra.mxu1 %v4354_v49 }
  0x1a   :  { %v4342_v47 = vld [vmem:[%s11617_s1 + $0x4c8] sm:$0xff]  ;;  %322 = vmatpush.msra.mxu2 %v4337_v46  ;;  %v4378_v53 = vld [vmem:[%s11617_s1 + $0x4c0] sm:$0xff]  ;;  %282 = vmatpush.msra.mxu0 %v4373_v52 }
  0x1b   :  { %v4361_v50 = vld [vmem:[%s11617_s1 + $0x88] sm:$0xff]  ;;  %342 = vmatpush.msra.mxu3 %v4342_v47  ;;  %v4397_v56 = vld [vmem:[%s11617_s1 + $0x80] sm:$0xff]  ;;  %302 = vmatpush.msra.mxu1 %v4378_v53 }
  0x1c   :  { %v4366_v51 = vld [vmem:[%s11617_s1 + $0x488] sm:$0xff]  ;;  %323 = vmatpush.msra.mxu2 %v4361_v50  ;;  %v4402_v57 = vld [vmem:[%s11617_s1 + $0x480] sm:$0xff]  ;;  %283 = vmatpush.msra.mxu0 %v4397_v56 }
  0x1d   :  { %v4385_v54 = vld [vmem:[%s11617_s1 + $0x48] sm:$0xff]  ;;  %343 = vmatpush.msra.mxu3 %v4366_v51  ;;  %303 = vmatpush.msra.mxu1 %v4402_v57  ;;  %v4433_v62 = vld [vmem:[%s11617_s1 + $0x40] sm:$0xff] }
  0x1e   :  { %v4390_v55 = vld [vmem:[%s11617_s1 + $0x448] sm:$0xff]  ;;  %324 = vmatpush.msra.mxu2 %v4385_v54  ;;  %v4438_v63 = vld [vmem:[%s11617_s1 + $0x440] sm:$0xff]  ;;  %284 = vmatpush.msra.mxu0 %v4433_v62 }
  0x1f   :  { %v4409_v58 = vld [vmem:[%s11617_s1 + $0x8] sm:$0xff]  ;;  %344 = vmatpush.msra.mxu3 %v4390_v55  ;;  %v4457_v2 = vld [vmem:[%s11617_s1] sm:$0xff]  ;;  %304 = vmatpush.msra.mxu1 %v4438_v63 }
  0x20   :  { %v4414_v59 = vld [vmem:[%s11617_s1 + $0x408] sm:$0xff]  ;;  %325 = vmatpush.msra.mxu2 %v4409_v58  ;;  %v4462_v3 = vld [vmem:[%s11617_s1 + $0x400] sm:$0xff]  ;;  %285 = vmatpush.msra.mxu0 %v4457_v2 }
  0x21   :  { %345 = vmatpush.msra.mxu3 %v4414_v59  ;;  %305 = vmatpush.msra.mxu1 %v4462_v3 }
  0x22   :  { %390 = vmatpush.msrb.mxu2 %v4421_v60  ;;  %350 = vmatpush.msrb.mxu0 %v4481_v6 }
  0x23   :  { %410 = vmatpush.msrb.mxu3 %v4426_v61  ;;  %370 = vmatpush.msrb.mxu1 %v4486_v7 }
  0x24   :  { %391 = vmatpush.msrb.mxu2 %v4445_v0  ;;  %351 = vmatpush.msrb.mxu0 %v4505_v10 }
  0x25   :  { %411 = vmatpush.msrb.mxu3 %v4450_v1  ;;  %371 = vmatpush.msrb.mxu1 %v4510_v11 }
  0x26   :  { %392 = vmatpush.msrb.mxu2 %v4469_v4  ;;  %352 = vmatpush.msrb.mxu0 %v4529_v14 }
  0x27   :  { %412 = vmatpush.msrb.mxu3 %v4474_v5  ;;  %372 = vmatpush.msrb.mxu1 %v4534_v15 }
  0x28   :  { %393 = vmatpush.msrb.mxu2 %v4493_v8  ;;  %353 = vmatpush.msrb.mxu0 %v4553_v18  ;;  %v4601_v18 = vld [vmem:[%s11617_s1 + $0x290] sm:$0xff] }
  0x29   :  { %413 = vmatpush.msrb.mxu3 %v4498_v9  ;;  %373 = vmatpush.msrb.mxu1 %v4558_v19  ;;  %12389 = vst [vmem:[#allocation15_spill] sm:$0xff] %v4601_v18  ;;  %v4606_v19 = vld [vmem:[%s11617_s1 + $0x690] sm:$0xff] }
  0x2a   :  { %394 = vmatpush.msrb.mxu2 %v4517_v12  ;;  %v4582_v12 = vld [vmem:[%s11617_s1 + $0x6d0] sm:$0xff]  ;;  %12390 = vst [vmem:[#allocation16_spill] sm:$0xff] %v4606_v19 }
  0x2b   :  { %414 = vmatpush.msrb.mxu3 %v4522_v13  ;;  %v4577_v13 = vld [vmem:[%s11617_s1 + $0x2d0] sm:$0xff]  ;;  %12386 = vst [vmem:[#allocation12_spill] sm:$0xff] %v4582_v12  ;;  %374 = vmatpush.msrb.mxu1 %v4582_v12 }
  0x2c   :  { %395 = vmatpush.msrb.mxu2 %v4541_v16  ;;  %12385 = vst [vmem:[#allocation11_spill] sm:$0xff] %v4577_v13  ;;  %v4589_v16 = vld [vmem:[%s11617_s1 + $0x218] sm:$0xff]  ;;  %354 = vmatpush.msrb.mxu0 %v4577_v13  ;;  %v4625_v13 = vld [vmem:[%s11617_s1 + $0x250] sm:$0xff] }
  0x2d   :  { %415 = vmatpush.msrb.mxu3 %v4546_v17  ;;  %12387 = vst [vmem:[#allocation13_spill] sm:$0xff] %v4589_v16  ;;  %v4594_v17 = vld [vmem:[%s11617_s1 + $0x618] sm:$0xff]  ;;  %v4630_v12 = vld [vmem:[%s11617_s1 + $0x650] sm:$0xff]  ;;  %375 = vmatpush.msrb.mxu1 %v4606_v19 }
  0x2e   :  { %12388 = vst [vmem:[#allocation14_spill] sm:$0xff] %v4594_v17  ;;  %396 = vmatpush.msrb.mxu2 %v4565_v20  ;;  %v4613_v20 = vld [vmem:[%s11617_s1 + $0x1d8] sm:$0xff]  ;;  %355 = vmatpush.msrb.mxu0 %v4601_v18  ;;  %v4649_v18 = vld [vmem:[%s11617_s1 + $0x210] sm:$0xff] }
  0x2f   :  { %416 = vmatpush.msrb.mxu3 %v4570_v21  ;;  %12391 = vst [vmem:[#allocation17_spill] sm:$0xff] %v4613_v20  ;;  %v4618_v21 = vld [vmem:[%s11617_s1 + $0x5d8] sm:$0xff]  ;;  %v4654_v19 = vld [vmem:[%s11617_s1 + $0x610] sm:$0xff]  ;;  %376 = vmatpush.msrb.mxu1 %v4630_v12 }
  0x30   :  { %12392 = vst [vmem:[#allocation18_spill] sm:$0xff] %v4618_v21  ;;  %397 = vmatpush.msrb.mxu2 %v4589_v16  ;;  %v4637_v16 = vld [vmem:[%s11617_s1 + $0x198] sm:$0xff]  ;;  %356 = vmatpush.msrb.mxu0 %v4625_v13  ;;  %v4840_v9 = vld [vmem:[%s11617_s1 + $0x450] sm:$0xff] }
  0x31   :  { %417 = vmatpush.msrb.mxu3 %v4594_v17  ;;  %12393 = vst [vmem:[#allocation19_spill] sm:$0xff] %v4625_v13  ;;  %v4642_v17 = vld [vmem:[%s11617_s1 + $0x598] sm:$0xff]  ;;  %v4673_v13 = vld [vmem:[%s11617_s1 + $0x1d0] sm:$0xff]  ;;  %377 = vmatpush.msrb.mxu1 %v4654_v19 }
  0x32   :  { %12394 = vst [vmem:[#allocation20_spill] sm:$0xff] %v4630_v12  ;;  %398 = vmatpush.msrb.mxu2 %v4613_v20  ;;  %v4661_v20 = vld [vmem:[%s11617_s1 + $0x158] sm:$0xff]  ;;  %v4678_v12 = vld [vmem:[%s11617_s1 + $0x5d0] sm:$0xff]  ;;  %357 = vmatpush.msrb.mxu0 %v4649_v18 }
  0x33   :  { %12395 = vst [vmem:[#allocation21_spill] sm:$0xff] %v4637_v16  ;;  %418 = vmatpush.msrb.mxu3 %v4618_v21  ;;  %v4666_v21 = vld [vmem:[%s11617_s1 + $0x558] sm:$0xff]  ;;  %378 = vmatpush.msrb.mxu1 %v4678_v12 }
  0x34   :  { %12396 = vst [vmem:[#allocation22_spill] sm:$0xff] %v4642_v17  ;;  %399 = vmatpush.msrb.mxu2 %v4637_v16  ;;  %v4685_v16 = vld [vmem:[%s11617_s1 + $0x118] sm:$0xff]  ;;  %358 = vmatpush.msrb.mxu0 %v4673_v13 }
  0x35   :  { %12397 = vst [vmem:[#allocation23_spill] sm:$0xff] %v4649_v18  ;;  %419 = vmatpush.msrb.mxu3 %v4642_v17  ;;  %v4690_v17 = vld [vmem:[%s11617_s1 + $0x518] sm:$0xff]  ;;  %v4704_v18 = vld [vmem:[%s11617_s1 + $0x590] sm:$0xff] }
  0x36   :  { %12398 = vst [vmem:[#allocation24_spill] sm:$0xff] %v4654_v19  ;;  %400 = vmatpush.msrb.mxu2 %v4661_v20  ;;  %v4699_v19 = vld [vmem:[%s11617_s1 + $0x190] sm:$0xff]  ;;  %379 = vmatpush.msrb.mxu1 %v4704_v18 }
  0x37   :  { %12399 = vst [vmem:[#allocation25_spill] sm:$0xff] %v4661_v20  ;;  %420 = vmatpush.msrb.mxu3 %v4666_v21  ;;  %v4716_v20 = vld [vmem:[%s11617_s1 + $0x4d8] sm:$0xff]  ;;  %359 = vmatpush.msrb.mxu0 %v4699_v19 }
  0x38   :  { %12400 = vst [vmem:[#allocation26_spill] sm:$0xff] %v4666_v21  ;;  %401 = vmatpush.msrb.mxu2 %v4685_v16  ;;  %v4711_v21 = vld [vmem:[%s11617_s1 + $0xd8] sm:$0xff] }
  0x39   :  { %12401 = vst [vmem:[#allocation27_spill] sm:$0xff] %v4673_v13  ;;  %421 = vmatpush.msrb.mxu3 %v4690_v17  ;;  %v4735_v13 = vld [vmem:[%s11617_s1 + $0x98] sm:$0xff] }
  0x3a   :  { %12402 = vst [vmem:[#allocation28_spill] sm:$0xff] %v4678_v12  ;;  %v11648_v12 = vmov 0.0   ;;  %402 = vmatpush.msrb.mxu2 %v4711_v21 }
  0x3b   :  { %12403 = vst [vmem:[#allocation29_spill] sm:$0xff] %v4685_v16  ;;  %326 = vmatmul.f32.vlgmr.msra.gmra.mxu2 %v11648_v12  ;;  %346 = vmatmul.f32.vlgmr.msra.gmra.mxu3 %v11648_v12  ;;  %v4723_v16 = vld [vmem:[%s11617_s1 + $0x150] sm:$0xff]  ;;  %v4740_v12 = vld [vmem:[%s11617_s1 + $0x498] sm:$0xff] }
  0x3c   :  { %12404 = vst [vmem:[#allocation30_spill] sm:$0xff] %v4690_v17  ;;  %v4728_v17 = vld [vmem:[%s11617_s1 + $0x550] sm:$0xff]  ;;  %422 = vmatpush.msrb.mxu3 %v4716_v20  ;;  %360 = vmatpush.msrb.mxu0 %v4723_v16 }
  0x3d   :  { %12405 = vst [vmem:[#allocation31_spill] sm:$0xff] %v4699_v19  ;;  %v4747_v19 = vld [vmem:[%s11617_s1 + $0x110] sm:$0xff]  ;;  %380 = vmatpush.msrb.mxu1 %v4728_v17  ;;  %403 = vmatpush.msrb.mxu2 %v4735_v13 }
  0x3e   :  { %12406 = vst [vmem:[#allocation32_spill] sm:$0xff] %v4704_v18  ;;  %v4752_v18 = vld [vmem:[%s11617_s1 + $0x510] sm:$0xff]  ;;  %423 = vmatpush.msrb.mxu3 %v4740_v12  ;;  %361 = vmatpush.msrb.mxu0 %v4747_v19 }
  0x3f   :  { %12407 = vst [vmem:[#allocation33_spill] sm:$0xff] %v4711_v21  ;;  %v4759_v21 = vld [vmem:[%s11617_s1 + $0x58] sm:$0xff]  ;;  %381 = vmatpush.msrb.mxu1 %v4752_v18 }
  0x40   :  { %12408 = vst [vmem:[#allocation34_spill] sm:$0xff] %v4716_v20  ;;  %v4764_v20 = vld [vmem:[%s11617_s1 + $0x458] sm:$0xff]  ;;  %404 = vmatpush.msrb.mxu2 %v4759_v21 }
  0x41   :  { %12409 = vst [vmem:[#allocation35_spill] sm:$0xff] %v4723_v16  ;;  %v4778_v16 = vld [vmem:[%s11617_s1 + $0x4d0] sm:$0xff]  ;;  %424 = vmatpush.msrb.mxu3 %v4764_v20 }
  0x42   :  { %12410 = vst [vmem:[#allocation36_spill] sm:$0xff] %v4728_v17  ;;  %v4773_v17 = vld [vmem:[%s11617_s1 + $0xd0] sm:$0xff]  ;;  %382 = vmatpush.msrb.mxu1 %v4778_v16 }
  0x43   :  { %12411 = vst [vmem:[#allocation37_spill] sm:$0xff] %v4735_v13  ;;  %v4790_v13 = vld [vmem:[%s11617_s1 + $0x418] sm:$0xff]  ;;  %362 = vmatpush.msrb.mxu0 %v4773_v17 }
  0x44   :  { %12412 = vst [vmem:[#allocation38_spill] sm:$0xff] %v4740_v12  ;;  %v4785_v12 = vld [vmem:[%s11617_s1 + $0x18] sm:$0xff]  ;;  %425 = vmatpush.msrb.mxu3 %v4790_v13 }
  0x45   :  { %12413 = vst [vmem:[#allocation39_spill] sm:$0xff] %v4747_v19  ;;  %405 = vmatpush.msrb.mxu2 %v4785_v12  ;;  %v4835_v19 = vld [vmem:[%s11617_s1 + $0x50] sm:$0xff] }
  0x46   :  { %12414 = vst [vmem:[#allocation40_spill] sm:$0xff] %v4752_v18  ;;  %v12421_v18 = vmov 0.0  }
  0x47   :  { %12415 = vst [vmem:[#allocation41_spill] sm:$0xff] %v4759_v21  ;;  %286 = vmatmul.f32.vlgmr.msra.gmra.mxu0 %v12421_v18  ;;  %306 = vmatmul.f32.vlgmr.msra.gmra.mxu1 %v12421_v18  ;;  %v4804_v21 = vld [vmem:[%s11617_s1 + $0x7e8] sm:$0xff] }
  0x48   :  { %12416 = vst [vmem:[#allocation42_spill] sm:$0xff] %v4764_v20  ;;  %v4799_v20 = vld [vmem:[%s11617_s1 + $0x3e8] sm:$0xff]  ;;  %406 = vmatmul.f32.vlgmr.msrb.gmra.mxu2 %v12421_v18  ;;  %426 = vmatmul.f32.vlgmr.msrb.gmra.mxu3 %v12421_v18 }
  0x49   :  { %12417 = vst [vmem:[#allocation43_spill] sm:$0xff] %v4773_v17  ;;  %v4811_v17 = vld [vmem:[%s11617_s1 + $0x90] sm:$0xff]  ;;  %470 = vmatpush.msra.mxu2 %v4799_v20  ;;  %490 = vmatpush.msra.mxu3 %v4804_v21 }
  0x4a   :  { %12418 = vst [vmem:[#allocation44_spill] sm:$0xff] %v4778_v16  ;;  %v4816_v16 = vld [vmem:[%s11617_s1 + $0x490] sm:$0xff]  ;;  %363 = vmatpush.msrb.mxu0 %v4811_v17 }
  0x4b   :  { %12419 = vst [vmem:[#allocation45_spill] sm:$0xff] %v4785_v12  ;;  %v4823_v12 = vld [vmem:[%s11617_s1 + $0x3a8] sm:$0xff]  ;;  %383 = vmatpush.msrb.mxu1 %v4816_v16 }
  0x4c   :  { %12420 = vst [vmem:[#allocation46_spill] sm:$0xff] %v4790_v13  ;;  %v4828_v13 = vld [vmem:[%s11617_s1 + $0x7a8] sm:$0xff]  ;;  %471 = vmatpush.msra.mxu2 %v4823_v12  ;;  %364 = vmatpush.msrb.mxu0 %v4835_v19 }
  0x4d   :  { %12422 = vst [vmem:[#allocation47_spill] sm:$0xff] %v4799_v20  ;;  %v4847_v20 = vld [vmem:[%s11617_s1 + $0x368] sm:$0xff]  ;;  %491 = vmatpush.msra.mxu3 %v4828_v13  ;;  %384 = vmatpush.msrb.mxu1 %v4840_v9 }
  0x4e   :  { %12423 = vst [vmem:[#allocation48_spill] sm:$0xff] %v4804_v21  ;;  %v4852_v21 = vld [vmem:[%s11617_s1 + $0x768] sm:$0xff]  ;;  %472 = vmatpush.msra.mxu2 %v4847_v20 }
  0x4f   :  { %12424 = vst [vmem:[#allocation49_spill] sm:$0xff] %v4811_v17  ;;  %v4859_v17 = vld [vmem:[%s11617_s1 + $0x10] sm:$0xff]  ;;  %492 = vmatpush.msra.mxu3 %v4852_v21 }
  0x50   :  { %12425 = vst [vmem:[#allocation50_spill] sm:$0xff] %v4816_v16  ;;  %v4864_v16 = vld [vmem:[%s11617_s1 + $0x410] sm:$0xff]  ;;  %365 = vmatpush.msrb.mxu0 %v4859_v17 }
  0x51   :  { %12426 = vst [vmem:[#allocation51_spill] sm:$0xff] %v4823_v12  ;;  %v4878_v12 = vld [vmem:[%s11617_s1 + $0x7e0] sm:$0xff]  ;;  %385 = vmatpush.msrb.mxu1 %v4864_v16  ;;  %366 = vmatmul.f32.vlgmr.msrb.gmra.mxu0 %v12421_v18 }
  0x52   :  { %12427 = vst [vmem:[#allocation52_spill] sm:$0xff] %v4828_v13  ;;  %v4873_v13 = vld [vmem:[%s11617_s1 + $0x3e0] sm:$0xff]  ;;  %386 = vmatmul.f32.vlgmr.msrb.gmra.mxu1 %v12421_v18 }
  0x53   :  { %12428 = vst [vmem:[#allocation53_spill] sm:$0xff] %v4835_v19  ;;  %430 = vmatpush.msra.mxu0 %v4873_v13  ;;  %450 = vmatpush.msra.mxu1 %v4878_v12  ;;  %v4914_v19 = vld [vmem:[%s11617_s1 + $0x6e8] sm:$0xff] }
  0x54   :  { %12429 = vst [vmem:[#allocation54_spill] sm:$0xff] %v4840_v9  ;;  %v4909_v9 = vld [vmem:[%s11617_s1 + $0x2e8] sm:$0xff] }
  0x55   :  { %12430 = vst [vmem:[#allocation55_spill] sm:$0xff] %v4847_v20  ;;  %v4885_v20 = vld [vmem:[%s11617_s1 + $0x328] sm:$0xff] }
  0x56   :  { %12431 = vst [vmem:[#allocation56_spill] sm:$0xff] %v4852_v21  ;;  %v4890_v21 = vld [vmem:[%s11617_s1 + $0x728] sm:$0xff]  ;;  %473 = vmatpush.msra.mxu2 %v4885_v20 }
  0x57   :  { %12432 = vst [vmem:[#allocation57_spill] sm:$0xff] %v4859_v17  ;;  %v4897_v17 = vld [vmem:[%s11617_s1 + $0x3a0] sm:$0xff]  ;;  %493 = vmatpush.msra.mxu3 %v4890_v21 }
  0x58   :  { %12433 = vst [vmem:[#allocation58_spill] sm:$0xff] %v4864_v16  ;;  %v4902_v16 = vld [vmem:[%s11617_s1 + $0x7a0] sm:$0xff]  ;;  %431 = vmatpush.msra.mxu0 %v4897_v17  ;;  %474 = vmatpush.msra.mxu2 %v4909_v9 }
  0x59   :  { %12434 = vst [vmem:[#allocation59_spill] sm:$0xff] %v4873_v13  ;;  %v4921_v13 = vld [vmem:[%s11617_s1 + $0x360] sm:$0xff]  ;;  %451 = vmatpush.msra.mxu1 %v4902_v16  ;;  %494 = vmatpush.msra.mxu3 %v4914_v19 }
  0x5a   :  { %12435 = vst [vmem:[#allocation60_spill] sm:$0xff] %v4878_v12  ;;  %v4926_v12 = vld [vmem:[%s11617_s1 + $0x760] sm:$0xff]  ;;  %432 = vmatpush.msra.mxu0 %v4921_v13 }
  0x5b   :  { %12436 = vst [vmem:[#allocation61_spill] sm:$0xff] %v4885_v20  ;;  %v4933_v20 = vld [vmem:[%s11617_s1 + $0x2a8] sm:$0xff]  ;;  %452 = vmatpush.msra.mxu1 %v4926_v12 }
  0x5c   :  { %12437 = vst [vmem:[#allocation62_spill] sm:$0xff] %v4890_v21  ;;  %v4938_v21 = vld [vmem:[%s11617_s1 + $0x6a8] sm:$0xff]  ;;  %475 = vmatpush.msra.mxu2 %v4933_v20 }
  0x5d   :  { %12438 = vst [vmem:[#allocation63_spill] sm:$0xff] %v4897_v17  ;;  %v4945_v17 = vld [vmem:[%s11617_s1 + $0x320] sm:$0xff]  ;;  %495 = vmatpush.msra.mxu3 %v4938_v21 }
  0x5e   :  { %12439 = vst [vmem:[#allocation64_spill] sm:$0xff] %v4902_v16  ;;  %v4950_v16 = vld [vmem:[%s11617_s1 + $0x720] sm:$0xff]  ;;  %433 = vmatpush.msra.mxu0 %v4945_v17 }
  0x5f   :  { %12440 = vst [vmem:[#allocation65_spill] sm:$0xff] %v4909_v9  ;;  %v4957_v9 = vld [vmem:[%s11617_s1 + $0x268] sm:$0xff]  ;;  %453 = vmatpush.msra.mxu1 %v4950_v16 }
  0x60   :  { %12441 = vst [vmem:[#allocation66_spill] sm:$0xff] %v4914_v19  ;;  %v4962_v19 = vld [vmem:[%s11617_s1 + $0x668] sm:$0xff]  ;;  %476 = vmatpush.msra.mxu2 %v4957_v9 }
  0x61   :  { %12442 = vst [vmem:[#allocation67_spill] sm:$0xff] %v4921_v13  ;;  %v4969_v13 = vld [vmem:[%s11617_s1 + $0x2e0] sm:$0xff]  ;;  %496 = vmatpush.msra.mxu3 %v4962_v19 }
  0x62   :  { %12443 = vst [vmem:[#allocation68_spill] sm:$0xff] %v4926_v12  ;;  %v4974_v12 = vld [vmem:[%s11617_s1 + $0x6e0] sm:$0xff]  ;;  %434 = vmatpush.msra.mxu0 %v4969_v13 }
  0x63   :  { %12444 = vst [vmem:[#allocation69_spill] sm:$0xff] %v4933_v20  ;;  %v4981_v20 = vld [vmem:[%s11617_s1 + $0x228] sm:$0xff]  ;;  %454 = vmatpush.msra.mxu1 %v4974_v12 }
  0x64   :  { %12445 = vst [vmem:[#allocation70_spill] sm:$0xff] %v4938_v21  ;;  %v4986_v21 = vld [vmem:[%s11617_s1 + $0x628] sm:$0xff]  ;;  %477 = vmatpush.msra.mxu2 %v4981_v20 }
  0x65   :  { %12446 = vst [vmem:[#allocation71_spill] sm:$0xff] %v4945_v17  ;;  %v4993_v17 = vld [vmem:[%s11617_s1 + $0x2a0] sm:$0xff]  ;;  %497 = vmatpush.msra.mxu3 %v4986_v21 }
  0x66   :  { %12447 = vst [vmem:[#allocation72_spill] sm:$0xff] %v4950_v16  ;;  %v4998_v16 = vld [vmem:[%s11617_s1 + $0x6a0] sm:$0xff]  ;;  %435 = vmatpush.msra.mxu0 %v4993_v17 }
  0x67   :  { %12448 = vst [vmem:[#allocation73_spill] sm:$0xff] %v4957_v9  ;;  %v5005_v9 = vld [vmem:[%s11617_s1 + $0x1e8] sm:$0xff]  ;;  %455 = vmatpush.msra.mxu1 %v4998_v16 }
  0x68   :  { %12449 = vst [vmem:[#allocation74_spill] sm:$0xff] %v4962_v19  ;;  %v5010_v19 = vld [vmem:[%s11617_s1 + $0x5e8] sm:$0xff]  ;;  %478 = vmatpush.msra.mxu2 %v5005_v9 }
  0x69   :  { %12450 = vst [vmem:[#allocation75_spill] sm:$0xff] %v4969_v13  ;;  %v5017_v13 = vld [vmem:[%s11617_s1 + $0x260] sm:$0xff]  ;;  %498 = vmatpush.msra.mxu3 %v5010_v19 }
  0x6a   :  { %12451 = vst [vmem:[#allocation76_spill] sm:$0xff] %v4974_v12  ;;  %v5022_v12 = vld [vmem:[%s11617_s1 + $0x660] sm:$0xff]  ;;  %436 = vmatpush.msra.mxu0 %v5017_v13 }
  0x6b   :  { %12452 = vst [vmem:[#allocation77_spill] sm:$0xff] %v4981_v20  ;;  %v5029_v20 = vld [vmem:[%s11617_s1 + $0x1a8] sm:$0xff]  ;;  %456 = vmatpush.msra.mxu1 %v5022_v12 }
  0x6c   :  { %12453 = vst [vmem:[#allocation78_spill] sm:$0xff] %v4986_v21  ;;  %v5034_v21 = vld [vmem:[%s11617_s1 + $0x5a8] sm:$0xff]  ;;  %479 = vmatpush.msra.mxu2 %v5029_v20 }
  0x6d   :  { %12454 = vst [vmem:[#allocation79_spill] sm:$0xff] %v4993_v17  ;;  %v5041_v17 = vld [vmem:[%s11617_s1 + $0x220] sm:$0xff]  ;;  %499 = vmatpush.msra.mxu3 %v5034_v21 }
  0x6e   :  { %12455 = vst [vmem:[#allocation80_spill] sm:$0xff] %v4998_v16  ;;  %v5046_v16 = vld [vmem:[%s11617_s1 + $0x620] sm:$0xff]  ;;  %437 = vmatpush.msra.mxu0 %v5041_v17 }
  0x6f   :  { %12456 = vst [vmem:[#allocation81_spill] sm:$0xff] %v5005_v9  ;;  %v5053_v9 = vld [vmem:[%s11617_s1 + $0x168] sm:$0xff]  ;;  %457 = vmatpush.msra.mxu1 %v5046_v16 }
  0x70   :  { %12457 = vst [vmem:[#allocation82_spill] sm:$0xff] %v5010_v19  ;;  %v5058_v19 = vld [vmem:[%s11617_s1 + $0x568] sm:$0xff]  ;;  %480 = vmatpush.msra.mxu2 %v5053_v9 }
  0x71   :  { %12458 = vst [vmem:[#allocation83_spill] sm:$0xff] %v5017_v13  ;;  %v5065_v13 = vld [vmem:[%s11617_s1 + $0x1e0] sm:$0xff]  ;;  %500 = vmatpush.msra.mxu3 %v5058_v19 }
  0x72   :  { %12459 = vst [vmem:[#allocation84_spill] sm:$0xff] %v5022_v12  ;;  %v5070_v12 = vld [vmem:[%s11617_s1 + $0x5e0] sm:$0xff]  ;;  %438 = vmatpush.msra.mxu0 %v5065_v13 }
  0x73   :  { %12460 = vst [vmem:[#allocation85_spill] sm:$0xff] %v5029_v20  ;;  %v5077_v20 = vld [vmem:[%s11617_s1 + $0x128] sm:$0xff]  ;;  %458 = vmatpush.msra.mxu1 %v5070_v12 }
  0x74   :  { %12461 = vst [vmem:[#allocation86_spill] sm:$0xff] %v5034_v21  ;;  %v5082_v21 = vld [vmem:[%s11617_s1 + $0x528] sm:$0xff]  ;;  %481 = vmatpush.msra.mxu2 %v5077_v20 }
  0x75   :  { %12462 = vst [vmem:[#allocation87_spill] sm:$0xff] %v5041_v17  ;;  %v5089_v17 = vld [vmem:[%s11617_s1 + $0x1a0] sm:$0xff]  ;;  %501 = vmatpush.msra.mxu3 %v5082_v21 }
  0x76   :  { %12463 = vst [vmem:[#allocation88_spill] sm:$0xff] %v5046_v16  ;;  %v5094_v16 = vld [vmem:[%s11617_s1 + $0x5a0] sm:$0xff]  ;;  %439 = vmatpush.msra.mxu0 %v5089_v17 }
  0x77   :  { %12464 = vst [vmem:[#allocation89_spill] sm:$0xff] %v5053_v9  ;;  %v5101_v9 = vld [vmem:[%s11617_s1 + $0xe8] sm:$0xff]  ;;  %459 = vmatpush.msra.mxu1 %v5094_v16 }
  0x78   :  { %12465 = vst [vmem:[#allocation90_spill] sm:$0xff] %v5058_v19  ;;  %v5106_v19 = vld [vmem:[%s11617_s1 + $0x4e8] sm:$0xff]  ;;  %482 = vmatpush.msra.mxu2 %v5101_v9 }
  0x79   :  { %12466 = vst [vmem:[#allocation91_spill] sm:$0xff] %v5065_v13  ;;  %v5113_v13 = vld [vmem:[%s11617_s1 + $0x160] sm:$0xff]  ;;  %502 = vmatpush.msra.mxu3 %v5106_v19 }
  0x7a   :  { %12467 = vst [vmem:[#allocation92_spill] sm:$0xff] %v5070_v12  ;;  %v5118_v12 = vld [vmem:[%s11617_s1 + $0x560] sm:$0xff]  ;;  %440 = vmatpush.msra.mxu0 %v5113_v13 }
  0x7b   :  { %12468 = vst [vmem:[#allocation93_spill] sm:$0xff] %v5077_v20  ;;  %v5125_v20 = vld [vmem:[%s11617_s1 + $0xa8] sm:$0xff]  ;;  %460 = vmatpush.msra.mxu1 %v5118_v12 }
  0x7c   :  { %12469 = vst [vmem:[#allocation94_spill] sm:$0xff] %v5082_v21  ;;  %v5130_v21 = vld [vmem:[%s11617_s1 + $0x4a8] sm:$0xff]  ;;  %483 = vmatpush.msra.mxu2 %v5125_v20 }
  0x7d   :  { %12470 = vst [vmem:[#allocation95_spill] sm:$0xff] %v5089_v17  ;;  %v5137_v17 = vld [vmem:[%s11617_s1 + $0x120] sm:$0xff]  ;;  %503 = vmatpush.msra.mxu3 %v5130_v21 }
  0x7e   :  { %12471 = vst [vmem:[#allocation96_spill] sm:$0xff] %v5094_v16  ;;  %v5142_v16 = vld [vmem:[%s11617_s1 + $0x520] sm:$0xff]  ;;  %441 = vmatpush.msra.mxu0 %v5137_v17 }
  0x7f   :  { %12472 = vst [vmem:[#allocation97_spill] sm:$0xff] %v5101_v9  ;;  %v5149_v9 = vld [vmem:[%s11617_s1 + $0x68] sm:$0xff]  ;;  %461 = vmatpush.msra.mxu1 %v5142_v16 }
  0x80   :  { %12473 = vst [vmem:[#allocation98_spill] sm:$0xff] %v5106_v19  ;;  %v5154_v19 = vld [vmem:[%s11617_s1 + $0x468] sm:$0xff]  ;;  %484 = vmatpush.msra.mxu2 %v5149_v9 }
  0x81   :  { %12474 = vst [vmem:[#allocation99_spill] sm:$0xff] %v5113_v13  ;;  %v5161_v13 = vld [vmem:[%s11617_s1 + $0xe0] sm:$0xff]  ;;  %504 = vmatpush.msra.mxu3 %v5154_v19 }
  0x82   :  { %12475 = vst [vmem:[#allocation100_spill] sm:$0xff] %v5118_v12  ;;  %v5166_v12 = vld [vmem:[%s11617_s1 + $0x4e0] sm:$0xff]  ;;  %442 = vmatpush.msra.mxu0 %v5161_v13 }
  0x83   :  { %12476 = vst [vmem:[#allocation101_spill] sm:$0xff] %v5125_v20  ;;  %v5173_v20 = vld [vmem:[%s11617_s1 + $0x28] sm:$0xff]  ;;  %462 = vmatpush.msra.mxu1 %v5166_v12 }
  0x84   :  { %12477 = vst [vmem:[#allocation102_spill] sm:$0xff] %v5130_v21  ;;  %v5178_v21 = vld [vmem:[%s11617_s1 + $0x428] sm:$0xff]  ;;  %485 = vmatpush.msra.mxu2 %v5173_v20 }
  0x85   :  { %12478 = vst [vmem:[#allocation103_spill] sm:$0xff] %v5137_v17  ;;  %v5185_v17 = vld [vmem:[%s11617_s1 + $0x3f8] sm:$0xff]  ;;  %505 = vmatpush.msra.mxu3 %v5178_v21  ;;  %486 = vmatmul.f32.vlgmr.msra.gmra.mxu2 %v12421_v18 }
  0x86   :  { %12479 = vst [vmem:[#allocation104_spill] sm:$0xff] %v5142_v16  ;;  %v5190_v16 = vld [vmem:[%s11617_s1 + $0x7f8] sm:$0xff]  ;;  %550 = vmatpush.msrb.mxu2 %v5185_v17  ;;  %506 = vmatmul.f32.vlgmr.msra.gmra.mxu3 %v12421_v18 }
  0x87   :  { %12480 = vst [vmem:[#allocation105_spill] sm:$0xff] %v5149_v9  ;;  %v5197_v9 = vld [vmem:[%s11617_s1 + $0xa0] sm:$0xff]  ;;  %570 = vmatpush.msrb.mxu3 %v5190_v16 }
  0x88   :  { %12481 = vst [vmem:[#allocation106_spill] sm:$0xff] %v5154_v19  ;;  %v5202_v19 = vld [vmem:[%s11617_s1 + $0x4a0] sm:$0xff]  ;;  %443 = vmatpush.msra.mxu0 %v5197_v9 }
  0x89   :  { %12482 = vst [vmem:[#allocation107_spill] sm:$0xff] %v5161_v13  ;;  %v5209_v13 = vld [vmem:[%s11617_s1 + $0x3b8] sm:$0xff]  ;;  %463 = vmatpush.msra.mxu1 %v5202_v19 }
  0x8a   :  { %12483 = vst [vmem:[#allocation108_spill] sm:$0xff] %v5166_v12  ;;  %v5214_v12 = vld [vmem:[%s11617_s1 + $0x7b8] sm:$0xff]  ;;  %551 = vmatpush.msrb.mxu2 %v5209_v13 }
  0x8b   :  { %12484 = vst [vmem:[#allocation109_spill] sm:$0xff] %v5173_v20  ;;  %v5221_v20 = vld [vmem:[%s11617_s1 + $0x60] sm:$0xff]  ;;  %571 = vmatpush.msrb.mxu3 %v5214_v12 }
  0x8c   :  { %12485 = vst [vmem:[#allocation110_spill] sm:$0xff] %v5178_v21  ;;  %v5226_v21 = vld [vmem:[%s11617_s1 + $0x460] sm:$0xff]  ;;  %444 = vmatpush.msra.mxu0 %v5221_v20 }
  0x8d   :  { %12486 = vst [vmem:[#allocation111_spill] sm:$0xff] %v5185_v17  ;;  %v5233_v17 = vld [vmem:[%s11617_s1 + $0x378] sm:$0xff]  ;;  %464 = vmatpush.msra.mxu1 %v5226_v21 }
  0x8e   :  { %12487 = vst [vmem:[#allocation112_spill] sm:$0xff] %v5190_v16  ;;  %v5238_v16 = vld [vmem:[%s11617_s1 + $0x778] sm:$0xff]  ;;  %552 = vmatpush.msrb.mxu2 %v5233_v17 }
  0x8f   :  { %12488 = vst [vmem:[#allocation113_spill] sm:$0xff] %v5197_v9  ;;  %v5245_v9 = vld [vmem:[%s11617_s1 + $0x20] sm:$0xff]  ;;  %572 = vmatpush.msrb.mxu3 %v5238_v16 }
  0x90   :  { %12489 = vst [vmem:[#allocation114_spill] sm:$0xff] %v5202_v19  ;;  %v5250_v19 = vld [vmem:[%s11617_s1 + $0x420] sm:$0xff]  ;;  %445 = vmatpush.msra.mxu0 %v5245_v9 }
  0x91   :  { %12490 = vst [vmem:[#allocation115_spill] sm:$0xff] %v5209_v13  ;;  %v5257_v13 = vld [vmem:[%s11617_s1 + $0x3f0] sm:$0xff]  ;;  %465 = vmatpush.msra.mxu1 %v5250_v19  ;;  %446 = vmatmul.f32.vlgmr.msra.gmra.mxu0 %v12421_v18 }
  0x92   :  { %12491 = vst [vmem:[#allocation116_spill] sm:$0xff] %v5214_v12  ;;  %v5262_v12 = vld [vmem:[%s11617_s1 + $0x7f0] sm:$0xff]  ;;  %510 = vmatpush.msrb.mxu0 %v5257_v13  ;;  %466 = vmatmul.f32.vlgmr.msra.gmra.mxu1 %v12421_v18 }
  0x93   :  { %12492 = vst [vmem:[#allocation117_spill] sm:$0xff] %v5221_v20  ;;  %v5269_v20 = vld [vmem:[%s11617_s1 + $0x338] sm:$0xff]  ;;  %530 = vmatpush.msrb.mxu1 %v5262_v12 }
  0x94   :  { %12493 = vst [vmem:[#allocation118_spill] sm:$0xff] %v5226_v21  ;;  %v5274_v21 = vld [vmem:[%s11617_s1 + $0x738] sm:$0xff]  ;;  %553 = vmatpush.msrb.mxu2 %v5269_v20 }
  0x95   :  { %12494 = vst [vmem:[#allocation119_spill] sm:$0xff] %v5233_v17  ;;  %v5281_v17 = vld [vmem:[%s11617_s1 + $0x3b0] sm:$0xff]  ;;  %573 = vmatpush.msrb.mxu3 %v5274_v21 }
  0x96   :  { %12495 = vst [vmem:[#allocation120_spill] sm:$0xff] %v5238_v16  ;;  %v5286_v16 = vld [vmem:[%s11617_s1 + $0x7b0] sm:$0xff]  ;;  %511 = vmatpush.msrb.mxu0 %v5281_v17 }
  0x97   :  { %12496 = vst [vmem:[#allocation121_spill] sm:$0xff] %v5245_v9  ;;  %v5293_v9 = vld [vmem:[%s11617_s1 + $0x2f8] sm:$0xff]  ;;  %531 = vmatpush.msrb.mxu1 %v5286_v16 }
  0x98   :  { %12497 = vst [vmem:[#allocation122_spill] sm:$0xff] %v5250_v19  ;;  %v5298_v19 = vld [vmem:[%s11617_s1 + $0x6f8] sm:$0xff]  ;;  %554 = vmatpush.msrb.mxu2 %v5293_v9 }
  0x99   :  { %12498 = vst [vmem:[#allocation123_spill] sm:$0xff] %v5257_v13  ;;  %v5305_v13 = vld [vmem:[%s11617_s1 + $0x370] sm:$0xff]  ;;  %574 = vmatpush.msrb.mxu3 %v5298_v19 }
  0x9a   :  { %12499 = vst [vmem:[#allocation124_spill] sm:$0xff] %v5262_v12  ;;  %v5310_v12 = vld [vmem:[%s11617_s1 + $0x770] sm:$0xff]  ;;  %512 = vmatpush.msrb.mxu0 %v5305_v13 }
  0x9b   :  { %12500 = vst [vmem:[#allocation125_spill] sm:$0xff] %v5269_v20  ;;  %v5317_v20 = vld [vmem:[%s11617_s1 + $0x2b8] sm:$0xff]  ;;  %532 = vmatpush.msrb.mxu1 %v5310_v12 }
  0x9c   :  { %12501 = vst [vmem:[#allocation126_spill] sm:$0xff] %v5274_v21  ;;  %v5322_v21 = vld [vmem:[%s11617_s1 + $0x6b8] sm:$0xff]  ;;  %555 = vmatpush.msrb.mxu2 %v5317_v20 }
  0x9d   :  { %12502 = vst [vmem:[#allocation127_spill] sm:$0xff] %v5281_v17  ;;  %v5329_v17 = vld [vmem:[%s11617_s1 + $0x330] sm:$0xff]  ;;  %575 = vmatpush.msrb.mxu3 %v5322_v21 }
  0x9e   :  { %12503 = vst [vmem:[#allocation128_spill] sm:$0xff] %v5286_v16  ;;  %v5334_v16 = vld [vmem:[%s11617_s1 + $0x730] sm:$0xff]  ;;  %513 = vmatpush.msrb.mxu0 %v5329_v17 }
  0x9f   :  { %12504 = vst [vmem:[#allocation129_spill] sm:$0xff] %v5293_v9  ;;  %v5341_v9 = vld [vmem:[%s11617_s1 + $0x278] sm:$0xff]  ;;  %533 = vmatpush.msrb.mxu1 %v5334_v16 }
  0xa0   :  { %12505 = vst [vmem:[#allocation130_spill] sm:$0xff] %v5298_v19  ;;  %v5346_v19 = vld [vmem:[%s11617_s1 + $0x678] sm:$0xff]  ;;  %556 = vmatpush.msrb.mxu2 %v5341_v9 }
  0xa1   :  { %12506 = vst [vmem:[#allocation131_spill] sm:$0xff] %v5305_v13  ;;  %v5353_v13 = vld [vmem:[%s11617_s1 + $0x2f0] sm:$0xff]  ;;  %576 = vmatpush.msrb.mxu3 %v5346_v19 }
  0xa2   :  { %12507 = vst [vmem:[#allocation132_spill] sm:$0xff] %v5310_v12  ;;  %v5358_v12 = vld [vmem:[%s11617_s1 + $0x6f0] sm:$0xff]  ;;  %514 = vmatpush.msrb.mxu0 %v5353_v13 }
  0xa3   :  { %12508 = vst [vmem:[#allocation133_spill] sm:$0xff] %v5317_v20  ;;  %v5365_v20 = vld [vmem:[%s11617_s1 + $0x238] sm:$0xff]  ;;  %534 = vmatpush.msrb.mxu1 %v5358_v12 }
  0xa4   :  { %12509 = vst [vmem:[#allocation134_spill] sm:$0xff] %v5322_v21  ;;  %v5370_v21 = vld [vmem:[%s11617_s1 + $0x638] sm:$0xff]  ;;  %557 = vmatpush.msrb.mxu2 %v5365_v20 }
  0xa5   :  { %12510 = vst [vmem:[#allocation135_spill] sm:$0xff] %v5329_v17  ;;  %v5377_v17 = vld [vmem:[%s11617_s1 + $0x2b0] sm:$0xff]  ;;  %577 = vmatpush.msrb.mxu3 %v5370_v21 }
  0xa6   :  { %12511 = vst [vmem:[#allocation136_spill] sm:$0xff] %v5334_v16  ;;  %v5382_v16 = vld [vmem:[%s11617_s1 + $0x6b0] sm:$0xff]  ;;  %515 = vmatpush.msrb.mxu0 %v5377_v17 }
  0xa7   :  { %12512 = vst [vmem:[#allocation137_spill] sm:$0xff] %v5341_v9  ;;  %v5389_v9 = vld [vmem:[%s11617_s1 + $0x1f8] sm:$0xff]  ;;  %535 = vmatpush.msrb.mxu1 %v5382_v16 }
  0xa8   :  { %12513 = vst [vmem:[#allocation138_spill] sm:$0xff] %v5346_v19  ;;  %v5394_v19 = vld [vmem:[%s11617_s1 + $0x5f8] sm:$0xff]  ;;  %558 = vmatpush.msrb.mxu2 %v5389_v9 }
  0xa9   :  { %12514 = vst [vmem:[#allocation139_spill] sm:$0xff] %v5353_v13  ;;  %v5401_v13 = vld [vmem:[%s11617_s1 + $0x270] sm:$0xff]  ;;  %578 = vmatpush.msrb.mxu3 %v5394_v19 }
  0xaa   :  { %12515 = vst [vmem:[#allocation140_spill] sm:$0xff] %v5358_v12  ;;  %v5406_v12 = vld [vmem:[%s11617_s1 + $0x670] sm:$0xff]  ;;  %516 = vmatpush.msrb.mxu0 %v5401_v13 }
  0xab   :  { %12516 = vst [vmem:[#allocation141_spill] sm:$0xff] %v5365_v20  ;;  %v5413_v20 = vld [vmem:[%s11617_s1 + $0x1b8] sm:$0xff]  ;;  %536 = vmatpush.msrb.mxu1 %v5406_v12 }
  0xac   :  { %12517 = vst [vmem:[#allocation142_spill] sm:$0xff] %v5370_v21  ;;  %v5418_v21 = vld [vmem:[%s11617_s1 + $0x5b8] sm:$0xff]  ;;  %559 = vmatpush.msrb.mxu2 %v5413_v20 }
  0xad   :  { %12518 = vst [vmem:[#allocation143_spill] sm:$0xff] %v5377_v17  ;;  %v5425_v17 = vld [vmem:[%s11617_s1 + $0x230] sm:$0xff]  ;;  %579 = vmatpush.msrb.mxu3 %v5418_v21 }
  0xae   :  { %12519 = vst [vmem:[#allocation144_spill] sm:$0xff] %v5382_v16  ;;  %v5430_v16 = vld [vmem:[%s11617_s1 + $0x630] sm:$0xff]  ;;  %517 = vmatpush.msrb.mxu0 %v5425_v17 }
  0xaf   :  { %12520 = vst [vmem:[#allocation145_spill] sm:$0xff] %v5389_v9  ;;  %v5437_v9 = vld [vmem:[%s11617_s1 + $0x178] sm:$0xff]  ;;  %537 = vmatpush.msrb.mxu1 %v5430_v16 }
  0xb0   :  { %12521 = vst [vmem:[#allocation146_spill] sm:$0xff] %v5394_v19  ;;  %v5442_v19 = vld [vmem:[%s11617_s1 + $0x578] sm:$0xff]  ;;  %560 = vmatpush.msrb.mxu2 %v5437_v9 }
  0xb1   :  { %12522 = vst [vmem:[#allocation147_spill] sm:$0xff] %v5401_v13  ;;  %v5449_v13 = vld [vmem:[%s11617_s1 + $0x1f0] sm:$0xff]  ;;  %580 = vmatpush.msrb.mxu3 %v5442_v19 }
  0xb2   :  { %12523 = vst [vmem:[#allocation148_spill] sm:$0xff] %v5406_v12  ;;  %v5454_v12 = vld [vmem:[%s11617_s1 + $0x5f0] sm:$0xff]  ;;  %518 = vmatpush.msrb.mxu0 %v5449_v13 }
  0xb3   :  { %12524 = vst [vmem:[#allocation149_spill] sm:$0xff] %v5413_v20  ;;  %v5461_v20 = vld [vmem:[%s11617_s1 + $0x138] sm:$0xff]  ;;  %538 = vmatpush.msrb.mxu1 %v5454_v12 }
  0xb4   :  { %12525 = vst [vmem:[#allocation150_spill] sm:$0xff] %v5418_v21  ;;  %v5466_v21 = vld [vmem:[%s11617_s1 + $0x538] sm:$0xff]  ;;  %561 = vmatpush.msrb.mxu2 %v5461_v20 }
  0xb5   :  { %12526 = vst [vmem:[#allocation151_spill] sm:$0xff] %v5425_v17  ;;  %v5480_v17 = vld [vmem:[%s11617_s1 + $0x5b0] sm:$0xff]  ;;  %581 = vmatpush.msrb.mxu3 %v5466_v21 }
  0xb6   :  { %12527 = vst [vmem:[#allocation152_spill] sm:$0xff] %v5430_v16  ;;  %v5475_v16 = vld [vmem:[%s11617_s1 + $0x1b0] sm:$0xff]  ;;  %539 = vmatpush.msrb.mxu1 %v5480_v17 }
  0xb7   :  { %12528 = vst [vmem:[#allocation153_spill] sm:$0xff] %v5437_v9  ;;  %v5492_v9 = vld [vmem:[%s11617_s1 + $0x4f8] sm:$0xff]  ;;  %519 = vmatpush.msrb.mxu0 %v5475_v16 }
  0xb8   :  { %12529 = vst [vmem:[#allocation154_spill] sm:$0xff] %v5442_v19  ;;  %v5487_v19 = vld [vmem:[%s11617_s1 + $0xf8] sm:$0xff]  ;;  %582 = vmatpush.msrb.mxu3 %v5492_v9 }
  0xb9   :  { %12530 = vst [vmem:[#allocation155_spill] sm:$0xff] %v5449_v13  ;;  %v5516_v13 = vld [vmem:[%s11617_s1 + $0x4b8] sm:$0xff]  ;;  %562 = vmatpush.msrb.mxu2 %v5487_v19 }
  0xba   :  { %12531 = vst [vmem:[#allocation156_spill] sm:$0xff] %v5454_v12  ;;  %v5511_v12 = vld [vmem:[%s11617_s1 + $0xb8] sm:$0xff]  ;;  %583 = vmatpush.msrb.mxu3 %v5516_v13 }
  0xbb   :  { %12532 = vst [vmem:[#allocation157_spill] sm:$0xff] %v5461_v20  ;;  %v5499_v20 = vld [vmem:[%s11617_s1 + $0x170] sm:$0xff]  ;;  %563 = vmatpush.msrb.mxu2 %v5511_v12 }
  0xbc   :  { %12533 = vst [vmem:[#allocation158_spill] sm:$0xff] %v5466_v21  ;;  %v5504_v21 = vld [vmem:[%s11617_s1 + $0x570] sm:$0xff]  ;;  %520 = vmatpush.msrb.mxu0 %v5499_v20 }
  0xbd   :  { %12534 = vst [vmem:[#allocation159_spill] sm:$0xff] %v5475_v16  ;;  %v5523_v16 = vld [vmem:[%s11617_s1 + $0x130] sm:$0xff]  ;;  %540 = vmatpush.msrb.mxu1 %v5504_v21 }
  0xbe   :  { %12535 = vst [vmem:[#allocation160_spill] sm:$0xff] %v5480_v17  ;;  %v5528_v17 = vld [vmem:[%s11617_s1 + $0x530] sm:$0xff]  ;;  %521 = vmatpush.msrb.mxu0 %v5523_v16 }
  0xbf   :  { %12536 = vst [vmem:[#allocation161_spill] sm:$0xff] %v5487_v19  ;;  %v5535_v19 = vld [vmem:[%s11617_s1 + $0x78] sm:$0xff]  ;;  %541 = vmatpush.msrb.mxu1 %v5528_v17 }
  0xc0   :  { %12537 = vst [vmem:[#allocation162_spill] sm:$0xff] %v5492_v9  ;;  %v5540_v9 = vld [vmem:[%s11617_s1 + $0x478] sm:$0xff]  ;;  %564 = vmatpush.msrb.mxu2 %v5535_v19 }
  0xc1   :  { %12538 = vst [vmem:[#allocation163_spill] sm:$0xff] %v5499_v20  ;;  %v5554_v20 = vld [vmem:[%s11617_s1 + $0x4f0] sm:$0xff]  ;;  %584 = vmatpush.msrb.mxu3 %v5540_v9 }
  0xc2   :  { %12539 = vst [vmem:[#allocation164_spill] sm:$0xff] %v5504_v21  ;;  %v5549_v21 = vld [vmem:[%s11617_s1 + $0xf0] sm:$0xff]  ;;  %542 = vmatpush.msrb.mxu1 %v5554_v20 }
  0xc3   :  { %12540 = vst [vmem:[#allocation165_spill] sm:$0xff] %v5511_v12  ;;  %v5566_v12 = vld [vmem:[%s11617_s1 + $0x438] sm:$0xff]  ;;  %522 = vmatpush.msrb.mxu0 %v5549_v21 }
  0xc4   :  { %12541 = vst [vmem:[#allocation166_spill] sm:$0xff] %v5516_v13  ;;  %v5561_v13 = vld [vmem:[%s11617_s1 + $0x38] sm:$0xff]  ;;  %585 = vmatpush.msrb.mxu3 %v5566_v12 }
  0xc5   :  { %12542 = vst [vmem:[#allocation167_spill] sm:$0xff] %v5528_v17  ;;  %565 = vmatpush.msrb.mxu2 %v5561_v13  ;;  %586 = vmatmul.f32.vlgmr.msrb.gmra.mxu3 %v12421_v18  ;;  %v5611_v17 = vld [vmem:[%s11617_s1 + $0x3c8] sm:$0xff] }
  0xc6   :  { %12543 = vst [vmem:[#allocation168_spill] sm:$0xff] %v5535_v19  ;;  %v5580_v19 = vld [vmem:[%s11617_s1 + $0x4b0] sm:$0xff]  ;;  %566 = vmatmul.f32.vlgmr.msrb.gmra.mxu2 %v12421_v18 }
  0xc7   :  { %12544 = vst [vmem:[#allocation169_spill] sm:$0xff] %v5540_v9  ;;  %v5575_v9 = vld [vmem:[%s11617_s1 + $0xb0] sm:$0xff]  ;;  %543 = vmatpush.msrb.mxu1 %v5580_v19  ;;  %690 = vmatpush.msra.mxu2 %v5611_v17 }
  0xc8   :  { %12545 = vst [vmem:[#allocation170_spill] sm:$0xff] %v5549_v21  ;;  %v5594_v21 = vld [vmem:[%s11617_s1 + $0x470] sm:$0xff]  ;;  %523 = vmatpush.msrb.mxu0 %v5575_v9 }
  0xc9   :  { %12546 = vst [vmem:[#allocation171_spill] sm:$0xff] %v5554_v20  ;;  %v5589_v20 = vld [vmem:[%s11617_s1 + $0x70] sm:$0xff]  ;;  %544 = vmatpush.msrb.mxu1 %v5594_v21 }
  0xca   :  { %12547 = vst [vmem:[#allocation172_spill] sm:$0xff] %v5561_v13  ;;  %v5606_v13 = vld [vmem:[%s11617_s1 + $0x430] sm:$0xff]  ;;  %524 = vmatpush.msrb.mxu0 %v5589_v20 }
  0xcb   :  { %12548 = vst [vmem:[#allocation173_spill] sm:$0xff] %v5566_v12  ;;  %v5601_v12 = vld [vmem:[%s11617_s1 + $0x30] sm:$0xff]  ;;  %545 = vmatpush.msrb.mxu1 %v5606_v13 }
  0xcc   :  { %12549 = vst [vmem:[#allocation174_spill] sm:$0xff] %v5575_v9  ;;  %v5625_v9 = vld [vmem:[%s11617_s1 + $0x388] sm:$0xff]  ;;  %525 = vmatpush.msrb.mxu0 %v5601_v12  ;;  %546 = vmatmul.f32.vlgmr.msrb.gmra.mxu1 %v12421_v18 }
  0xcd   :  { %12550 = vst [vmem:[#allocation175_spill] sm:$0xff] %v5580_v19  ;;  %v5617_v19 = vld [vmem:[%s11617_s1 + $0x7c8] sm:$0xff]  ;;  %691 = vmatpush.msra.mxu2 %v5625_v9  ;;  %526 = vmatmul.f32.vlgmr.msrb.gmra.mxu0 %v12421_v18 }
  0xce   :  { %12551 = vst [vmem:[#allocation176_spill] sm:$0xff] %v5611_v17  ;;  %710 = vmatpush.msra.mxu3 %v5617_v19  ;;  %v5631_v17 = vld [vmem:[%s11617_s1 + $0x788] sm:$0xff] }
  0xcf   :  { %12552 = vst [vmem:[#allocation177_spill] sm:$0xff] %v5617_v19  ;;  %v5641_v19 = vld [vmem:[%s11617_s1 + $0x3c0] sm:$0xff]  ;;  %v5659_v18 = vld [vmem:[%s11617_s1 + $0x748] sm:$0xff] }
  0xd0   :  { %12553 = vst [vmem:[#allocation178_spill] sm:$0xff] %v5625_v9  ;;  %711 = vmatpush.msra.mxu3 %v5631_v17  ;;  %650 = vmatpush.msra.mxu0 %v5641_v19  ;;  %v5647_v9 = vld [vmem:[%s11617_s1 + $0x7c0] sm:$0xff] }
  0xd1   :  { %12554 = vst [vmem:[#allocation179_spill] sm:$0xff] %v5631_v17  ;;  %670 = vmatpush.msra.mxu1 %v5647_v9  ;;  %v5653_v17 = vld [vmem:[%s11617_s1 + $0x348] sm:$0xff] }
  0xd2   :  { %12555 = vst [vmem:[#allocation180_spill] sm:$0xff] %v5641_v19  ;;  %692 = vmatpush.msra.mxu2 %v5653_v17  ;;  %712 = vmatpush.msra.mxu3 %v5659_v18  ;;  %v5665_v19 = vld [vmem:[%s11617_s1 + $0x380] sm:$0xff] }
  0xd3   :  { %12556 = vst [vmem:[#allocation181_spill] sm:$0xff] %v5647_v9  ;;  %651 = vmatpush.msra.mxu0 %v5665_v19  ;;  %v5671_v9 = vld [vmem:[%s11617_s1 + $0x780] sm:$0xff] }
  0xd4   :  { %12557 = vst [vmem:[#allocation182_spill] sm:$0xff] %v5653_v17  ;;  %671 = vmatpush.msra.mxu1 %v5671_v9  ;;  %v5677_v17 = vld [vmem:[%s11617_s1 + $0x308] sm:$0xff] }
  0xd5   :  { %12558 = vst [vmem:[#allocation183_spill] sm:$0xff] %v5659_v18  ;;  %693 = vmatpush.msra.mxu2 %v5677_v17  ;;  %v5683_v18 = vld [vmem:[%s11617_s1 + $0x708] sm:$0xff] }
  0xd6   :  { %12559 = vst [vmem:[#allocation184_spill] sm:$0xff] %v5665_v19  ;;  %713 = vmatpush.msra.mxu3 %v5683_v18  ;;  %v5689_v19 = vld [vmem:[%s11617_s1 + $0x340] sm:$0xff] }
  0xd7   :  { %12560 = vst [vmem:[#allocation185_spill] sm:$0xff] %v5671_v9  ;;  %652 = vmatpush.msra.mxu0 %v5689_v19  ;;  %v5695_v9 = vld [vmem:[%s11617_s1 + $0x740] sm:$0xff] }
  0xd8   :  { %12561 = vst [vmem:[#allocation186_spill] sm:$0xff] %v5677_v17  ;;  %672 = vmatpush.msra.mxu1 %v5695_v9  ;;  %v5701_v17 = vld [vmem:[%s11617_s1 + $0x2c8] sm:$0xff] }
  0xd9   :  { %12562 = vst [vmem:[#allocation187_spill] sm:$0xff] %v5683_v18  ;;  %694 = vmatpush.msra.mxu2 %v5701_v17  ;;  %v5707_v18 = vld [vmem:[%s11617_s1 + $0x6c8] sm:$0xff] }
  0xda   :  { %12563 = vst [vmem:[#allocation188_spill] sm:$0xff] %v5689_v19  ;;  %714 = vmatpush.msra.mxu3 %v5707_v18  ;;  %v5713_v19 = vld [vmem:[%s11617_s1 + $0x300] sm:$0xff] }
  0xdb   :  { %12564 = vst [vmem:[#allocation189_spill] sm:$0xff] %v5695_v9  ;;  %653 = vmatpush.msra.mxu0 %v5713_v19  ;;  %v5719_v9 = vld [vmem:[%s11617_s1 + $0x700] sm:$0xff] }
  0xdc   :  { %12565 = vst [vmem:[#allocation190_spill] sm:$0xff] %v5701_v17  ;;  %673 = vmatpush.msra.mxu1 %v5719_v9  ;;  %v5725_v17 = vld [vmem:[%s11617_s1 + $0x288] sm:$0xff] }
  0xdd   :  { %12566 = vst [vmem:[#allocation191_spill] sm:$0xff] %v5707_v18  ;;  %695 = vmatpush.msra.mxu2 %v5725_v17  ;;  %v5731_v18 = vld [vmem:[%s11617_s1 + $0x688] sm:$0xff] }
  0xde   :  { %12567 = vst [vmem:[#allocation192_spill] sm:$0xff] %v5713_v19  ;;  %715 = vmatpush.msra.mxu3 %v5731_v18  ;;  %v5737_v19 = vld [vmem:[%s11617_s1 + $0x2c0] sm:$0xff] }
  0xdf   :  { %12568 = vst [vmem:[#allocation193_spill] sm:$0xff] %v5719_v9  ;;  %654 = vmatpush.msra.mxu0 %v5737_v19  ;;  %v5743_v9 = vld [vmem:[%s11617_s1 + $0x6c0] sm:$0xff]  ;;  %696 = vmatpush.msra.mxu2 %v4197_v22 }
  0xe0   :  { %674 = vmatpush.msra.mxu1 %v5743_v9  ;;  %716 = vmatpush.msra.mxu3 %v4202_v23  ;;  %v12569_v22 = vld [vmem:[#allocation2_spill] sm:$0xff]  ;;  %v12570_v23 = vld [vmem:[#allocation7_spill] sm:$0xff] }
  0xe1   :  { %655 = vmatpush.msra.mxu0 %v4207_v24  ;;  %697 = vmatpush.msra.mxu2 %v4217_v26  ;;  %v12571_v24 = vld [vmem:[#allocation8_spill] sm:$0xff] }
  0xe2   :  { %675 = vmatpush.msra.mxu1 %v4212_v25  ;;  %717 = vmatpush.msra.mxu3 %v4222_v27  ;;  %v12572_v25 = vld [vmem:[#allocation3_spill] sm:$0xff]  ;;  %v12573_v26 = vld [vmem:[#allocation4_spill] sm:$0xff] }
  0xe3   :  { %656 = vmatpush.msra.mxu0 %v4229_v28  ;;  %698 = vmatpush.msra.mxu2 %v4241_v30  ;;  %v12574_v27 = vld [vmem:[#allocation11_spill] sm:$0xff]  ;;  %v12575_v28 = vld [vmem:[#allocation12_spill] sm:$0xff]  ;;  %v12577_v30 = vld [vmem:[#allocation6_spill] sm:$0xff] }
  0xe4   :  { %676 = vmatpush.msra.mxu1 %v4234_v29  ;;  %718 = vmatpush.msra.mxu3 %v4246_v31  ;;  %v12576_v29 = vld [vmem:[#allocation5_spill] sm:$0xff]  ;;  %v12578_v31 = vld [vmem:[#allocation15_spill] sm:$0xff] }
  0xe5   :  { %657 = vmatpush.msra.mxu0 %v4253_v32  ;;  %699 = vmatpush.msra.mxu2 %v4265_v34  ;;  %v12579_v32 = vld [vmem:[#allocation16_spill] sm:$0xff]  ;;  %v12581_v34 = vld [vmem:[#allocation10_spill] sm:$0xff] }
  0xe6   :  { %677 = vmatpush.msra.mxu1 %v4258_v33  ;;  %719 = vmatpush.msra.mxu3 %v4270_v35  ;;  %v12580_v33 = vld [vmem:[#allocation9_spill] sm:$0xff]  ;;  %v12582_v35 = vld [vmem:[#allocation19_spill] sm:$0xff] }
  0xe7   :  { %658 = vmatpush.msra.mxu0 %v4277_v36  ;;  %700 = vmatpush.msra.mxu2 %v4289_v38  ;;  %v12583_v36 = vld [vmem:[#allocation20_spill] sm:$0xff]  ;;  %v12585_v38 = vld [vmem:[#allocation14_spill] sm:$0xff] }
  0xe8   :  { %678 = vmatpush.msra.mxu1 %v4282_v37  ;;  %720 = vmatpush.msra.mxu3 %v4294_v39  ;;  %v12584_v37 = vld [vmem:[#allocation13_spill] sm:$0xff]  ;;  %v12586_v39 = vld [vmem:[#allocation23_spill] sm:$0xff] }
  0xe9   :  { %659 = vmatpush.msra.mxu0 %v4301_v40  ;;  %701 = vmatpush.msra.mxu2 %v4313_v42  ;;  %v12587_v40 = vld [vmem:[#allocation24_spill] sm:$0xff]  ;;  %v12589_v42 = vld [vmem:[#allocation18_spill] sm:$0xff] }
  0xea   :  { %679 = vmatpush.msra.mxu1 %v4306_v41  ;;  %721 = vmatpush.msra.mxu3 %v4318_v43  ;;  %v12588_v41 = vld [vmem:[#allocation17_spill] sm:$0xff]  ;;  %v12590_v43 = vld [vmem:[#allocation27_spill] sm:$0xff] }
  0xeb   :  { %660 = vmatpush.msra.mxu0 %v4325_v44  ;;  %702 = vmatpush.msra.mxu2 %v4337_v46  ;;  %v12591_v44 = vld [vmem:[#allocation28_spill] sm:$0xff]  ;;  %v12593_v46 = vld [vmem:[#allocation22_spill] sm:$0xff] }
  0xec   :  { %680 = vmatpush.msra.mxu1 %v4330_v45  ;;  %722 = vmatpush.msra.mxu3 %v4342_v47  ;;  %v12592_v45 = vld [vmem:[#allocation21_spill] sm:$0xff]  ;;  %v12594_v47 = vld [vmem:[#allocation31_spill] sm:$0xff] }
  0xed   :  { %661 = vmatpush.msra.mxu0 %v4349_v48  ;;  %703 = vmatpush.msra.mxu2 %v4361_v50  ;;  %v12595_v48 = vld [vmem:[#allocation32_spill] sm:$0xff]  ;;  %v12597_v50 = vld [vmem:[#allocation26_spill] sm:$0xff] }
  0xee   :  { %681 = vmatpush.msra.mxu1 %v4354_v49  ;;  %723 = vmatpush.msra.mxu3 %v4366_v51  ;;  %v12596_v49 = vld [vmem:[#allocation25_spill] sm:$0xff]  ;;  %v12598_v51 = vld [vmem:[#allocation35_spill] sm:$0xff] }
  0xef   :  { %662 = vmatpush.msra.mxu0 %v4373_v52  ;;  %704 = vmatpush.msra.mxu2 %v4385_v54  ;;  %v12599_v52 = vld [vmem:[#allocation36_spill] sm:$0xff]  ;;  %v12601_v54 = vld [vmem:[#allocation30_spill] sm:$0xff] }
  0xf0   :  { %682 = vmatpush.msra.mxu1 %v4378_v53  ;;  %724 = vmatpush.msra.mxu3 %v4390_v55  ;;  %v12600_v53 = vld [vmem:[#allocation29_spill] sm:$0xff]  ;;  %v12602_v55 = vld [vmem:[#allocation39_spill] sm:$0xff] }
  0xf1   :  { %663 = vmatpush.msra.mxu0 %v4397_v56  ;;  %705 = vmatpush.msra.mxu2 %v4409_v58  ;;  %v12603_v56 = vld [vmem:[#allocation40_spill] sm:$0xff]  ;;  %v12605_v58 = vld [vmem:[#allocation34_spill] sm:$0xff] }
  0xf2   :  { %683 = vmatpush.msra.mxu1 %v4402_v57  ;;  %725 = vmatpush.msra.mxu3 %v4414_v59  ;;  %v12604_v57 = vld [vmem:[#allocation33_spill] sm:$0xff]  ;;  %v12606_v59 = vld [vmem:[#allocation43_spill] sm:$0xff] }
  0xf3   :  { %664 = vmatpush.msra.mxu0 %v4433_v62  ;;  %770 = vmatpush.msrb.mxu2 %v4421_v60  ;;  %v12607_v60 = vld [vmem:[#allocation44_spill] sm:$0xff]  ;;  %v12609_v62 = vld [vmem:[#allocation38_spill] sm:$0xff] }
  0xf4   :  { %684 = vmatpush.msra.mxu1 %v4438_v63  ;;  %790 = vmatpush.msrb.mxu3 %v4426_v61  ;;  %v12608_v61 = vld [vmem:[#allocation37_spill] sm:$0xff] }
  0xf5   :  { %665 = vmatpush.msra.mxu0 %v4457_v2  ;;  %771 = vmatpush.msrb.mxu2 %v4445_v0  ;;  %v12610_v63 = vld [vmem:[#allocation49_spill] sm:$0xff]  ;;  %v12611_v0 = vld [vmem:[#allocation50_spill] sm:$0xff] }
  0xf6   :  { %685 = vmatpush.msra.mxu1 %v4462_v3  ;;  %791 = vmatpush.msrb.mxu3 %v4450_v1  ;;  %v12612_v1 = vld [vmem:[#allocation41_spill] sm:$0xff]  ;;  %v12613_v2 = vld [vmem:[#allocation42_spill] sm:$0xff] }
  0xf7   :  { %730 = vmatpush.msrb.mxu0 %v4481_v6  ;;  %772 = vmatpush.msrb.mxu2 %v4469_v4  ;;  %v12614_v3 = vld [vmem:[#allocation53_spill] sm:$0xff]  ;;  %v12615_v4 = vld [vmem:[#allocation54_spill] sm:$0xff] }
  0xf8   :  { %750 = vmatpush.msrb.mxu1 %v4486_v7  ;;  %792 = vmatpush.msrb.mxu3 %v4474_v5  ;;  %v12616_v5 = vld [vmem:[#allocation45_spill] sm:$0xff]  ;;  %v12617_v6 = vld [vmem:[#allocation46_spill] sm:$0xff] }
  0xf9   :  { %731 = vmatpush.msrb.mxu0 %v4505_v10  ;;  %773 = vmatpush.msrb.mxu2 %v4493_v8  ;;  %v12618_v7 = vld [vmem:[#allocation57_spill] sm:$0xff]  ;;  %v12619_v8 = vld [vmem:[#allocation58_spill] sm:$0xff]  ;;  %v327_v10 = vpop.f32.mrf.mxu2 }
  0xfa   :  { %751 = vmatpush.msrb.mxu1 %v4510_v11  ;;  %793 = vmatpush.msrb.mxu3 %v12569_v22  ;;  %v347_v11 = vpop.f32.mrf.mxu3 }
  0xfb   :  { %732 = vmatpush.msrb.mxu0 %v4529_v14  ;;  %774 = vmatpush.msrb.mxu2 %v12572_v25  ;;  %v287_v14 = vpop.f32.mrf.mxu0 }
  0xfc   :  { %752 = vmatpush.msrb.mxu1 %v4534_v15  ;;  %794 = vmatpush.msrb.mxu3 %v12573_v26  ;;  %v307_v15 = vpop.f32.mrf.mxu1 }
  0xfd   :  { %733 = vmatpush.msrb.mxu0 %v12570_v23  ;;  %775 = vmatpush.msrb.mxu2 %v12576_v29 }
  0xfe   :  { %753 = vmatpush.msrb.mxu1 %v12571_v24  ;;  %795 = vmatpush.msrb.mxu3 %v12577_v30 }
  0xff   :  { %734 = vmatpush.msrb.mxu0 %v12574_v27  ;;  %776 = vmatpush.msrb.mxu2 %v12580_v33 }
 0x100   :  { %754 = vmatpush.msrb.mxu1 %v12575_v28  ;;  %796 = vmatpush.msrb.mxu3 %v12581_v34 }
 0x101   :  { %735 = vmatpush.msrb.mxu0 %v12578_v31  ;;  %777 = vmatpush.msrb.mxu2 %v12584_v37  ;;  %v407_v22 = vpop.f32.mrf.mxu2 }
 0x102   :  { %755 = vmatpush.msrb.mxu1 %v12579_v32  ;;  %797 = vmatpush.msrb.mxu3 %v12585_v38  ;;  %v427_v23 = vpop.f32.mrf.mxu3  ;;  %v348_v32 = vadd.f32 %v347_v11, %v327_v10 }
 0x103   :  { %736 = vmatpush.msrb.mxu0 %v12582_v35  ;;  %778 = vmatpush.msrb.mxu2 %v12588_v41  ;;  %v367_v24 = vpop.f32.mrf.mxu0  ;;  %v428_v31 = vadd.f32 %v427_v23, %v407_v22  ;;  %v12622_v22 = vld [vmem:[#allocation47_spill] sm:$0xff]  ;;  %v12623_v23 = vld [vmem:[#allocation48_spill] sm:$0xff] }
 0x104   :  { %756 = vmatpush.msrb.mxu1 %v12583_v36  ;;  %798 = vmatpush.msrb.mxu3 %v12589_v42  ;;  %v387_v25 = vpop.f32.mrf.mxu1  ;;  %v267_v42 = vld [vmem:[%s11618_s0] ss:$8 sm:$0xf] }
 0x105   :  { %737 = vmatpush.msrb.mxu0 %v12586_v39  ;;  %779 = vmatpush.msrb.mxu2 %v12592_v45  ;;  %v388_v30 = vadd.f32 %v387_v25, %v367_v24  ;;  %v600_v36 = vrot.slane %v428_v31, 5  ;;  %v308_v39 = vadd.f32 %v307_v15, %v287_v14  ;;  %v12620_v14 = vld [vmem:[#allocation59_spill] sm:$0xff]  ;;  %v12621_v15 = vld [vmem:[#allocation60_spill] sm:$0xff] }
 0x106   :  { %757 = vmatpush.msrb.mxu1 %v12587_v40  ;;  %799 = vmatpush.msrb.mxu3 %v12593_v46  ;;  %v12624_v24 = vld [vmem:[#allocation63_spill] sm:$0xff]  ;;  %v12625_v25 = vld [vmem:[#allocation64_spill] sm:$0xff] }
 0x107   :  { %738 = vmatpush.msrb.mxu0 %v12590_v43  ;;  %780 = vmatpush.msrb.mxu2 %v12596_v49  ;;  %v599_v35 = vrot.slane %v388_v30, 6  ;;  %v12630_v30 = vld [vmem:[#allocation55_spill] sm:$0xff]  ;;  %v12631_v31 = vld [vmem:[#allocation56_spill] sm:$0xff] }
 0x108   :  { %758 = vmatpush.msrb.mxu1 %v12591_v44  ;;  %800 = vmatpush.msrb.mxu3 %v12597_v50  ;;  %v598_v44 = vrot.slane %v348_v32, 7  ;;  %v12632_v32 = vld [vmem:[#allocation71_spill] sm:$0xff] }
 0x109   :  { %739 = vmatpush.msrb.mxu0 %v12594_v47  ;;  %781 = vmatpush.msrb.mxu2 %v12600_v53  ;;  %v487_v26 = vpop.f32.mrf.mxu2  ;;  %v268_v47 = vld [vmem:[%s11618_s0] ss:$8 sm:$0xf0]  ;;  %v608_v50 = vsel %vm607_vm0, %v599_v35, %v600_v36 }
 0x10a   :  { %759 = vmatpush.msrb.mxu1 %v12595_v48  ;;  %801 = vmatpush.msrb.mxu3 %v12601_v54  ;;  %v507_v27 = vpop.f32.mrf.mxu3  ;;  %v606_v53 = vsel %vm605_vm1, %v308_v39, %v598_v44  ;;  %v12635_v35 = vld [vmem:[#allocation62_spill] sm:$0xff]  ;;  %v12636_v36 = vld [vmem:[#allocation75_spill] sm:$0xff] }
 0x10b   :  { %740 = vmatpush.msrb.mxu0 %v12598_v51  ;;  %782 = vmatpush.msrb.mxu2 %v12604_v57  ;;  %v508_v34 = vadd.f32 %v507_v27, %v487_v26  ;;  %v12626_v26 = vld [vmem:[#allocation51_spill] sm:$0xff]  ;;  %v12627_v27 = vld [vmem:[#allocation52_spill] sm:$0xff]  ;;  %v12639_v39 = vld [vmem:[#allocation66_spill] sm:$0xff] }
 0x10c   :  { %760 = vmatpush.msrb.mxu1 %v12599_v52  ;;  %802 = vmatpush.msrb.mxu3 %v12605_v58  ;;  %v269_v52 = vor.u32 %v268_v47, %v267_v42  ;;  %v12642_v42 = vld [vmem:[#allocation69_spill] sm:$0xff]  ;;  %v12644_v44 = vld [vmem:[#allocation83_spill] sm:$0xff]  ;;  %v12647_v47 = vld [vmem:[#allocation74_spill] sm:$0xff] }
 0x10d   :  { %741 = vmatpush.msrb.mxu0 %v12602_v55  ;;  %783 = vmatpush.msrb.mxu2 %v12608_v61  ;;  %v602_v46 = vrot.slane %v508_v34, 3  ;;  %v12634_v34 = vld [vmem:[#allocation61_spill] sm:$0xff] }
 0x10e   :  { %761 = vmatpush.msrb.mxu1 %v12603_v56  ;;  %803 = vmatpush.msrb.mxu3 %v12609_v62  ;;  %v447_v28 = vpop.f32.mrf.mxu0  ;;  %v610_v56 = vsel %vm609_vm4, %v606_v53, %v608_v50  ;;  %v12650_v50 = vld [vmem:[#allocation77_spill] sm:$0xff]  ;;  %v12653_v53 = vld [vmem:[#allocation92_spill] sm:$0xff] }
 0x10f   :  { %742 = vmatpush.msrb.mxu0 %v12606_v59  ;;  %784 = vmatpush.msrb.mxu2 %v12612_v1  ;;  %v467_v29 = vpop.f32.mrf.mxu1 }
 0x110   :  { %762 = vmatpush.msrb.mxu1 %v12607_v60  ;;  %804 = vmatpush.msrb.mxu3 %v12613_v2  ;;  %v468_v33 = vadd.f32 %v467_v29, %v447_v28  ;;  %v12628_v28 = vld [vmem:[#allocation67_spill] sm:$0xff]  ;;  %v12629_v29 = vld [vmem:[#allocation68_spill] sm:$0xff] }
 0x111   :  { %743 = vmatpush.msrb.mxu0 %v12610_v63  ;;  %785 = vmatpush.msrb.mxu2 %v12616_v5 }
 0x112   :  { %763 = vmatpush.msrb.mxu1 %v12611_v0  ;;  %805 = vmatpush.msrb.mxu3 %v12617_v6  ;;  %v601_v45 = vrot.slane %v468_v33, 4  ;;  %v12633_v33 = vld [vmem:[#allocation72_spill] sm:$0xff] }
 0x113   :  { %744 = vmatpush.msrb.mxu0 %v12614_v3 }
 0x114   :  { %764 = vmatpush.msrb.mxu1 %v12615_v4  ;;  %v612_v54 = vsel %vm611_vm2, %v601_v45, %v602_v46  ;;  %v12645_v45 = vld [vmem:[#allocation84_spill] sm:$0xff]  ;;  %v12646_v46 = vld [vmem:[#allocation73_spill] sm:$0xff] }
 0x115   :  { %745 = vmatpush.msrb.mxu0 %v12618_v7 }
 0x116   :  { %765 = vmatpush.msrb.mxu1 %v12619_v8 }
 0x148   :  { %v587_v43 = vpop.f32.mrf.mxu3 }
 0x149   :  { %v547_v38 = vpop.f32.mrf.mxu1  ;;  %v567_v41 = vpop.f32.mrf.mxu2 }
 0x14a   :  { %v527_v37 = vpop.f32.mrf.mxu0  ;;  %v588_v48 = vadd.f32 %v587_v43, %v567_v41  ;;  %v12641_v41 = vld [vmem:[#allocation80_spill] sm:$0xff]  ;;  %v12643_v43 = vld [vmem:[#allocation70_spill] sm:$0xff] }
 0x14b   :  { %v548_v40 = vadd.f32 %v547_v38, %v527_v37  ;;  %v12637_v37 = vld [vmem:[#allocation76_spill] sm:$0xff]  ;;  %v12638_v38 = vld [vmem:[#allocation65_spill] sm:$0xff] }
 0x14c   :  { %v604_v51 = vrot.slane %v588_v48, 1  ;;  %v12648_v48 = vld [vmem:[#allocation87_spill] sm:$0xff] }
 0x14d   :  { %v603_v49 = vrot.slane %v548_v40, 2  ;;  %v12640_v40 = vld [vmem:[#allocation79_spill] sm:$0xff] }
 0x14f   :  { %v614_v55 = vsel %vm613_vm3, %v603_v49, %v604_v51  ;;  %v12649_v49 = vld [vmem:[#allocation88_spill] sm:$0xff]  ;;  %v12651_v51 = vld [vmem:[#allocation78_spill] sm:$0xff] }
 0x150   :  { %v616_v57 = vsel %vm615_vm5, %v612_v54, %v614_v55  ;;  %v12654_v54 = vld [vmem:[#allocation81_spill] sm:$0xff]  ;;  %v12655_v55 = vld [vmem:[#allocation82_spill] sm:$0xff] }
 0x151   :  { %v618_v58 = vsel %vm617_vm6, %v610_v56, %v616_v57  ;;  %v12656_v56 = vld [vmem:[#allocation95_spill] sm:$0xff]  ;;  %v12657_v57 = vld [vmem:[#allocation96_spill] sm:$0xff] }
 0x152   :  { %v620_v59 = vadd.f32 %v618_v58, %v269_v52  ;;  %v12652_v52 = vld [vmem:[#allocation91_spill] sm:$0xff]  ;;  %v12658_v58 = vld [vmem:[#allocation85_spill] sm:$0xff] }
 0x154   :  { %v621_v60 = vmul.f32 0.5, %v620_v59  ;;  %v626_v61 = vrot.slane %v620_v59, 6  ;;  %v12659_v59 = vld [vmem:[#allocation86_spill] sm:$0xff] }
 0x156   :  { %3274 = vtanh.f32 %v621_v60  ;;  %v12660_v60 = vld [vmem:[#allocation99_spill] sm:$0xff] }
 0x157   :  { %3276 = vtanh.f32 %v626_v61  ;;  %v12661_v61 = vld [vmem:[#allocation100_spill] sm:$0xff] }
 0x15c   :  { %v3275_v62 = vpop.eup %3274 }
 0x15d   :  { %v623_v63 = vmul.f32 0.5, %v3275_v62  ;;  %v3277_v2 = vpop.eup %3276  ;;  %v12662_v62 = vld [vmem:[#allocation89_spill] sm:$0xff] }
 0x15f   :  { %v624_v0 = vadd.f32 0.5, %v623_v63  ;;  %v12663_v63 = vld [vmem:[#allocation90_spill] sm:$0xff] }
 0x161   :  { %v630_v1 = vrot.slane %v624_v0, 2  ;;  %v633_v4 = vmul.f32 %v3277_v2, %v624_v0  ;;  %v636_v6 = vrot.slane %v624_v0, 4  ;;  %v12664_v0 = vld [vmem:[#allocation103_spill] sm:$0xff]  ;;  %v12666_v2 = vld [vmem:[#allocation93_spill] sm:$0xff] }
 0x163   :  { %v632_v3 = vmul.f32 0.0, %v630_v1  ;;  %v12665_v1 = vld [vmem:[#allocation104_spill] sm:$0xff] }
 0x165   :  { %v5865_v5 = vadd.f32 %v633_v4, %v632_v3  ;;  %v12667_v3 = vld [vmem:[#allocation94_spill] sm:$0xff]  ;;  %v12668_v4 = vld [vmem:[#allocation107_spill] sm:$0xff] }
 0x167   :  { %3278 = vtanh.f32 %v5865_v5 }
 0x16d   :  { %v3279_v7 = vpop.eup %3278 }
 0x16e   :  { %v638_v8 = vmul.f32 %v3279_v7, %v636_v6  ;;  %v12669_v6 = vld [vmem:[#allocation108_spill] sm:$0xff]  ;;  %v12670_v7 = vld [vmem:[#allocation97_spill] sm:$0xff] }
 0x170   :  { %639 = vst [vmem:[%s11619_s2] sm:$0x1] %v638_v8  ;;  %v5871_v10 = vperm.slane %v638_v8, 1  ;;  %v5873_v11 = vperm.slane %v638_v8, 0  ;;  %v12671_v8 = vld [vmem:[#allocation98_spill] sm:$0xff] }
 0x172   :  { %643 = vst [vmem:[%s11619_s2 + $0xf] sm:$0x1] %v5871_v10  ;;  %666 = vmatmul.f32.vlgmr.msra.gmra.mxu0 %v5873_v11  ;;  %686 = vmatmul.f32.vlgmr.msra.gmra.mxu1 %v5871_v10 }
 0x173   :  { %706 = vmatmul.f32.vlgmr.msra.gmra.mxu2 %v5873_v11  ;;  %726 = vmatmul.f32.vlgmr.msra.gmra.mxu3 %v5871_v10 }
 0x174   :  { %810 = vmatpush.msra.mxu0 %v12620_v14  ;;  %830 = vmatpush.msra.mxu1 %v12621_v15  ;;  %v12672_v14 = vld [vmem:[#allocation113_spill] sm:$0xff]  ;;  %v12673_v15 = vld [vmem:[#allocation114_spill] sm:$0xff] }
 0x175   :  { %850 = vmatpush.msra.mxu2 %v12622_v22  ;;  %870 = vmatpush.msra.mxu3 %v12623_v23  ;;  %v12674_v22 = vld [vmem:[#allocation101_spill] sm:$0xff]  ;;  %v12675_v23 = vld [vmem:[#allocation102_spill] sm:$0xff] }
 0x176   :  { %811 = vmatpush.msra.mxu0 %v12624_v24  ;;  %831 = vmatpush.msra.mxu1 %v12625_v25  ;;  %v12676_v24 = vld [vmem:[#allocation117_spill] sm:$0xff]  ;;  %v12677_v25 = vld [vmem:[#allocation118_spill] sm:$0xff] }
 0x177   :  { %851 = vmatpush.msra.mxu2 %v12626_v26  ;;  %871 = vmatpush.msra.mxu3 %v12627_v27  ;;  %v12678_v26 = vld [vmem:[#allocation105_spill] sm:$0xff]  ;;  %v12679_v27 = vld [vmem:[#allocation106_spill] sm:$0xff] }
 0x178   :  { %812 = vmatpush.msra.mxu0 %v12628_v28  ;;  %832 = vmatpush.msra.mxu1 %v12629_v29  ;;  %v12680_v28 = vld [vmem:[#allocation121_spill] sm:$0xff]  ;;  %v12681_v29 = vld [vmem:[#allocation122_spill] sm:$0xff] }
 0x179   :  { %852 = vmatpush.msra.mxu2 %v12630_v30  ;;  %872 = vmatpush.msra.mxu3 %v12631_v31  ;;  %v12682_v30 = vld [vmem:[#allocation109_spill] sm:$0xff]  ;;  %v12683_v31 = vld [vmem:[#allocation110_spill] sm:$0xff] }
 0x17a   :  { %813 = vmatpush.msra.mxu0 %v12632_v32  ;;  %833 = vmatpush.msra.mxu1 %v12633_v33  ;;  %v12684_v32 = vld [vmem:[#allocation123_spill] sm:$0xff]  ;;  %v12685_v33 = vld [vmem:[#allocation124_spill] sm:$0xff] }
 0x17b   :  { %853 = vmatpush.msra.mxu2 %v12634_v34  ;;  %873 = vmatpush.msra.mxu3 %v12635_v35  ;;  %v12686_v34 = vld [vmem:[#allocation111_spill] sm:$0xff]  ;;  %v12687_v35 = vld [vmem:[#allocation112_spill] sm:$0xff] }
 0x17c   :  { %746 = vmatmul.f32.vlgmr.msrb.gmra.mxu0 %v5873_v11  ;;  %766 = vmatmul.f32.vlgmr.msrb.gmra.mxu1 %v5871_v10 }
 0x17d   :  { %786 = vmatmul.f32.vlgmr.msrb.gmra.mxu2 %v5873_v11  ;;  %806 = vmatmul.f32.vlgmr.msrb.gmra.mxu3 %v5871_v10 }
 0x17e   :  { %814 = vmatpush.msra.mxu0 %v12636_v36  ;;  %834 = vmatpush.msra.mxu1 %v12637_v37  ;;  %v12688_v36 = vld [vmem:[#allocation127_spill] sm:$0xff]  ;;  %v12689_v37 = vld [vmem:[#allocation128_spill] sm:$0xff] }
 0x17f   :  { %854 = vmatpush.msra.mxu2 %v12638_v38  ;;  %874 = vmatpush.msra.mxu3 %v12639_v39  ;;  %v12690_v38 = vld [vmem:[#allocation115_spill] sm:$0xff]  ;;  %v12691_v39 = vld [vmem:[#allocation116_spill] sm:$0xff] }
 0x180   :  { %815 = vmatpush.msra.mxu0 %v12640_v40  ;;  %835 = vmatpush.msra.mxu1 %v12641_v41  ;;  %v12692_v40 = vld [vmem:[#allocation131_spill] sm:$0xff]  ;;  %v12693_v41 = vld [vmem:[#allocation132_spill] sm:$0xff] }
 0x181   :  { %855 = vmatpush.msra.mxu2 %v12642_v42  ;;  %875 = vmatpush.msra.mxu3 %v12643_v43  ;;  %v12694_v42 = vld [vmem:[#allocation119_spill] sm:$0xff]  ;;  %v12695_v43 = vld [vmem:[#allocation120_spill] sm:$0xff] }
 0x182   :  { %816 = vmatpush.msra.mxu0 %v12644_v44  ;;  %836 = vmatpush.msra.mxu1 %v12645_v45  ;;  %v12696_v44 = vld [vmem:[#allocation135_spill] sm:$0xff]  ;;  %v12697_v45 = vld [vmem:[#allocation136_spill] sm:$0xff] }
 0x183   :  { %856 = vmatpush.msra.mxu2 %v12646_v46  ;;  %876 = vmatpush.msra.mxu3 %v12647_v47  ;;  %v12698_v46 = vld [vmem:[#allocation125_spill] sm:$0xff]  ;;  %v12699_v47 = vld [vmem:[#allocation126_spill] sm:$0xff] }
 0x184   :  { %817 = vmatpush.msra.mxu0 %v12648_v48  ;;  %837 = vmatpush.msra.mxu1 %v12649_v49  ;;  %v12700_v48 = vld [vmem:[#allocation139_spill] sm:$0xff]  ;;  %v12701_v49 = vld [vmem:[#allocation140_spill] sm:$0xff] }
 0x185   :  { %857 = vmatpush.msra.mxu2 %v12650_v50  ;;  %877 = vmatpush.msra.mxu3 %v12651_v51  ;;  %v12702_v50 = vld [vmem:[#allocation129_spill] sm:$0xff]  ;;  %v12703_v51 = vld [vmem:[#allocation130_spill] sm:$0xff] }
 0x186   :  { %818 = vmatpush.msra.mxu0 %v12652_v52  ;;  %838 = vmatpush.msra.mxu1 %v12653_v53  ;;  %v12704_v52 = vld [vmem:[#allocation143_spill] sm:$0xff]  ;;  %v12705_v53 = vld [vmem:[#allocation144_spill] sm:$0xff] }
 0x187   :  { %858 = vmatpush.msra.mxu2 %v12654_v54  ;;  %878 = vmatpush.msra.mxu3 %v12655_v55  ;;  %v12706_v54 = vld [vmem:[#allocation133_spill] sm:$0xff]  ;;  %v12707_v55 = vld [vmem:[#allocation134_spill] sm:$0xff] }
 0x188   :  { %819 = vmatpush.msra.mxu0 %v12656_v56  ;;  %839 = vmatpush.msra.mxu1 %v12657_v57  ;;  %v12708_v56 = vld [vmem:[#allocation147_spill] sm:$0xff]  ;;  %v12709_v57 = vld [vmem:[#allocation148_spill] sm:$0xff] }
 0x189   :  { %859 = vmatpush.msra.mxu2 %v12658_v58  ;;  %879 = vmatpush.msra.mxu3 %v12659_v59  ;;  %v12710_v58 = vld [vmem:[#allocation137_spill] sm:$0xff]  ;;  %v12711_v59 = vld [vmem:[#allocation138_spill] sm:$0xff] }
 0x18a   :  { %820 = vmatpush.msra.mxu0 %v12660_v60  ;;  %840 = vmatpush.msra.mxu1 %v12661_v61  ;;  %v12712_v60 = vld [vmem:[#allocation151_spill] sm:$0xff]  ;;  %v12713_v61 = vld [vmem:[#allocation152_spill] sm:$0xff] }
 0x18b   :  { %860 = vmatpush.msra.mxu2 %v12662_v62  ;;  %880 = vmatpush.msra.mxu3 %v12663_v63  ;;  %v12714_v62 = vld [vmem:[#allocation141_spill] sm:$0xff]  ;;  %v12715_v63 = vld [vmem:[#allocation142_spill] sm:$0xff] }
 0x18c   :  { %821 = vmatpush.msra.mxu0 %v12664_v0  ;;  %841 = vmatpush.msra.mxu1 %v12665_v1  ;;  %v12716_v0 = vld [vmem:[#allocation155_spill] sm:$0xff]  ;;  %v12717_v1 = vld [vmem:[#allocation156_spill] sm:$0xff] }
 0x18d   :  { %861 = vmatpush.msra.mxu2 %v12666_v2  ;;  %881 = vmatpush.msra.mxu3 %v12667_v3  ;;  %v12718_v2 = vld [vmem:[#allocation145_spill] sm:$0xff]  ;;  %v12719_v3 = vld [vmem:[#allocation146_spill] sm:$0xff] }
 0x18e   :  { %822 = vmatpush.msra.mxu0 %v12668_v4  ;;  %842 = vmatpush.msra.mxu1 %v12669_v6  ;;  %v12720_v4 = vld [vmem:[#allocation159_spill] sm:$0xff]  ;;  %v12721_v6 = vld [vmem:[#allocation160_spill] sm:$0xff] }
 0x18f   :  { %862 = vmatpush.msra.mxu2 %v12670_v7  ;;  %882 = vmatpush.msra.mxu3 %v12671_v8  ;;  %v12722_v7 = vld [vmem:[#allocation149_spill] sm:$0xff]  ;;  %v12723_v8 = vld [vmem:[#allocation150_spill] sm:$0xff] }
 0x190   :  { %823 = vmatpush.msra.mxu0 %v12672_v14  ;;  %843 = vmatpush.msra.mxu1 %v12673_v15  ;;  %v12724_v14 = vld [vmem:[#allocation163_spill] sm:$0xff]  ;;  %v12725_v15 = vld [vmem:[#allocation164_spill] sm:$0xff] }
 0x191   :  { %863 = vmatpush.msra.mxu2 %v12674_v22  ;;  %883 = vmatpush.msra.mxu3 %v12675_v23  ;;  %v12726_v22 = vld [vmem:[#allocation153_spill] sm:$0xff]  ;;  %v12727_v23 = vld [vmem:[#allocation154_spill] sm:$0xff] }
 0x192   :  { %824 = vmatpush.msra.mxu0 %v12676_v24  ;;  %844 = vmatpush.msra.mxu1 %v12677_v25  ;;  %v12728_v24 = vld [vmem:[#allocation167_spill] sm:$0xff]  ;;  %v12729_v25 = vld [vmem:[#allocation157_spill] sm:$0xff] }
 0x193   :  { %864 = vmatpush.msra.mxu2 %v12678_v26  ;;  %884 = vmatpush.msra.mxu3 %v12679_v27  ;;  %v12730_v26 = vld [vmem:[#allocation158_spill] sm:$0xff] }
 0x194   :  { %825 = vmatpush.msra.mxu0 %v12680_v28  ;;  %845 = vmatpush.msra.mxu1 %v12681_v29  ;;  %v12731_v27 = vld [vmem:[#allocation170_spill] sm:$0xff]  ;;  %v12732_v28 = vld [vmem:[#allocation171_spill] sm:$0xff]  ;;  %v12733_v29 = vld [vmem:[#allocation161_spill] sm:$0xff] }
 0x195   :  { %865 = vmatpush.msra.mxu2 %v12682_v30  ;;  %885 = vmatpush.msra.mxu3 %v12683_v31  ;;  %v12734_v30 = vld [vmem:[#allocation162_spill] sm:$0xff] }
 0x196   :  { %826 = vmatmul.f32.vlgmr.msra.gmra.mxu0 %v5873_v11  ;;  %846 = vmatmul.f32.vlgmr.msra.gmra.mxu1 %v5871_v10  ;;  %v12735_v31 = vld [vmem:[#allocation174_spill] sm:$0xff] }
 0x197   :  { %866 = vmatmul.f32.vlgmr.msra.gmra.mxu2 %v5873_v11  ;;  %886 = vmatmul.f32.vlgmr.msra.gmra.mxu3 %v5871_v10 }
 0x198   :  { %890 = vmatpush.msrb.mxu0 %v12684_v32  ;;  %910 = vmatpush.msrb.mxu1 %v12685_v33  ;;  %v12736_v32 = vld [vmem:[#allocation175_spill] sm:$0xff]  ;;  %v12737_v33 = vld [vmem:[#allocation165_spill] sm:$0xff] }
 0x199   :  { %930 = vmatpush.msrb.mxu2 %v12686_v34  ;;  %950 = vmatpush.msrb.mxu3 %v12687_v35  ;;  %v12739_v34 = vld [vmem:[#allocation168_spill] sm:$0xff]  ;;  %v12740_v35 = vld [vmem:[#allocation169_spill] sm:$0xff] }
 0x19a   :  { %891 = vmatpush.msrb.mxu0 %v12688_v36  ;;  %911 = vmatpush.msrb.mxu1 %v12689_v37  ;;  %v12741_v36 = vld [vmem:[#allocation172_spill] sm:$0xff]  ;;  %v12742_v37 = vld [vmem:[#allocation173_spill] sm:$0xff] }
 0x19b   :  { %931 = vmatpush.msrb.mxu2 %v12690_v38  ;;  %951 = vmatpush.msrb.mxu3 %v12691_v39  ;;  %v12745_v38 = vld [vmem:[#allocation176_spill] sm:$0xff]  ;;  %v12748_v39 = vld [vmem:[#allocation185_spill] sm:$0xff] }
 0x19c   :  { %892 = vmatpush.msrb.mxu0 %v12692_v40  ;;  %912 = vmatpush.msrb.mxu1 %v12693_v41  ;;  %v12749_v40 = vld [vmem:[#allocation178_spill] sm:$0xff]  ;;  %v12750_v41 = vld [vmem:[#allocation179_spill] sm:$0xff] }
 0x19d   :  { %932 = vmatpush.msrb.mxu2 %v12694_v42  ;;  %952 = vmatpush.msrb.mxu3 %v12695_v43  ;;  %v12751_v42 = vld [vmem:[#allocation188_spill] sm:$0xff]  ;;  %v12754_v43 = vld [vmem:[#allocation183_spill] sm:$0xff] }
 0x19e   :  { %893 = vmatpush.msrb.mxu0 %v12696_v44  ;;  %913 = vmatpush.msrb.mxu1 %v12697_v45  ;;  %v12755_v44 = vld [vmem:[#allocation192_spill] sm:$0xff]  ;;  %v12756_v45 = vld [vmem:[#allocation193_spill] sm:$0xff] }
 0x19f   :  { %933 = vmatpush.msrb.mxu2 %v12698_v46  ;;  %953 = vmatpush.msrb.mxu3 %v12699_v47  ;;  %v12757_v46 = vld [vmem:[#allocation186_spill] sm:$0xff]  ;;  %v12758_v47 = vld [vmem:[#allocation187_spill] sm:$0xff] }
 0x1a0   :  { %894 = vmatpush.msrb.mxu0 %v12700_v48  ;;  %914 = vmatpush.msrb.mxu1 %v12701_v49  ;;  %v12759_v48 = vld [vmem:[#allocation190_spill] sm:$0xff]  ;;  %v12760_v49 = vld [vmem:[#allocation191_spill] sm:$0xff] }
 0x1a1   :  { %934 = vmatpush.msrb.mxu2 %v12702_v50  ;;  %954 = vmatpush.msrb.mxu3 %v12703_v51  ;;  %v6046_v50 = vld [vmem:[%s11617_s1 + $0x280] sm:$0xff] }
 0x1a2   :  { %895 = vmatpush.msrb.mxu0 %v12704_v52  ;;  %915 = vmatpush.msrb.mxu1 %v12705_v53  ;;  %v6052_v51 = vld [vmem:[%s11617_s1 + $0x680] sm:$0xff] }
 0x1a3   :  { %935 = vmatpush.msrb.mxu2 %v12706_v54  ;;  %955 = vmatpush.msrb.mxu3 %v12707_v55  ;;  %v6084_v52 = vld [vmem:[%s11617_s1 + $0x200] sm:$0xff]  ;;  %v6096_v54 = vld [vmem:[%s11617_s1 + $0x208] sm:$0xff] }
 0x1a4   :  { %896 = vmatpush.msrb.mxu0 %v12708_v56  ;;  %916 = vmatpush.msrb.mxu1 %v12709_v57  ;;  %v6090_v53 = vld [vmem:[%s11617_s1 + $0x600] sm:$0xff]  ;;  %v6102_v55 = vld [vmem:[%s11617_s1 + $0x608] sm:$0xff] }
 0x1a5   :  { %936 = vmatpush.msrb.mxu2 %v12710_v58  ;;  %956 = vmatpush.msrb.mxu3 %v12711_v59  ;;  %v6108_v56 = vld [vmem:[%s11617_s1 + $0x1c0] sm:$0xff]  ;;  %v6120_v58 = vld [vmem:[%s11617_s1 + $0x1c8] sm:$0xff] }
 0x1a6   :  { %897 = vmatpush.msrb.mxu0 %v12712_v60  ;;  %917 = vmatpush.msrb.mxu1 %v12713_v61  ;;  %v6114_v57 = vld [vmem:[%s11617_s1 + $0x5c0] sm:$0xff]  ;;  %v6126_v59 = vld [vmem:[%s11617_s1 + $0x5c8] sm:$0xff] }
 0x1a7   :  { %937 = vmatpush.msrb.mxu2 %v12714_v62  ;;  %957 = vmatpush.msrb.mxu3 %v12715_v63  ;;  %v6132_v60 = vld [vmem:[%s11617_s1 + $0x180] sm:$0xff]  ;;  %v6144_v62 = vld [vmem:[%s11617_s1 + $0x188] sm:$0xff] }
 0x1a8   :  { %898 = vmatpush.msrb.mxu0 %v12716_v0  ;;  %918 = vmatpush.msrb.mxu1 %v12717_v1  ;;  %v6138_v61 = vld [vmem:[%s11617_s1 + $0x580] sm:$0xff]  ;;  %v6150_v63 = vld [vmem:[%s11617_s1 + $0x588] sm:$0xff] }
 0x1a9   :  { %938 = vmatpush.msrb.mxu2 %v12718_v2  ;;  %958 = vmatpush.msrb.mxu3 %v12719_v3  ;;  %v6156_v0 = vld [vmem:[%s11617_s1 + $0x140] sm:$0xff]  ;;  %v6168_v2 = vld [vmem:[%s11617_s1 + $0x148] sm:$0xff] }
 0x1aa   :  { %899 = vmatpush.msrb.mxu0 %v12720_v4  ;;  %919 = vmatpush.msrb.mxu1 %v12721_v6  ;;  %v6162_v1 = vld [vmem:[%s11617_s1 + $0x540] sm:$0xff]  ;;  %v6174_v3 = vld [vmem:[%s11617_s1 + $0x548] sm:$0xff] }
 0x1ab   :  { %939 = vmatpush.msrb.mxu2 %v12722_v7  ;;  %959 = vmatpush.msrb.mxu3 %v12723_v8  ;;  %v6180_v4 = vld [vmem:[%s11617_s1 + $0x100] sm:$0xff]  ;;  %v6192_v7 = vld [vmem:[%s11617_s1 + $0x108] sm:$0xff] }
 0x1ac   :  { %900 = vmatpush.msrb.mxu0 %v12724_v14  ;;  %920 = vmatpush.msrb.mxu1 %v12725_v15  ;;  %v6186_v6 = vld [vmem:[%s11617_s1 + $0x500] sm:$0xff]  ;;  %v6198_v8 = vld [vmem:[%s11617_s1 + $0x508] sm:$0xff] }
 0x1ad   :  { %940 = vmatpush.msrb.mxu2 %v12726_v22  ;;  %960 = vmatpush.msrb.mxu3 %v12727_v23  ;;  %v6204_v14 = vld [vmem:[%s11617_s1 + $0xc0] sm:$0xff]  ;;  %v6216_v22 = vld [vmem:[%s11617_s1 + $0xc8] sm:$0xff] }
 0x1ae   :  { %901 = vmatpush.msrb.mxu0 %v5523_v16  ;;  %921 = vmatpush.msrb.mxu1 %v12728_v24  ;;  %v12738_v16 = vld [vmem:[#allocation166_spill] sm:$0xff]  ;;  %v6222_v23 = vld [vmem:[%s11617_s1 + $0x4c8] sm:$0xff] }
 0x1af   :  { %941 = vmatpush.msrb.mxu2 %v12729_v25  ;;  %961 = vmatpush.msrb.mxu3 %v12730_v26  ;;  %v6210_v15 = vld [vmem:[%s11617_s1 + $0x4c0] sm:$0xff]  ;;  %v6240_v26 = vld [vmem:[%s11617_s1 + $0x88] sm:$0xff] }
 0x1b0   :  { %902 = vmatpush.msrb.mxu0 %v12731_v27  ;;  %922 = vmatpush.msrb.mxu1 %v12732_v28  ;;  %v6228_v24 = vld [vmem:[%s11617_s1 + $0x80] sm:$0xff]  ;;  %v6246_v27 = vld [vmem:[%s11617_s1 + $0x488] sm:$0xff] }
 0x1b1   :  { %942 = vmatpush.msrb.mxu2 %v12733_v29  ;;  %962 = vmatpush.msrb.mxu3 %v12734_v30  ;;  %v6234_v25 = vld [vmem:[%s11617_s1 + $0x480] sm:$0xff]  ;;  %v6264_v30 = vld [vmem:[%s11617_s1 + $0x48] sm:$0xff] }
 0x1b2   :  { %903 = vmatpush.msrb.mxu0 %v12735_v31  ;;  %923 = vmatpush.msrb.mxu1 %v12736_v32  ;;  %v6252_v28 = vld [vmem:[%s11617_s1 + $0x40] sm:$0xff]  ;;  %12761 = vst [vmem:[#allocation2_spill] sm:$0xff] %v6264_v30  ;;  %v6270_v31 = vld [vmem:[%s11617_s1 + $0x448] sm:$0xff] }
 0x1b3   :  { %943 = vmatpush.msrb.mxu2 %v12737_v33  ;;  %963 = vmatpush.msrb.mxu3 %v12738_v16  ;;  %v6258_v29 = vld [vmem:[%s11617_s1 + $0x440] sm:$0xff]  ;;  %12762 = vst [vmem:[#allocation7_spill] sm:$0xff] %v6270_v31  ;;  %v6288_v16 = vld [vmem:[%s11617_s1 + $0x8] sm:$0xff] }
 0x1b4   :  { %904 = vmatpush.msrb.mxu0 %v5589_v20  ;;  %924 = vmatpush.msrb.mxu1 %v5594_v21  ;;  %v12743_v20 = vld [vmem:[#allocation180_spill] sm:$0xff]  ;;  %v12744_v21 = vld [vmem:[#allocation181_spill] sm:$0xff]  ;;  %v6276_v32 = vld [vmem:[%s11617_s1] sm:$0xff]  ;;  %12765 = vst [vmem:[#allocation4_spill] sm:$0xff] %v6288_v16 }
 0x1b5   :  { %944 = vmatpush.msrb.mxu2 %v12739_v34  ;;  %964 = vmatpush.msrb.mxu3 %v12740_v35  ;;  %12763 = vst [vmem:[#allocation8_spill] sm:$0xff] %v6276_v32  ;;  %v6282_v33 = vld [vmem:[%s11617_s1 + $0x400] sm:$0xff]  ;;  %v6294_v34 = vld [vmem:[%s11617_s1 + $0x408] sm:$0xff]  ;;  %v6300_v35 = vld [vmem:[%s11617_s1 + $0x3d0] sm:$0xff] }
 0x1b6   :  { %905 = vmatpush.msrb.mxu0 %v5601_v12  ;;  %925 = vmatpush.msrb.mxu1 %v5606_v13  ;;  %v12746_v12 = vld [vmem:[#allocation177_spill] sm:$0xff]  ;;  %v12747_v13 = vld [vmem:[#allocation184_spill] sm:$0xff]  ;;  %12764 = vst [vmem:[#allocation3_spill] sm:$0xff] %v6282_v33 }
 0x1b7   :  { %945 = vmatpush.msrb.mxu2 %v12741_v36  ;;  %965 = vmatpush.msrb.mxu3 %v12742_v37  ;;  %12766 = vst [vmem:[#allocation11_spill] sm:$0xff] %v6294_v34  ;;  %v6306_v36 = vld [vmem:[%s11617_s1 + $0x7d0] sm:$0xff]  ;;  %v6312_v37 = vld [vmem:[%s11617_s1 + $0x3d8] sm:$0xff] }
 0x1b8   :  { %906 = vmatmul.f32.vlgmr.msrb.gmra.mxu0 %v5873_v11  ;;  %926 = vmatmul.f32.vlgmr.msrb.gmra.mxu1 %v5871_v10  ;;  %12767 = vst [vmem:[#allocation12_spill] sm:$0xff] %v6300_v35 }
 0x1b9   :  { %946 = vmatmul.f32.vlgmr.msrb.gmra.mxu2 %v5873_v11  ;;  %966 = vmatmul.f32.vlgmr.msrb.gmra.mxu3 %v5871_v10  ;;  %v12752_v11 = vld [vmem:[#allocation189_spill] sm:$0xff]  ;;  %v12753_v10 = vld [vmem:[#allocation182_spill] sm:$0xff]  ;;  %12768 = vst [vmem:[#allocation5_spill] sm:$0xff] %v6306_v36 }
 0x1ba   :  { %1023 = vmatpush.msra.mxu0 %v12743_v20  ;;  %1043 = vmatpush.msra.mxu1 %v12744_v21  ;;  %12769 = vst [vmem:[#allocation6_spill] sm:$0xff] %v6312_v37  ;;  %v6318_v20 = vld [vmem:[%s11617_s1 + $0x7d8] sm:$0xff]  ;;  %v6324_v21 = vld [vmem:[%s11617_s1 + $0x390] sm:$0xff] }
 0x1bb   :  { %1063 = vmatpush.msra.mxu2 %v12745_v38  ;;  %1083 = vmatpush.msra.mxu3 %v12746_v12  ;;  %12770 = vst [vmem:[#allocation15_spill] sm:$0xff] %v6318_v20  ;;  %v6330_v38 = vld [vmem:[%s11617_s1 + $0x790] sm:$0xff]  ;;  %v6336_v12 = vld [vmem:[%s11617_s1 + $0x398] sm:$0xff] }
 0x1bc   :  { %1024 = vmatpush.msra.mxu0 %v12747_v13  ;;  %1044 = vmatpush.msra.mxu1 %v12748_v39  ;;  %12771 = vst [vmem:[#allocation16_spill] sm:$0xff] %v6324_v21  ;;  %v6342_v13 = vld [vmem:[%s11617_s1 + $0x798] sm:$0xff]  ;;  %v6348_v39 = vld [vmem:[%s11617_s1 + $0x350] sm:$0xff] }
 0x1bd   :  { %1064 = vmatpush.msra.mxu2 %v12749_v40  ;;  %1084 = vmatpush.msra.mxu3 %v12750_v41  ;;  %12772 = vst [vmem:[#allocation9_spill] sm:$0xff] %v6330_v38  ;;  %v6354_v40 = vld [vmem:[%s11617_s1 + $0x750] sm:$0xff]  ;;  %v6360_v41 = vld [vmem:[%s11617_s1 + $0x358] sm:$0xff] }
 0x1be   :  { %1025 = vmatpush.msra.mxu0 %v12751_v42  ;;  %1045 = vmatpush.msra.mxu1 %v12752_v11  ;;  %12773 = vst [vmem:[#allocation10_spill] sm:$0xff] %v6336_v12  ;;  %v6366_v42 = vld [vmem:[%s11617_s1 + $0x758] sm:$0xff]  ;;  %v6372_v11 = vld [vmem:[%s11617_s1 + $0x310] sm:$0xff] }
 0x1bf   :  { %1065 = vmatpush.msra.mxu2 %v12753_v10  ;;  %1085 = vmatpush.msra.mxu3 %v12754_v43  ;;  %12774 = vst [vmem:[#allocation19_spill] sm:$0xff] %v6342_v13  ;;  %v6378_v10 = vld [vmem:[%s11617_s1 + $0x710] sm:$0xff]  ;;  %v6384_v43 = vld [vmem:[%s11617_s1 + $0x318] sm:$0xff] }
 0x1c0   :  { %1026 = vmatpush.msra.mxu0 %v12755_v44  ;;  %1046 = vmatpush.msra.mxu1 %v12756_v45  ;;  %12775 = vst [vmem:[#allocation20_spill] sm:$0xff] %v6348_v39  ;;  %v6390_v44 = vld [vmem:[%s11617_s1 + $0x718] sm:$0xff]  ;;  %v6396_v45 = vld [vmem:[%s11617_s1 + $0x2d0] sm:$0xff] }
 0x1c1   :  { %1066 = vmatpush.msra.mxu2 %v12757_v46  ;;  %1086 = vmatpush.msra.mxu3 %v12758_v47  ;;  %12776 = vst [vmem:[#allocation13_spill] sm:$0xff] %v6354_v40  ;;  %v6402_v46 = vld [vmem:[%s11617_s1 + $0x6d0] sm:$0xff]  ;;  %v6408_v47 = vld [vmem:[%s11617_s1 + $0x2d8] sm:$0xff] }
 0x1c2   :  { %1027 = vmatpush.msra.mxu0 %v5737_v19  ;;  %1047 = vmatpush.msra.mxu1 %v5743_v9  ;;  %v6060_v9 = vld [vmem:[%s11617_s1 + $0x240] sm:$0xff]  ;;  %12777 = vst [vmem:[#allocation14_spill] sm:$0xff] %v6360_v41 }
 0x1c3   :  { %1067 = vmatpush.msra.mxu2 %v12759_v48  ;;  %1087 = vmatpush.msra.mxu3 %v12760_v49  ;;  %v6066_v19 = vld [vmem:[%s11617_s1 + $0x640] sm:$0xff]  ;;  %12778 = vst [vmem:[#allocation23_spill] sm:$0xff] %v6366_v42  ;;  %v6414_v48 = vld [vmem:[%s11617_s1 + $0x6d8] sm:$0xff]  ;;  %v6420_v49 = vld [vmem:[%s11617_s1 + $0x290] sm:$0xff] }
 0x1c4   :  { %1028 = vmatpush.msra.mxu0 %v6046_v50  ;;  %1048 = vmatpush.msra.mxu1 %v6052_v51  ;;  %12779 = vst [vmem:[#allocation24_spill] sm:$0xff] %v6372_v11 }
 0x1c5   :  { %1068 = vmatpush.msra.mxu2 %v5725_v17  ;;  %1088 = vmatpush.msra.mxu3 %v5731_v18  ;;  %v6072_v17 = vld [vmem:[%s11617_s1 + $0x248] sm:$0xff]  ;;  %12780 = vst [vmem:[#allocation17_spill] sm:$0xff] %v6378_v10 }
 0x1c6   :  { %1029 = vmatpush.msra.mxu0 %v6060_v9  ;;  %1049 = vmatpush.msra.mxu1 %v6066_v19  ;;  %v6078_v18 = vld [vmem:[%s11617_s1 + $0x648] sm:$0xff]  ;;  %12781 = vst [vmem:[#allocation18_spill] sm:$0xff] %v6384_v43 }
 0x1c7   :  { %1069 = vmatpush.msra.mxu2 %v6072_v17  ;;  %1089 = vmatpush.msra.mxu3 %v6078_v18  ;;  %12782 = vst [vmem:[#allocation27_spill] sm:$0xff] %v6390_v44 }
 0x1c8   :  { %1030 = vmatpush.msra.mxu0 %v6084_v52  ;;  %1050 = vmatpush.msra.mxu1 %v6090_v53  ;;  %12783 = vst [vmem:[#allocation28_spill] sm:$0xff] %v6396_v45 }
 0x1c9   :  { %1070 = vmatpush.msra.mxu2 %v6096_v54  ;;  %1090 = vmatpush.msra.mxu3 %v6102_v55  ;;  %12784 = vst [vmem:[#allocation21_spill] sm:$0xff] %v6402_v46 }
 0x1ca   :  { %1031 = vmatpush.msra.mxu0 %v6108_v56  ;;  %1051 = vmatpush.msra.mxu1 %v6114_v57  ;;  %12785 = vst [vmem:[#allocation22_spill] sm:$0xff] %v6408_v47 }
 0x1cb   :  { %1071 = vmatpush.msra.mxu2 %v6120_v58  ;;  %1091 = vmatpush.msra.mxu3 %v6126_v59  ;;  %12786 = vst [vmem:[#allocation31_spill] sm:$0xff] %v6414_v48 }
 0x1cc   :  { %1032 = vmatpush.msra.mxu0 %v6132_v60  ;;  %1052 = vmatpush.msra.mxu1 %v6138_v61  ;;  %12787 = vst [vmem:[#allocation32_spill] sm:$0xff] %v6420_v49 }
 0x1cd   :  { %1072 = vmatpush.msra.mxu2 %v6144_v62  ;;  %1092 = vmatpush.msra.mxu3 %v6150_v63 }
 0x1ce   :  { %1033 = vmatpush.msra.mxu0 %v6156_v0  ;;  %1053 = vmatpush.msra.mxu1 %v6162_v1 }
 0x1cf   :  { %1073 = vmatpush.msra.mxu2 %v6168_v2  ;;  %1093 = vmatpush.msra.mxu3 %v6174_v3 }
 0x1d0   :  { %1034 = vmatpush.msra.mxu0 %v6180_v4  ;;  %1054 = vmatpush.msra.mxu1 %v6186_v6 }
 0x1d1   :  { %1074 = vmatpush.msra.mxu2 %v6192_v7  ;;  %1094 = vmatpush.msra.mxu3 %v6198_v8 }
 0x1d2   :  { %1035 = vmatpush.msra.mxu0 %v6204_v14  ;;  %1055 = vmatpush.msra.mxu1 %v6210_v15 }
 0x1d3   :  { %1075 = vmatpush.msra.mxu2 %v6216_v22  ;;  %1095 = vmatpush.msra.mxu3 %v6222_v23 }
 0x1d4   :  { %1036 = vmatpush.msra.mxu0 %v6228_v24  ;;  %1056 = vmatpush.msra.mxu1 %v6234_v25 }
 0x1d5   :  { %1076 = vmatpush.msra.mxu2 %v6240_v26  ;;  %1096 = vmatpush.msra.mxu3 %v6246_v27 }
 0x1d6   :  { %1037 = vmatpush.msra.mxu0 %v6252_v28  ;;  %1057 = vmatpush.msra.mxu1 %v6258_v29 }
 0x1d7   :  { %1077 = vmatpush.msra.mxu2 %v6264_v30  ;;  %1097 = vmatpush.msra.mxu3 %v6270_v31 }
 0x1d8   :  { %1038 = vmatpush.msra.mxu0 %v6276_v32  ;;  %1058 = vmatpush.msra.mxu1 %v6282_v33 }
 0x1d9   :  { %1078 = vmatpush.msra.mxu2 %v6288_v16  ;;  %1098 = vmatpush.msra.mxu3 %v6294_v34  ;;  %v3259_v16 = vld [vmem:[%s11618_s0 + $0x1] ss:$8 sm:$0xf] }
 0x1da   :  { %1103 = vmatpush.msrb.mxu0 %v6300_v35  ;;  %1123 = vmatpush.msrb.mxu1 %v6306_v36 }
 0x1db   :  { %1143 = vmatpush.msrb.mxu2 %v6312_v37  ;;  %1163 = vmatpush.msrb.mxu3 %v6318_v20 }
 0x1dc   :  { %1104 = vmatpush.msrb.mxu0 %v6324_v21  ;;  %1124 = vmatpush.msrb.mxu1 %v6330_v38 }
 0x1dd   :  { %1144 = vmatpush.msrb.mxu2 %v6336_v12  ;;  %1164 = vmatpush.msrb.mxu3 %v6342_v13 }
 0x1de   :  { %1105 = vmatpush.msrb.mxu0 %v6348_v39  ;;  %1125 = vmatpush.msrb.mxu1 %v6354_v40 }
 0x1df   :  { %1145 = vmatpush.msrb.mxu2 %v6360_v41  ;;  %1165 = vmatpush.msrb.mxu3 %v6366_v42 }
 0x1e0   :  { %1106 = vmatpush.msrb.mxu0 %v6372_v11  ;;  %1126 = vmatpush.msrb.mxu1 %v6378_v10 }
 0x1e1   :  { %1146 = vmatpush.msrb.mxu2 %v6384_v43  ;;  %1166 = vmatpush.msrb.mxu3 %v6390_v44 }
 0x1e2   :  { %1107 = vmatpush.msrb.mxu0 %v6396_v45  ;;  %1127 = vmatpush.msrb.mxu1 %v6402_v46  ;;  %v6426_v46 = vld [vmem:[%s11617_s1 + $0x690] sm:$0xff] }
 0x1e3   :  { %1147 = vmatpush.msrb.mxu2 %v6408_v47  ;;  %1167 = vmatpush.msrb.mxu3 %v6414_v48  ;;  %12788 = vst [vmem:[#allocation25_spill] sm:$0xff] %v6426_v46  ;;  %v6432_v47 = vld [vmem:[%s11617_s1 + $0x298] sm:$0xff] }
 0x1e4   :  { %1108 = vmatpush.msrb.mxu0 %v6420_v49  ;;  %1128 = vmatpush.msrb.mxu1 %v6426_v46  ;;  %12789 = vst [vmem:[#allocation26_spill] sm:$0xff] %v6432_v47  ;;  %v6438_v48 = vld [vmem:[%s11617_s1 + $0x698] sm:$0xff]  ;;  %v6444_v49 = vld [vmem:[%s11617_s1 + $0x250] sm:$0xff] }
 0x1e5   :  { %1148 = vmatpush.msrb.mxu2 %v6432_v47  ;;  %12790 = vst [vmem:[#allocation35_spill] sm:$0xff] %v6438_v48  ;;  %1168 = vmatpush.msrb.mxu3 %v6438_v48  ;;  %v6450_v46 = vld [vmem:[%s11617_s1 + $0x650] sm:$0xff]  ;;  %v6456_v47 = vld [vmem:[%s11617_s1 + $0x258] sm:$0xff] }
 0x1e6   :  { %12791 = vst [vmem:[#allocation36_spill] sm:$0xff] %v6444_v49  ;;  %1109 = vmatpush.msrb.mxu0 %v6444_v49  ;;  %1129 = vmatpush.msrb.mxu1 %v6450_v46  ;;  %v6462_v48 = vld [vmem:[%s11617_s1 + $0x658] sm:$0xff]  ;;  %v6468_v49 = vld [vmem:[%s11617_s1 + $0x210] sm:$0xff] }
 0x1e7   :  { %12792 = vst [vmem:[#allocation29_spill] sm:$0xff] %v6450_v46  ;;  %1149 = vmatpush.msrb.mxu2 %v6456_v47  ;;  %1169 = vmatpush.msrb.mxu3 %v6462_v48  ;;  %v6474_v46 = vld [vmem:[%s11617_s1 + $0x610] sm:$0xff] }
 0x1e8   :  { %12793 = vst [vmem:[#allocation30_spill] sm:$0xff] %v6456_v47  ;;  %1110 = vmatpush.msrb.mxu0 %v6468_v49  ;;  %1130 = vmatpush.msrb.mxu1 %v6474_v46  ;;  %v6480_v47 = vld [vmem:[%s11617_s1 + $0x218] sm:$0xff] }
 0x1e9   :  { %12794 = vst [vmem:[#allocation39_spill] sm:$0xff] %v6462_v48  ;;  %1150 = vmatpush.msrb.mxu2 %v6480_v47  ;;  %v6486_v48 = vld [vmem:[%s11617_s1 + $0x618] sm:$0xff] }
 0x1ea   :  { %12795 = vst [vmem:[#allocation40_spill] sm:$0xff] %v6468_v49  ;;  %1170 = vmatpush.msrb.mxu3 %v6486_v48  ;;  %v6492_v49 = vld [vmem:[%s11617_s1 + $0x1d0] sm:$0xff] }
 0x1eb   :  { %12796 = vst [vmem:[#allocation33_spill] sm:$0xff] %v6474_v46  ;;  %1111 = vmatpush.msrb.mxu0 %v6492_v49  ;;  %v6498_v46 = vld [vmem:[%s11617_s1 + $0x5d0] sm:$0xff] }
 0x1ec   :  { %12797 = vst [vmem:[#allocation34_spill] sm:$0xff] %v6480_v47  ;;  %1131 = vmatpush.msrb.mxu1 %v6498_v46  ;;  %v6504_v47 = vld [vmem:[%s11617_s1 + $0x1d8] sm:$0xff] }
 0x1ed   :  { %12798 = vst [vmem:[#allocation43_spill] sm:$0xff] %v6486_v48  ;;  %1151 = vmatpush.msrb.mxu2 %v6504_v47  ;;  %v6510_v48 = vld [vmem:[%s11617_s1 + $0x5d8] sm:$0xff] }
 0x1ee   :  { %12799 = vst [vmem:[#allocation44_spill] sm:$0xff] %v6492_v49  ;;  %1171 = vmatpush.msrb.mxu3 %v6510_v48  ;;  %v6516_v49 = vld [vmem:[%s11617_s1 + $0x190] sm:$0xff] }
 0x1ef   :  { %12800 = vst [vmem:[#allocation37_spill] sm:$0xff] %v6498_v46  ;;  %1112 = vmatpush.msrb.mxu0 %v6516_v49  ;;  %v6522_v46 = vld [vmem:[%s11617_s1 + $0x590] sm:$0xff]  ;;  %v687_v45 = vpop.f32.mrf.mxu1 }
 0x1f0   :  { %12801 = vst [vmem:[#allocation38_spill] sm:$0xff] %v6504_v47  ;;  %1132 = vmatpush.msrb.mxu1 %v6522_v46  ;;  %v6528_v47 = vld [vmem:[%s11617_s1 + $0x198] sm:$0xff] }
 0x1f1   :  { %12802 = vst [vmem:[#allocation49_spill] sm:$0xff] %v6510_v48  ;;  %1152 = vmatpush.msrb.mxu2 %v6528_v47  ;;  %v6534_v48 = vld [vmem:[%s11617_s1 + $0x598] sm:$0xff] }
 0x1f2   :  { %12803 = vst [vmem:[#allocation50_spill] sm:$0xff] %v6516_v49  ;;  %1172 = vmatpush.msrb.mxu3 %v6534_v48  ;;  %v6540_v49 = vld [vmem:[%s11617_s1 + $0x150] sm:$0xff] }
 0x1f3   :  { %12804 = vst [vmem:[#allocation41_spill] sm:$0xff] %v6522_v46  ;;  %1113 = vmatpush.msrb.mxu0 %v6540_v49  ;;  %v6546_v46 = vld [vmem:[%s11617_s1 + $0x550] sm:$0xff] }
 0x1f4   :  { %12805 = vst [vmem:[#allocation42_spill] sm:$0xff] %v6528_v47  ;;  %1133 = vmatpush.msrb.mxu1 %v6546_v46  ;;  %v6552_v47 = vld [vmem:[%s11617_s1 + $0x158] sm:$0xff] }
 0x1f5   :  { %12806 = vst [vmem:[#allocation53_spill] sm:$0xff] %v6534_v48  ;;  %1153 = vmatpush.msrb.mxu2 %v6552_v47  ;;  %v6558_v48 = vld [vmem:[%s11617_s1 + $0x558] sm:$0xff] }
 0x1f6   :  { %12807 = vst [vmem:[#allocation54_spill] sm:$0xff] %v6540_v49  ;;  %1173 = vmatpush.msrb.mxu3 %v6558_v48  ;;  %v6564_v49 = vld [vmem:[%s11617_s1 + $0x110] sm:$0xff]  ;;  %v707_v44 = vpop.f32.mrf.mxu2  ;;  %v727_v43 = vpop.f32.mrf.mxu3 }
 0x1f7   :  { %12808 = vst [vmem:[#allocation45_spill] sm:$0xff] %v6546_v46  ;;  %1114 = vmatpush.msrb.mxu0 %v6564_v49  ;;  %v6570_v46 = vld [vmem:[%s11617_s1 + $0x510] sm:$0xff]  ;;  %v728_v21 = vadd.f32 %v727_v43, %v707_v44 }
 0x1f8   :  { %12809 = vst [vmem:[#allocation46_spill] sm:$0xff] %v6552_v47  ;;  %1134 = vmatpush.msrb.mxu1 %v6570_v46  ;;  %v6576_v47 = vld [vmem:[%s11617_s1 + $0x118] sm:$0xff] }
 0x1f9   :  { %12810 = vst [vmem:[#allocation57_spill] sm:$0xff] %v6558_v48  ;;  %1154 = vmatpush.msrb.mxu2 %v6576_v47  ;;  %v6582_v48 = vld [vmem:[%s11617_s1 + $0x518] sm:$0xff]  ;;  %v978_v32 = vrot.slane %v728_v21, 7 }
 0x1fa   :  { %12811 = vst [vmem:[#allocation58_spill] sm:$0xff] %v6564_v49  ;;  %1174 = vmatpush.msrb.mxu3 %v6582_v48  ;;  %v6588_v49 = vld [vmem:[%s11617_s1 + $0xd0] sm:$0xff] }
 0x1fb   :  { %12812 = vst [vmem:[#allocation59_spill] sm:$0xff] %v6570_v46  ;;  %1115 = vmatpush.msrb.mxu0 %v6588_v49  ;;  %v6594_v46 = vld [vmem:[%s11617_s1 + $0x4d0] sm:$0xff] }
 0x1fc   :  { %12813 = vst [vmem:[#allocation60_spill] sm:$0xff] %v6576_v47  ;;  %1135 = vmatpush.msrb.mxu1 %v6594_v46  ;;  %v6600_v47 = vld [vmem:[%s11617_s1 + $0xd8] sm:$0xff] }
 0x1fd   :  { %12814 = vst [vmem:[#allocation47_spill] sm:$0xff] %v6582_v48  ;;  %1155 = vmatpush.msrb.mxu2 %v6600_v47  ;;  %v6606_v48 = vld [vmem:[%s11617_s1 + $0x4d8] sm:$0xff] }
 0x1fe   :  { %12815 = vst [vmem:[#allocation48_spill] sm:$0xff] %v6588_v49  ;;  %1175 = vmatpush.msrb.mxu3 %v6606_v48  ;;  %v6612_v49 = vld [vmem:[%s11617_s1 + $0x90] sm:$0xff] }
 0x1ff   :  { %12816 = vst [vmem:[#allocation63_spill] sm:$0xff] %v6594_v46  ;;  %1116 = vmatpush.msrb.mxu0 %v6612_v49  ;;  %v6618_v46 = vld [vmem:[%s11617_s1 + $0x490] sm:$0xff] }
 0x200   :  { %12817 = vst [vmem:[#allocation64_spill] sm:$0xff] %v6600_v47  ;;  %1136 = vmatpush.msrb.mxu1 %v6618_v46  ;;  %v6624_v47 = vld [vmem:[%s11617_s1 + $0x98] sm:$0xff]  ;;  %v787_v11 = vpop.f32.mrf.mxu2  ;;  %v807_v42 = vpop.f32.mrf.mxu3 }
 0x201   :  { %12818 = vst [vmem:[#allocation51_spill] sm:$0xff] %v6606_v48  ;;  %1156 = vmatpush.msrb.mxu2 %v6624_v47  ;;  %v6630_v48 = vld [vmem:[%s11617_s1 + $0x498] sm:$0xff] }
 0x202   :  { %12819 = vst [vmem:[#allocation52_spill] sm:$0xff] %v6612_v49  ;;  %1176 = vmatpush.msrb.mxu3 %v6630_v48  ;;  %v6636_v49 = vld [vmem:[%s11617_s1 + $0x50] sm:$0xff] }
 0x203   :  { %12820 = vst [vmem:[#allocation67_spill] sm:$0xff] %v6618_v46  ;;  %1117 = vmatpush.msrb.mxu0 %v6636_v49  ;;  %v6642_v46 = vld [vmem:[%s11617_s1 + $0x450] sm:$0xff] }
 0x204   :  { %12821 = vst [vmem:[#allocation68_spill] sm:$0xff] %v6624_v47  ;;  %1137 = vmatpush.msrb.mxu1 %v6642_v46  ;;  %v6648_v47 = vld [vmem:[%s11617_s1 + $0x58] sm:$0xff] }
 0x205   :  { %12822 = vst [vmem:[#allocation55_spill] sm:$0xff] %v6630_v48  ;;  %1157 = vmatpush.msrb.mxu2 %v6648_v47  ;;  %v6654_v48 = vld [vmem:[%s11617_s1 + $0x458] sm:$0xff] }
 0x206   :  { %12823 = vst [vmem:[#allocation56_spill] sm:$0xff] %v6636_v49  ;;  %1177 = vmatpush.msrb.mxu3 %v6654_v48  ;;  %v6660_v49 = vld [vmem:[%s11617_s1 + $0x10] sm:$0xff] }
 0x207   :  { %12824 = vst [vmem:[#allocation71_spill] sm:$0xff] %v6642_v46  ;;  %1118 = vmatpush.msrb.mxu0 %v6660_v49  ;;  %v6666_v46 = vld [vmem:[%s11617_s1 + $0x410] sm:$0xff] }
 0x208   :  { %12825 = vst [vmem:[#allocation72_spill] sm:$0xff] %v6648_v47  ;;  %1138 = vmatpush.msrb.mxu1 %v6666_v46  ;;  %v6672_v47 = vld [vmem:[%s11617_s1 + $0x18] sm:$0xff] }
 0x209   :  { %12826 = vst [vmem:[#allocation61_spill] sm:$0xff] %v6654_v48  ;;  %1158 = vmatpush.msrb.mxu2 %v6672_v47  ;;  %v6678_v48 = vld [vmem:[%s11617_s1 + $0x418] sm:$0xff] }
 0x20a   :  { %12827 = vst [vmem:[#allocation62_spill] sm:$0xff] %v6660_v49  ;;  %1178 = vmatpush.msrb.mxu3 %v6678_v48  ;;  %v667_v49 = vpop.f32.mrf.mxu0 }
 0x20b   :  { %12828 = vst [vmem:[#allocation75_spill] sm:$0xff] %v6666_v46  ;;  %v767_v46 = vpop.f32.mrf.mxu1  ;;  %v688_v43 = vadd.f32 %v687_v45, %v667_v49 }
 0x20c   :  { %12829 = vst [vmem:[#allocation76_spill] sm:$0xff] %v6672_v47  ;;  %v808_v47 = vadd.f32 %v807_v42, %v787_v11  ;;  %v3260_v42 = vld [vmem:[%s11618_s0 + $0x1] ss:$8 sm:$0xf0] }
 0x20d   :  { %12830 = vst [vmem:[#allocation65_spill] sm:$0xff] %v6678_v48 }
 0x20e   :  { %v980_v36 = vrot.slane %v808_v47, 5 }
 0x212   :  { %v747_v10 = vpop.f32.mrf.mxu0 }
 0x213   :  { %v847_v40 = vpop.f32.mrf.mxu1  ;;  %v768_v20 = vadd.f32 %v767_v46, %v747_v10 }
 0x215   :  { %v979_v31 = vrot.slane %v768_v20, 6 }
 0x21a   :  { %v827_v41 = vpop.f32.mrf.mxu0  ;;  %v867_v39 = vpop.f32.mrf.mxu2 }
 0x21b   :  { %v887_v13 = vpop.f32.mrf.mxu3  ;;  %v848_v48 = vadd.f32 %v847_v40, %v827_v41  ;;  %v985_v41 = vsel %vm605_vm1, %v688_v43, %v978_v32 }
 0x21c   :  { %v888_v37 = vadd.f32 %v887_v13, %v867_v39  ;;  %v986_v13 = vsel %vm607_vm0, %v979_v31, %v980_v36 }
 0x21d   :  { %v981_v39 = vrot.slane %v848_v48, 4 }
 0x21e   :  { %v982_v30 = vrot.slane %v888_v37, 3  ;;  %v987_v37 = vsel %vm609_vm4, %v985_v41, %v986_v13  ;;  %v6722_v13 = vld [vmem:[%s11617_s1 + $0x7e0] sm:$0xff]  ;;  %v6752_v41 = vld [vmem:[%s11617_s1 + $0x3a8] sm:$0xff] }
 0x220   :  { %v988_v10 = vsel %vm611_vm2, %v981_v39, %v982_v30  ;;  %v6728_v39 = vld [vmem:[%s11617_s1 + $0x3e8] sm:$0xff] }
 0x235   :  { %v907_v12 = vpop.f32.mrf.mxu0  ;;  %v927_v38 = vpop.f32.mrf.mxu1 }
 0x236   :  { %v928_v35 = vadd.f32 %v927_v38, %v907_v12  ;;  %v647_v12 = vor.u32 %v3260_v42, %v3259_v16 }
 0x238   :  { %v983_v40 = vrot.slane %v928_v35, 2 }
 0x23c   :  { %v947_v34 = vpop.f32.mrf.mxu2  ;;  %v967_v33 = vpop.f32.mrf.mxu3 }
 0x23d   :  { %v968_v11 = vadd.f32 %v967_v33, %v947_v34 }
 0x23f   :  { %v984_v38 = vrot.slane %v968_v11, 1 }
 0x241   :  { %v989_v21 = vsel %vm613_vm3, %v983_v40, %v984_v38  ;;  %v6734_v40 = vld [vmem:[%s11617_s1 + $0x7e8] sm:$0xff]  ;;  %v6740_v38 = vld [vmem:[%s11617_s1 + $0x3a0] sm:$0xff] }
 0x242   :  { %v990_v20 = vsel %vm615_vm5, %v988_v10, %v989_v21  ;;  %v6758_v10 = vld [vmem:[%s11617_s1 + $0x7a8] sm:$0xff]  ;;  %v6764_v21 = vld [vmem:[%s11617_s1 + $0x360] sm:$0xff] }
 0x243   :  { %v991_v44 = vsel %vm617_vm6, %v987_v37, %v990_v20  ;;  %v6770_v37 = vld [vmem:[%s11617_s1 + $0x760] sm:$0xff]  ;;  %v6776_v20 = vld [vmem:[%s11617_s1 + $0x368] sm:$0xff] }
 0x244   :  { %v993_v33 = vadd.f32 %v991_v44, %v647_v12  ;;  %v6746_v12 = vld [vmem:[%s11617_s1 + $0x7a0] sm:$0xff]  ;;  %v6782_v44 = vld [vmem:[%s11617_s1 + $0x768] sm:$0xff] }
 0x246   :  { %v994_v34 = vmul.f32 0.5, %v993_v33  ;;  %v999_v31 = vrot.slane %v993_v33, 6  ;;  %v6788_v33 = vld [vmem:[%s11617_s1 + $0x320] sm:$0xff] }
 0x248   :  { %3280 = vtanh.f32 %v994_v34  ;;  %v6794_v34 = vld [vmem:[%s11617_s1 + $0x720] sm:$0xff] }
 0x249   :  { %3282 = vtanh.f32 %v999_v31  ;;  %v6800_v31 = vld [vmem:[%s11617_s1 + $0x328] sm:$0xff] }
 0x24e   :  { %v3281_v36 = vpop.eup %3280 }
 0x24f   :  { %v996_v35 = vmul.f32 0.5, %v3281_v36  ;;  %v3283_v32 = vpop.eup %3282  ;;  %v6806_v36 = vld [vmem:[%s11617_s1 + $0x728] sm:$0xff] }
 0x251   :  { %v997_v16 = vadd.f32 0.5, %v996_v35  ;;  %v6816_v35 = vld [vmem:[%s11617_s1 + $0x2e0] sm:$0xff] }
 0x253   :  { %v1003_v45 = vrot.slane %v997_v16, 2  ;;  %v1006_v46 = vmul.f32 %v3283_v32, %v997_v16  ;;  %v1009_v48 = vrot.slane %v997_v16, 4  ;;  %v6822_v16 = vld [vmem:[%s11617_s1 + $0x6e0] sm:$0xff]  ;;  %v6834_v32 = vld [vmem:[%s11617_s1 + $0x6e8] sm:$0xff] }
 0x255   :  { %v1005_v30 = vmul.f32 %v1003_v45, %v5865_v5  ;;  %v6716_v5 = vld [vmem:[%s11617_s1 + $0x3e0] sm:$0xff]  ;;  %v6828_v45 = vld [vmem:[%s11617_s1 + $0x2e8] sm:$0xff] }
 0x257   :  { %v6695_v47 = vadd.f32 %v1006_v46, %v1005_v30  ;;  %v6840_v30 = vld [vmem:[%s11617_s1 + $0x2a0] sm:$0xff] }
 0x258   :  { %v6846_v46 = vld [vmem:[%s11617_s1 + $0x6a0] sm:$0xff] }
 0x259   :  { %3284 = vtanh.f32 %v6695_v47  ;;  %12831 = vst [vmem:[#allocation66_spill] sm:$0xff] %v6846_v46 }
 0x25f   :  { %v3285_v49 = vpop.eup %3284 }
 0x260   :  { %v1011_v42 = vmul.f32 %v3285_v49, %v1009_v48  ;;  %v6852_v48 = vld [vmem:[%s11617_s1 + $0x2a8] sm:$0xff] }
 0x261   :  { %12832 = vst [vmem:[#allocation79_spill] sm:$0xff] %v6852_v48  ;;  %v6858_v49 = vld [vmem:[%s11617_s1 + $0x6a8] sm:$0xff] }
 0x262   :  { %1012 = vst [vmem:[%s11619_s2 + $0x1] sm:$0x1] %v1011_v42  ;;  %v6701_v11 = vperm.slane %v1011_v42, 1  ;;  %v6703_v43 = vperm.slane %v1011_v42, 0  ;;  %v6864_v42 = vld [vmem:[%s11617_s1 + $0x260] sm:$0xff] }
 0x263   :  { %12833 = vst [vmem:[#allocation80_spill] sm:$0xff] %v6858_v49 }
 0x264   :  { %1016 = vst [vmem:[%s11619_s2 + $0xe] sm:$0x1] %v6701_v11  ;;  %1039 = vmatmul.f32.vlgmr.msra.gmra.mxu0 %v6703_v43  ;;  %1059 = vmatmul.f32.vlgmr.msra.gmra.mxu1 %v6701_v11 }
 0x265   :  { %1079 = vmatmul.f32.vlgmr.msra.gmra.mxu2 %v6703_v43  ;;  %1099 = vmatmul.f32.vlgmr.msra.gmra.mxu3 %v6701_v11  ;;  %12834 = vst [vmem:[#allocation69_spill] sm:$0xff] %v6864_v42 }
 0x266   :  { %1183 = vmatpush.msra.mxu0 %v6716_v5  ;;  %1203 = vmatpush.msra.mxu1 %v6722_v13 }
 0x267   :  { %1223 = vmatpush.msra.mxu2 %v6728_v39  ;;  %1243 = vmatpush.msra.mxu3 %v6734_v40 }
 0x268   :  { %1184 = vmatpush.msra.mxu0 %v6740_v38  ;;  %1204 = vmatpush.msra.mxu1 %v6746_v12 }
 0x269   :  { %1224 = vmatpush.msra.mxu2 %v6752_v41  ;;  %1244 = vmatpush.msra.mxu3 %v6758_v10 }
 0x26a   :  { %1185 = vmatpush.msra.mxu0 %v6764_v21  ;;  %1205 = vmatpush.msra.mxu1 %v6770_v37 }
 0x26b   :  { %1225 = vmatpush.msra.mxu2 %v6776_v20  ;;  %1245 = vmatpush.msra.mxu3 %v6782_v44 }
 0x26c   :  { %1186 = vmatpush.msra.mxu0 %v6788_v33  ;;  %1206 = vmatpush.msra.mxu1 %v6794_v34 }
 0x26d   :  { %1226 = vmatpush.msra.mxu2 %v6800_v31  ;;  %1246 = vmatpush.msra.mxu3 %v6806_v36 }
 0x26e   :  { %1119 = vmatmul.f32.vlgmr.msrb.gmra.mxu0 %v6703_v43  ;;  %1139 = vmatmul.f32.vlgmr.msrb.gmra.mxu1 %v6701_v11 }
 0x26f   :  { %1159 = vmatmul.f32.vlgmr.msrb.gmra.mxu2 %v6703_v43  ;;  %1179 = vmatmul.f32.vlgmr.msrb.gmra.mxu3 %v6701_v11 }
 0x270   :  { %1187 = vmatpush.msra.mxu0 %v6816_v35  ;;  %1207 = vmatpush.msra.mxu1 %v6822_v16 }
 0x271   :  { %1227 = vmatpush.msra.mxu2 %v6828_v45  ;;  %1247 = vmatpush.msra.mxu3 %v6834_v32 }
 0x272   :  { %1188 = vmatpush.msra.mxu0 %v6840_v30  ;;  %1208 = vmatpush.msra.mxu1 %v6846_v46  ;;  %v6870_v46 = vld [vmem:[%s11617_s1 + $0x660] sm:$0xff] }
 0x273   :  { %1228 = vmatpush.msra.mxu2 %v6852_v48  ;;  %1248 = vmatpush.msra.mxu3 %v6858_v49  ;;  %12835 = vst [vmem:[#allocation70_spill] sm:$0xff] %v6870_v46  ;;  %v6876_v48 = vld [vmem:[%s11617_s1 + $0x268] sm:$0xff] }
 0x274   :  { %1189 = vmatpush.msra.mxu0 %v6864_v42  ;;  %1209 = vmatpush.msra.mxu1 %v6870_v46  ;;  %12836 = vst [vmem:[#allocation83_spill] sm:$0xff] %v6876_v48  ;;  %v6882_v49 = vld [vmem:[%s11617_s1 + $0x668] sm:$0xff]  ;;  %v6888_v42 = vld [vmem:[%s11617_s1 + $0x220] sm:$0xff] }
 0x275   :  { %1229 = vmatpush.msra.mxu2 %v6876_v48  ;;  %12837 = vst [vmem:[#allocation84_spill] sm:$0xff] %v6882_v49  ;;  %1249 = vmatpush.msra.mxu3 %v6882_v49  ;;  %v6894_v46 = vld [vmem:[%s11617_s1 + $0x620] sm:$0xff]  ;;  %v6900_v48 = vld [vmem:[%s11617_s1 + $0x228] sm:$0xff] }
 0x276   :  { %12838 = vst [vmem:[#allocation73_spill] sm:$0xff] %v6888_v42  ;;  %1190 = vmatpush.msra.mxu0 %v6888_v42  ;;  %1210 = vmatpush.msra.mxu1 %v6894_v46  ;;  %v6906_v49 = vld [vmem:[%s11617_s1 + $0x628] sm:$0xff]  ;;  %v6912_v42 = vld [vmem:[%s11617_s1 + $0x1e0] sm:$0xff] }
 0x277   :  { %12839 = vst [vmem:[#allocation74_spill] sm:$0xff] %v6894_v46  ;;  %1230 = vmatpush.msra.mxu2 %v6900_v48  ;;  %1250 = vmatpush.msra.mxu3 %v6906_v49  ;;  %v6918_v46 = vld [vmem:[%s11617_s1 + $0x5e0] sm:$0xff] }
 0x278   :  { %12840 = vst [vmem:[#allocation87_spill] sm:$0xff] %v6900_v48  ;;  %1191 = vmatpush.msra.mxu0 %v6912_v42  ;;  %1211 = vmatpush.msra.mxu1 %v6918_v46  ;;  %v6924_v48 = vld [vmem:[%s11617_s1 + $0x1e8] sm:$0xff] }
 0x279   :  { %12841 = vst [vmem:[#allocation88_spill] sm:$0xff] %v6906_v49  ;;  %1231 = vmatpush.msra.mxu2 %v6924_v48  ;;  %v6930_v49 = vld [vmem:[%s11617_s1 + $0x5e8] sm:$0xff] }
 0x27a   :  { %12842 = vst [vmem:[#allocation77_spill] sm:$0xff] %v6912_v42  ;;  %1251 = vmatpush.msra.mxu3 %v6930_v49  ;;  %v6936_v42 = vld [vmem:[%s11617_s1 + $0x1a0] sm:$0xff] }
 0x27b   :  { %12843 = vst [vmem:[#allocation78_spill] sm:$0xff] %v6918_v46  ;;  %1192 = vmatpush.msra.mxu0 %v6936_v42  ;;  %v6942_v46 = vld [vmem:[%s11617_s1 + $0x5a0] sm:$0xff] }
 0x27c   :  { %12844 = vst [vmem:[#allocation91_spill] sm:$0xff] %v6924_v48  ;;  %1212 = vmatpush.msra.mxu1 %v6942_v46  ;;  %v6948_v48 = vld [vmem:[%s11617_s1 + $0x1a8] sm:$0xff] }
 0x27d   :  { %12845 = vst [vmem:[#allocation92_spill] sm:$0xff] %v6930_v49  ;;  %1232 = vmatpush.msra.mxu2 %v6948_v48  ;;  %v6954_v49 = vld [vmem:[%s11617_s1 + $0x5a8] sm:$0xff] }
 0x27e   :  { %12846 = vst [vmem:[#allocation81_spill] sm:$0xff] %v6936_v42  ;;  %1252 = vmatpush.msra.mxu3 %v6954_v49  ;;  %v6960_v42 = vld [vmem:[%s11617_s1 + $0x160] sm:$0xff] }
 0x27f   :  { %12847 = vst [vmem:[#allocation82_spill] sm:$0xff] %v6942_v46  ;;  %1193 = vmatpush.msra.mxu0 %v6960_v42  ;;  %v6966_v46 = vld [vmem:[%s11617_s1 + $0x560] sm:$0xff] }
 0x280   :  { %12848 = vst [vmem:[#allocation95_spill] sm:$0xff] %v6948_v48  ;;  %1213 = vmatpush.msra.mxu1 %v6966_v46  ;;  %v6972_v48 = vld [vmem:[%s11617_s1 + $0x168] sm:$0xff] }
 0x281   :  { %12849 = vst [vmem:[#allocation96_spill] sm:$0xff] %v6954_v49  ;;  %1233 = vmatpush.msra.mxu2 %v6972_v48  ;;  %v6978_v49 = vld [vmem:[%s11617_s1 + $0x568] sm:$0xff] }
 0x282   :  { %12850 = vst [vmem:[#allocation85_spill] sm:$0xff] %v6960_v42  ;;  %1253 = vmatpush.msra.mxu3 %v6978_v49  ;;  %v6984_v42 = vld [vmem:[%s11617_s1 + $0x120] sm:$0xff] }
 0x283   :  { %12851 = vst [vmem:[#allocation86_spill] sm:$0xff] %v6966_v46  ;;  %1194 = vmatpush.msra.mxu0 %v6984_v42  ;;  %v6990_v46 = vld [vmem:[%s11617_s1 + $0x520] sm:$0xff] }
 0x284   :  { %12852 = vst [vmem:[#allocation99_spill] sm:$0xff] %v6972_v48  ;;  %1214 = vmatpush.msra.mxu1 %v6990_v46  ;;  %v6996_v48 = vld [vmem:[%s11617_s1 + $0x128] sm:$0xff] }
 0x285   :  { %12853 = vst [vmem:[#allocation100_spill] sm:$0xff] %v6978_v49  ;;  %1234 = vmatpush.msra.mxu2 %v6996_v48  ;;  %v7002_v49 = vld [vmem:[%s11617_s1 + $0x528] sm:$0xff] }
 0x286   :  { %12854 = vst [vmem:[#allocation89_spill] sm:$0xff] %v6984_v42  ;;  %1254 = vmatpush.msra.mxu3 %v7002_v49  ;;  %v7008_v42 = vld [vmem:[%s11617_s1 + $0xe0] sm:$0xff] }
 0x287   :  { %12855 = vst [vmem:[#allocation90_spill] sm:$0xff] %v6990_v46  ;;  %1195 = vmatpush.msra.mxu0 %v7008_v42  ;;  %v7014_v46 = vld [vmem:[%s11617_s1 + $0x4e0] sm:$0xff] }
 0x288   :  { %12856 = vst [vmem:[#allocation103_spill] sm:$0xff] %v6996_v48  ;;  %1215 = vmatpush.msra.mxu1 %v7014_v46  ;;  %v7020_v48 = vld [vmem:[%s11617_s1 + $0xe8] sm:$0xff] }
 0x289   :  { %12857 = vst [vmem:[#allocation104_spill] sm:$0xff] %v7002_v49  ;;  %1235 = vmatpush.msra.mxu2 %v7020_v48  ;;  %v7026_v49 = vld [vmem:[%s11617_s1 + $0x4e8] sm:$0xff] }
 0x28a   :  { %12858 = vst [vmem:[#allocation93_spill] sm:$0xff] %v7008_v42  ;;  %1255 = vmatpush.msra.mxu3 %v7026_v49  ;;  %v7032_v42 = vld [vmem:[%s11617_s1 + $0xa0] sm:$0xff] }
 0x28b   :  { %12859 = vst [vmem:[#allocation94_spill] sm:$0xff] %v7014_v46  ;;  %1196 = vmatpush.msra.mxu0 %v7032_v42  ;;  %v7038_v46 = vld [vmem:[%s11617_s1 + $0x4a0] sm:$0xff] }
 0x28c   :  { %12860 = vst [vmem:[#allocation107_spill] sm:$0xff] %v7020_v48  ;;  %1216 = vmatpush.msra.mxu1 %v7038_v46  ;;  %v7044_v48 = vld [vmem:[%s11617_s1 + $0xa8] sm:$0xff] }
 0x28d   :  { %12861 = vst [vmem:[#allocation108_spill] sm:$0xff] %v7026_v49  ;;  %1236 = vmatpush.msra.mxu2 %v7044_v48  ;;  %v7050_v49 = vld [vmem:[%s11617_s1 + $0x4a8] sm:$0xff] }
 0x28e   :  { %12862 = vst [vmem:[#allocation97_spill] sm:$0xff] %v7032_v42  ;;  %1256 = vmatpush.msra.mxu3 %v7050_v49  ;;  %v7056_v42 = vld [vmem:[%s11617_s1 + $0x60] sm:$0xff] }
 0x28f   :  { %12863 = vst [vmem:[#allocation98_spill] sm:$0xff] %v7038_v46  ;;  %1197 = vmatpush.msra.mxu0 %v7056_v42  ;;  %v7062_v46 = vld [vmem:[%s11617_s1 + $0x460] sm:$0xff] }
 0x290   :  { %12864 = vst [vmem:[#allocation113_spill] sm:$0xff] %v7044_v48  ;;  %1217 = vmatpush.msra.mxu1 %v7062_v46  ;;  %v7068_v48 = vld [vmem:[%s11617_s1 + $0x68] sm:$0xff] }
 0x291   :  { %12865 = vst [vmem:[#allocation114_spill] sm:$0xff] %v7050_v49  ;;  %1237 = vmatpush.msra.mxu2 %v7068_v48  ;;  %v7074_v49 = vld [vmem:[%s11617_s1 + $0x468] sm:$0xff] }
 0x292   :  { %12866 = vst [vmem:[#allocation101_spill] sm:$0xff] %v7056_v42  ;;  %1257 = vmatpush.msra.mxu3 %v7074_v49  ;;  %v7080_v42 = vld [vmem:[%s11617_s1 + $0x20] sm:$0xff] }
 0x293   :  { %12867 = vst [vmem:[#allocation102_spill] sm:$0xff] %v7062_v46  ;;  %1198 = vmatpush.msra.mxu0 %v7080_v42  ;;  %v7086_v46 = vld [vmem:[%s11617_s1 + $0x420] sm:$0xff] }
 0x294   :  { %12868 = vst [vmem:[#allocation117_spill] sm:$0xff] %v7068_v48  ;;  %1218 = vmatpush.msra.mxu1 %v7086_v46  ;;  %v7092_v48 = vld [vmem:[%s11617_s1 + $0x28] sm:$0xff]  ;;  %1199 = vmatmul.f32.vlgmr.msra.gmra.mxu0 %v6703_v43 }
 0x295   :  { %12869 = vst [vmem:[#allocation118_spill] sm:$0xff] %v7074_v49  ;;  %1238 = vmatpush.msra.mxu2 %v7092_v48  ;;  %v7098_v49 = vld [vmem:[%s11617_s1 + $0x428] sm:$0xff]  ;;  %1219 = vmatmul.f32.vlgmr.msra.gmra.mxu1 %v6701_v11 }
 0x296   :  { %12870 = vst [vmem:[#allocation105_spill] sm:$0xff] %v7080_v42  ;;  %1258 = vmatpush.msra.mxu3 %v7098_v49  ;;  %1239 = vmatmul.f32.vlgmr.msra.gmra.mxu2 %v6703_v43  ;;  %v7126_v42 = vld [vmem:[%s11617_s1 + $0x7f8] sm:$0xff] }
 0x297   :  { %12871 = vst [vmem:[#allocation106_spill] sm:$0xff] %v7086_v46  ;;  %1259 = vmatmul.f32.vlgmr.msra.gmra.mxu3 %v6701_v11  ;;  %v7108_v46 = vld [vmem:[%s11617_s1 + $0x3f0] sm:$0xff] }
 0x298   :  { %12872 = vst [vmem:[#allocation121_spill] sm:$0xff] %v7092_v48  ;;  %1263 = vmatpush.msrb.mxu0 %v7108_v46  ;;  %v7114_v48 = vld [vmem:[%s11617_s1 + $0x7f0] sm:$0xff]  ;;  %1323 = vmatpush.msrb.mxu3 %v7126_v42 }
 0x299   :  { %12873 = vst [vmem:[#allocation122_spill] sm:$0xff] %v7098_v49  ;;  %1283 = vmatpush.msrb.mxu1 %v7114_v48  ;;  %v7120_v49 = vld [vmem:[%s11617_s1 + $0x3f8] sm:$0xff] }
 0x29a   :  { %12874 = vst [vmem:[#allocation109_spill] sm:$0xff] %v7108_v46  ;;  %1303 = vmatpush.msrb.mxu2 %v7120_v49  ;;  %v7132_v46 = vld [vmem:[%s11617_s1 + $0x3b0] sm:$0xff] }
 0x29b   :  { %12875 = vst [vmem:[#allocation110_spill] sm:$0xff] %v7114_v48  ;;  %1264 = vmatpush.msrb.mxu0 %v7132_v46  ;;  %v7138_v48 = vld [vmem:[%s11617_s1 + $0x7b0] sm:$0xff] }
 0x29c   :  { %12876 = vst [vmem:[#allocation123_spill] sm:$0xff] %v7120_v49  ;;  %1284 = vmatpush.msrb.mxu1 %v7138_v48  ;;  %v7144_v49 = vld [vmem:[%s11617_s1 + $0x3b8] sm:$0xff] }
 0x29d   :  { %12877 = vst [vmem:[#allocation124_spill] sm:$0xff] %v7126_v42  ;;  %1304 = vmatpush.msrb.mxu2 %v7144_v49  ;;  %v7150_v42 = vld [vmem:[%s11617_s1 + $0x7b8] sm:$0xff] }
 0x29e   :  { %12878 = vst [vmem:[#allocation111_spill] sm:$0xff] %v7132_v46  ;;  %1324 = vmatpush.msrb.mxu3 %v7150_v42  ;;  %v7156_v46 = vld [vmem:[%s11617_s1 + $0x370] sm:$0xff] }
 0x29f   :  { %12879 = vst [vmem:[#allocation112_spill] sm:$0xff] %v7138_v48  ;;  %1265 = vmatpush.msrb.mxu0 %v7156_v46  ;;  %v7162_v48 = vld [vmem:[%s11617_s1 + $0x770] sm:$0xff] }
 0x2a0   :  { %12880 = vst [vmem:[#allocation127_spill] sm:$0xff] %v7144_v49  ;;  %1285 = vmatpush.msrb.mxu1 %v7162_v48  ;;  %v7168_v49 = vld [vmem:[%s11617_s1 + $0x378] sm:$0xff] }
 0x2a1   :  { %12881 = vst [vmem:[#allocation128_spill] sm:$0xff] %v7150_v42  ;;  %1305 = vmatpush.msrb.mxu2 %v7168_v49  ;;  %v7174_v42 = vld [vmem:[%s11617_s1 + $0x778] sm:$0xff] }
 0x2a2   :  { %12882 = vst [vmem:[#allocation115_spill] sm:$0xff] %v7156_v46  ;;  %1325 = vmatpush.msrb.mxu3 %v7174_v42  ;;  %v7180_v46 = vld [vmem:[%s11617_s1 + $0x330] sm:$0xff] }
 0x2a3   :  { %12883 = vst [vmem:[#allocation116_spill] sm:$0xff] %v7162_v48  ;;  %1266 = vmatpush.msrb.mxu0 %v7180_v46  ;;  %v7186_v48 = vld [vmem:[%s11617_s1 + $0x730] sm:$0xff] }
 0x2a4   :  { %12884 = vst [vmem:[#allocation131_spill] sm:$0xff] %v7168_v49  ;;  %1286 = vmatpush.msrb.mxu1 %v7186_v48  ;;  %v7192_v49 = vld [vmem:[%s11617_s1 + $0x338] sm:$0xff] }
 0x2a5   :  { %12885 = vst [vmem:[#allocation132_spill] sm:$0xff] %v7174_v42  ;;  %1306 = vmatpush.msrb.mxu2 %v7192_v49  ;;  %v7198_v42 = vld [vmem:[%s11617_s1 + $0x738] sm:$0xff] }
 0x2a6   :  { %12886 = vst [vmem:[#allocation119_spill] sm:$0xff] %v7180_v46  ;;  %1326 = vmatpush.msrb.mxu3 %v7198_v42  ;;  %v7204_v46 = vld [vmem:[%s11617_s1 + $0x2f0] sm:$0xff] }
 0x2a7   :  { %12887 = vst [vmem:[#allocation120_spill] sm:$0xff] %v7186_v48  ;;  %1267 = vmatpush.msrb.mxu0 %v7204_v46  ;;  %v7210_v48 = vld [vmem:[%s11617_s1 + $0x6f0] sm:$0xff] }
 0x2a8   :  { %12888 = vst [vmem:[#allocation135_spill] sm:$0xff] %v7192_v49  ;;  %1287 = vmatpush.msrb.mxu1 %v7210_v48  ;;  %v7216_v49 = vld [vmem:[%s11617_s1 + $0x2f8] sm:$0xff] }
 0x2a9   :  { %12889 = vst [vmem:[#allocation136_spill] sm:$0xff] %v7198_v42  ;;  %1307 = vmatpush.msrb.mxu2 %v7216_v49  ;;  %v7222_v42 = vld [vmem:[%s11617_s1 + $0x6f8] sm:$0xff] }
 0x2aa   :  { %12890 = vst [vmem:[#allocation125_spill] sm:$0xff] %v7204_v46  ;;  %1327 = vmatpush.msrb.mxu3 %v7222_v42  ;;  %v7228_v46 = vld [vmem:[%s11617_s1 + $0x2b0] sm:$0xff] }
 0x2ab   :  { %12891 = vst [vmem:[#allocation126_spill] sm:$0xff] %v7210_v48  ;;  %1268 = vmatpush.msrb.mxu0 %v7228_v46  ;;  %v7234_v48 = vld [vmem:[%s11617_s1 + $0x6b0] sm:$0xff] }
 0x2ac   :  { %12892 = vst [vmem:[#allocation139_spill] sm:$0xff] %v7216_v49  ;;  %1288 = vmatpush.msrb.mxu1 %v7234_v48  ;;  %v7240_v49 = vld [vmem:[%s11617_s1 + $0x2b8] sm:$0xff] }
 0x2ad   :  { %12893 = vst [vmem:[#allocation140_spill] sm:$0xff] %v7222_v42  ;;  %1308 = vmatpush.msrb.mxu2 %v7240_v49  ;;  %v7246_v42 = vld [vmem:[%s11617_s1 + $0x6b8] sm:$0xff] }
 0x2ae   :  { %12894 = vst [vmem:[#allocation129_spill] sm:$0xff] %v7228_v46  ;;  %1328 = vmatpush.msrb.mxu3 %v7246_v42  ;;  %v7252_v46 = vld [vmem:[%s11617_s1 + $0x270] sm:$0xff] }
 0x2af   :  { %12895 = vst [vmem:[#allocation130_spill] sm:$0xff] %v7234_v48  ;;  %1269 = vmatpush.msrb.mxu0 %v7252_v46  ;;  %v7258_v48 = vld [vmem:[%s11617_s1 + $0x670] sm:$0xff] }
 0x2b0   :  { %12896 = vst [vmem:[#allocation143_spill] sm:$0xff] %v7240_v49  ;;  %1289 = vmatpush.msrb.mxu1 %v7258_v48  ;;  %v7264_v49 = vld [vmem:[%s11617_s1 + $0x278] sm:$0xff] }
 0x2b1   :  { %12897 = vst [vmem:[#allocation144_spill] sm:$0xff] %v7246_v42  ;;  %1309 = vmatpush.msrb.mxu2 %v7264_v49  ;;  %v7270_v42 = vld [vmem:[%s11617_s1 + $0x678] sm:$0xff] }
 0x2b2   :  { %12898 = vst [vmem:[#allocation133_spill] sm:$0xff] %v7252_v46  ;;  %1329 = vmatpush.msrb.mxu3 %v7270_v42  ;;  %v7276_v46 = vld [vmem:[%s11617_s1 + $0x230] sm:$0xff] }
 0x2b3   :  { %12899 = vst [vmem:[#allocation134_spill] sm:$0xff] %v7258_v48  ;;  %1270 = vmatpush.msrb.mxu0 %v7276_v46  ;;  %v7282_v48 = vld [vmem:[%s11617_s1 + $0x630] sm:$0xff] }
 0x2b4   :  { %12900 = vst [vmem:[#allocation147_spill] sm:$0xff] %v7264_v49  ;;  %1290 = vmatpush.msrb.mxu1 %v7282_v48  ;;  %v7288_v49 = vld [vmem:[%s11617_s1 + $0x238] sm:$0xff] }
 0x2b5   :  { %12901 = vst [vmem:[#allocation148_spill] sm:$0xff] %v7270_v42  ;;  %1310 = vmatpush.msrb.mxu2 %v7288_v49  ;;  %v7294_v42 = vld [vmem:[%s11617_s1 + $0x638] sm:$0xff] }
 0x2b6   :  { %12902 = vst [vmem:[#allocation137_spill] sm:$0xff] %v7276_v46  ;;  %1330 = vmatpush.msrb.mxu3 %v7294_v42  ;;  %v7300_v46 = vld [vmem:[%s11617_s1 + $0x1f0] sm:$0xff] }
 0x2b7   :  { %12903 = vst [vmem:[#allocation138_spill] sm:$0xff] %v7282_v48  ;;  %1271 = vmatpush.msrb.mxu0 %v7300_v46  ;;  %v7306_v48 = vld [vmem:[%s11617_s1 + $0x5f0] sm:$0xff] }
 0x2b8   :  { %12904 = vst [vmem:[#allocation151_spill] sm:$0xff] %v7288_v49  ;;  %1291 = vmatpush.msrb.mxu1 %v7306_v48  ;;  %v7312_v49 = vld [vmem:[%s11617_s1 + $0x1f8] sm:$0xff] }
 0x2b9   :  { %12905 = vst [vmem:[#allocation152_spill] sm:$0xff] %v7294_v42  ;;  %1311 = vmatpush.msrb.mxu2 %v7312_v49  ;;  %v7318_v42 = vld [vmem:[%s11617_s1 + $0x5f8] sm:$0xff] }
 0x2ba   :  { %12906 = vst [vmem:[#allocation141_spill] sm:$0xff] %v7300_v46  ;;  %1331 = vmatpush.msrb.mxu3 %v7318_v42  ;;  %v7324_v46 = vld [vmem:[%s11617_s1 + $0x1b0] sm:$0xff] }
 0x2bb   :  { %12907 = vst [vmem:[#allocation142_spill] sm:$0xff] %v7306_v48  ;;  %1272 = vmatpush.msrb.mxu0 %v7324_v46  ;;  %v7330_v48 = vld [vmem:[%s11617_s1 + $0x5b0] sm:$0xff] }
 0x2bc   :  { %12908 = vst [vmem:[#allocation155_spill] sm:$0xff] %v7312_v49  ;;  %1292 = vmatpush.msrb.mxu1 %v7330_v48  ;;  %v7336_v49 = vld [vmem:[%s11617_s1 + $0x1b8] sm:$0xff] }
 0x2bd   :  { %12909 = vst [vmem:[#allocation156_spill] sm:$0xff] %v7318_v42  ;;  %1312 = vmatpush.msrb.mxu2 %v7336_v49  ;;  %v7342_v42 = vld [vmem:[%s11617_s1 + $0x5b8] sm:$0xff] }
 0x2be   :  { %12910 = vst [vmem:[#allocation145_spill] sm:$0xff] %v7324_v46  ;;  %1332 = vmatpush.msrb.mxu3 %v7342_v42  ;;  %v7348_v46 = vld [vmem:[%s11617_s1 + $0x170] sm:$0xff] }
 0x2bf   :  { %12911 = vst [vmem:[#allocation146_spill] sm:$0xff] %v7330_v48  ;;  %1273 = vmatpush.msrb.mxu0 %v7348_v46  ;;  %v7354_v48 = vld [vmem:[%s11617_s1 + $0x570] sm:$0xff] }
 0x2c0   :  { %12912 = vst [vmem:[#allocation159_spill] sm:$0xff] %v7336_v49  ;;  %1293 = vmatpush.msrb.mxu1 %v7354_v48  ;;  %v7360_v49 = vld [vmem:[%s11617_s1 + $0x178] sm:$0xff] }
 0x2c1   :  { %12913 = vst [vmem:[#allocation160_spill] sm:$0xff] %v7342_v42  ;;  %1313 = vmatpush.msrb.mxu2 %v7360_v49  ;;  %v7366_v42 = vld [vmem:[%s11617_s1 + $0x578] sm:$0xff] }
 0x2c2   :  { %12914 = vst [vmem:[#allocation149_spill] sm:$0xff] %v7348_v46  ;;  %1333 = vmatpush.msrb.mxu3 %v7366_v42  ;;  %v7372_v46 = vld [vmem:[%s11617_s1 + $0x130] sm:$0xff] }
 0x2c3   :  { %12915 = vst [vmem:[#allocation150_spill] sm:$0xff] %v7354_v48  ;;  %1274 = vmatpush.msrb.mxu0 %v7372_v46  ;;  %v7378_v48 = vld [vmem:[%s11617_s1 + $0x530] sm:$0xff] }
 0x2c4   :  { %12916 = vst [vmem:[#allocation163_spill] sm:$0xff] %v7360_v49  ;;  %1294 = vmatpush.msrb.mxu1 %v7378_v48  ;;  %v7384_v49 = vld [vmem:[%s11617_s1 + $0x138] sm:$0xff] }
 0x2c5   :  { %12917 = vst [vmem:[#allocation164_spill] sm:$0xff] %v7366_v42  ;;  %1314 = vmatpush.msrb.mxu2 %v7384_v49  ;;  %v7390_v42 = vld [vmem:[%s11617_s1 + $0x538] sm:$0xff] }
 0x2c6   :  { %12918 = vst [vmem:[#allocation153_spill] sm:$0xff] %v7372_v46  ;;  %1334 = vmatpush.msrb.mxu3 %v7390_v42  ;;  %v7396_v46 = vld [vmem:[%s11617_s1 + $0xf0] sm:$0xff] }
 0x2c7   :  { %12919 = vst [vmem:[#allocation154_spill] sm:$0xff] %v7378_v48  ;;  %1275 = vmatpush.msrb.mxu0 %v7396_v46  ;;  %v7402_v48 = vld [vmem:[%s11617_s1 + $0x4f0] sm:$0xff] }
 0x2c8   :  { %12920 = vst [vmem:[#allocation167_spill] sm:$0xff] %v7384_v49  ;;  %1295 = vmatpush.msrb.mxu1 %v7402_v48  ;;  %v7408_v49 = vld [vmem:[%s11617_s1 + $0xf8] sm:$0xff] }
 0x2c9   :  { %12921 = vst [vmem:[#allocation157_spill] sm:$0xff] %v7390_v42  ;;  %1315 = vmatpush.msrb.mxu2 %v7408_v49  ;;  %v7414_v42 = vld [vmem:[%s11617_s1 + $0x4f8] sm:$0xff] }
 0x2ca   :  { %12922 = vst [vmem:[#allocation158_spill] sm:$0xff] %v7396_v46  ;;  %1335 = vmatpush.msrb.mxu3 %v7414_v42  ;;  %v7420_v46 = vld [vmem:[%s11617_s1 + $0xb0] sm:$0xff] }
 0x2cb   :  { %12923 = vst [vmem:[#allocation170_spill] sm:$0xff] %v7402_v48  ;;  %1276 = vmatpush.msrb.mxu0 %v7420_v46  ;;  %v7426_v48 = vld [vmem:[%s11617_s1 + $0x4b0] sm:$0xff] }
 0x2cc   :  { %12924 = vst [vmem:[#allocation171_spill] sm:$0xff] %v7408_v49  ;;  %1296 = vmatpush.msrb.mxu1 %v7426_v48  ;;  %v7432_v49 = vld [vmem:[%s11617_s1 + $0xb8] sm:$0xff] }
 0x2cd   :  { %12925 = vst [vmem:[#allocation161_spill] sm:$0xff] %v7414_v42  ;;  %1316 = vmatpush.msrb.mxu2 %v7432_v49  ;;  %v7438_v42 = vld [vmem:[%s11617_s1 + $0x4b8] sm:$0xff] }
 0x2ce   :  { %12926 = vst [vmem:[#allocation162_spill] sm:$0xff] %v7420_v46  ;;  %1336 = vmatpush.msrb.mxu3 %v7438_v42  ;;  %v7444_v46 = vld [vmem:[%s11617_s1 + $0x70] sm:$0xff] }
 0x2cf   :  { %12927 = vst [vmem:[#allocation174_spill] sm:$0xff] %v7426_v48  ;;  %1277 = vmatpush.msrb.mxu0 %v7444_v46  ;;  %v7450_v48 = vld [vmem:[%s11617_s1 + $0x470] sm:$0xff] }
 0x2d0   :  { %12928 = vst [vmem:[#allocation175_spill] sm:$0xff] %v7432_v49  ;;  %1297 = vmatpush.msrb.mxu1 %v7450_v48  ;;  %v7456_v49 = vld [vmem:[%s11617_s1 + $0x78] sm:$0xff] }
 0x2d1   :  { %12929 = vst [vmem:[#allocation165_spill] sm:$0xff] %v7438_v42  ;;  %1317 = vmatpush.msrb.mxu2 %v7456_v49  ;;  %v7462_v42 = vld [vmem:[%s11617_s1 + $0x478] sm:$0xff] }
 0x2d2   :  { %12930 = vst [vmem:[#allocation166_spill] sm:$0xff] %v7444_v46  ;;  %1337 = vmatpush.msrb.mxu3 %v7462_v42  ;;  %v7468_v46 = vld [vmem:[%s11617_s1 + $0x30] sm:$0xff] }
 0x2d3   :  { %12931 = vst [vmem:[#allocation168_spill] sm:$0xff] %v7450_v48  ;;  %1278 = vmatpush.msrb.mxu0 %v7468_v46  ;;  %v7474_v48 = vld [vmem:[%s11617_s1 + $0x430] sm:$0xff] }
 0x2d4   :  { %12932 = vst [vmem:[#allocation169_spill] sm:$0xff] %v7456_v49  ;;  %1298 = vmatpush.msrb.mxu1 %v7474_v48  ;;  %v7480_v49 = vld [vmem:[%s11617_s1 + $0x38] sm:$0xff]  ;;  %1279 = vmatmul.f32.vlgmr.msrb.gmra.mxu0 %v6703_v43 }
 0x2d5   :  { %12933 = vst [vmem:[#allocation172_spill] sm:$0xff] %v7462_v42  ;;  %1318 = vmatpush.msrb.mxu2 %v7480_v49  ;;  %v7486_v42 = vld [vmem:[%s11617_s1 + $0x438] sm:$0xff]  ;;  %1299 = vmatmul.f32.vlgmr.msrb.gmra.mxu1 %v6701_v11 }
 0x2d6   :  { %12934 = vst [vmem:[#allocation173_spill] sm:$0xff] %v7474_v48  ;;  %1338 = vmatpush.msrb.mxu3 %v7486_v42  ;;  %1319 = vmatmul.f32.vlgmr.msrb.gmra.mxu2 %v6703_v43  ;;  %v7496_v48 = vld [vmem:[%s11617_s1 + $0x3c0] sm:$0xff]  ;;  %v7508_v43 = vld [vmem:[%s11617_s1 + $0x3c8] sm:$0xff] }
 0x2d7   :  { %12935 = vst [vmem:[#allocation180_spill] sm:$0xff] %v7480_v49  ;;  %1339 = vmatmul.f32.vlgmr.msrb.gmra.mxu3 %v6701_v11  ;;  %1396 = vmatpush.msra.mxu0 %v7496_v48  ;;  %v7502_v49 = vld [vmem:[%s11617_s1 + $0x7c0] sm:$0xff]  ;;  %v7514_v11 = vld [vmem:[%s11617_s1 + $0x7c8] sm:$0xff] }
 0x2d8   :  { %12936 = vst [vmem:[#allocation181_spill] sm:$0xff] %v7496_v48  ;;  %1416 = vmatpush.msra.mxu1 %v7502_v49  ;;  %1436 = vmatpush.msra.mxu2 %v7508_v43  ;;  %v7520_v48 = vld [vmem:[%s11617_s1 + $0x380] sm:$0xff] }
 0x2d9   :  { %12937 = vst [vmem:[#allocation176_spill] sm:$0xff] %v7502_v49  ;;  %1456 = vmatpush.msra.mxu3 %v7514_v11  ;;  %1397 = vmatpush.msra.mxu0 %v7520_v48  ;;  %v7526_v49 = vld [vmem:[%s11617_s1 + $0x780] sm:$0xff] }
 0x2da   :  { %12938 = vst [vmem:[#allocation177_spill] sm:$0xff] %v7508_v43  ;;  %1417 = vmatpush.msra.mxu1 %v7526_v49  ;;  %v7532_v43 = vld [vmem:[%s11617_s1 + $0x388] sm:$0xff] }
 0x2db   :  { %12939 = vst [vmem:[#allocation184_spill] sm:$0xff] %v7514_v11  ;;  %1437 = vmatpush.msra.mxu2 %v7532_v43  ;;  %v7538_v11 = vld [vmem:[%s11617_s1 + $0x788] sm:$0xff] }
 0x2dc   :  { %12940 = vst [vmem:[#allocation185_spill] sm:$0xff] %v7520_v48  ;;  %1457 = vmatpush.msra.mxu3 %v7538_v11  ;;  %v7544_v48 = vld [vmem:[%s11617_s1 + $0x340] sm:$0xff] }
 0x2dd   :  { %12941 = vst [vmem:[#allocation178_spill] sm:$0xff] %v7526_v49  ;;  %1398 = vmatpush.msra.mxu0 %v7544_v48  ;;  %v7550_v49 = vld [vmem:[%s11617_s1 + $0x740] sm:$0xff] }
 0x2de   :  { %12942 = vst [vmem:[#allocation179_spill] sm:$0xff] %v7532_v43  ;;  %1418 = vmatpush.msra.mxu1 %v7550_v49  ;;  %v7556_v43 = vld [vmem:[%s11617_s1 + $0x348] sm:$0xff] }
 0x2df   :  { %12943 = vst [vmem:[#allocation188_spill] sm:$0xff] %v7538_v11  ;;  %1438 = vmatpush.msra.mxu2 %v7556_v43  ;;  %v7562_v11 = vld [vmem:[%s11617_s1 + $0x748] sm:$0xff] }
 0x2e0   :  { %12944 = vst [vmem:[#allocation189_spill] sm:$0xff] %v7544_v48  ;;  %1458 = vmatpush.msra.mxu3 %v7562_v11  ;;  %v7568_v48 = vld [vmem:[%s11617_s1 + $0x300] sm:$0xff] }
 0x2e1   :  { %12945 = vst [vmem:[#allocation182_spill] sm:$0xff] %v7550_v49  ;;  %1399 = vmatpush.msra.mxu0 %v7568_v48  ;;  %v7574_v49 = vld [vmem:[%s11617_s1 + $0x700] sm:$0xff] }
 0x2e2   :  { %12946 = vst [vmem:[#allocation183_spill] sm:$0xff] %v7556_v43  ;;  %1419 = vmatpush.msra.mxu1 %v7574_v49  ;;  %v7580_v43 = vld [vmem:[%s11617_s1 + $0x308] sm:$0xff] }
 0x2e3   :  { %12947 = vst [vmem:[#allocation192_spill] sm:$0xff] %v7562_v11  ;;  %1439 = vmatpush.msra.mxu2 %v7580_v43  ;;  %v7586_v11 = vld [vmem:[%s11617_s1 + $0x708] sm:$0xff] }
 0x2e4   :  { %12948 = vst [vmem:[#allocation193_spill] sm:$0xff] %v7568_v48  ;;  %1459 = vmatpush.msra.mxu3 %v7586_v11  ;;  %v7592_v48 = vld [vmem:[%s11617_s1 + $0x2c0] sm:$0xff] }
 0x2e5   :  { %12949 = vst [vmem:[#allocation186_spill] sm:$0xff] %v7574_v49  ;;  %1400 = vmatpush.msra.mxu0 %v7592_v48  ;;  %v7598_v49 = vld [vmem:[%s11617_s1 + $0x6c0] sm:$0xff] }
 0x2e6   :  { %12950 = vst [vmem:[#allocation187_spill] sm:$0xff] %v7580_v43  ;;  %1420 = vmatpush.msra.mxu1 %v7598_v49  ;;  %v7604_v43 = vld [vmem:[%s11617_s1 + $0x2c8] sm:$0xff] }
 0x2e7   :  { %12951 = vst [vmem:[#allocation190_spill] sm:$0xff] %v7586_v11  ;;  %1440 = vmatpush.msra.mxu2 %v7604_v43  ;;  %v7610_v11 = vld [vmem:[%s11617_s1 + $0x6c8] sm:$0xff]  ;;  %1401 = vmatpush.msra.mxu0 %v6046_v50  ;;  %v12954_v50 = vld [vmem:[#allocation2_spill] sm:$0xff] }
 0x2e8   :  { %12952 = vst [vmem:[#allocation191_spill] sm:$0xff] %v7598_v49  ;;  %1460 = vmatpush.msra.mxu3 %v7610_v11  ;;  %1421 = vmatpush.msra.mxu1 %v6052_v51  ;;  %v7618_v49 = vld [vmem:[%s11617_s1 + $0x288] sm:$0xff] }
 0x2e9   :  { %12953 = vst [vmem:[#allocation194_spill] sm:$0xff] %v7604_v43  ;;  %1441 = vmatpush.msra.mxu2 %v7618_v49  ;;  %v7624_v43 = vld [vmem:[%s11617_s1 + $0x688] sm:$0xff]  ;;  %1402 = vmatpush.msra.mxu0 %v6060_v9  ;;  %v12956_v9 = vld [vmem:[#allocation8_spill] sm:$0xff] }
 0x2ea   :  { %1461 = vmatpush.msra.mxu3 %v7624_v43  ;;  %1422 = vmatpush.msra.mxu1 %v6066_v19  ;;  %v12955_v51 = vld [vmem:[#allocation7_spill] sm:$0xff] }
 0x2eb   :  { %1442 = vmatpush.msra.mxu2 %v6072_v17  ;;  %1403 = vmatpush.msra.mxu0 %v6084_v52  ;;  %v12957_v19 = vld [vmem:[#allocation3_spill] sm:$0xff]  ;;  %v12958_v17 = vld [vmem:[#allocation4_spill] sm:$0xff] }
 0x2ec   :  { %1462 = vmatpush.msra.mxu3 %v6078_v18  ;;  %1423 = vmatpush.msra.mxu1 %v6090_v53  ;;  %v12959_v18 = vld [vmem:[#allocation11_spill] sm:$0xff]  ;;  %v12960_v52 = vld [vmem:[#allocation12_spill] sm:$0xff]  ;;  %v12961_v53 = vld [vmem:[#allocation5_spill] sm:$0xff] }
 0x2ed   :  { %1443 = vmatpush.msra.mxu2 %v6096_v54  ;;  %1404 = vmatpush.msra.mxu0 %v6108_v56  ;;  %v12962_v54 = vld [vmem:[#allocation6_spill] sm:$0xff]  ;;  %v12964_v56 = vld [vmem:[#allocation16_spill] sm:$0xff] }
 0x2ee   :  { %1463 = vmatpush.msra.mxu3 %v6102_v55  ;;  %1424 = vmatpush.msra.mxu1 %v6114_v57  ;;  %v12963_v55 = vld [vmem:[#allocation15_spill] sm:$0xff]  ;;  %v12965_v57 = vld [vmem:[#allocation9_spill] sm:$0xff] }
 0x2ef   :  { %1444 = vmatpush.msra.mxu2 %v6120_v58  ;;  %1405 = vmatpush.msra.mxu0 %v6132_v60  ;;  %v12966_v58 = vld [vmem:[#allocation10_spill] sm:$0xff]  ;;  %v12968_v60 = vld [vmem:[#allocation20_spill] sm:$0xff] }
 0x2f0   :  { %1464 = vmatpush.msra.mxu3 %v6126_v59  ;;  %1425 = vmatpush.msra.mxu1 %v6138_v61  ;;  %v12967_v59 = vld [vmem:[#allocation19_spill] sm:$0xff]  ;;  %v12969_v61 = vld [vmem:[#allocation13_spill] sm:$0xff] }
 0x2f1   :  { %1445 = vmatpush.msra.mxu2 %v6144_v62  ;;  %1406 = vmatpush.msra.mxu0 %v6156_v0  ;;  %v12970_v62 = vld [vmem:[#allocation14_spill] sm:$0xff]  ;;  %v12972_v0 = vld [vmem:[#allocation24_spill] sm:$0xff] }
 0x2f2   :  { %1465 = vmatpush.msra.mxu3 %v6150_v63  ;;  %1426 = vmatpush.msra.mxu1 %v6162_v1  ;;  %v12971_v63 = vld [vmem:[#allocation23_spill] sm:$0xff]  ;;  %v12973_v1 = vld [vmem:[#allocation17_spill] sm:$0xff] }
 0x2f3   :  { %1446 = vmatpush.msra.mxu2 %v6168_v2  ;;  %1407 = vmatpush.msra.mxu0 %v6180_v4  ;;  %v12974_v2 = vld [vmem:[#allocation18_spill] sm:$0xff]  ;;  %v12976_v4 = vld [vmem:[#allocation28_spill] sm:$0xff] }
 0x2f4   :  { %1466 = vmatpush.msra.mxu3 %v6174_v3  ;;  %1427 = vmatpush.msra.mxu1 %v6186_v6  ;;  %v12975_v3 = vld [vmem:[#allocation27_spill] sm:$0xff]  ;;  %v12977_v6 = vld [vmem:[#allocation21_spill] sm:$0xff] }
 0x2f5   :  { %1447 = vmatpush.msra.mxu2 %v6192_v7  ;;  %1408 = vmatpush.msra.mxu0 %v6204_v14  ;;  %v12978_v7 = vld [vmem:[#allocation22_spill] sm:$0xff]  ;;  %v12980_v14 = vld [vmem:[#allocation32_spill] sm:$0xff] }
 0x2f6   :  { %1467 = vmatpush.msra.mxu3 %v6198_v8  ;;  %1428 = vmatpush.msra.mxu1 %v6210_v15  ;;  %v12979_v8 = vld [vmem:[#allocation31_spill] sm:$0xff]  ;;  %v12981_v15 = vld [vmem:[#allocation25_spill] sm:$0xff] }
 0x2f7   :  { %1448 = vmatpush.msra.mxu2 %v6216_v22  ;;  %1409 = vmatpush.msra.mxu0 %v6228_v24  ;;  %v12982_v22 = vld [vmem:[#allocation26_spill] sm:$0xff]  ;;  %v12984_v24 = vld [vmem:[#allocation36_spill] sm:$0xff] }
 0x2f8   :  { %1468 = vmatpush.msra.mxu3 %v6222_v23  ;;  %1429 = vmatpush.msra.mxu1 %v6234_v25  ;;  %v12983_v23 = vld [vmem:[#allocation35_spill] sm:$0xff]  ;;  %v12985_v25 = vld [vmem:[#allocation29_spill] sm:$0xff] }
 0x2f9   :  { %1449 = vmatpush.msra.mxu2 %v6240_v26  ;;  %1410 = vmatpush.msra.mxu0 %v6252_v28  ;;  %v12986_v26 = vld [vmem:[#allocation30_spill] sm:$0xff]  ;;  %v12988_v28 = vld [vmem:[#allocation40_spill] sm:$0xff] }
 0x2fa   :  { %1469 = vmatpush.msra.mxu3 %v6246_v27  ;;  %1430 = vmatpush.msra.mxu1 %v6258_v29  ;;  %v12987_v27 = vld [vmem:[#allocation39_spill] sm:$0xff]  ;;  %v12989_v29 = vld [vmem:[#allocation33_spill] sm:$0xff] }
 0x2fb   :  { %1450 = vmatpush.msra.mxu2 %v12954_v50  ;;  %1411 = vmatpush.msra.mxu0 %v12956_v9  ;;  %v12990_v50 = vld [vmem:[#allocation34_spill] sm:$0xff]  ;;  %v12992_v9 = vld [vmem:[#allocation44_spill] sm:$0xff] }
 0x2fc   :  { %1470 = vmatpush.msra.mxu3 %v12955_v51  ;;  %1431 = vmatpush.msra.mxu1 %v12957_v19  ;;  %v12991_v51 = vld [vmem:[#allocation43_spill] sm:$0xff]  ;;  %v12993_v19 = vld [vmem:[#allocation37_spill] sm:$0xff] }
 0x2fd   :  { %1451 = vmatpush.msra.mxu2 %v12958_v17  ;;  %1476 = vmatpush.msrb.mxu0 %v12960_v52  ;;  %v12994_v17 = vld [vmem:[#allocation38_spill] sm:$0xff] }
 0x2fe   :  { %1471 = vmatpush.msra.mxu3 %v12959_v18  ;;  %1496 = vmatpush.msrb.mxu1 %v12961_v53  ;;  %v12995_v18 = vld [vmem:[#allocation49_spill] sm:$0xff]  ;;  %v12996_v52 = vld [vmem:[#allocation50_spill] sm:$0xff] }
 0x2ff   :  { %1516 = vmatpush.msrb.mxu2 %v12962_v54  ;;  %1477 = vmatpush.msrb.mxu0 %v12964_v56  ;;  %v12997_v53 = vld [vmem:[#allocation41_spill] sm:$0xff]  ;;  %v12998_v54 = vld [vmem:[#allocation42_spill] sm:$0xff] }
 0x300   :  { %1536 = vmatpush.msrb.mxu3 %v12963_v55  ;;  %1497 = vmatpush.msrb.mxu1 %v12965_v57  ;;  %v12999_v55 = vld [vmem:[#allocation53_spill] sm:$0xff]  ;;  %v13000_v56 = vld [vmem:[#allocation54_spill] sm:$0xff] }
 0x301   :  { %1517 = vmatpush.msrb.mxu2 %v12966_v58  ;;  %1478 = vmatpush.msrb.mxu0 %v12968_v60  ;;  %v13001_v57 = vld [vmem:[#allocation45_spill] sm:$0xff]  ;;  %v13002_v58 = vld [vmem:[#allocation46_spill] sm:$0xff] }
 0x302   :  { %1537 = vmatpush.msrb.mxu3 %v12967_v59  ;;  %1498 = vmatpush.msrb.mxu1 %v12969_v61  ;;  %v13003_v59 = vld [vmem:[#allocation57_spill] sm:$0xff]  ;;  %v13004_v60 = vld [vmem:[#allocation58_spill] sm:$0xff]  ;;  %v13005_v61 = vld [vmem:[#allocation59_spill] sm:$0xff] }
 0x303   :  { %1518 = vmatpush.msrb.mxu2 %v12970_v62  ;;  %1479 = vmatpush.msrb.mxu0 %v12972_v0  ;;  %v13006_v62 = vld [vmem:[#allocation60_spill] sm:$0xff] }
 0x304   :  { %1538 = vmatpush.msrb.mxu3 %v12971_v63  ;;  %1499 = vmatpush.msrb.mxu1 %v12973_v1  ;;  %v13007_v63 = vld [vmem:[#allocation47_spill] sm:$0xff]  ;;  %v13008_v0 = vld [vmem:[#allocation48_spill] sm:$0xff] }
 0x305   :  { %1519 = vmatpush.msrb.mxu2 %v12974_v2  ;;  %1480 = vmatpush.msrb.mxu0 %v12976_v4  ;;  %v13009_v1 = vld [vmem:[#allocation63_spill] sm:$0xff]  ;;  %v13010_v2 = vld [vmem:[#allocation64_spill] sm:$0xff] }
 0x306   :  { %1539 = vmatpush.msrb.mxu3 %v12975_v3  ;;  %1500 = vmatpush.msrb.mxu1 %v12977_v6  ;;  %v13011_v3 = vld [vmem:[#allocation51_spill] sm:$0xff]  ;;  %v13012_v4 = vld [vmem:[#allocation52_spill] sm:$0xff] }
 0x307   :  { %1520 = vmatpush.msrb.mxu2 %v12978_v7  ;;  %1481 = vmatpush.msrb.mxu0 %v12980_v14  ;;  %v13013_v6 = vld [vmem:[#allocation67_spill] sm:$0xff]  ;;  %v13014_v7 = vld [vmem:[#allocation68_spill] sm:$0xff] }
 0x308   :  { %1540 = vmatpush.msrb.mxu3 %v12979_v8  ;;  %1501 = vmatpush.msrb.mxu1 %v12981_v15  ;;  %v13015_v8 = vld [vmem:[#allocation55_spill] sm:$0xff]  ;;  %v13016_v14 = vld [vmem:[#allocation56_spill] sm:$0xff] }
 0x309   :  { %1521 = vmatpush.msrb.mxu2 %v12982_v22  ;;  %1482 = vmatpush.msrb.mxu0 %v12984_v24  ;;  %v13017_v15 = vld [vmem:[#allocation71_spill] sm:$0xff]  ;;  %v13018_v22 = vld [vmem:[#allocation72_spill] sm:$0xff]  ;;  %v13020_v24 = vld [vmem:[#allocation62_spill] sm:$0xff] }
 0x30a   :  { %1541 = vmatpush.msrb.mxu3 %v12983_v23  ;;  %1502 = vmatpush.msrb.mxu1 %v12985_v25  ;;  %v13019_v23 = vld [vmem:[#allocation61_spill] sm:$0xff]  ;;  %v13021_v25 = vld [vmem:[#allocation75_spill] sm:$0xff] }
 0x30b   :  { %1522 = vmatpush.msrb.mxu2 %v12986_v26  ;;  %1483 = vmatpush.msrb.mxu0 %v12988_v28  ;;  %v13022_v26 = vld [vmem:[#allocation76_spill] sm:$0xff]  ;;  %v1040_v28 = vpop.f32.mrf.mxu0 }
 0x30c   :  { %1542 = vmatpush.msrb.mxu3 %v12987_v27  ;;  %1503 = vmatpush.msrb.mxu1 %v12989_v29  ;;  %v13023_v27 = vld [vmem:[#allocation65_spill] sm:$0xff]  ;;  %v1060_v29 = vpop.f32.mrf.mxu1 }
 0x30d   :  { %1523 = vmatpush.msrb.mxu2 %v12990_v50  ;;  %1484 = vmatpush.msrb.mxu0 %v12992_v9  ;;  %v1080_v50 = vpop.f32.mrf.mxu2 }
 0x30e   :  { %1543 = vmatpush.msrb.mxu3 %v12991_v51  ;;  %1504 = vmatpush.msrb.mxu1 %v12993_v19  ;;  %v1100_v51 = vpop.f32.mrf.mxu3 }
 0x30f   :  { %1524 = vmatpush.msrb.mxu2 %v12994_v17  ;;  %1485 = vmatpush.msrb.mxu0 %v12996_v52 }
 0x310   :  { %1544 = vmatpush.msrb.mxu3 %v12995_v18  ;;  %1505 = vmatpush.msrb.mxu1 %v12997_v53 }
 0x311   :  { %1525 = vmatpush.msrb.mxu2 %v12998_v54  ;;  %1486 = vmatpush.msrb.mxu0 %v13000_v56 }
 0x312   :  { %1545 = vmatpush.msrb.mxu3 %v12999_v55  ;;  %1506 = vmatpush.msrb.mxu1 %v13001_v57 }
 0x313   :  { %1526 = vmatpush.msrb.mxu2 %v13002_v58  ;;  %1487 = vmatpush.msrb.mxu0 %v13004_v60  ;;  %v1120_v9 = vpop.f32.mrf.mxu0 }
 0x314   :  { %1546 = vmatpush.msrb.mxu3 %v13003_v59  ;;  %1507 = vmatpush.msrb.mxu1 %v13005_v61  ;;  %v1140_v19 = vpop.f32.mrf.mxu1  ;;  %v1101_v59 = vadd.f32 %v1100_v51, %v1080_v50 }
 0x315   :  { %1527 = vmatpush.msrb.mxu2 %v13006_v62  ;;  %1488 = vmatpush.msrb.mxu0 %v13008_v0  ;;  %v1160_v17 = vpop.f32.mrf.mxu2  ;;  %v1141_v60 = vadd.f32 %v1140_v19, %v1120_v9 }
 0x316   :  { %1547 = vmatpush.msrb.mxu3 %v13007_v63  ;;  %1508 = vmatpush.msrb.mxu1 %v13009_v1  ;;  %v1180_v18 = vpop.f32.mrf.mxu3 }
 0x317   :  { %1528 = vmatpush.msrb.mxu2 %v13010_v2  ;;  %1489 = vmatpush.msrb.mxu0 %v13012_v4  ;;  %v1181_v56 = vadd.f32 %v1180_v18, %v1160_v17  ;;  %v3261_v2 = vld [vmem:[%s11618_s0 + $0x2] ss:$8 sm:$0xf]  ;;  %v1351_v4 = vrot.slane %v1101_v59, 7 }
 0x318   :  { %1548 = vmatpush.msrb.mxu3 %v13011_v3  ;;  %1509 = vmatpush.msrb.mxu1 %v13013_v6  ;;  %v1352_v6 = vrot.slane %v1141_v60, 6 }
 0x319   :  { %1529 = vmatpush.msrb.mxu2 %v13014_v7  ;;  %1490 = vmatpush.msrb.mxu0 %v13016_v14  ;;  %v1353_v62 = vrot.slane %v1181_v56, 5 }
 0x31a   :  { %1549 = vmatpush.msrb.mxu3 %v13015_v8  ;;  %1510 = vmatpush.msrb.mxu1 %v13017_v15  ;;  %v3262_v8 = vld [vmem:[%s11618_s0 + $0x2] ss:$8 sm:$0xf0]  ;;  %v1061_v15 = vadd.f32 %v1060_v29, %v1040_v28 }
 0x31b   :  { %1530 = vmatpush.msrb.mxu2 %v13018_v22  ;;  %1491 = vmatpush.msrb.mxu0 %v13020_v24  ;;  %v1200_v52 = vpop.f32.mrf.mxu0  ;;  %v1359_v22 = vsel %vm607_vm0, %v1352_v6, %v1353_v62  ;;  %v13050_v6 = vld [vmem:[#allocation104_spill] sm:$0xff] }
 0x31c   :  { %1550 = vmatpush.msrb.mxu3 %v13019_v23  ;;  %1511 = vmatpush.msrb.mxu1 %v13021_v25  ;;  %v1220_v53 = vpop.f32.mrf.mxu1 }
 0x31d   :  { %1531 = vmatpush.msrb.mxu2 %v13022_v26  ;;  %v1240_v54 = vpop.f32.mrf.mxu2  ;;  %v1221_v63 = vadd.f32 %v1220_v53, %v1200_v52  ;;  %v1020_v26 = vor.u32 %v3262_v8, %v3261_v2  ;;  %v13047_v2 = vld [vmem:[#allocation89_spill] sm:$0xff]  ;;  %v13052_v8 = vld [vmem:[#allocation94_spill] sm:$0xff] }
 0x31e   :  { %1551 = vmatpush.msrb.mxu3 %v13023_v27  ;;  %v1260_v55 = vpop.f32.mrf.mxu3  ;;  %v1358_v27 = vsel %vm605_vm1, %v1061_v15, %v1351_v4  ;;  %v13049_v4 = vld [vmem:[#allocation103_spill] sm:$0xff]  ;;  %v13054_v15 = vld [vmem:[#allocation108_spill] sm:$0xff] }
 0x31f   :  { %v1261_v61 = vadd.f32 %v1260_v55, %v1240_v54  ;;  %v1354_v23 = vrot.slane %v1221_v63, 4  ;;  %v1360_v9 = vsel %vm609_vm4, %v1358_v27, %v1359_v22  ;;  %v13055_v22 = vld [vmem:[#allocation97_spill] sm:$0xff]  ;;  %v13060_v27 = vld [vmem:[#allocation102_spill] sm:$0xff] }
 0x321   :  { %v1355_v7 = vrot.slane %v1261_v61, 3 }
 0x323   :  { %v1361_v50 = vsel %vm611_vm2, %v1354_v23, %v1355_v7  ;;  %v13051_v7 = vld [vmem:[#allocation93_spill] sm:$0xff]  ;;  %v13056_v23 = vld [vmem:[#allocation98_spill] sm:$0xff] }
 0x351   :  { %v1280_v57 = vpop.f32.mrf.mxu0 }
 0x352   :  { %v1300_v58 = vpop.f32.mrf.mxu1 }
 0x353   :  { %v1301_v0 = vadd.f32 %v1300_v58, %v1280_v57 }
 0x355   :  { %v1356_v24 = vrot.slane %v1301_v0, 2 }
 0x359   :  { %v1320_v1 = vpop.f32.mrf.mxu2 }
 0x35a   :  { %v1340_v3 = vpop.f32.mrf.mxu3 }
 0x35b   :  { %v1341_v14 = vadd.f32 %v1340_v3, %v1320_v1  ;;  %v13046_v1 = vld [vmem:[#allocation100_spill] sm:$0xff]  ;;  %v13048_v3 = vld [vmem:[#allocation90_spill] sm:$0xff] }
 0x35d   :  { %v1357_v25 = vrot.slane %v1341_v14, 1  ;;  %v13053_v14 = vld [vmem:[#allocation107_spill] sm:$0xff] }
 0x35f   :  { %v1362_v51 = vsel %vm613_vm3, %v1356_v24, %v1357_v25  ;;  %v13057_v24 = vld [vmem:[#allocation113_spill] sm:$0xff]  ;;  %v13058_v25 = vld [vmem:[#allocation114_spill] sm:$0xff] }
 0x360   :  { %v1363_v19 = vsel %vm615_vm5, %v1361_v50, %v1362_v51  ;;  %v13061_v50 = vld [vmem:[#allocation117_spill] sm:$0xff]  ;;  %v13062_v51 = vld [vmem:[#allocation118_spill] sm:$0xff] }
 0x361   :  { %v1364_v17 = vsel %vm617_vm6, %v1360_v9, %v1363_v19  ;;  %v13063_v9 = vld [vmem:[#allocation105_spill] sm:$0xff]  ;;  %v13064_v19 = vld [vmem:[#allocation106_spill] sm:$0xff] }
 0x362   :  { %v1366_v18 = vadd.f32 %v1364_v17, %v1020_v26  ;;  %v13059_v26 = vld [vmem:[#allocation101_spill] sm:$0xff] }
 0x363   :  { %v13065_v17 = vld [vmem:[#allocation121_spill] sm:$0xff] }
 0x364   :  { %v1367_v28 = vmul.f32 0.5, %v1366_v18  ;;  %v1372_v29 = vrot.slane %v1366_v18, 6  ;;  %v13066_v18 = vld [vmem:[#allocation122_spill] sm:$0xff] }
 0x366   :  { %3286 = vtanh.f32 %v1367_v28  ;;  %v13067_v28 = vld [vmem:[#allocation109_spill] sm:$0xff] }
 0x367   :  { %3288 = vtanh.f32 %v1372_v29  ;;  %v13068_v29 = vld [vmem:[#allocation110_spill] sm:$0xff] }
 0x36c   :  { %v3287_v52 = vpop.eup %3286 }
 0x36d   :  { %v1369_v53 = vmul.f32 0.5, %v3287_v52  ;;  %v3289_v56 = vpop.eup %3288  ;;  %v13069_v52 = vld [vmem:[#allocation123_spill] sm:$0xff] }
 0x36f   :  { %v1370_v54 = vadd.f32 0.5, %v1369_v53  ;;  %v13070_v53 = vld [vmem:[#allocation124_spill] sm:$0xff] }
 0x371   :  { %v1376_v55 = vrot.slane %v1370_v54, 2  ;;  %v1379_v58 = vmul.f32 %v3289_v56, %v1370_v54  ;;  %v1382_v60 = vrot.slane %v1370_v54, 4  ;;  %v13071_v54 = vld [vmem:[#allocation111_spill] sm:$0xff] }
 0x372   :  { %v13073_v56 = vld [vmem:[#allocation127_spill] sm:$0xff] }
 0x373   :  { %v1378_v57 = vmul.f32 %v1376_v55, %v6695_v47  ;;  %v13024_v47 = vld [vmem:[#allocation66_spill] sm:$0xff]  ;;  %v13072_v55 = vld [vmem:[#allocation112_spill] sm:$0xff] }
 0x375   :  { %v7745_v59 = vadd.f32 %v1379_v58, %v1378_v57  ;;  %v13074_v57 = vld [vmem:[#allocation128_spill] sm:$0xff]  ;;  %v13075_v58 = vld [vmem:[#allocation115_spill] sm:$0xff] }
 0x377   :  { %3290 = vtanh.f32 %v7745_v59 }
 0x37d   :  { %v3291_v61 = vpop.eup %3290 }
 0x37e   :  { %v1384_v62 = vmul.f32 %v3291_v61, %v1382_v60  ;;  %v13076_v60 = vld [vmem:[#allocation116_spill] sm:$0xff]  ;;  %v13077_v61 = vld [vmem:[#allocation131_spill] sm:$0xff] }
 0x380   :  { %1385 = vst [vmem:[%s11619_s2 + $0x2] sm:$0x1] %v1384_v62  ;;  %v7751_v63 = vperm.slane %v1384_v62, 1  ;;  %v7753_v0 = vperm.slane %v1384_v62, 0  ;;  %v13078_v62 = vld [vmem:[#allocation132_spill] sm:$0xff] }
 0x382   :  { %1389 = vst [vmem:[%s11619_s2 + $0xd] sm:$0x1] %v7751_v63  ;;  %1412 = vmatmul.f32.vlgmr.msra.gmra.mxu0 %v7753_v0  ;;  %1432 = vmatmul.f32.vlgmr.msra.gmra.mxu1 %v7751_v63 }
 0x383   :  { %1452 = vmatmul.f32.vlgmr.msra.gmra.mxu2 %v7753_v0  ;;  %1472 = vmatmul.f32.vlgmr.msra.gmra.mxu3 %v7751_v63 }
 0x384   :  { %1556 = vmatpush.msra.mxu0 %v6716_v5  ;;  %1576 = vmatpush.msra.mxu1 %v6722_v13  ;;  %v13025_v5 = vld [vmem:[#allocation79_spill] sm:$0xff]  ;;  %v13026_v13 = vld [vmem:[#allocation80_spill] sm:$0xff] }
 0x385   :  { %1596 = vmatpush.msra.mxu2 %v6728_v39  ;;  %1616 = vmatpush.msra.mxu3 %v6734_v40  ;;  %v13027_v39 = vld [vmem:[#allocation69_spill] sm:$0xff]  ;;  %v13028_v40 = vld [vmem:[#allocation70_spill] sm:$0xff] }
 0x386   :  { %1557 = vmatpush.msra.mxu0 %v6740_v38  ;;  %1577 = vmatpush.msra.mxu1 %v6746_v12  ;;  %v13029_v38 = vld [vmem:[#allocation83_spill] sm:$0xff]  ;;  %v13030_v12 = vld [vmem:[#allocation84_spill] sm:$0xff] }
 0x387   :  { %1597 = vmatpush.msra.mxu2 %v6752_v41  ;;  %1617 = vmatpush.msra.mxu3 %v6758_v10  ;;  %v13031_v41 = vld [vmem:[#allocation73_spill] sm:$0xff]  ;;  %v13032_v10 = vld [vmem:[#allocation74_spill] sm:$0xff] }
 0x388   :  { %1558 = vmatpush.msra.mxu0 %v6764_v21  ;;  %1578 = vmatpush.msra.mxu1 %v6770_v37  ;;  %v13033_v21 = vld [vmem:[#allocation87_spill] sm:$0xff]  ;;  %v13034_v37 = vld [vmem:[#allocation88_spill] sm:$0xff] }
 0x389   :  { %1598 = vmatpush.msra.mxu2 %v6776_v20  ;;  %1618 = vmatpush.msra.mxu3 %v6782_v44  ;;  %v13035_v20 = vld [vmem:[#allocation77_spill] sm:$0xff]  ;;  %v13036_v44 = vld [vmem:[#allocation78_spill] sm:$0xff] }
 0x38a   :  { %1559 = vmatpush.msra.mxu0 %v6788_v33  ;;  %1579 = vmatpush.msra.mxu1 %v6794_v34  ;;  %v13037_v33 = vld [vmem:[#allocation91_spill] sm:$0xff]  ;;  %v13038_v34 = vld [vmem:[#allocation92_spill] sm:$0xff] }
 0x38b   :  { %1599 = vmatpush.msra.mxu2 %v6800_v31  ;;  %1619 = vmatpush.msra.mxu3 %v6806_v36  ;;  %v13039_v31 = vld [vmem:[#allocation81_spill] sm:$0xff]  ;;  %v13040_v36 = vld [vmem:[#allocation82_spill] sm:$0xff] }
 0x38c   :  { %1492 = vmatmul.f32.vlgmr.msrb.gmra.mxu0 %v7753_v0  ;;  %1512 = vmatmul.f32.vlgmr.msrb.gmra.mxu1 %v7751_v63 }
 0x38d   :  { %1532 = vmatmul.f32.vlgmr.msrb.gmra.mxu2 %v7753_v0  ;;  %1552 = vmatmul.f32.vlgmr.msrb.gmra.mxu3 %v7751_v63 }
 0x38e   :  { %1560 = vmatpush.msra.mxu0 %v6816_v35  ;;  %1580 = vmatpush.msra.mxu1 %v6822_v16  ;;  %v13041_v35 = vld [vmem:[#allocation95_spill] sm:$0xff]  ;;  %v13042_v16 = vld [vmem:[#allocation96_spill] sm:$0xff] }
 0x38f   :  { %1600 = vmatpush.msra.mxu2 %v6828_v45  ;;  %1620 = vmatpush.msra.mxu3 %v6834_v32  ;;  %v13043_v45 = vld [vmem:[#allocation85_spill] sm:$0xff]  ;;  %v13044_v32 = vld [vmem:[#allocation86_spill] sm:$0xff] }
 0x390   :  { %1561 = vmatpush.msra.mxu0 %v6840_v30  ;;  %1581 = vmatpush.msra.mxu1 %v13024_v47  ;;  %v13045_v30 = vld [vmem:[#allocation99_spill] sm:$0xff] }
 0x391   :  { %1601 = vmatpush.msra.mxu2 %v13025_v5  ;;  %1621 = vmatpush.msra.mxu3 %v13026_v13  ;;  %v13079_v47 = vld [vmem:[#allocation119_spill] sm:$0xff]  ;;  %v13080_v5 = vld [vmem:[#allocation120_spill] sm:$0xff] }
 0x392   :  { %1562 = vmatpush.msra.mxu0 %v13027_v39  ;;  %1582 = vmatpush.msra.mxu1 %v13028_v40  ;;  %v13081_v13 = vld [vmem:[#allocation135_spill] sm:$0xff]  ;;  %v13082_v39 = vld [vmem:[#allocation136_spill] sm:$0xff]  ;;  %v13083_v40 = vld [vmem:[#allocation125_spill] sm:$0xff] }
 0x393   :  { %1602 = vmatpush.msra.mxu2 %v13029_v38  ;;  %1622 = vmatpush.msra.mxu3 %v13030_v12  ;;  %v13084_v38 = vld [vmem:[#allocation126_spill] sm:$0xff]  ;;  %v13085_v12 = vld [vmem:[#allocation139_spill] sm:$0xff] }
 0x394   :  { %1563 = vmatpush.msra.mxu0 %v13031_v41  ;;  %1583 = vmatpush.msra.mxu1 %v13032_v10  ;;  %v13086_v41 = vld [vmem:[#allocation140_spill] sm:$0xff]  ;;  %v13087_v10 = vld [vmem:[#allocation129_spill] sm:$0xff] }
 0x395   :  { %1603 = vmatpush.msra.mxu2 %v13033_v21  ;;  %1623 = vmatpush.msra.mxu3 %v13034_v37  ;;  %v13088_v21 = vld [vmem:[#allocation130_spill] sm:$0xff]  ;;  %v13089_v37 = vld [vmem:[#allocation143_spill] sm:$0xff] }
 0x396   :  { %1564 = vmatpush.msra.mxu0 %v13035_v20  ;;  %1584 = vmatpush.msra.mxu1 %v13036_v44  ;;  %v13090_v20 = vld [vmem:[#allocation144_spill] sm:$0xff]  ;;  %v13091_v44 = vld [vmem:[#allocation133_spill] sm:$0xff] }
 0x397   :  { %1604 = vmatpush.msra.mxu2 %v13037_v33  ;;  %1624 = vmatpush.msra.mxu3 %v13038_v34  ;;  %v13092_v33 = vld [vmem:[#allocation134_spill] sm:$0xff]  ;;  %v13093_v34 = vld [vmem:[#allocation147_spill] sm:$0xff] }
 0x398   :  { %1565 = vmatpush.msra.mxu0 %v13039_v31  ;;  %1585 = vmatpush.msra.mxu1 %v13040_v36  ;;  %v13094_v31 = vld [vmem:[#allocation148_spill] sm:$0xff]  ;;  %v13095_v36 = vld [vmem:[#allocation137_spill] sm:$0xff] }
 0x399   :  { %1605 = vmatpush.msra.mxu2 %v13041_v35  ;;  %1625 = vmatpush.msra.mxu3 %v13042_v16  ;;  %v13096_v35 = vld [vmem:[#allocation138_spill] sm:$0xff]  ;;  %v13097_v16 = vld [vmem:[#allocation151_spill] sm:$0xff] }
 0x39a   :  { %1566 = vmatpush.msra.mxu0 %v13043_v45  ;;  %1586 = vmatpush.msra.mxu1 %v13044_v32  ;;  %v13098_v45 = vld [vmem:[#allocation152_spill] sm:$0xff]  ;;  %v13099_v32 = vld [vmem:[#allocation141_spill] sm:$0xff] }
 0x39b   :  { %1606 = vmatpush.msra.mxu2 %v13045_v30  ;;  %1626 = vmatpush.msra.mxu3 %v13046_v1  ;;  %v13100_v30 = vld [vmem:[#allocation142_spill] sm:$0xff]  ;;  %v13101_v1 = vld [vmem:[#allocation155_spill] sm:$0xff] }
 0x39c   :  { %1567 = vmatpush.msra.mxu0 %v13047_v2  ;;  %1587 = vmatpush.msra.mxu1 %v13048_v3  ;;  %v13102_v2 = vld [vmem:[#allocation156_spill] sm:$0xff]  ;;  %v13103_v3 = vld [vmem:[#allocation145_spill] sm:$0xff] }
 0x39d   :  { %1607 = vmatpush.msra.mxu2 %v13049_v4  ;;  %1627 = vmatpush.msra.mxu3 %v13050_v6  ;;  %v13104_v4 = vld [vmem:[#allocation146_spill] sm:$0xff]  ;;  %v13105_v6 = vld [vmem:[#allocation159_spill] sm:$0xff] }
 0x39e   :  { %1568 = vmatpush.msra.mxu0 %v13051_v7  ;;  %1588 = vmatpush.msra.mxu1 %v13052_v8  ;;  %v13106_v7 = vld [vmem:[#allocation160_spill] sm:$0xff]  ;;  %v13107_v8 = vld [vmem:[#allocation149_spill] sm:$0xff] }
 0x39f   :  { %1608 = vmatpush.msra.mxu2 %v13053_v14  ;;  %1628 = vmatpush.msra.mxu3 %v13054_v15  ;;  %v13108_v14 = vld [vmem:[#allocation150_spill] sm:$0xff]  ;;  %v13109_v15 = vld [vmem:[#allocation163_spill] sm:$0xff] }
 0x3a0   :  { %1569 = vmatpush.msra.mxu0 %v13055_v22  ;;  %1589 = vmatpush.msra.mxu1 %v13056_v23  ;;  %v13110_v22 = vld [vmem:[#allocation164_spill] sm:$0xff]  ;;  %v13111_v23 = vld [vmem:[#allocation153_spill] sm:$0xff] }
 0x3a1   :  { %1609 = vmatpush.msra.mxu2 %v13057_v24  ;;  %1629 = vmatpush.msra.mxu3 %v13058_v25  ;;  %v13112_v24 = vld [vmem:[#allocation154_spill] sm:$0xff]  ;;  %v13113_v25 = vld [vmem:[#allocation167_spill] sm:$0xff] }
 0x3a2   :  { %1570 = vmatpush.msra.mxu0 %v13059_v26  ;;  %1590 = vmatpush.msra.mxu1 %v13060_v27  ;;  %v13114_v26 = vld [vmem:[#allocation157_spill] sm:$0xff]  ;;  %v13115_v27 = vld [vmem:[#allocation158_spill] sm:$0xff] }
 0x3a3   :  { %1610 = vmatpush.msra.mxu2 %v13061_v50  ;;  %1630 = vmatpush.msra.mxu3 %v13062_v51  ;;  %v13116_v50 = vld [vmem:[#allocation170_spill] sm:$0xff]  ;;  %v13117_v51 = vld [vmem:[#allocation171_spill] sm:$0xff] }
 0x3a4   :  { %1571 = vmatpush.msra.mxu0 %v13063_v9  ;;  %1591 = vmatpush.msra.mxu1 %v13064_v19  ;;  %v13118_v9 = vld [vmem:[#allocation161_spill] sm:$0xff]  ;;  %v13119_v19 = vld [vmem:[#allocation162_spill] sm:$0xff] }
 0x3a5   :  { %1611 = vmatpush.msra.mxu2 %v13065_v17  ;;  %1631 = vmatpush.msra.mxu3 %v13066_v18  ;;  %v13120_v17 = vld [vmem:[#allocation174_spill] sm:$0xff]  ;;  %v13121_v18 = vld [vmem:[#allocation175_spill] sm:$0xff] }
 0x3a6   :  { %1572 = vmatmul.f32.vlgmr.msra.gmra.mxu0 %v7753_v0  ;;  %1592 = vmatmul.f32.vlgmr.msra.gmra.mxu1 %v7751_v63 }
 0x3a7   :  { %1612 = vmatmul.f32.vlgmr.msra.gmra.mxu2 %v7753_v0  ;;  %1632 = vmatmul.f32.vlgmr.msra.gmra.mxu3 %v7751_v63 }
 0x3a8   :  { %1636 = vmatpush.msrb.mxu0 %v13067_v28  ;;  %1656 = vmatpush.msrb.mxu1 %v13068_v29  ;;  %v13122_v28 = vld [vmem:[#allocation165_spill] sm:$0xff]  ;;  %v13123_v29 = vld [vmem:[#allocation166_spill] sm:$0xff] }
 0x3a9   :  { %1676 = vmatpush.msrb.mxu2 %v13069_v52  ;;  %1696 = vmatpush.msrb.mxu3 %v13070_v53  ;;  %v13124_v52 = vld [vmem:[#allocation168_spill] sm:$0xff]  ;;  %v13125_v53 = vld [vmem:[#allocation169_spill] sm:$0xff] }
 0x3aa   :  { %1637 = vmatpush.msrb.mxu0 %v13071_v54  ;;  %1657 = vmatpush.msrb.mxu1 %v13072_v55  ;;  %v13126_v54 = vld [vmem:[#allocation172_spill] sm:$0xff]  ;;  %v13127_v55 = vld [vmem:[#allocation173_spill] sm:$0xff] }
 0x3ab   :  { %1677 = vmatpush.msrb.mxu2 %v13073_v56  ;;  %1697 = vmatpush.msrb.mxu3 %v13074_v57  ;;  %v13128_v56 = vld [vmem:[#allocation180_spill] sm:$0xff]  ;;  %v13129_v57 = vld [vmem:[#allocation181_spill] sm:$0xff] }
 0x3ac   :  { %1638 = vmatpush.msrb.mxu0 %v13075_v58  ;;  %1658 = vmatpush.msrb.mxu1 %v13076_v60  ;;  %v13130_v58 = vld [vmem:[#allocation176_spill] sm:$0xff]  ;;  %v13131_v60 = vld [vmem:[#allocation177_spill] sm:$0xff] }
 0x3ad   :  { %1678 = vmatpush.msrb.mxu2 %v13077_v61  ;;  %1698 = vmatpush.msrb.mxu3 %v13078_v62  ;;  %v13133_v61 = vld [vmem:[#allocation185_spill] sm:$0xff]  ;;  %v13134_v62 = vld [vmem:[#allocation178_spill] sm:$0xff] }
 0x3ae   :  { %1639 = vmatpush.msrb.mxu0 %v13079_v47  ;;  %1659 = vmatpush.msrb.mxu1 %v13080_v5  ;;  %v13136_v47 = vld [vmem:[#allocation188_spill] sm:$0xff]  ;;  %v13137_v5 = vld [vmem:[#allocation189_spill] sm:$0xff] }
 0x3af   :  { %1679 = vmatpush.msrb.mxu2 %v13081_v13  ;;  %1699 = vmatpush.msrb.mxu3 %v13082_v39  ;;  %v13140_v13 = vld [vmem:[#allocation192_spill] sm:$0xff]  ;;  %v13141_v39 = vld [vmem:[#allocation193_spill] sm:$0xff] }
 0x3b0   :  { %1640 = vmatpush.msrb.mxu0 %v13083_v40  ;;  %1660 = vmatpush.msrb.mxu1 %v13084_v38  ;;  %v13142_v40 = vld [vmem:[#allocation186_spill] sm:$0xff]  ;;  %v13143_v38 = vld [vmem:[#allocation187_spill] sm:$0xff] }
 0x3b1   :  { %1680 = vmatpush.msrb.mxu2 %v13085_v12  ;;  %1700 = vmatpush.msrb.mxu3 %v13086_v41  ;;  %v13144_v12 = vld [vmem:[#allocation190_spill] sm:$0xff]  ;;  %v13145_v41 = vld [vmem:[#allocation191_spill] sm:$0xff] }
 0x3b2   :  { %1641 = vmatpush.msrb.mxu0 %v13087_v10  ;;  %1661 = vmatpush.msrb.mxu1 %v13088_v21  ;;  %v13146_v10 = vld [vmem:[#allocation194_spill] sm:$0xff] }
 0x3b3   :  { %1681 = vmatpush.msrb.mxu2 %v13089_v37  ;;  %1701 = vmatpush.msrb.mxu3 %v13090_v20  ;;  %v7926_v21 = vld [vmem:[%s11617_s1 + $0x280] sm:$0xff] }
 0x3b4   :  { %1642 = vmatpush.msrb.mxu0 %v13091_v44  ;;  %1662 = vmatpush.msrb.mxu1 %v13092_v33  ;;  %v7932_v37 = vld [vmem:[%s11617_s1 + $0x680] sm:$0xff]  ;;  %v7976_v33 = vld [vmem:[%s11617_s1 + $0x208] sm:$0xff] }
 0x3b5   :  { %1682 = vmatpush.msrb.mxu2 %v13093_v34  ;;  %1702 = vmatpush.msrb.mxu3 %v13094_v31  ;;  %v7964_v20 = vld [vmem:[%s11617_s1 + $0x200] sm:$0xff]  ;;  %v7982_v34 = vld [vmem:[%s11617_s1 + $0x608] sm:$0xff] }
 0x3b6   :  { %1643 = vmatpush.msrb.mxu0 %v13095_v36  ;;  %1663 = vmatpush.msrb.mxu1 %v13096_v35  ;;  %v7970_v44 = vld [vmem:[%s11617_s1 + $0x600] sm:$0xff]  ;;  %v8000_v35 = vld [vmem:[%s11617_s1 + $0x1c8] sm:$0xff] }
 0x3b7   :  { %1683 = vmatpush.msrb.mxu2 %v13097_v16  ;;  %1703 = vmatpush.msrb.mxu3 %v13098_v45  ;;  %v7988_v31 = vld [vmem:[%s11617_s1 + $0x1c0] sm:$0xff]  ;;  %v8006_v16 = vld [vmem:[%s11617_s1 + $0x5c8] sm:$0xff] }
 0x3b8   :  { %1644 = vmatpush.msrb.mxu0 %v13099_v32  ;;  %1664 = vmatpush.msrb.mxu1 %v13100_v30  ;;  %v7994_v36 = vld [vmem:[%s11617_s1 + $0x5c0] sm:$0xff]  ;;  %v8024_v30 = vld [vmem:[%s11617_s1 + $0x188] sm:$0xff] }
 0x3b9   :  { %1684 = vmatpush.msrb.mxu2 %v13101_v1  ;;  %1704 = vmatpush.msrb.mxu3 %v13102_v2  ;;  %v8012_v45 = vld [vmem:[%s11617_s1 + $0x180] sm:$0xff]  ;;  %v8030_v1 = vld [vmem:[%s11617_s1 + $0x588] sm:$0xff] }
 0x3ba   :  { %1645 = vmatpush.msrb.mxu0 %v13103_v3  ;;  %1665 = vmatpush.msrb.mxu1 %v13104_v4  ;;  %v8018_v32 = vld [vmem:[%s11617_s1 + $0x580] sm:$0xff]  ;;  %v8048_v4 = vld [vmem:[%s11617_s1 + $0x148] sm:$0xff] }
 0x3bb   :  { %1685 = vmatpush.msrb.mxu2 %v13105_v6  ;;  %1705 = vmatpush.msrb.mxu3 %v13106_v7  ;;  %v8036_v2 = vld [vmem:[%s11617_s1 + $0x140] sm:$0xff]  ;;  %v8054_v6 = vld [vmem:[%s11617_s1 + $0x548] sm:$0xff] }
 0x3bc   :  { %1646 = vmatpush.msrb.mxu0 %v13107_v8  ;;  %1666 = vmatpush.msrb.mxu1 %v13108_v14  ;;  %v8042_v3 = vld [vmem:[%s11617_s1 + $0x540] sm:$0xff]  ;;  %v8072_v14 = vld [vmem:[%s11617_s1 + $0x108] sm:$0xff] }
 0x3bd   :  { %1686 = vmatpush.msrb.mxu2 %v13109_v15  ;;  %1706 = vmatpush.msrb.mxu3 %v13110_v22  ;;  %v8060_v7 = vld [vmem:[%s11617_s1 + $0x100] sm:$0xff]  ;;  %v8078_v15 = vld [vmem:[%s11617_s1 + $0x508] sm:$0xff] }
 0x3be   :  { %1647 = vmatpush.msrb.mxu0 %v13111_v23  ;;  %1667 = vmatpush.msrb.mxu1 %v13112_v24  ;;  %v8066_v8 = vld [vmem:[%s11617_s1 + $0x500] sm:$0xff]  ;;  %v8096_v24 = vld [vmem:[%s11617_s1 + $0xc8] sm:$0xff] }
 0x3bf   :  { %1687 = vmatpush.msrb.mxu2 %v13113_v25  ;;  %1707 = vmatpush.msrb.mxu3 %v13114_v26  ;;  %v8084_v22 = vld [vmem:[%s11617_s1 + $0xc0] sm:$0xff]  ;;  %v8102_v25 = vld [vmem:[%s11617_s1 + $0x4c8] sm:$0xff] }
 0x3c0   :  { %1648 = vmatpush.msrb.mxu0 %v13115_v27  ;;  %1668 = vmatpush.msrb.mxu1 %v13116_v50  ;;  %v8090_v23 = vld [vmem:[%s11617_s1 + $0x4c0] sm:$0xff]  ;;  %v8120_v50 = vld [vmem:[%s11617_s1 + $0x88] sm:$0xff] }
 0x3c1   :  { %1688 = vmatpush.msrb.mxu2 %v13117_v51  ;;  %1708 = vmatpush.msrb.mxu3 %v13118_v9  ;;  %v8108_v26 = vld [vmem:[%s11617_s1 + $0x80] sm:$0xff]  ;;  %v8126_v51 = vld [vmem:[%s11617_s1 + $0x488] sm:$0xff] }
 0x3c2   :  { %1649 = vmatpush.msrb.mxu0 %v13119_v19  ;;  %1669 = vmatpush.msrb.mxu1 %v13120_v17  ;;  %v8114_v27 = vld [vmem:[%s11617_s1 + $0x480] sm:$0xff]  ;;  %v8144_v17 = vld [vmem:[%s11617_s1 + $0x48] sm:$0xff] }
 0x3c3   :  { %1689 = vmatpush.msrb.mxu2 %v13121_v18  ;;  %1709 = vmatpush.msrb.mxu3 %v13122_v28  ;;  %v8132_v9 = vld [vmem:[%s11617_s1 + $0x40] sm:$0xff]  ;;  %13147 = vst [vmem:[#allocation2_spill] sm:$0xff] %v8144_v17  ;;  %v8150_v18 = vld [vmem:[%s11617_s1 + $0x448] sm:$0xff] }
 0x3c4   :  { %1650 = vmatpush.msrb.mxu0 %v13123_v29  ;;  %1670 = vmatpush.msrb.mxu1 %v13124_v52  ;;  %v8138_v19 = vld [vmem:[%s11617_s1 + $0x440] sm:$0xff]  ;;  %13148 = vst [vmem:[#allocation7_spill] sm:$0xff] %v8150_v18  ;;  %v8168_v52 = vld [vmem:[%s11617_s1 + $0x8] sm:$0xff] }
 0x3c5   :  { %1690 = vmatpush.msrb.mxu2 %v13125_v53  ;;  %1710 = vmatpush.msrb.mxu3 %v13126_v54  ;;  %v8156_v28 = vld [vmem:[%s11617_s1] sm:$0xff]  ;;  %13151 = vst [vmem:[#allocation4_spill] sm:$0xff] %v8168_v52  ;;  %v8174_v53 = vld [vmem:[%s11617_s1 + $0x408] sm:$0xff]  ;;  %v8180_v54 = vld [vmem:[%s11617_s1 + $0x3d0] sm:$0xff] }
 0x3c6   :  { %1651 = vmatpush.msrb.mxu0 %v7468_v46  ;;  %1671 = vmatpush.msrb.mxu1 %v13127_v55  ;;  %v13132_v46 = vld [vmem:[#allocation184_spill] sm:$0xff]  ;;  %13149 = vst [vmem:[#allocation8_spill] sm:$0xff] %v8156_v28  ;;  %v8162_v29 = vld [vmem:[%s11617_s1 + $0x400] sm:$0xff] }
 0x3c7   :  { %1691 = vmatpush.msrb.mxu2 %v13128_v56  ;;  %1711 = vmatpush.msrb.mxu3 %v7486_v42  ;;  %v13135_v42 = vld [vmem:[#allocation179_spill] sm:$0xff]  ;;  %13150 = vst [vmem:[#allocation3_spill] sm:$0xff] %v8162_v29  ;;  %v8186_v55 = vld [vmem:[%s11617_s1 + $0x7d0] sm:$0xff]  ;;  %v8192_v56 = vld [vmem:[%s11617_s1 + $0x3d8] sm:$0xff] }
 0x3c8   :  { %1652 = vmatmul.f32.vlgmr.msrb.gmra.mxu0 %v7753_v0  ;;  %1672 = vmatmul.f32.vlgmr.msrb.gmra.mxu1 %v7751_v63  ;;  %13152 = vst [vmem:[#allocation11_spill] sm:$0xff] %v8174_v53 }
 0x3c9   :  { %1692 = vmatmul.f32.vlgmr.msrb.gmra.mxu2 %v7753_v0  ;;  %1712 = vmatmul.f32.vlgmr.msrb.gmra.mxu3 %v7751_v63  ;;  %v13138_v0 = vld [vmem:[#allocation182_spill] sm:$0xff]  ;;  %v13139_v63 = vld [vmem:[#allocation183_spill] sm:$0xff]  ;;  %13153 = vst [vmem:[#allocation12_spill] sm:$0xff] %v8180_v54 }
 0x3ca   :  { %1769 = vmatpush.msra.mxu0 %v13129_v57  ;;  %1789 = vmatpush.msra.mxu1 %v13130_v58  ;;  %13154 = vst [vmem:[#allocation5_spill] sm:$0xff] %v8186_v55  ;;  %v8198_v57 = vld [vmem:[%s11617_s1 + $0x7d8] sm:$0xff]  ;;  %v8204_v58 = vld [vmem:[%s11617_s1 + $0x390] sm:$0xff] }
 0x3cb   :  { %1809 = vmatpush.msra.mxu2 %v13131_v60  ;;  %1829 = vmatpush.msra.mxu3 %v13132_v46  ;;  %13155 = vst [vmem:[#allocation6_spill] sm:$0xff] %v8192_v56  ;;  %v8210_v60 = vld [vmem:[%s11617_s1 + $0x790] sm:$0xff]  ;;  %v8216_v46 = vld [vmem:[%s11617_s1 + $0x398] sm:$0xff] }
 0x3cc   :  { %1770 = vmatpush.msra.mxu0 %v13133_v61  ;;  %1790 = vmatpush.msra.mxu1 %v13134_v62  ;;  %13156 = vst [vmem:[#allocation15_spill] sm:$0xff] %v8198_v57  ;;  %v8222_v61 = vld [vmem:[%s11617_s1 + $0x798] sm:$0xff]  ;;  %v8228_v62 = vld [vmem:[%s11617_s1 + $0x350] sm:$0xff] }
 0x3cd   :  { %1810 = vmatpush.msra.mxu2 %v13135_v42  ;;  %1830 = vmatpush.msra.mxu3 %v13136_v47  ;;  %13157 = vst [vmem:[#allocation16_spill] sm:$0xff] %v8204_v58  ;;  %v8234_v42 = vld [vmem:[%s11617_s1 + $0x750] sm:$0xff]  ;;  %v8240_v47 = vld [vmem:[%s11617_s1 + $0x358] sm:$0xff] }
 0x3ce   :  { %1771 = vmatpush.msra.mxu0 %v13137_v5  ;;  %1791 = vmatpush.msra.mxu1 %v13138_v0  ;;  %13158 = vst [vmem:[#allocation9_spill] sm:$0xff] %v8210_v60  ;;  %v8246_v5 = vld [vmem:[%s11617_s1 + $0x758] sm:$0xff]  ;;  %v8252_v0 = vld [vmem:[%s11617_s1 + $0x310] sm:$0xff] }
 0x3cf   :  { %1811 = vmatpush.msra.mxu2 %v13139_v63  ;;  %1831 = vmatpush.msra.mxu3 %v13140_v13  ;;  %13159 = vst [vmem:[#allocation10_spill] sm:$0xff] %v8216_v46  ;;  %v8258_v63 = vld [vmem:[%s11617_s1 + $0x710] sm:$0xff]  ;;  %v8264_v13 = vld [vmem:[%s11617_s1 + $0x318] sm:$0xff] }
 0x3d0   :  { %1772 = vmatpush.msra.mxu0 %v13141_v39  ;;  %1792 = vmatpush.msra.mxu1 %v13142_v40  ;;  %13160 = vst [vmem:[#allocation19_spill] sm:$0xff] %v8222_v61  ;;  %v8270_v39 = vld [vmem:[%s11617_s1 + $0x718] sm:$0xff]  ;;  %v8276_v40 = vld [vmem:[%s11617_s1 + $0x2d0] sm:$0xff] }
 0x3d1   :  { %1812 = vmatpush.msra.mxu2 %v13143_v38  ;;  %1832 = vmatpush.msra.mxu3 %v13144_v12  ;;  %13161 = vst [vmem:[#allocation20_spill] sm:$0xff] %v8228_v62  ;;  %v8282_v38 = vld [vmem:[%s11617_s1 + $0x6d0] sm:$0xff]  ;;  %v8288_v12 = vld [vmem:[%s11617_s1 + $0x2d8] sm:$0xff] }
 0x3d2   :  { %1773 = vmatpush.msra.mxu0 %v7592_v48  ;;  %1793 = vmatpush.msra.mxu1 %v13145_v41  ;;  %v7940_v48 = vld [vmem:[%s11617_s1 + $0x240] sm:$0xff]  ;;  %13162 = vst [vmem:[#allocation13_spill] sm:$0xff] %v8234_v42  ;;  %v8294_v41 = vld [vmem:[%s11617_s1 + $0x6d8] sm:$0xff] }
 0x3d3   :  { %1813 = vmatpush.msra.mxu2 %v13146_v10  ;;  %1833 = vmatpush.msra.mxu3 %v7610_v11  ;;  %v7946_v11 = vld [vmem:[%s11617_s1 + $0x640] sm:$0xff]  ;;  %13163 = vst [vmem:[#allocation14_spill] sm:$0xff] %v8240_v47  ;;  %v8300_v10 = vld [vmem:[%s11617_s1 + $0x290] sm:$0xff] }
 0x3d4   :  { %1774 = vmatpush.msra.mxu0 %v7926_v21  ;;  %1794 = vmatpush.msra.mxu1 %v7932_v37  ;;  %13164 = vst [vmem:[#allocation23_spill] sm:$0xff] %v8246_v5 }
 0x3d5   :  { %1814 = vmatpush.msra.mxu2 %v7618_v49  ;;  %1834 = vmatpush.msra.mxu3 %v7624_v43  ;;  %v7952_v49 = vld [vmem:[%s11617_s1 + $0x248] sm:$0xff]  ;;  %13165 = vst [vmem:[#allocation24_spill] sm:$0xff] %v8252_v0 }
 0x3d6   :  { %1775 = vmatpush.msra.mxu0 %v7940_v48  ;;  %1795 = vmatpush.msra.mxu1 %v7946_v11  ;;  %v7958_v43 = vld [vmem:[%s11617_s1 + $0x648] sm:$0xff]  ;;  %13166 = vst [vmem:[#allocation17_spill] sm:$0xff] %v8258_v63 }
 0x3d7   :  { %1815 = vmatpush.msra.mxu2 %v7952_v49  ;;  %1835 = vmatpush.msra.mxu3 %v7958_v43  ;;  %13167 = vst [vmem:[#allocation18_spill] sm:$0xff] %v8264_v13 }
 0x3d8   :  { %1776 = vmatpush.msra.mxu0 %v7964_v20  ;;  %1796 = vmatpush.msra.mxu1 %v7970_v44  ;;  %13168 = vst [vmem:[#allocation27_spill] sm:$0xff] %v8270_v39 }
 0x3d9   :  { %1816 = vmatpush.msra.mxu2 %v7976_v33  ;;  %1836 = vmatpush.msra.mxu3 %v7982_v34  ;;  %13169 = vst [vmem:[#allocation28_spill] sm:$0xff] %v8276_v40 }
 0x3da   :  { %1777 = vmatpush.msra.mxu0 %v7988_v31  ;;  %1797 = vmatpush.msra.mxu1 %v7994_v36  ;;  %13170 = vst [vmem:[#allocation21_spill] sm:$0xff] %v8282_v38 }
 0x3db   :  { %1817 = vmatpush.msra.mxu2 %v8000_v35  ;;  %1837 = vmatpush.msra.mxu3 %v8006_v16  ;;  %13171 = vst [vmem:[#allocation22_spill] sm:$0xff] %v8288_v12 }
 0x3dc   :  { %1778 = vmatpush.msra.mxu0 %v8012_v45  ;;  %1798 = vmatpush.msra.mxu1 %v8018_v32  ;;  %13172 = vst [vmem:[#allocation31_spill] sm:$0xff] %v8294_v41 }
 0x3dd   :  { %1818 = vmatpush.msra.mxu2 %v8024_v30  ;;  %1838 = vmatpush.msra.mxu3 %v8030_v1  ;;  %13173 = vst [vmem:[#allocation32_spill] sm:$0xff] %v8300_v10 }
 0x3de   :  { %1779 = vmatpush.msra.mxu0 %v8036_v2  ;;  %1799 = vmatpush.msra.mxu1 %v8042_v3 }
 0x3df   :  { %1819 = vmatpush.msra.mxu2 %v8048_v4  ;;  %1839 = vmatpush.msra.mxu3 %v8054_v6 }
 0x3e0   :  { %1780 = vmatpush.msra.mxu0 %v8060_v7  ;;  %1800 = vmatpush.msra.mxu1 %v8066_v8 }
 0x3e1   :  { %1820 = vmatpush.msra.mxu2 %v8072_v14  ;;  %1840 = vmatpush.msra.mxu3 %v8078_v15 }
 0x3e2   :  { %1781 = vmatpush.msra.mxu0 %v8084_v22  ;;  %1801 = vmatpush.msra.mxu1 %v8090_v23 }
 0x3e3   :  { %1821 = vmatpush.msra.mxu2 %v8096_v24  ;;  %1841 = vmatpush.msra.mxu3 %v8102_v25 }
 0x3e4   :  { %1782 = vmatpush.msra.mxu0 %v8108_v26  ;;  %1802 = vmatpush.msra.mxu1 %v8114_v27 }
 0x3e5   :  { %1822 = vmatpush.msra.mxu2 %v8120_v50  ;;  %1842 = vmatpush.msra.mxu3 %v8126_v51 }
 0x3e6   :  { %1783 = vmatpush.msra.mxu0 %v8132_v9  ;;  %1803 = vmatpush.msra.mxu1 %v8138_v19 }
 0x3e7   :  { %1823 = vmatpush.msra.mxu2 %v8144_v17  ;;  %1843 = vmatpush.msra.mxu3 %v8150_v18 }
 0x3e8   :  { %1784 = vmatpush.msra.mxu0 %v8156_v28  ;;  %1804 = vmatpush.msra.mxu1 %v8162_v29 }
 0x3e9   :  { %1824 = vmatpush.msra.mxu2 %v8168_v52  ;;  %1844 = vmatpush.msra.mxu3 %v8174_v53  ;;  %v3263_v52 = vld [vmem:[%s11618_s0 + $0x3] ss:$8 sm:$0xf] }
 0x3ea   :  { %1849 = vmatpush.msrb.mxu0 %v8180_v54  ;;  %1869 = vmatpush.msrb.mxu1 %v8186_v55 }
 0x3eb   :  { %1889 = vmatpush.msrb.mxu2 %v8192_v56  ;;  %1909 = vmatpush.msrb.mxu3 %v8198_v57 }
 0x3ec   :  { %1850 = vmatpush.msrb.mxu0 %v8204_v58  ;;  %1870 = vmatpush.msrb.mxu1 %v8210_v60 }
 0x3ed   :  { %1890 = vmatpush.msrb.mxu2 %v8216_v46  ;;  %1910 = vmatpush.msrb.mxu3 %v8222_v61 }
 0x3ee   :  { %1851 = vmatpush.msrb.mxu0 %v8228_v62  ;;  %1871 = vmatpush.msrb.mxu1 %v8234_v42 }
 0x3ef   :  { %1891 = vmatpush.msrb.mxu2 %v8240_v47  ;;  %1911 = vmatpush.msrb.mxu3 %v8246_v5 }
 0x3f0   :  { %1852 = vmatpush.msrb.mxu0 %v8252_v0  ;;  %1872 = vmatpush.msrb.mxu1 %v8258_v63 }
 0x3f1   :  { %1892 = vmatpush.msrb.mxu2 %v8264_v13  ;;  %1912 = vmatpush.msrb.mxu3 %v8270_v39 }
 0x3f2   :  { %1853 = vmatpush.msrb.mxu0 %v8276_v40  ;;  %1873 = vmatpush.msrb.mxu1 %v8282_v38  ;;  %v8306_v38 = vld [vmem:[%s11617_s1 + $0x690] sm:$0xff] }
 0x3f3   :  { %1893 = vmatpush.msrb.mxu2 %v8288_v12  ;;  %1913 = vmatpush.msrb.mxu3 %v8294_v41  ;;  %13174 = vst [vmem:[#allocation25_spill] sm:$0xff] %v8306_v38  ;;  %v8312_v12 = vld [vmem:[%s11617_s1 + $0x298] sm:$0xff] }
 0x3f4   :  { %1854 = vmatpush.msrb.mxu0 %v8300_v10  ;;  %1874 = vmatpush.msrb.mxu1 %v8306_v38  ;;  %13175 = vst [vmem:[#allocation26_spill] sm:$0xff] %v8312_v12  ;;  %v8318_v41 = vld [vmem:[%s11617_s1 + $0x698] sm:$0xff]  ;;  %v8324_v10 = vld [vmem:[%s11617_s1 + $0x250] sm:$0xff] }
 0x3f5   :  { %1894 = vmatpush.msrb.mxu2 %v8312_v12  ;;  %13176 = vst [vmem:[#allocation35_spill] sm:$0xff] %v8318_v41  ;;  %1914 = vmatpush.msrb.mxu3 %v8318_v41  ;;  %v8330_v38 = vld [vmem:[%s11617_s1 + $0x650] sm:$0xff]  ;;  %v8336_v12 = vld [vmem:[%s11617_s1 + $0x258] sm:$0xff] }
 0x3f6   :  { %13177 = vst [vmem:[#allocation36_spill] sm:$0xff] %v8324_v10  ;;  %1855 = vmatpush.msrb.mxu0 %v8324_v10  ;;  %1875 = vmatpush.msrb.mxu1 %v8330_v38  ;;  %v8342_v41 = vld [vmem:[%s11617_s1 + $0x658] sm:$0xff]  ;;  %v8348_v10 = vld [vmem:[%s11617_s1 + $0x210] sm:$0xff] }
 0x3f7   :  { %13178 = vst [vmem:[#allocation29_spill] sm:$0xff] %v8330_v38  ;;  %1895 = vmatpush.msrb.mxu2 %v8336_v12  ;;  %1915 = vmatpush.msrb.mxu3 %v8342_v41  ;;  %v8354_v38 = vld [vmem:[%s11617_s1 + $0x610] sm:$0xff] }
 0x3f8   :  { %13179 = vst [vmem:[#allocation30_spill] sm:$0xff] %v8336_v12  ;;  %1856 = vmatpush.msrb.mxu0 %v8348_v10  ;;  %1876 = vmatpush.msrb.mxu1 %v8354_v38  ;;  %v8360_v12 = vld [vmem:[%s11617_s1 + $0x218] sm:$0xff] }
 0x3f9   :  { %13180 = vst [vmem:[#allocation39_spill] sm:$0xff] %v8342_v41  ;;  %1896 = vmatpush.msrb.mxu2 %v8360_v12  ;;  %v8366_v41 = vld [vmem:[%s11617_s1 + $0x618] sm:$0xff] }
 0x3fa   :  { %13181 = vst [vmem:[#allocation40_spill] sm:$0xff] %v8348_v10  ;;  %1916 = vmatpush.msrb.mxu3 %v8366_v41  ;;  %v8372_v10 = vld [vmem:[%s11617_s1 + $0x1d0] sm:$0xff] }
 0x3fb   :  { %13182 = vst [vmem:[#allocation33_spill] sm:$0xff] %v8354_v38  ;;  %1857 = vmatpush.msrb.mxu0 %v8372_v10  ;;  %v8378_v38 = vld [vmem:[%s11617_s1 + $0x5d0] sm:$0xff] }
 0x3fc   :  { %13183 = vst [vmem:[#allocation34_spill] sm:$0xff] %v8360_v12  ;;  %1877 = vmatpush.msrb.mxu1 %v8378_v38  ;;  %v8384_v12 = vld [vmem:[%s11617_s1 + $0x1d8] sm:$0xff] }
 0x3fd   :  { %13184 = vst [vmem:[#allocation43_spill] sm:$0xff] %v8366_v41  ;;  %1897 = vmatpush.msrb.mxu2 %v8384_v12  ;;  %v8390_v41 = vld [vmem:[%s11617_s1 + $0x5d8] sm:$0xff] }
 0x3fe   :  { %13185 = vst [vmem:[#allocation44_spill] sm:$0xff] %v8372_v10  ;;  %1917 = vmatpush.msrb.mxu3 %v8390_v41  ;;  %v8396_v10 = vld [vmem:[%s11617_s1 + $0x190] sm:$0xff] }
 0x3ff   :  { %13186 = vst [vmem:[#allocation37_spill] sm:$0xff] %v8378_v38  ;;  %1858 = vmatpush.msrb.mxu0 %v8396_v10  ;;  %v8402_v38 = vld [vmem:[%s11617_s1 + $0x590] sm:$0xff]  ;;  %v1433_v40 = vpop.f32.mrf.mxu1 }
 0x400   :  { %13187 = vst [vmem:[#allocation38_spill] sm:$0xff] %v8384_v12  ;;  %1878 = vmatpush.msrb.mxu1 %v8402_v38  ;;  %v8408_v12 = vld [vmem:[%s11617_s1 + $0x198] sm:$0xff] }
 0x401   :  { %13188 = vst [vmem:[#allocation49_spill] sm:$0xff] %v8390_v41  ;;  %1898 = vmatpush.msrb.mxu2 %v8408_v12  ;;  %v8414_v41 = vld [vmem:[%s11617_s1 + $0x598] sm:$0xff] }
 0x402   :  { %13189 = vst [vmem:[#allocation50_spill] sm:$0xff] %v8396_v10  ;;  %1918 = vmatpush.msrb.mxu3 %v8414_v41  ;;  %v8420_v10 = vld [vmem:[%s11617_s1 + $0x150] sm:$0xff] }
 0x403   :  { %13190 = vst [vmem:[#allocation41_spill] sm:$0xff] %v8402_v38  ;;  %1859 = vmatpush.msrb.mxu0 %v8420_v10  ;;  %v8426_v38 = vld [vmem:[%s11617_s1 + $0x550] sm:$0xff] }
 0x404   :  { %13191 = vst [vmem:[#allocation42_spill] sm:$0xff] %v8408_v12  ;;  %1879 = vmatpush.msrb.mxu1 %v8426_v38  ;;  %v8432_v12 = vld [vmem:[%s11617_s1 + $0x158] sm:$0xff] }
 0x405   :  { %13192 = vst [vmem:[#allocation53_spill] sm:$0xff] %v8414_v41  ;;  %1899 = vmatpush.msrb.mxu2 %v8432_v12  ;;  %v8438_v41 = vld [vmem:[%s11617_s1 + $0x558] sm:$0xff] }
 0x406   :  { %13193 = vst [vmem:[#allocation54_spill] sm:$0xff] %v8420_v10  ;;  %1919 = vmatpush.msrb.mxu3 %v8438_v41  ;;  %v8444_v10 = vld [vmem:[%s11617_s1 + $0x110] sm:$0xff]  ;;  %v1453_v39 = vpop.f32.mrf.mxu2  ;;  %v1473_v13 = vpop.f32.mrf.mxu3 }
 0x407   :  { %13194 = vst [vmem:[#allocation45_spill] sm:$0xff] %v8426_v38  ;;  %1860 = vmatpush.msrb.mxu0 %v8444_v10  ;;  %v8450_v38 = vld [vmem:[%s11617_s1 + $0x510] sm:$0xff]  ;;  %v1474_v58 = vadd.f32 %v1473_v13, %v1453_v39 }
 0x408   :  { %13195 = vst [vmem:[#allocation46_spill] sm:$0xff] %v8432_v12  ;;  %1880 = vmatpush.msrb.mxu1 %v8450_v38  ;;  %v8456_v12 = vld [vmem:[%s11617_s1 + $0x118] sm:$0xff] }
 0x409   :  { %13196 = vst [vmem:[#allocation57_spill] sm:$0xff] %v8438_v41  ;;  %1900 = vmatpush.msrb.mxu2 %v8456_v12  ;;  %v8462_v41 = vld [vmem:[%s11617_s1 + $0x518] sm:$0xff]  ;;  %v1724_v28 = vrot.slane %v1474_v58, 7 }
 0x40a   :  { %13197 = vst [vmem:[#allocation58_spill] sm:$0xff] %v8444_v10  ;;  %1920 = vmatpush.msrb.mxu3 %v8462_v41  ;;  %v8468_v10 = vld [vmem:[%s11617_s1 + $0xd0] sm:$0xff] }
 0x40b   :  { %13198 = vst [vmem:[#allocation59_spill] sm:$0xff] %v8450_v38  ;;  %1861 = vmatpush.msrb.mxu0 %v8468_v10  ;;  %v8474_v38 = vld [vmem:[%s11617_s1 + $0x4d0] sm:$0xff] }
 0x40c   :  { %13199 = vst [vmem:[#allocation60_spill] sm:$0xff] %v8456_v12  ;;  %1881 = vmatpush.msrb.mxu1 %v8474_v38  ;;  %v8480_v12 = vld [vmem:[%s11617_s1 + $0xd8] sm:$0xff] }
 0x40d   :  { %13200 = vst [vmem:[#allocation47_spill] sm:$0xff] %v8462_v41  ;;  %1901 = vmatpush.msrb.mxu2 %v8480_v12  ;;  %v8486_v41 = vld [vmem:[%s11617_s1 + $0x4d8] sm:$0xff] }
 0x40e   :  { %13201 = vst [vmem:[#allocation48_spill] sm:$0xff] %v8468_v10  ;;  %1921 = vmatpush.msrb.mxu3 %v8486_v41  ;;  %v8492_v10 = vld [vmem:[%s11617_s1 + $0x90] sm:$0xff] }
 0x40f   :  { %13202 = vst [vmem:[#allocation63_spill] sm:$0xff] %v8474_v38  ;;  %1862 = vmatpush.msrb.mxu0 %v8492_v10  ;;  %v8498_v38 = vld [vmem:[%s11617_s1 + $0x490] sm:$0xff] }
 0x410   :  { %13203 = vst [vmem:[#allocation64_spill] sm:$0xff] %v8480_v12  ;;  %1882 = vmatpush.msrb.mxu1 %v8498_v38  ;;  %v8504_v12 = vld [vmem:[%s11617_s1 + $0x98] sm:$0xff]  ;;  %v1533_v0 = vpop.f32.mrf.mxu2  ;;  %v1553_v5 = vpop.f32.mrf.mxu3 }
 0x411   :  { %13204 = vst [vmem:[#allocation51_spill] sm:$0xff] %v8486_v41  ;;  %1902 = vmatpush.msrb.mxu2 %v8504_v12  ;;  %v8510_v41 = vld [vmem:[%s11617_s1 + $0x498] sm:$0xff] }
 0x412   :  { %13205 = vst [vmem:[#allocation52_spill] sm:$0xff] %v8492_v10  ;;  %1922 = vmatpush.msrb.mxu3 %v8510_v41  ;;  %v8516_v10 = vld [vmem:[%s11617_s1 + $0x50] sm:$0xff] }
 0x413   :  { %13206 = vst [vmem:[#allocation67_spill] sm:$0xff] %v8498_v38  ;;  %1863 = vmatpush.msrb.mxu0 %v8516_v10  ;;  %v8522_v38 = vld [vmem:[%s11617_s1 + $0x450] sm:$0xff] }
 0x414   :  { %13207 = vst [vmem:[#allocation68_spill] sm:$0xff] %v8504_v12  ;;  %1883 = vmatpush.msrb.mxu1 %v8522_v38  ;;  %v8528_v12 = vld [vmem:[%s11617_s1 + $0x58] sm:$0xff] }
 0x415   :  { %13208 = vst [vmem:[#allocation55_spill] sm:$0xff] %v8510_v41  ;;  %1903 = vmatpush.msrb.mxu2 %v8528_v12  ;;  %v8534_v41 = vld [vmem:[%s11617_s1 + $0x458] sm:$0xff] }
 0x416   :  { %13209 = vst [vmem:[#allocation56_spill] sm:$0xff] %v8516_v10  ;;  %1923 = vmatpush.msrb.mxu3 %v8534_v41  ;;  %v8540_v10 = vld [vmem:[%s11617_s1 + $0x10] sm:$0xff] }
 0x417   :  { %13210 = vst [vmem:[#allocation71_spill] sm:$0xff] %v8522_v38  ;;  %1864 = vmatpush.msrb.mxu0 %v8540_v10  ;;  %v8546_v38 = vld [vmem:[%s11617_s1 + $0x410] sm:$0xff] }
 0x418   :  { %13211 = vst [vmem:[#allocation72_spill] sm:$0xff] %v8528_v12  ;;  %1884 = vmatpush.msrb.mxu1 %v8546_v38  ;;  %v8552_v12 = vld [vmem:[%s11617_s1 + $0x18] sm:$0xff] }
 0x419   :  { %13212 = vst [vmem:[#allocation61_spill] sm:$0xff] %v8534_v41  ;;  %1904 = vmatpush.msrb.mxu2 %v8552_v12  ;;  %v8558_v41 = vld [vmem:[%s11617_s1 + $0x418] sm:$0xff] }
 0x41a   :  { %13213 = vst [vmem:[#allocation62_spill] sm:$0xff] %v8540_v10  ;;  %1924 = vmatpush.msrb.mxu3 %v8558_v41  ;;  %v1413_v10 = vpop.f32.mrf.mxu0 }
 0x41b   :  { %13214 = vst [vmem:[#allocation75_spill] sm:$0xff] %v8546_v38  ;;  %v1513_v38 = vpop.f32.mrf.mxu1  ;;  %v1434_v13 = vadd.f32 %v1433_v40, %v1413_v10 }
 0x41c   :  { %13215 = vst [vmem:[#allocation76_spill] sm:$0xff] %v8552_v12  ;;  %v1554_v12 = vadd.f32 %v1553_v5, %v1533_v0  ;;  %v3264_v5 = vld [vmem:[%s11618_s0 + $0x3] ss:$8 sm:$0xf0] }
 0x41d   :  { %13216 = vst [vmem:[#allocation65_spill] sm:$0xff] %v8558_v41 }
 0x41e   :  { %v1726_v55 = vrot.slane %v1554_v12, 5 }
 0x422   :  { %v1493_v63 = vpop.f32.mrf.mxu0 }
 0x423   :  { %v1593_v42 = vpop.f32.mrf.mxu1  ;;  %v1514_v57 = vadd.f32 %v1513_v38, %v1493_v63 }
 0x425   :  { %v1725_v18 = vrot.slane %v1514_v57, 6 }
 0x42a   :  { %v1573_v47 = vpop.f32.mrf.mxu0  ;;  %v1613_v62 = vpop.f32.mrf.mxu2 }
 0x42b   :  { %v1633_v61 = vpop.f32.mrf.mxu3  ;;  %v1594_v41 = vadd.f32 %v1593_v42, %v1573_v47  ;;  %v1731_v47 = vsel %vm605_vm1, %v1434_v13, %v1724_v28 }
 0x42c   :  { %v1634_v56 = vadd.f32 %v1633_v61, %v1613_v62  ;;  %v1732_v61 = vsel %vm607_vm0, %v1725_v18, %v1726_v55 }
 0x42d   :  { %v1727_v62 = vrot.slane %v1594_v41, 4 }
 0x42e   :  { %v1728_v17 = vrot.slane %v1634_v56, 3  ;;  %v1733_v56 = vsel %vm609_vm4, %v1731_v47, %v1732_v61  ;;  %v8602_v61 = vld [vmem:[%s11617_s1 + $0x7e0] sm:$0xff]  ;;  %v8632_v47 = vld [vmem:[%s11617_s1 + $0x3a8] sm:$0xff] }
 0x430   :  { %v1734_v63 = vsel %vm611_vm2, %v1727_v62, %v1728_v17  ;;  %v8608_v62 = vld [vmem:[%s11617_s1 + $0x3e8] sm:$0xff] }
 0x445   :  { %v1653_v46 = vpop.f32.mrf.mxu0  ;;  %v1673_v60 = vpop.f32.mrf.mxu1 }
 0x446   :  { %v1674_v54 = vadd.f32 %v1673_v60, %v1653_v46  ;;  %v1393_v46 = vor.u32 %v3264_v5, %v3263_v52 }
 0x448   :  { %v1729_v42 = vrot.slane %v1674_v54, 2 }
 0x44c   :  { %v1693_v53 = vpop.f32.mrf.mxu2  ;;  %v1713_v29 = vpop.f32.mrf.mxu3 }
 0x44d   :  { %v1714_v0 = vadd.f32 %v1713_v29, %v1693_v53 }
 0x44f   :  { %v1730_v60 = vrot.slane %v1714_v0, 1 }
 0x451   :  { %v1735_v58 = vsel %vm613_vm3, %v1729_v42, %v1730_v60  ;;  %v8614_v42 = vld [vmem:[%s11617_s1 + $0x7e8] sm:$0xff]  ;;  %v8620_v60 = vld [vmem:[%s11617_s1 + $0x3a0] sm:$0xff] }
 0x452   :  { %v1736_v57 = vsel %vm615_vm5, %v1734_v63, %v1735_v58  ;;  %v8638_v63 = vld [vmem:[%s11617_s1 + $0x7a8] sm:$0xff]  ;;  %v8644_v58 = vld [vmem:[%s11617_s1 + $0x360] sm:$0xff] }
 0x453   :  { %v1737_v39 = vsel %vm617_vm6, %v1733_v56, %v1736_v57  ;;  %v8650_v56 = vld [vmem:[%s11617_s1 + $0x760] sm:$0xff]  ;;  %v8656_v57 = vld [vmem:[%s11617_s1 + $0x368] sm:$0xff] }
 0x454   :  { %v1739_v29 = vadd.f32 %v1737_v39, %v1393_v46  ;;  %v8626_v46 = vld [vmem:[%s11617_s1 + $0x7a0] sm:$0xff]  ;;  %v8662_v39 = vld [vmem:[%s11617_s1 + $0x768] sm:$0xff] }
 0x456   :  { %v1740_v53 = vmul.f32 0.5, %v1739_v29  ;;  %v1745_v18 = vrot.slane %v1739_v29, 6  ;;  %v8668_v29 = vld [vmem:[%s11617_s1 + $0x320] sm:$0xff] }
 0x458   :  { %3292 = vtanh.f32 %v1740_v53  ;;  %v8674_v53 = vld [vmem:[%s11617_s1 + $0x720] sm:$0xff] }
 0x459   :  { %3294 = vtanh.f32 %v1745_v18  ;;  %v8680_v18 = vld [vmem:[%s11617_s1 + $0x328] sm:$0xff] }
 0x45e   :  { %v3293_v55 = vpop.eup %3292 }
 0x45f   :  { %v1742_v54 = vmul.f32 0.5, %v3293_v55  ;;  %v3295_v28 = vpop.eup %3294  ;;  %v8686_v55 = vld [vmem:[%s11617_s1 + $0x728] sm:$0xff] }
 0x461   :  { %v1743_v52 = vadd.f32 0.5, %v1742_v54  ;;  %v8696_v54 = vld [vmem:[%s11617_s1 + $0x2e0] sm:$0xff] }
 0x463   :  { %v1749_v40 = vrot.slane %v1743_v52, 2  ;;  %v1752_v38 = vmul.f32 %v3295_v28, %v1743_v52  ;;  %v1755_v41 = vrot.slane %v1743_v52, 4  ;;  %v8702_v52 = vld [vmem:[%s11617_s1 + $0x6e0] sm:$0xff]  ;;  %v8714_v28 = vld [vmem:[%s11617_s1 + $0x6e8] sm:$0xff] }
 0x465   :  { %v1751_v17 = vmul.f32 %v1749_v40, %v7745_v59  ;;  %v8596_v59 = vld [vmem:[%s11617_s1 + $0x3e0] sm:$0xff]  ;;  %v8708_v40 = vld [vmem:[%s11617_s1 + $0x2e8] sm:$0xff] }
 0x467   :  { %v8575_v12 = vadd.f32 %v1752_v38, %v1751_v17  ;;  %v8720_v17 = vld [vmem:[%s11617_s1 + $0x2a0] sm:$0xff] }
 0x468   :  { %v8726_v38 = vld [vmem:[%s11617_s1 + $0x6a0] sm:$0xff] }
 0x469   :  { %3296 = vtanh.f32 %v8575_v12  ;;  %13217 = vst [vmem:[#allocation66_spill] sm:$0xff] %v8726_v38 }
 0x46f   :  { %v3297_v10 = vpop.eup %3296 }
 0x470   :  { %v1757_v5 = vmul.f32 %v3297_v10, %v1755_v41  ;;  %v8732_v41 = vld [vmem:[%s11617_s1 + $0x2a8] sm:$0xff] }
 0x471   :  { %13218 = vst [vmem:[#allocation79_spill] sm:$0xff] %v8732_v41  ;;  %v8738_v10 = vld [vmem:[%s11617_s1 + $0x6a8] sm:$0xff] }
 0x472   :  { %1758 = vst [vmem:[%s11619_s2 + $0x3] sm:$0x1] %v1757_v5  ;;  %v8581_v0 = vperm.slane %v1757_v5, 1  ;;  %v8583_v13 = vperm.slane %v1757_v5, 0  ;;  %v8744_v5 = vld [vmem:[%s11617_s1 + $0x260] sm:$0xff] }
 0x473   :  { %13219 = vst [vmem:[#allocation80_spill] sm:$0xff] %v8738_v10 }
 0x474   :  { %1762 = vst [vmem:[%s11619_s2 + $0xc] sm:$0x1] %v8581_v0  ;;  %1785 = vmatmul.f32.vlgmr.msra.gmra.mxu0 %v8583_v13  ;;  %1805 = vmatmul.f32.vlgmr.msra.gmra.mxu1 %v8581_v0 }
 0x475   :  { %1825 = vmatmul.f32.vlgmr.msra.gmra.mxu2 %v8583_v13  ;;  %1845 = vmatmul.f32.vlgmr.msra.gmra.mxu3 %v8581_v0  ;;  %13220 = vst [vmem:[#allocation69_spill] sm:$0xff] %v8744_v5 }
 0x476   :  { %1929 = vmatpush.msra.mxu0 %v8596_v59  ;;  %1949 = vmatpush.msra.mxu1 %v8602_v61 }
 0x477   :  { %1969 = vmatpush.msra.mxu2 %v8608_v62  ;;  %1989 = vmatpush.msra.mxu3 %v8614_v42 }
 0x478   :  { %1930 = vmatpush.msra.mxu0 %v8620_v60  ;;  %1950 = vmatpush.msra.mxu1 %v8626_v46 }
 0x479   :  { %1970 = vmatpush.msra.mxu2 %v8632_v47  ;;  %1990 = vmatpush.msra.mxu3 %v8638_v63 }
 0x47a   :  { %1931 = vmatpush.msra.mxu0 %v8644_v58  ;;  %1951 = vmatpush.msra.mxu1 %v8650_v56 }
 0x47b   :  { %1971 = vmatpush.msra.mxu2 %v8656_v57  ;;  %1991 = vmatpush.msra.mxu3 %v8662_v39 }
 0x47c   :  { %1932 = vmatpush.msra.mxu0 %v8668_v29  ;;  %1952 = vmatpush.msra.mxu1 %v8674_v53 }
 0x47d   :  { %1972 = vmatpush.msra.mxu2 %v8680_v18  ;;  %1992 = vmatpush.msra.mxu3 %v8686_v55 }
 0x47e   :  { %1865 = vmatmul.f32.vlgmr.msrb.gmra.mxu0 %v8583_v13  ;;  %1885 = vmatmul.f32.vlgmr.msrb.gmra.mxu1 %v8581_v0 }
 0x47f   :  { %1905 = vmatmul.f32.vlgmr.msrb.gmra.mxu2 %v8583_v13  ;;  %1925 = vmatmul.f32.vlgmr.msrb.gmra.mxu3 %v8581_v0 }
 0x480   :  { %1933 = vmatpush.msra.mxu0 %v8696_v54  ;;  %1953 = vmatpush.msra.mxu1 %v8702_v52 }
 0x481   :  { %1973 = vmatpush.msra.mxu2 %v8708_v40  ;;  %1993 = vmatpush.msra.mxu3 %v8714_v28 }
 0x482   :  { %1934 = vmatpush.msra.mxu0 %v8720_v17  ;;  %1954 = vmatpush.msra.mxu1 %v8726_v38  ;;  %v8750_v38 = vld [vmem:[%s11617_s1 + $0x660] sm:$0xff] }
 0x483   :  { %1974 = vmatpush.msra.mxu2 %v8732_v41  ;;  %1994 = vmatpush.msra.mxu3 %v8738_v10  ;;  %13221 = vst [vmem:[#allocation70_spill] sm:$0xff] %v8750_v38  ;;  %v8756_v41 = vld [vmem:[%s11617_s1 + $0x268] sm:$0xff] }
 0x484   :  { %1935 = vmatpush.msra.mxu0 %v8744_v5  ;;  %1955 = vmatpush.msra.mxu1 %v8750_v38  ;;  %13222 = vst [vmem:[#allocation83_spill] sm:$0xff] %v8756_v41  ;;  %v8762_v10 = vld [vmem:[%s11617_s1 + $0x668] sm:$0xff]  ;;  %v8768_v5 = vld [vmem:[%s11617_s1 + $0x220] sm:$0xff] }
 0x485   :  { %1975 = vmatpush.msra.mxu2 %v8756_v41  ;;  %13223 = vst [vmem:[#allocation84_spill] sm:$0xff] %v8762_v10  ;;  %1995 = vmatpush.msra.mxu3 %v8762_v10  ;;  %v8774_v38 = vld [vmem:[%s11617_s1 + $0x620] sm:$0xff]  ;;  %v8780_v41 = vld [vmem:[%s11617_s1 + $0x228] sm:$0xff] }
 0x486   :  { %13224 = vst [vmem:[#allocation73_spill] sm:$0xff] %v8768_v5  ;;  %1936 = vmatpush.msra.mxu0 %v8768_v5  ;;  %1956 = vmatpush.msra.mxu1 %v8774_v38  ;;  %v8786_v10 = vld [vmem:[%s11617_s1 + $0x628] sm:$0xff]  ;;  %v8792_v5 = vld [vmem:[%s11617_s1 + $0x1e0] sm:$0xff] }
 0x487   :  { %13225 = vst [vmem:[#allocation74_spill] sm:$0xff] %v8774_v38  ;;  %1976 = vmatpush.msra.mxu2 %v8780_v41  ;;  %1996 = vmatpush.msra.mxu3 %v8786_v10  ;;  %v8798_v38 = vld [vmem:[%s11617_s1 + $0x5e0] sm:$0xff] }
 0x488   :  { %13226 = vst [vmem:[#allocation87_spill] sm:$0xff] %v8780_v41  ;;  %1937 = vmatpush.msra.mxu0 %v8792_v5  ;;  %1957 = vmatpush.msra.mxu1 %v8798_v38  ;;  %v8804_v41 = vld [vmem:[%s11617_s1 + $0x1e8] sm:$0xff] }
 0x489   :  { %13227 = vst [vmem:[#allocation88_spill] sm:$0xff] %v8786_v10  ;;  %1977 = vmatpush.msra.mxu2 %v8804_v41  ;;  %v8810_v10 = vld [vmem:[%s11617_s1 + $0x5e8] sm:$0xff] }
 0x48a   :  { %13228 = vst [vmem:[#allocation77_spill] sm:$0xff] %v8792_v5  ;;  %1997 = vmatpush.msra.mxu3 %v8810_v10  ;;  %v8816_v5 = vld [vmem:[%s11617_s1 + $0x1a0] sm:$0xff] }
 0x48b   :  { %13229 = vst [vmem:[#allocation78_spill] sm:$0xff] %v8798_v38  ;;  %1938 = vmatpush.msra.mxu0 %v8816_v5  ;;  %v8822_v38 = vld [vmem:[%s11617_s1 + $0x5a0] sm:$0xff] }
 0x48c   :  { %13230 = vst [vmem:[#allocation91_spill] sm:$0xff] %v8804_v41  ;;  %1958 = vmatpush.msra.mxu1 %v8822_v38  ;;  %v8828_v41 = vld [vmem:[%s11617_s1 + $0x1a8] sm:$0xff] }
 0x48d   :  { %13231 = vst [vmem:[#allocation92_spill] sm:$0xff] %v8810_v10  ;;  %1978 = vmatpush.msra.mxu2 %v8828_v41  ;;  %v8834_v10 = vld [vmem:[%s11617_s1 + $0x5a8] sm:$0xff] }
 0x48e   :  { %13232 = vst [vmem:[#allocation81_spill] sm:$0xff] %v8816_v5  ;;  %1998 = vmatpush.msra.mxu3 %v8834_v10  ;;  %v8840_v5 = vld [vmem:[%s11617_s1 + $0x160] sm:$0xff] }
 0x48f   :  { %13233 = vst [vmem:[#allocation82_spill] sm:$0xff] %v8822_v38  ;;  %1939 = vmatpush.msra.mxu0 %v8840_v5  ;;  %v8846_v38 = vld [vmem:[%s11617_s1 + $0x560] sm:$0xff] }
 0x490   :  { %13234 = vst [vmem:[#allocation95_spill] sm:$0xff] %v8828_v41  ;;  %1959 = vmatpush.msra.mxu1 %v8846_v38  ;;  %v8852_v41 = vld [vmem:[%s11617_s1 + $0x168] sm:$0xff] }
 0x491   :  { %13235 = vst [vmem:[#allocation96_spill] sm:$0xff] %v8834_v10  ;;  %1979 = vmatpush.msra.mxu2 %v8852_v41  ;;  %v8858_v10 = vld [vmem:[%s11617_s1 + $0x568] sm:$0xff] }
 0x492   :  { %13236 = vst [vmem:[#allocation85_spill] sm:$0xff] %v8840_v5  ;;  %1999 = vmatpush.msra.mxu3 %v8858_v10  ;;  %v8864_v5 = vld [vmem:[%s11617_s1 + $0x120] sm:$0xff] }
 0x493   :  { %13237 = vst [vmem:[#allocation86_spill] sm:$0xff] %v8846_v38  ;;  %1940 = vmatpush.msra.mxu0 %v8864_v5  ;;  %v8870_v38 = vld [vmem:[%s11617_s1 + $0x520] sm:$0xff] }
 0x494   :  { %13238 = vst [vmem:[#allocation99_spill] sm:$0xff] %v8852_v41  ;;  %1960 = vmatpush.msra.mxu1 %v8870_v38  ;;  %v8876_v41 = vld [vmem:[%s11617_s1 + $0x128] sm:$0xff] }
 0x495   :  { %13239 = vst [vmem:[#allocation100_spill] sm:$0xff] %v8858_v10  ;;  %1980 = vmatpush.msra.mxu2 %v8876_v41  ;;  %v8882_v10 = vld [vmem:[%s11617_s1 + $0x528] sm:$0xff] }
 0x496   :  { %13240 = vst [vmem:[#allocation89_spill] sm:$0xff] %v8864_v5  ;;  %2000 = vmatpush.msra.mxu3 %v8882_v10  ;;  %v8888_v5 = vld [vmem:[%s11617_s1 + $0xe0] sm:$0xff] }
 0x497   :  { %13241 = vst [vmem:[#allocation90_spill] sm:$0xff] %v8870_v38  ;;  %1941 = vmatpush.msra.mxu0 %v8888_v5  ;;  %v8894_v38 = vld [vmem:[%s11617_s1 + $0x4e0] sm:$0xff] }
 0x498   :  { %13242 = vst [vmem:[#allocation103_spill] sm:$0xff] %v8876_v41  ;;  %1961 = vmatpush.msra.mxu1 %v8894_v38  ;;  %v8900_v41 = vld [vmem:[%s11617_s1 + $0xe8] sm:$0xff] }
 0x499   :  { %13243 = vst [vmem:[#allocation104_spill] sm:$0xff] %v8882_v10  ;;  %1981 = vmatpush.msra.mxu2 %v8900_v41  ;;  %v8906_v10 = vld [vmem:[%s11617_s1 + $0x4e8] sm:$0xff] }
 0x49a   :  { %13244 = vst [vmem:[#allocation93_spill] sm:$0xff] %v8888_v5  ;;  %2001 = vmatpush.msra.mxu3 %v8906_v10  ;;  %v8912_v5 = vld [vmem:[%s11617_s1 + $0xa0] sm:$0xff] }
 0x49b   :  { %13245 = vst [vmem:[#allocation94_spill] sm:$0xff] %v8894_v38  ;;  %1942 = vmatpush.msra.mxu0 %v8912_v5  ;;  %v8918_v38 = vld [vmem:[%s11617_s1 + $0x4a0] sm:$0xff] }
 0x49c   :  { %13246 = vst [vmem:[#allocation107_spill] sm:$0xff] %v8900_v41  ;;  %1962 = vmatpush.msra.mxu1 %v8918_v38  ;;  %v8924_v41 = vld [vmem:[%s11617_s1 + $0xa8] sm:$0xff] }
 0x49d   :  { %13247 = vst [vmem:[#allocation108_spill] sm:$0xff] %v8906_v10  ;;  %1982 = vmatpush.msra.mxu2 %v8924_v41  ;;  %v8930_v10 = vld [vmem:[%s11617_s1 + $0x4a8] sm:$0xff] }
 0x49e   :  { %13248 = vst [vmem:[#allocation97_spill] sm:$0xff] %v8912_v5  ;;  %2002 = vmatpush.msra.mxu3 %v8930_v10  ;;  %v8936_v5 = vld [vmem:[%s11617_s1 + $0x60] sm:$0xff] }
 0x49f   :  { %13249 = vst [vmem:[#allocation98_spill] sm:$0xff] %v8918_v38  ;;  %1943 = vmatpush.msra.mxu0 %v8936_v5  ;;  %v8942_v38 = vld [vmem:[%s11617_s1 + $0x460] sm:$0xff] }
 0x4a0   :  { %13250 = vst [vmem:[#allocation113_spill] sm:$0xff] %v8924_v41  ;;  %1963 = vmatpush.msra.mxu1 %v8942_v38  ;;  %v8948_v41 = vld [vmem:[%s11617_s1 + $0x68] sm:$0xff] }
 0x4a1   :  { %13251 = vst [vmem:[#allocation114_spill] sm:$0xff] %v8930_v10  ;;  %1983 = vmatpush.msra.mxu2 %v8948_v41  ;;  %v8954_v10 = vld [vmem:[%s11617_s1 + $0x468] sm:$0xff] }
 0x4a2   :  { %13252 = vst [vmem:[#allocation101_spill] sm:$0xff] %v8936_v5  ;;  %2003 = vmatpush.msra.mxu3 %v8954_v10  ;;  %v8960_v5 = vld [vmem:[%s11617_s1 + $0x20] sm:$0xff] }
 0x4a3   :  { %13253 = vst [vmem:[#allocation102_spill] sm:$0xff] %v8942_v38  ;;  %1944 = vmatpush.msra.mxu0 %v8960_v5  ;;  %v8966_v38 = vld [vmem:[%s11617_s1 + $0x420] sm:$0xff] }
 0x4a4   :  { %13254 = vst [vmem:[#allocation117_spill] sm:$0xff] %v8948_v41  ;;  %1964 = vmatpush.msra.mxu1 %v8966_v38  ;;  %v8972_v41 = vld [vmem:[%s11617_s1 + $0x28] sm:$0xff]  ;;  %1945 = vmatmul.f32.vlgmr.msra.gmra.mxu0 %v8583_v13 }
 0x4a5   :  { %13255 = vst [vmem:[#allocation118_spill] sm:$0xff] %v8954_v10  ;;  %1984 = vmatpush.msra.mxu2 %v8972_v41  ;;  %v8978_v10 = vld [vmem:[%s11617_s1 + $0x428] sm:$0xff]  ;;  %1965 = vmatmul.f32.vlgmr.msra.gmra.mxu1 %v8581_v0 }
 0x4a6   :  { %13256 = vst [vmem:[#allocation105_spill] sm:$0xff] %v8960_v5  ;;  %2004 = vmatpush.msra.mxu3 %v8978_v10  ;;  %1985 = vmatmul.f32.vlgmr.msra.gmra.mxu2 %v8583_v13  ;;  %v9006_v5 = vld [vmem:[%s11617_s1 + $0x7f8] sm:$0xff] }
 0x4a7   :  { %13257 = vst [vmem:[#allocation106_spill] sm:$0xff] %v8966_v38  ;;  %2005 = vmatmul.f32.vlgmr.msra.gmra.mxu3 %v8581_v0  ;;  %v8988_v38 = vld [vmem:[%s11617_s1 + $0x3f0] sm:$0xff] }
 0x4a8   :  { %13258 = vst [vmem:[#allocation121_spill] sm:$0xff] %v8972_v41  ;;  %2009 = vmatpush.msrb.mxu0 %v8988_v38  ;;  %v8994_v41 = vld [vmem:[%s11617_s1 + $0x7f0] sm:$0xff]  ;;  %2069 = vmatpush.msrb.mxu3 %v9006_v5 }
 0x4a9   :  { %13259 = vst [vmem:[#allocation122_spill] sm:$0xff] %v8978_v10  ;;  %2029 = vmatpush.msrb.mxu1 %v8994_v41  ;;  %v9000_v10 = vld [vmem:[%s11617_s1 + $0x3f8] sm:$0xff] }
 0x4aa   :  { %13260 = vst [vmem:[#allocation109_spill] sm:$0xff] %v8988_v38  ;;  %2049 = vmatpush.msrb.mxu2 %v9000_v10  ;;  %v9012_v38 = vld [vmem:[%s11617_s1 + $0x3b0] sm:$0xff] }
 0x4ab   :  { %13261 = vst [vmem:[#allocation110_spill] sm:$0xff] %v8994_v41  ;;  %2010 = vmatpush.msrb.mxu0 %v9012_v38  ;;  %v9018_v41 = vld [vmem:[%s11617_s1 + $0x7b0] sm:$0xff] }
 0x4ac   :  { %13262 = vst [vmem:[#allocation123_spill] sm:$0xff] %v9000_v10  ;;  %2030 = vmatpush.msrb.mxu1 %v9018_v41  ;;  %v9024_v10 = vld [vmem:[%s11617_s1 + $0x3b8] sm:$0xff] }
 0x4ad   :  { %13263 = vst [vmem:[#allocation124_spill] sm:$0xff] %v9006_v5  ;;  %2050 = vmatpush.msrb.mxu2 %v9024_v10  ;;  %v9030_v5 = vld [vmem:[%s11617_s1 + $0x7b8] sm:$0xff] }
 0x4ae   :  { %13264 = vst [vmem:[#allocation111_spill] sm:$0xff] %v9012_v38  ;;  %2070 = vmatpush.msrb.mxu3 %v9030_v5  ;;  %v9036_v38 = vld [vmem:[%s11617_s1 + $0x370] sm:$0xff] }
 0x4af   :  { %13265 = vst [vmem:[#allocation112_spill] sm:$0xff] %v9018_v41  ;;  %2011 = vmatpush.msrb.mxu0 %v9036_v38  ;;  %v9042_v41 = vld [vmem:[%s11617_s1 + $0x770] sm:$0xff] }
 0x4b0   :  { %13266 = vst [vmem:[#allocation127_spill] sm:$0xff] %v9024_v10  ;;  %2031 = vmatpush.msrb.mxu1 %v9042_v41  ;;  %v9048_v10 = vld [vmem:[%s11617_s1 + $0x378] sm:$0xff] }
 0x4b1   :  { %13267 = vst [vmem:[#allocation128_spill] sm:$0xff] %v9030_v5  ;;  %2051 = vmatpush.msrb.mxu2 %v9048_v10  ;;  %v9054_v5 = vld [vmem:[%s11617_s1 + $0x778] sm:$0xff] }
 0x4b2   :  { %13268 = vst [vmem:[#allocation115_spill] sm:$0xff] %v9036_v38  ;;  %2071 = vmatpush.msrb.mxu3 %v9054_v5  ;;  %v9060_v38 = vld [vmem:[%s11617_s1 + $0x330] sm:$0xff] }
 0x4b3   :  { %13269 = vst [vmem:[#allocation116_spill] sm:$0xff] %v9042_v41  ;;  %2012 = vmatpush.msrb.mxu0 %v9060_v38  ;;  %v9066_v41 = vld [vmem:[%s11617_s1 + $0x730] sm:$0xff] }
 0x4b4   :  { %13270 = vst [vmem:[#allocation131_spill] sm:$0xff] %v9048_v10  ;;  %2032 = vmatpush.msrb.mxu1 %v9066_v41  ;;  %v9072_v10 = vld [vmem:[%s11617_s1 + $0x338] sm:$0xff] }
 0x4b5   :  { %13271 = vst [vmem:[#allocation132_spill] sm:$0xff] %v9054_v5  ;;  %2052 = vmatpush.msrb.mxu2 %v9072_v10  ;;  %v9078_v5 = vld [vmem:[%s11617_s1 + $0x738] sm:$0xff] }
 0x4b6   :  { %13272 = vst [vmem:[#allocation119_spill] sm:$0xff] %v9060_v38  ;;  %2072 = vmatpush.msrb.mxu3 %v9078_v5  ;;  %v9084_v38 = vld [vmem:[%s11617_s1 + $0x2f0] sm:$0xff] }
 0x4b7   :  { %13273 = vst [vmem:[#allocation120_spill] sm:$0xff] %v9066_v41  ;;  %2013 = vmatpush.msrb.mxu0 %v9084_v38  ;;  %v9090_v41 = vld [vmem:[%s11617_s1 + $0x6f0] sm:$0xff] }
 0x4b8   :  { %13274 = vst [vmem:[#allocation135_spill] sm:$0xff] %v9072_v10  ;;  %2033 = vmatpush.msrb.mxu1 %v9090_v41  ;;  %v9096_v10 = vld [vmem:[%s11617_s1 + $0x2f8] sm:$0xff] }
 0x4b9   :  { %13275 = vst [vmem:[#allocation136_spill] sm:$0xff] %v9078_v5  ;;  %2053 = vmatpush.msrb.mxu2 %v9096_v10  ;;  %v9102_v5 = vld [vmem:[%s11617_s1 + $0x6f8] sm:$0xff] }
 0x4ba   :  { %13276 = vst [vmem:[#allocation125_spill] sm:$0xff] %v9084_v38  ;;  %2073 = vmatpush.msrb.mxu3 %v9102_v5  ;;  %v9108_v38 = vld [vmem:[%s11617_s1 + $0x2b0] sm:$0xff] }
 0x4bb   :  { %13277 = vst [vmem:[#allocation126_spill] sm:$0xff] %v9090_v41  ;;  %2014 = vmatpush.msrb.mxu0 %v9108_v38  ;;  %v9114_v41 = vld [vmem:[%s11617_s1 + $0x6b0] sm:$0xff] }
 0x4bc   :  { %13278 = vst [vmem:[#allocation139_spill] sm:$0xff] %v9096_v10  ;;  %2034 = vmatpush.msrb.mxu1 %v9114_v41  ;;  %v9120_v10 = vld [vmem:[%s11617_s1 + $0x2b8] sm:$0xff] }
 0x4bd   :  { %13279 = vst [vmem:[#allocation140_spill] sm:$0xff] %v9102_v5  ;;  %2054 = vmatpush.msrb.mxu2 %v9120_v10  ;;  %v9126_v5 = vld [vmem:[%s11617_s1 + $0x6b8] sm:$0xff] }
 0x4be   :  { %13280 = vst [vmem:[#allocation129_spill] sm:$0xff] %v9108_v38  ;;  %2074 = vmatpush.msrb.mxu3 %v9126_v5  ;;  %v9132_v38 = vld [vmem:[%s11617_s1 + $0x270] sm:$0xff] }
 0x4bf   :  { %13281 = vst [vmem:[#allocation130_spill] sm:$0xff] %v9114_v41  ;;  %2015 = vmatpush.msrb.mxu0 %v9132_v38  ;;  %v9138_v41 = vld [vmem:[%s11617_s1 + $0x670] sm:$0xff] }
 0x4c0   :  { %13282 = vst [vmem:[#allocation143_spill] sm:$0xff] %v9120_v10  ;;  %2035 = vmatpush.msrb.mxu1 %v9138_v41  ;;  %v9144_v10 = vld [vmem:[%s11617_s1 + $0x278] sm:$0xff] }
 0x4c1   :  { %13283 = vst [vmem:[#allocation144_spill] sm:$0xff] %v9126_v5  ;;  %2055 = vmatpush.msrb.mxu2 %v9144_v10  ;;  %v9150_v5 = vld [vmem:[%s11617_s1 + $0x678] sm:$0xff] }
 0x4c2   :  { %13284 = vst [vmem:[#allocation133_spill] sm:$0xff] %v9132_v38  ;;  %2075 = vmatpush.msrb.mxu3 %v9150_v5  ;;  %v9156_v38 = vld [vmem:[%s11617_s1 + $0x230] sm:$0xff] }
 0x4c3   :  { %13285 = vst [vmem:[#allocation134_spill] sm:$0xff] %v9138_v41  ;;  %2016 = vmatpush.msrb.mxu0 %v9156_v38  ;;  %v9162_v41 = vld [vmem:[%s11617_s1 + $0x630] sm:$0xff] }
 0x4c4   :  { %13286 = vst [vmem:[#allocation147_spill] sm:$0xff] %v9144_v10  ;;  %2036 = vmatpush.msrb.mxu1 %v9162_v41  ;;  %v9168_v10 = vld [vmem:[%s11617_s1 + $0x238] sm:$0xff] }
 0x4c5   :  { %13287 = vst [vmem:[#allocation148_spill] sm:$0xff] %v9150_v5  ;;  %2056 = vmatpush.msrb.mxu2 %v9168_v10  ;;  %v9174_v5 = vld [vmem:[%s11617_s1 + $0x638] sm:$0xff] }
 0x4c6   :  { %13288 = vst [vmem:[#allocation137_spill] sm:$0xff] %v9156_v38  ;;  %2076 = vmatpush.msrb.mxu3 %v9174_v5  ;;  %v9180_v38 = vld [vmem:[%s11617_s1 + $0x1f0] sm:$0xff] }
 0x4c7   :  { %13289 = vst [vmem:[#allocation138_spill] sm:$0xff] %v9162_v41  ;;  %2017 = vmatpush.msrb.mxu0 %v9180_v38  ;;  %v9186_v41 = vld [vmem:[%s11617_s1 + $0x5f0] sm:$0xff] }
 0x4c8   :  { %13290 = vst [vmem:[#allocation151_spill] sm:$0xff] %v9168_v10  ;;  %2037 = vmatpush.msrb.mxu1 %v9186_v41  ;;  %v9192_v10 = vld [vmem:[%s11617_s1 + $0x1f8] sm:$0xff] }
 0x4c9   :  { %13291 = vst [vmem:[#allocation152_spill] sm:$0xff] %v9174_v5  ;;  %2057 = vmatpush.msrb.mxu2 %v9192_v10  ;;  %v9198_v5 = vld [vmem:[%s11617_s1 + $0x5f8] sm:$0xff] }
 0x4ca   :  { %13292 = vst [vmem:[#allocation141_spill] sm:$0xff] %v9180_v38  ;;  %2077 = vmatpush.msrb.mxu3 %v9198_v5  ;;  %v9204_v38 = vld [vmem:[%s11617_s1 + $0x1b0] sm:$0xff] }
 0x4cb   :  { %13293 = vst [vmem:[#allocation142_spill] sm:$0xff] %v9186_v41  ;;  %2018 = vmatpush.msrb.mxu0 %v9204_v38  ;;  %v9210_v41 = vld [vmem:[%s11617_s1 + $0x5b0] sm:$0xff] }
 0x4cc   :  { %13294 = vst [vmem:[#allocation155_spill] sm:$0xff] %v9192_v10  ;;  %2038 = vmatpush.msrb.mxu1 %v9210_v41  ;;  %v9216_v10 = vld [vmem:[%s11617_s1 + $0x1b8] sm:$0xff] }
 0x4cd   :  { %13295 = vst [vmem:[#allocation156_spill] sm:$0xff] %v9198_v5  ;;  %2058 = vmatpush.msrb.mxu2 %v9216_v10  ;;  %v9222_v5 = vld [vmem:[%s11617_s1 + $0x5b8] sm:$0xff] }
 0x4ce   :  { %13296 = vst [vmem:[#allocation145_spill] sm:$0xff] %v9204_v38  ;;  %2078 = vmatpush.msrb.mxu3 %v9222_v5  ;;  %v9228_v38 = vld [vmem:[%s11617_s1 + $0x170] sm:$0xff] }
 0x4cf   :  { %13297 = vst [vmem:[#allocation146_spill] sm:$0xff] %v9210_v41  ;;  %2019 = vmatpush.msrb.mxu0 %v9228_v38  ;;  %v9234_v41 = vld [vmem:[%s11617_s1 + $0x570] sm:$0xff] }
 0x4d0   :  { %13298 = vst [vmem:[#allocation159_spill] sm:$0xff] %v9216_v10  ;;  %2039 = vmatpush.msrb.mxu1 %v9234_v41  ;;  %v9240_v10 = vld [vmem:[%s11617_s1 + $0x178] sm:$0xff] }
 0x4d1   :  { %13299 = vst [vmem:[#allocation160_spill] sm:$0xff] %v9222_v5  ;;  %2059 = vmatpush.msrb.mxu2 %v9240_v10  ;;  %v9246_v5 = vld [vmem:[%s11617_s1 + $0x578] sm:$0xff] }
 0x4d2   :  { %13300 = vst [vmem:[#allocation149_spill] sm:$0xff] %v9228_v38  ;;  %2079 = vmatpush.msrb.mxu3 %v9246_v5  ;;  %v9252_v38 = vld [vmem:[%s11617_s1 + $0x130] sm:$0xff] }
 0x4d3   :  { %13301 = vst [vmem:[#allocation150_spill] sm:$0xff] %v9234_v41  ;;  %2020 = vmatpush.msrb.mxu0 %v9252_v38  ;;  %v9258_v41 = vld [vmem:[%s11617_s1 + $0x530] sm:$0xff] }
 0x4d4   :  { %13302 = vst [vmem:[#allocation163_spill] sm:$0xff] %v9240_v10  ;;  %2040 = vmatpush.msrb.mxu1 %v9258_v41  ;;  %v9264_v10 = vld [vmem:[%s11617_s1 + $0x138] sm:$0xff] }
 0x4d5   :  { %13303 = vst [vmem:[#allocation164_spill] sm:$0xff] %v9246_v5  ;;  %2060 = vmatpush.msrb.mxu2 %v9264_v10  ;;  %v9270_v5 = vld [vmem:[%s11617_s1 + $0x538] sm:$0xff] }
 0x4d6   :  { %13304 = vst [vmem:[#allocation153_spill] sm:$0xff] %v9252_v38  ;;  %2080 = vmatpush.msrb.mxu3 %v9270_v5  ;;  %v9276_v38 = vld [vmem:[%s11617_s1 + $0xf0] sm:$0xff] }
 0x4d7   :  { %13305 = vst [vmem:[#allocation154_spill] sm:$0xff] %v9258_v41  ;;  %2021 = vmatpush.msrb.mxu0 %v9276_v38  ;;  %v9282_v41 = vld [vmem:[%s11617_s1 + $0x4f0] sm:$0xff] }
 0x4d8   :  { %13306 = vst [vmem:[#allocation167_spill] sm:$0xff] %v9264_v10  ;;  %2041 = vmatpush.msrb.mxu1 %v9282_v41  ;;  %v9288_v10 = vld [vmem:[%s11617_s1 + $0xf8] sm:$0xff] }
 0x4d9   :  { %13307 = vst [vmem:[#allocation157_spill] sm:$0xff] %v9270_v5  ;;  %2061 = vmatpush.msrb.mxu2 %v9288_v10  ;;  %v9294_v5 = vld [vmem:[%s11617_s1 + $0x4f8] sm:$0xff] }
 0x4da   :  { %13308 = vst [vmem:[#allocation158_spill] sm:$0xff] %v9276_v38  ;;  %2081 = vmatpush.msrb.mxu3 %v9294_v5  ;;  %v9300_v38 = vld [vmem:[%s11617_s1 + $0xb0] sm:$0xff] }
 0x4db   :  { %13309 = vst [vmem:[#allocation170_spill] sm:$0xff] %v9282_v41  ;;  %2022 = vmatpush.msrb.mxu0 %v9300_v38  ;;  %v9306_v41 = vld [vmem:[%s11617_s1 + $0x4b0] sm:$0xff] }
 0x4dc   :  { %13310 = vst [vmem:[#allocation171_spill] sm:$0xff] %v9288_v10  ;;  %2042 = vmatpush.msrb.mxu1 %v9306_v41  ;;  %v9312_v10 = vld [vmem:[%s11617_s1 + $0xb8] sm:$0xff] }
 0x4dd   :  { %13311 = vst [vmem:[#allocation161_spill] sm:$0xff] %v9294_v5  ;;  %2062 = vmatpush.msrb.mxu2 %v9312_v10  ;;  %v9318_v5 = vld [vmem:[%s11617_s1 + $0x4b8] sm:$0xff] }
 0x4de   :  { %13312 = vst [vmem:[#allocation162_spill] sm:$0xff] %v9300_v38  ;;  %2082 = vmatpush.msrb.mxu3 %v9318_v5  ;;  %v9324_v38 = vld [vmem:[%s11617_s1 + $0x70] sm:$0xff] }
 0x4df   :  { %13313 = vst [vmem:[#allocation174_spill] sm:$0xff] %v9306_v41  ;;  %2023 = vmatpush.msrb.mxu0 %v9324_v38  ;;  %v9330_v41 = vld [vmem:[%s11617_s1 + $0x470] sm:$0xff] }
 0x4e0   :  { %13314 = vst [vmem:[#allocation175_spill] sm:$0xff] %v9312_v10  ;;  %2043 = vmatpush.msrb.mxu1 %v9330_v41  ;;  %v9336_v10 = vld [vmem:[%s11617_s1 + $0x78] sm:$0xff] }
 0x4e1   :  { %13315 = vst [vmem:[#allocation165_spill] sm:$0xff] %v9318_v5  ;;  %2063 = vmatpush.msrb.mxu2 %v9336_v10  ;;  %v9342_v5 = vld [vmem:[%s11617_s1 + $0x478] sm:$0xff] }
 0x4e2   :  { %13316 = vst [vmem:[#allocation166_spill] sm:$0xff] %v9324_v38  ;;  %2083 = vmatpush.msrb.mxu3 %v9342_v5  ;;  %v9348_v38 = vld [vmem:[%s11617_s1 + $0x30] sm:$0xff] }
 0x4e3   :  { %13317 = vst [vmem:[#allocation168_spill] sm:$0xff] %v9330_v41  ;;  %2024 = vmatpush.msrb.mxu0 %v9348_v38  ;;  %v9354_v41 = vld [vmem:[%s11617_s1 + $0x430] sm:$0xff] }
 0x4e4   :  { %13318 = vst [vmem:[#allocation169_spill] sm:$0xff] %v9336_v10  ;;  %2044 = vmatpush.msrb.mxu1 %v9354_v41  ;;  %v9360_v10 = vld [vmem:[%s11617_s1 + $0x38] sm:$0xff]  ;;  %2025 = vmatmul.f32.vlgmr.msrb.gmra.mxu0 %v8583_v13 }
 0x4e5   :  { %13319 = vst [vmem:[#allocation172_spill] sm:$0xff] %v9342_v5  ;;  %2064 = vmatpush.msrb.mxu2 %v9360_v10  ;;  %v9366_v5 = vld [vmem:[%s11617_s1 + $0x438] sm:$0xff]  ;;  %2045 = vmatmul.f32.vlgmr.msrb.gmra.mxu1 %v8581_v0 }
 0x4e6   :  { %13320 = vst [vmem:[#allocation173_spill] sm:$0xff] %v9354_v41  ;;  %2084 = vmatpush.msrb.mxu3 %v9366_v5  ;;  %2065 = vmatmul.f32.vlgmr.msrb.gmra.mxu2 %v8583_v13  ;;  %v9376_v41 = vld [vmem:[%s11617_s1 + $0x3c0] sm:$0xff]  ;;  %v9388_v13 = vld [vmem:[%s11617_s1 + $0x3c8] sm:$0xff] }
 0x4e7   :  { %13321 = vst [vmem:[#allocation180_spill] sm:$0xff] %v9360_v10  ;;  %2085 = vmatmul.f32.vlgmr.msrb.gmra.mxu3 %v8581_v0  ;;  %2142 = vmatpush.msra.mxu0 %v9376_v41  ;;  %v9382_v10 = vld [vmem:[%s11617_s1 + $0x7c0] sm:$0xff]  ;;  %v9394_v0 = vld [vmem:[%s11617_s1 + $0x7c8] sm:$0xff] }
 0x4e8   :  { %13322 = vst [vmem:[#allocation181_spill] sm:$0xff] %v9376_v41  ;;  %2162 = vmatpush.msra.mxu1 %v9382_v10  ;;  %2182 = vmatpush.msra.mxu2 %v9388_v13  ;;  %v9400_v41 = vld [vmem:[%s11617_s1 + $0x380] sm:$0xff] }
 0x4e9   :  { %13323 = vst [vmem:[#allocation176_spill] sm:$0xff] %v9382_v10  ;;  %2202 = vmatpush.msra.mxu3 %v9394_v0  ;;  %2143 = vmatpush.msra.mxu0 %v9400_v41  ;;  %v9406_v10 = vld [vmem:[%s11617_s1 + $0x780] sm:$0xff] }
 0x4ea   :  { %13324 = vst [vmem:[#allocation177_spill] sm:$0xff] %v9388_v13  ;;  %2163 = vmatpush.msra.mxu1 %v9406_v10  ;;  %v9412_v13 = vld [vmem:[%s11617_s1 + $0x388] sm:$0xff] }
 0x4eb   :  { %13325 = vst [vmem:[#allocation184_spill] sm:$0xff] %v9394_v0  ;;  %2183 = vmatpush.msra.mxu2 %v9412_v13  ;;  %v9418_v0 = vld [vmem:[%s11617_s1 + $0x788] sm:$0xff] }
 0x4ec   :  { %13326 = vst [vmem:[#allocation185_spill] sm:$0xff] %v9400_v41  ;;  %2203 = vmatpush.msra.mxu3 %v9418_v0  ;;  %v9424_v41 = vld [vmem:[%s11617_s1 + $0x340] sm:$0xff] }
 0x4ed   :  { %13327 = vst [vmem:[#allocation178_spill] sm:$0xff] %v9406_v10  ;;  %2144 = vmatpush.msra.mxu0 %v9424_v41  ;;  %v9430_v10 = vld [vmem:[%s11617_s1 + $0x740] sm:$0xff] }
 0x4ee   :  { %13328 = vst [vmem:[#allocation179_spill] sm:$0xff] %v9412_v13  ;;  %2164 = vmatpush.msra.mxu1 %v9430_v10  ;;  %v9436_v13 = vld [vmem:[%s11617_s1 + $0x348] sm:$0xff] }
 0x4ef   :  { %13329 = vst [vmem:[#allocation188_spill] sm:$0xff] %v9418_v0  ;;  %2184 = vmatpush.msra.mxu2 %v9436_v13  ;;  %v9442_v0 = vld [vmem:[%s11617_s1 + $0x748] sm:$0xff] }
 0x4f0   :  { %13330 = vst [vmem:[#allocation189_spill] sm:$0xff] %v9424_v41  ;;  %2204 = vmatpush.msra.mxu3 %v9442_v0  ;;  %v9448_v41 = vld [vmem:[%s11617_s1 + $0x300] sm:$0xff] }
 0x4f1   :  { %13331 = vst [vmem:[#allocation182_spill] sm:$0xff] %v9430_v10  ;;  %2145 = vmatpush.msra.mxu0 %v9448_v41  ;;  %v9454_v10 = vld [vmem:[%s11617_s1 + $0x700] sm:$0xff] }
 0x4f2   :  { %13332 = vst [vmem:[#allocation183_spill] sm:$0xff] %v9436_v13  ;;  %2165 = vmatpush.msra.mxu1 %v9454_v10  ;;  %v9460_v13 = vld [vmem:[%s11617_s1 + $0x308] sm:$0xff] }
 0x4f3   :  { %13333 = vst [vmem:[#allocation192_spill] sm:$0xff] %v9442_v0  ;;  %2185 = vmatpush.msra.mxu2 %v9460_v13  ;;  %v9466_v0 = vld [vmem:[%s11617_s1 + $0x708] sm:$0xff] }
 0x4f4   :  { %13334 = vst [vmem:[#allocation193_spill] sm:$0xff] %v9448_v41  ;;  %2205 = vmatpush.msra.mxu3 %v9466_v0  ;;  %v9472_v41 = vld [vmem:[%s11617_s1 + $0x2c0] sm:$0xff] }
 0x4f5   :  { %13335 = vst [vmem:[#allocation186_spill] sm:$0xff] %v9454_v10  ;;  %2146 = vmatpush.msra.mxu0 %v9472_v41  ;;  %v9478_v10 = vld [vmem:[%s11617_s1 + $0x6c0] sm:$0xff] }
 0x4f6   :  { %13336 = vst [vmem:[#allocation187_spill] sm:$0xff] %v9460_v13  ;;  %2166 = vmatpush.msra.mxu1 %v9478_v10  ;;  %v9484_v13 = vld [vmem:[%s11617_s1 + $0x2c8] sm:$0xff] }
 0x4f7   :  { %13337 = vst [vmem:[#allocation190_spill] sm:$0xff] %v9466_v0  ;;  %2186 = vmatpush.msra.mxu2 %v9484_v13  ;;  %v9490_v0 = vld [vmem:[%s11617_s1 + $0x6c8] sm:$0xff]  ;;  %2147 = vmatpush.msra.mxu0 %v7926_v21  ;;  %v13340_v21 = vld [vmem:[#allocation2_spill] sm:$0xff] }
 0x4f8   :  { %13338 = vst [vmem:[#allocation191_spill] sm:$0xff] %v9478_v10  ;;  %2206 = vmatpush.msra.mxu3 %v9490_v0  ;;  %2167 = vmatpush.msra.mxu1 %v7932_v37  ;;  %v9498_v10 = vld [vmem:[%s11617_s1 + $0x288] sm:$0xff] }
 0x4f9   :  { %13339 = vst [vmem:[#allocation194_spill] sm:$0xff] %v9484_v13  ;;  %2187 = vmatpush.msra.mxu2 %v9498_v10  ;;  %v9504_v13 = vld [vmem:[%s11617_s1 + $0x688] sm:$0xff]  ;;  %2148 = vmatpush.msra.mxu0 %v7940_v48  ;;  %v13342_v48 = vld [vmem:[#allocation8_spill] sm:$0xff] }
 0x4fa   :  { %2207 = vmatpush.msra.mxu3 %v9504_v13  ;;  %2168 = vmatpush.msra.mxu1 %v7946_v11  ;;  %v13341_v37 = vld [vmem:[#allocation7_spill] sm:$0xff] }
 0x4fb   :  { %2188 = vmatpush.msra.mxu2 %v7952_v49  ;;  %2149 = vmatpush.msra.mxu0 %v7964_v20  ;;  %v13343_v11 = vld [vmem:[#allocation3_spill] sm:$0xff]  ;;  %v13344_v49 = vld [vmem:[#allocation4_spill] sm:$0xff] }
 0x4fc   :  { %2208 = vmatpush.msra.mxu3 %v7958_v43  ;;  %2169 = vmatpush.msra.mxu1 %v7970_v44  ;;  %v13345_v43 = vld [vmem:[#allocation11_spill] sm:$0xff]  ;;  %v13346_v20 = vld [vmem:[#allocation12_spill] sm:$0xff]  ;;  %v13347_v44 = vld [vmem:[#allocation5_spill] sm:$0xff] }
 0x4fd   :  { %2189 = vmatpush.msra.mxu2 %v7976_v33  ;;  %2150 = vmatpush.msra.mxu0 %v7988_v31  ;;  %v13348_v33 = vld [vmem:[#allocation6_spill] sm:$0xff]  ;;  %v13350_v31 = vld [vmem:[#allocation16_spill] sm:$0xff] }
 0x4fe   :  { %2209 = vmatpush.msra.mxu3 %v7982_v34  ;;  %2170 = vmatpush.msra.mxu1 %v7994_v36  ;;  %v13349_v34 = vld [vmem:[#allocation15_spill] sm:$0xff]  ;;  %v13351_v36 = vld [vmem:[#allocation9_spill] sm:$0xff] }
 0x4ff   :  { %2190 = vmatpush.msra.mxu2 %v8000_v35  ;;  %2151 = vmatpush.msra.mxu0 %v8012_v45  ;;  %v13352_v35 = vld [vmem:[#allocation10_spill] sm:$0xff]  ;;  %v13354_v45 = vld [vmem:[#allocation20_spill] sm:$0xff] }
 0x500   :  { %2210 = vmatpush.msra.mxu3 %v8006_v16  ;;  %2171 = vmatpush.msra.mxu1 %v8018_v32  ;;  %v13353_v16 = vld [vmem:[#allocation19_spill] sm:$0xff]  ;;  %v13355_v32 = vld [vmem:[#allocation13_spill] sm:$0xff] }
 0x501   :  { %2191 = vmatpush.msra.mxu2 %v8024_v30  ;;  %2152 = vmatpush.msra.mxu0 %v8036_v2  ;;  %v13356_v30 = vld [vmem:[#allocation14_spill] sm:$0xff]  ;;  %v13358_v2 = vld [vmem:[#allocation24_spill] sm:$0xff] }
 0x502   :  { %2211 = vmatpush.msra.mxu3 %v8030_v1  ;;  %2172 = vmatpush.msra.mxu1 %v8042_v3  ;;  %v13357_v1 = vld [vmem:[#allocation23_spill] sm:$0xff]  ;;  %v13359_v3 = vld [vmem:[#allocation17_spill] sm:$0xff] }
 0x503   :  { %2192 = vmatpush.msra.mxu2 %v8048_v4  ;;  %2153 = vmatpush.msra.mxu0 %v8060_v7  ;;  %v13360_v4 = vld [vmem:[#allocation18_spill] sm:$0xff]  ;;  %v13362_v7 = vld [vmem:[#allocation28_spill] sm:$0xff] }
 0x504   :  { %2212 = vmatpush.msra.mxu3 %v8054_v6  ;;  %2173 = vmatpush.msra.mxu1 %v8066_v8  ;;  %v13361_v6 = vld [vmem:[#allocation27_spill] sm:$0xff]  ;;  %v13363_v8 = vld [vmem:[#allocation21_spill] sm:$0xff] }
 0x505   :  { %2193 = vmatpush.msra.mxu2 %v8072_v14  ;;  %2154 = vmatpush.msra.mxu0 %v8084_v22  ;;  %v13364_v14 = vld [vmem:[#allocation22_spill] sm:$0xff]  ;;  %v13366_v22 = vld [vmem:[#allocation32_spill] sm:$0xff] }
 0x506   :  { %2213 = vmatpush.msra.mxu3 %v8078_v15  ;;  %2174 = vmatpush.msra.mxu1 %v8090_v23  ;;  %v13365_v15 = vld [vmem:[#allocation31_spill] sm:$0xff]  ;;  %v13367_v23 = vld [vmem:[#allocation25_spill] sm:$0xff] }
 0x507   :  { %2194 = vmatpush.msra.mxu2 %v8096_v24  ;;  %2155 = vmatpush.msra.mxu0 %v8108_v26  ;;  %v13368_v24 = vld [vmem:[#allocation26_spill] sm:$0xff]  ;;  %v13370_v26 = vld [vmem:[#allocation36_spill] sm:$0xff] }
 0x508   :  { %2214 = vmatpush.msra.mxu3 %v8102_v25  ;;  %2175 = vmatpush.msra.mxu1 %v8114_v27  ;;  %v13369_v25 = vld [vmem:[#allocation35_spill] sm:$0xff]  ;;  %v13371_v27 = vld [vmem:[#allocation29_spill] sm:$0xff] }
 0x509   :  { %2195 = vmatpush.msra.mxu2 %v8120_v50  ;;  %2156 = vmatpush.msra.mxu0 %v8132_v9  ;;  %v13372_v50 = vld [vmem:[#allocation30_spill] sm:$0xff]  ;;  %v13374_v9 = vld [vmem:[#allocation40_spill] sm:$0xff] }
 0x50a   :  { %2215 = vmatpush.msra.mxu3 %v8126_v51  ;;  %2176 = vmatpush.msra.mxu1 %v8138_v19  ;;  %v13373_v51 = vld [vmem:[#allocation39_spill] sm:$0xff]  ;;  %v13375_v19 = vld [vmem:[#allocation33_spill] sm:$0xff] }
 0x50b   :  { %2196 = vmatpush.msra.mxu2 %v13340_v21  ;;  %2157 = vmatpush.msra.mxu0 %v13342_v48  ;;  %v13376_v21 = vld [vmem:[#allocation34_spill] sm:$0xff]  ;;  %v13378_v48 = vld [vmem:[#allocation44_spill] sm:$0xff] }
 0x50c   :  { %2216 = vmatpush.msra.mxu3 %v13341_v37  ;;  %2177 = vmatpush.msra.mxu1 %v13343_v11  ;;  %v13377_v37 = vld [vmem:[#allocation43_spill] sm:$0xff]  ;;  %v13379_v11 = vld [vmem:[#allocation37_spill] sm:$0xff] }
 0x50d   :  { %2197 = vmatpush.msra.mxu2 %v13344_v49  ;;  %2222 = vmatpush.msrb.mxu0 %v13346_v20  ;;  %v13380_v49 = vld [vmem:[#allocation38_spill] sm:$0xff] }
 0x50e   :  { %2217 = vmatpush.msra.mxu3 %v13345_v43  ;;  %2242 = vmatpush.msrb.mxu1 %v13347_v44  ;;  %v13381_v43 = vld [vmem:[#allocation49_spill] sm:$0xff]  ;;  %v13382_v20 = vld [vmem:[#allocation50_spill] sm:$0xff] }
 0x50f   :  { %2262 = vmatpush.msrb.mxu2 %v13348_v33  ;;  %2223 = vmatpush.msrb.mxu0 %v13350_v31  ;;  %v13383_v44 = vld [vmem:[#allocation41_spill] sm:$0xff]  ;;  %v13384_v33 = vld [vmem:[#allocation42_spill] sm:$0xff] }
 0x510   :  { %2282 = vmatpush.msrb.mxu3 %v13349_v34  ;;  %2243 = vmatpush.msrb.mxu1 %v13351_v36  ;;  %v13385_v34 = vld [vmem:[#allocation53_spill] sm:$0xff]  ;;  %v13386_v31 = vld [vmem:[#allocation54_spill] sm:$0xff] }
 0x511   :  { %2263 = vmatpush.msrb.mxu2 %v13352_v35  ;;  %2224 = vmatpush.msrb.mxu0 %v13354_v45  ;;  %v13387_v36 = vld [vmem:[#allocation45_spill] sm:$0xff]  ;;  %v13388_v35 = vld [vmem:[#allocation46_spill] sm:$0xff] }
 0x512   :  { %2283 = vmatpush.msrb.mxu3 %v13353_v16  ;;  %2244 = vmatpush.msrb.mxu1 %v13355_v32  ;;  %v13389_v16 = vld [vmem:[#allocation57_spill] sm:$0xff]  ;;  %v13390_v45 = vld [vmem:[#allocation58_spill] sm:$0xff]  ;;  %v13391_v32 = vld [vmem:[#allocation59_spill] sm:$0xff] }
 0x513   :  { %2264 = vmatpush.msrb.mxu2 %v13356_v30  ;;  %2225 = vmatpush.msrb.mxu0 %v13358_v2  ;;  %v13392_v30 = vld [vmem:[#allocation60_spill] sm:$0xff] }
 0x514   :  { %2284 = vmatpush.msrb.mxu3 %v13357_v1  ;;  %2245 = vmatpush.msrb.mxu1 %v13359_v3  ;;  %v13393_v1 = vld [vmem:[#allocation47_spill] sm:$0xff]  ;;  %v13394_v2 = vld [vmem:[#allocation48_spill] sm:$0xff] }
 0x515   :  { %2265 = vmatpush.msrb.mxu2 %v13360_v4  ;;  %2226 = vmatpush.msrb.mxu0 %v13362_v7  ;;  %v13395_v3 = vld [vmem:[#allocation63_spill] sm:$0xff]  ;;  %v13396_v4 = vld [vmem:[#allocation64_spill] sm:$0xff] }
 0x516   :  { %2285 = vmatpush.msrb.mxu3 %v13361_v6  ;;  %2246 = vmatpush.msrb.mxu1 %v13363_v8  ;;  %v13397_v6 = vld [vmem:[#allocation51_spill] sm:$0xff]  ;;  %v13398_v7 = vld [vmem:[#allocation52_spill] sm:$0xff] }
 0x517   :  { %2266 = vmatpush.msrb.mxu2 %v13364_v14  ;;  %2227 = vmatpush.msrb.mxu0 %v13366_v22  ;;  %v13399_v8 = vld [vmem:[#allocation67_spill] sm:$0xff]  ;;  %v13400_v14 = vld [vmem:[#allocation68_spill] sm:$0xff] }
 0x518   :  { %2286 = vmatpush.msrb.mxu3 %v13365_v15  ;;  %2247 = vmatpush.msrb.mxu1 %v13367_v23  ;;  %v13401_v15 = vld [vmem:[#allocation55_spill] sm:$0xff]  ;;  %v13402_v22 = vld [vmem:[#allocation56_spill] sm:$0xff] }
 0x519   :  { %2267 = vmatpush.msrb.mxu2 %v13368_v24  ;;  %2228 = vmatpush.msrb.mxu0 %v13370_v26  ;;  %v13403_v23 = vld [vmem:[#allocation71_spill] sm:$0xff]  ;;  %v13404_v24 = vld [vmem:[#allocation72_spill] sm:$0xff]  ;;  %v13406_v26 = vld [vmem:[#allocation62_spill] sm:$0xff] }
 0x51a   :  { %2287 = vmatpush.msrb.mxu3 %v13369_v25  ;;  %2248 = vmatpush.msrb.mxu1 %v13371_v27  ;;  %v13405_v25 = vld [vmem:[#allocation61_spill] sm:$0xff]  ;;  %v13407_v27 = vld [vmem:[#allocation75_spill] sm:$0xff] }
 0x51b   :  { %2268 = vmatpush.msrb.mxu2 %v13372_v50  ;;  %2229 = vmatpush.msrb.mxu0 %v13374_v9  ;;  %v13408_v50 = vld [vmem:[#allocation76_spill] sm:$0xff]  ;;  %v1786_v9 = vpop.f32.mrf.mxu0 }
 0x51c   :  { %2288 = vmatpush.msrb.mxu3 %v13373_v51  ;;  %2249 = vmatpush.msrb.mxu1 %v13375_v19  ;;  %v13409_v51 = vld [vmem:[#allocation65_spill] sm:$0xff]  ;;  %v1806_v19 = vpop.f32.mrf.mxu1 }
 0x51d   :  { %2269 = vmatpush.msrb.mxu2 %v13376_v21  ;;  %2230 = vmatpush.msrb.mxu0 %v13378_v48  ;;  %v1826_v21 = vpop.f32.mrf.mxu2 }
 0x51e   :  { %2289 = vmatpush.msrb.mxu3 %v13377_v37  ;;  %2250 = vmatpush.msrb.mxu1 %v13379_v11  ;;  %v1846_v37 = vpop.f32.mrf.mxu3 }
 0x51f   :  { %2270 = vmatpush.msrb.mxu2 %v13380_v49  ;;  %2231 = vmatpush.msrb.mxu0 %v13382_v20 }
 0x520   :  { %2290 = vmatpush.msrb.mxu3 %v13381_v43  ;;  %2251 = vmatpush.msrb.mxu1 %v13383_v44 }
 0x521   :  { %2271 = vmatpush.msrb.mxu2 %v13384_v33  ;;  %2232 = vmatpush.msrb.mxu0 %v13386_v31 }
 0x522   :  { %2291 = vmatpush.msrb.mxu3 %v13385_v34  ;;  %2252 = vmatpush.msrb.mxu1 %v13387_v36 }
 0x523   :  { %2272 = vmatpush.msrb.mxu2 %v13388_v35  ;;  %2233 = vmatpush.msrb.mxu0 %v13390_v45  ;;  %v1866_v48 = vpop.f32.mrf.mxu0 }
 0x524   :  { %2292 = vmatpush.msrb.mxu3 %v13389_v16  ;;  %2253 = vmatpush.msrb.mxu1 %v13391_v32  ;;  %v1886_v11 = vpop.f32.mrf.mxu1  ;;  %v1847_v16 = vadd.f32 %v1846_v37, %v1826_v21 }
 0x525   :  { %2273 = vmatpush.msrb.mxu2 %v13392_v30  ;;  %2234 = vmatpush.msrb.mxu0 %v13394_v2  ;;  %v1906_v49 = vpop.f32.mrf.mxu2  ;;  %v1887_v45 = vadd.f32 %v1886_v11, %v1866_v48 }
 0x526   :  { %2293 = vmatpush.msrb.mxu3 %v13393_v1  ;;  %2254 = vmatpush.msrb.mxu1 %v13395_v3  ;;  %v1926_v43 = vpop.f32.mrf.mxu3 }
 0x527   :  { %2274 = vmatpush.msrb.mxu2 %v13396_v4  ;;  %2235 = vmatpush.msrb.mxu0 %v13398_v7  ;;  %v1927_v31 = vadd.f32 %v1926_v43, %v1906_v49  ;;  %v3265_v4 = vld [vmem:[%s11618_s0 + $0x4] ss:$8 sm:$0xf]  ;;  %v2097_v7 = vrot.slane %v1847_v16, 7 }
 0x528   :  { %2294 = vmatpush.msrb.mxu3 %v13397_v6  ;;  %2255 = vmatpush.msrb.mxu1 %v13399_v8  ;;  %v2098_v8 = vrot.slane %v1887_v45, 6 }
 0x529   :  { %2275 = vmatpush.msrb.mxu2 %v13400_v14  ;;  %2236 = vmatpush.msrb.mxu0 %v13402_v22  ;;  %v2099_v30 = vrot.slane %v1927_v31, 5 }
 0x52a   :  { %2295 = vmatpush.msrb.mxu3 %v13401_v15  ;;  %2256 = vmatpush.msrb.mxu1 %v13403_v23  ;;  %v3266_v15 = vld [vmem:[%s11618_s0 + $0x4] ss:$8 sm:$0xf0]  ;;  %v1807_v23 = vadd.f32 %v1806_v19, %v1786_v9 }
 0x52b   :  { %2276 = vmatpush.msrb.mxu2 %v13404_v24  ;;  %2237 = vmatpush.msrb.mxu0 %v13406_v26  ;;  %v1946_v20 = vpop.f32.mrf.mxu0  ;;  %v2105_v24 = vsel %vm607_vm0, %v2098_v8, %v2099_v30  ;;  %v13436_v8 = vld [vmem:[#allocation104_spill] sm:$0xff] }
 0x52c   :  { %2296 = vmatpush.msrb.mxu3 %v13405_v25  ;;  %2257 = vmatpush.msrb.mxu1 %v13407_v27  ;;  %v1966_v44 = vpop.f32.mrf.mxu1 }
 0x52d   :  { %2277 = vmatpush.msrb.mxu2 %v13408_v50  ;;  %v1986_v33 = vpop.f32.mrf.mxu2  ;;  %v1967_v1 = vadd.f32 %v1966_v44, %v1946_v20  ;;  %v1766_v50 = vor.u32 %v3266_v15, %v3265_v4  ;;  %v13433_v4 = vld [vmem:[#allocation89_spill] sm:$0xff]  ;;  %v13438_v15 = vld [vmem:[#allocation94_spill] sm:$0xff] }
 0x52e   :  { %2297 = vmatpush.msrb.mxu3 %v13409_v51  ;;  %v2006_v34 = vpop.f32.mrf.mxu3  ;;  %v2104_v51 = vsel %vm605_vm1, %v1807_v23, %v2097_v7  ;;  %v13435_v7 = vld [vmem:[#allocation103_spill] sm:$0xff]  ;;  %v13440_v23 = vld [vmem:[#allocation108_spill] sm:$0xff] }
 0x52f   :  { %v2007_v32 = vadd.f32 %v2006_v34, %v1986_v33  ;;  %v2100_v25 = vrot.slane %v1967_v1, 4  ;;  %v2106_v48 = vsel %vm609_vm4, %v2104_v51, %v2105_v24  ;;  %v13441_v24 = vld [vmem:[#allocation97_spill] sm:$0xff]  ;;  %v13446_v51 = vld [vmem:[#allocation102_spill] sm:$0xff] }
 0x531   :  { %v2101_v14 = vrot.slane %v2007_v32, 3 }
 0x533   :  { %v2107_v21 = vsel %vm611_vm2, %v2100_v25, %v2101_v14  ;;  %v13437_v14 = vld [vmem:[#allocation93_spill] sm:$0xff]  ;;  %v13442_v25 = vld [vmem:[#allocation98_spill] sm:$0xff] }
 0x561   :  { %v2026_v36 = vpop.f32.mrf.mxu0 }
 0x562   :  { %v2046_v35 = vpop.f32.mrf.mxu1 }
 0x563   :  { %v2047_v2 = vadd.f32 %v2046_v35, %v2026_v36 }
 0x565   :  { %v2102_v26 = vrot.slane %v2047_v2, 2 }
 0x569   :  { %v2066_v3 = vpop.f32.mrf.mxu2 }
 0x56a   :  { %v2086_v6 = vpop.f32.mrf.mxu3 }
 0x56b   :  { %v2087_v22 = vadd.f32 %v2086_v6, %v2066_v3  ;;  %v13432_v3 = vld [vmem:[#allocation100_spill] sm:$0xff]  ;;  %v13434_v6 = vld [vmem:[#allocation90_spill] sm:$0xff] }
 0x56d   :  { %v2103_v27 = vrot.slane %v2087_v22, 1  ;;  %v13439_v22 = vld [vmem:[#allocation107_spill] sm:$0xff] }
 0x56f   :  { %v2108_v37 = vsel %vm613_vm3, %v2102_v26, %v2103_v27  ;;  %v13443_v26 = vld [vmem:[#allocation113_spill] sm:$0xff]  ;;  %v13444_v27 = vld [vmem:[#allocation114_spill] sm:$0xff] }
 0x570   :  { %v2109_v11 = vsel %vm615_vm5, %v2107_v21, %v2108_v37  ;;  %v13447_v21 = vld [vmem:[#allocation117_spill] sm:$0xff]  ;;  %v13448_v37 = vld [vmem:[#allocation118_spill] sm:$0xff] }
 0x571   :  { %v2110_v49 = vsel %vm617_vm6, %v2106_v48, %v2109_v11  ;;  %v13449_v48 = vld [vmem:[#allocation105_spill] sm:$0xff]  ;;  %v13450_v11 = vld [vmem:[#allocation106_spill] sm:$0xff] }
 0x572   :  { %v2112_v43 = vadd.f32 %v2110_v49, %v1766_v50  ;;  %v13445_v50 = vld [vmem:[#allocation101_spill] sm:$0xff] }
 0x573   :  { %v13451_v49 = vld [vmem:[#allocation121_spill] sm:$0xff] }
 0x574   :  { %v2113_v9 = vmul.f32 0.5, %v2112_v43  ;;  %v2118_v19 = vrot.slane %v2112_v43, 6  ;;  %v13452_v43 = vld [vmem:[#allocation122_spill] sm:$0xff] }
 0x576   :  { %3298 = vtanh.f32 %v2113_v9  ;;  %v13453_v9 = vld [vmem:[#allocation109_spill] sm:$0xff] }
 0x577   :  { %3300 = vtanh.f32 %v2118_v19  ;;  %v13454_v19 = vld [vmem:[#allocation110_spill] sm:$0xff] }
 0x57c   :  { %v3299_v20 = vpop.eup %3298 }
 0x57d   :  { %v2115_v44 = vmul.f32 0.5, %v3299_v20  ;;  %v3301_v31 = vpop.eup %3300  ;;  %v13455_v20 = vld [vmem:[#allocation123_spill] sm:$0xff] }
 0x57f   :  { %v2116_v33 = vadd.f32 0.5, %v2115_v44  ;;  %v13456_v44 = vld [vmem:[#allocation124_spill] sm:$0xff] }
 0x581   :  { %v2122_v34 = vrot.slane %v2116_v33, 2  ;;  %v2125_v35 = vmul.f32 %v3301_v31, %v2116_v33  ;;  %v2128_v45 = vrot.slane %v2116_v33, 4  ;;  %v13457_v33 = vld [vmem:[#allocation111_spill] sm:$0xff] }
 0x582   :  { %v13459_v31 = vld [vmem:[#allocation127_spill] sm:$0xff] }
 0x583   :  { %v2124_v36 = vmul.f32 %v2122_v34, %v8575_v12  ;;  %v13410_v12 = vld [vmem:[#allocation66_spill] sm:$0xff]  ;;  %v13458_v34 = vld [vmem:[#allocation112_spill] sm:$0xff] }
 0x585   :  { %v9625_v16 = vadd.f32 %v2125_v35, %v2124_v36  ;;  %v13460_v36 = vld [vmem:[#allocation128_spill] sm:$0xff]  ;;  %v13461_v35 = vld [vmem:[#allocation115_spill] sm:$0xff] }
 0x587   :  { %3302 = vtanh.f32 %v9625_v16 }
 0x58d   :  { %v3303_v32 = vpop.eup %3302 }
 0x58e   :  { %v2130_v30 = vmul.f32 %v3303_v32, %v2128_v45  ;;  %v13462_v45 = vld [vmem:[#allocation116_spill] sm:$0xff]  ;;  %v13463_v32 = vld [vmem:[#allocation131_spill] sm:$0xff] }
 0x590   :  { %2131 = vst [vmem:[%s11619_s2 + $0x4] sm:$0x1] %v2130_v30  ;;  %v9631_v1 = vperm.slane %v2130_v30, 1  ;;  %v9633_v2 = vperm.slane %v2130_v30, 0  ;;  %v13464_v30 = vld [vmem:[#allocation132_spill] sm:$0xff] }
 0x592   :  { %2135 = vst [vmem:[%s11619_s2 + $0xb] sm:$0x1] %v9631_v1  ;;  %2158 = vmatmul.f32.vlgmr.msra.gmra.mxu0 %v9633_v2  ;;  %2178 = vmatmul.f32.vlgmr.msra.gmra.mxu1 %v9631_v1 }
 0x593   :  { %2198 = vmatmul.f32.vlgmr.msra.gmra.mxu2 %v9633_v2  ;;  %2218 = vmatmul.f32.vlgmr.msra.gmra.mxu3 %v9631_v1 }
 0x594   :  { %2302 = vmatpush.msra.mxu0 %v8596_v59  ;;  %2322 = vmatpush.msra.mxu1 %v8602_v61  ;;  %v13411_v59 = vld [vmem:[#allocation79_spill] sm:$0xff]  ;;  %v13412_v61 = vld [vmem:[#allocation80_spill] sm:$0xff] }
 0x595   :  { %2342 = vmatpush.msra.mxu2 %v8608_v62  ;;  %2362 = vmatpush.msra.mxu3 %v8614_v42  ;;  %v13413_v62 = vld [vmem:[#allocation69_spill] sm:$0xff]  ;;  %v13414_v42 = vld [vmem:[#allocation70_spill] sm:$0xff] }
 0x596   :  { %2303 = vmatpush.msra.mxu0 %v8620_v60  ;;  %2323 = vmatpush.msra.mxu1 %v8626_v46  ;;  %v13415_v60 = vld [vmem:[#allocation83_spill] sm:$0xff]  ;;  %v13416_v46 = vld [vmem:[#allocation84_spill] sm:$0xff] }
 0x597   :  { %2343 = vmatpush.msra.mxu2 %v8632_v47  ;;  %2363 = vmatpush.msra.mxu3 %v8638_v63  ;;  %v13417_v47 = vld [vmem:[#allocation73_spill] sm:$0xff]  ;;  %v13418_v63 = vld [vmem:[#allocation74_spill] sm:$0xff] }
 0x598   :  { %2304 = vmatpush.msra.mxu0 %v8644_v58  ;;  %2324 = vmatpush.msra.mxu1 %v8650_v56  ;;  %v13419_v58 = vld [vmem:[#allocation87_spill] sm:$0xff]  ;;  %v13420_v56 = vld [vmem:[#allocation88_spill] sm:$0xff] }
 0x599   :  { %2344 = vmatpush.msra.mxu2 %v8656_v57  ;;  %2364 = vmatpush.msra.mxu3 %v8662_v39  ;;  %v13421_v57 = vld [vmem:[#allocation77_spill] sm:$0xff]  ;;  %v13422_v39 = vld [vmem:[#allocation78_spill] sm:$0xff] }
 0x59a   :  { %2305 = vmatpush.msra.mxu0 %v8668_v29  ;;  %2325 = vmatpush.msra.mxu1 %v8674_v53  ;;  %v13423_v29 = vld [vmem:[#allocation91_spill] sm:$0xff]  ;;  %v13424_v53 = vld [vmem:[#allocation92_spill] sm:$0xff] }
 0x59b   :  { %2345 = vmatpush.msra.mxu2 %v8680_v18  ;;  %2365 = vmatpush.msra.mxu3 %v8686_v55  ;;  %v13425_v18 = vld [vmem:[#allocation81_spill] sm:$0xff]  ;;  %v13426_v55 = vld [vmem:[#allocation82_spill] sm:$0xff] }
 0x59c   :  { %2238 = vmatmul.f32.vlgmr.msrb.gmra.mxu0 %v9633_v2  ;;  %2258 = vmatmul.f32.vlgmr.msrb.gmra.mxu1 %v9631_v1 }
 0x59d   :  { %2278 = vmatmul.f32.vlgmr.msrb.gmra.mxu2 %v9633_v2  ;;  %2298 = vmatmul.f32.vlgmr.msrb.gmra.mxu3 %v9631_v1 }
 0x59e   :  { %2306 = vmatpush.msra.mxu0 %v8696_v54  ;;  %2326 = vmatpush.msra.mxu1 %v8702_v52  ;;  %v13427_v54 = vld [vmem:[#allocation95_spill] sm:$0xff]  ;;  %v13428_v52 = vld [vmem:[#allocation96_spill] sm:$0xff] }
 0x59f   :  { %2346 = vmatpush.msra.mxu2 %v8708_v40  ;;  %2366 = vmatpush.msra.mxu3 %v8714_v28  ;;  %v13429_v40 = vld [vmem:[#allocation85_spill] sm:$0xff]  ;;  %v13430_v28 = vld [vmem:[#allocation86_spill] sm:$0xff] }
 0x5a0   :  { %2307 = vmatpush.msra.mxu0 %v8720_v17  ;;  %2327 = vmatpush.msra.mxu1 %v13410_v12  ;;  %v13431_v17 = vld [vmem:[#allocation99_spill] sm:$0xff] }
 0x5a1   :  { %2347 = vmatpush.msra.mxu2 %v13411_v59  ;;  %2367 = vmatpush.msra.mxu3 %v13412_v61  ;;  %v13465_v12 = vld [vmem:[#allocation119_spill] sm:$0xff]  ;;  %v13466_v59 = vld [vmem:[#allocation120_spill] sm:$0xff] }
 0x5a2   :  { %2308 = vmatpush.msra.mxu0 %v13413_v62  ;;  %2328 = vmatpush.msra.mxu1 %v13414_v42  ;;  %v13467_v61 = vld [vmem:[#allocation135_spill] sm:$0xff]  ;;  %v13468_v62 = vld [vmem:[#allocation136_spill] sm:$0xff]  ;;  %v13469_v42 = vld [vmem:[#allocation125_spill] sm:$0xff] }
 0x5a3   :  { %2348 = vmatpush.msra.mxu2 %v13415_v60  ;;  %2368 = vmatpush.msra.mxu3 %v13416_v46  ;;  %v13470_v60 = vld [vmem:[#allocation126_spill] sm:$0xff]  ;;  %v13471_v46 = vld [vmem:[#allocation139_spill] sm:$0xff] }
 0x5a4   :  { %2309 = vmatpush.msra.mxu0 %v13417_v47  ;;  %2329 = vmatpush.msra.mxu1 %v13418_v63  ;;  %v13472_v47 = vld [vmem:[#allocation140_spill] sm:$0xff]  ;;  %v13473_v63 = vld [vmem:[#allocation129_spill] sm:$0xff] }
 0x5a5   :  { %2349 = vmatpush.msra.mxu2 %v13419_v58  ;;  %2369 = vmatpush.msra.mxu3 %v13420_v56  ;;  %v13474_v58 = vld [vmem:[#allocation130_spill] sm:$0xff]  ;;  %v13475_v56 = vld [vmem:[#allocation143_spill] sm:$0xff] }
 0x5a6   :  { %2310 = vmatpush.msra.mxu0 %v13421_v57  ;;  %2330 = vmatpush.msra.mxu1 %v13422_v39  ;;  %v13476_v57 = vld [vmem:[#allocation144_spill] sm:$0xff]  ;;  %v13477_v39 = vld [vmem:[#allocation133_spill] sm:$0xff] }
 0x5a7   :  { %2350 = vmatpush.msra.mxu2 %v13423_v29  ;;  %2370 = vmatpush.msra.mxu3 %v13424_v53  ;;  %v13478_v29 = vld [vmem:[#allocation134_spill] sm:$0xff]  ;;  %v13479_v53 = vld [vmem:[#allocation147_spill] sm:$0xff] }
 0x5a8   :  { %2311 = vmatpush.msra.mxu0 %v13425_v18  ;;  %2331 = vmatpush.msra.mxu1 %v13426_v55  ;;  %v13480_v18 = vld [vmem:[#allocation148_spill] sm:$0xff]  ;;  %v13481_v55 = vld [vmem:[#allocation137_spill] sm:$0xff] }
 0x5a9   :  { %2351 = vmatpush.msra.mxu2 %v13427_v54  ;;  %2371 = vmatpush.msra.mxu3 %v13428_v52  ;;  %v13482_v54 = vld [vmem:[#allocation138_spill] sm:$0xff]  ;;  %v13483_v52 = vld [vmem:[#allocation151_spill] sm:$0xff] }
 0x5aa   :  { %2312 = vmatpush.msra.mxu0 %v13429_v40  ;;  %2332 = vmatpush.msra.mxu1 %v13430_v28  ;;  %v13484_v40 = vld [vmem:[#allocation152_spill] sm:$0xff]  ;;  %v13485_v28 = vld [vmem:[#allocation141_spill] sm:$0xff] }
 0x5ab   :  { %2352 = vmatpush.msra.mxu2 %v13431_v17  ;;  %2372 = vmatpush.msra.mxu3 %v13432_v3  ;;  %v13486_v17 = vld [vmem:[#allocation142_spill] sm:$0xff]  ;;  %v13487_v3 = vld [vmem:[#allocation155_spill] sm:$0xff] }
 0x5ac   :  { %2313 = vmatpush.msra.mxu0 %v13433_v4  ;;  %2333 = vmatpush.msra.mxu1 %v13434_v6  ;;  %v13488_v4 = vld [vmem:[#allocation156_spill] sm:$0xff]  ;;  %v13489_v6 = vld [vmem:[#allocation145_spill] sm:$0xff] }
 0x5ad   :  { %2353 = vmatpush.msra.mxu2 %v13435_v7  ;;  %2373 = vmatpush.msra.mxu3 %v13436_v8  ;;  %v13490_v7 = vld [vmem:[#allocation146_spill] sm:$0xff]  ;;  %v13491_v8 = vld [vmem:[#allocation159_spill] sm:$0xff] }
 0x5ae   :  { %2314 = vmatpush.msra.mxu0 %v13437_v14  ;;  %2334 = vmatpush.msra.mxu1 %v13438_v15  ;;  %v13492_v14 = vld [vmem:[#allocation160_spill] sm:$0xff]  ;;  %v13493_v15 = vld [vmem:[#allocation149_spill] sm:$0xff] }
 0x5af   :  { %2354 = vmatpush.msra.mxu2 %v13439_v22  ;;  %2374 = vmatpush.msra.mxu3 %v13440_v23  ;;  %v13494_v22 = vld [vmem:[#allocation150_spill] sm:$0xff]  ;;  %v13495_v23 = vld [vmem:[#allocation163_spill] sm:$0xff] }
 0x5b0   :  { %2315 = vmatpush.msra.mxu0 %v13441_v24  ;;  %2335 = vmatpush.msra.mxu1 %v13442_v25  ;;  %v13496_v24 = vld [vmem:[#allocation164_spill] sm:$0xff]  ;;  %v13497_v25 = vld [vmem:[#allocation153_spill] sm:$0xff] }
 0x5b1   :  { %2355 = vmatpush.msra.mxu2 %v13443_v26  ;;  %2375 = vmatpush.msra.mxu3 %v13444_v27  ;;  %v13498_v26 = vld [vmem:[#allocation154_spill] sm:$0xff]  ;;  %v13499_v27 = vld [vmem:[#allocation167_spill] sm:$0xff] }
 0x5b2   :  { %2316 = vmatpush.msra.mxu0 %v13445_v50  ;;  %2336 = vmatpush.msra.mxu1 %v13446_v51  ;;  %v13500_v50 = vld [vmem:[#allocation157_spill] sm:$0xff]  ;;  %v13501_v51 = vld [vmem:[#allocation158_spill] sm:$0xff] }
 0x5b3   :  { %2356 = vmatpush.msra.mxu2 %v13447_v21  ;;  %2376 = vmatpush.msra.mxu3 %v13448_v37  ;;  %v13502_v21 = vld [vmem:[#allocation170_spill] sm:$0xff]  ;;  %v13503_v37 = vld [vmem:[#allocation171_spill] sm:$0xff] }
 0x5b4   :  { %2317 = vmatpush.msra.mxu0 %v13449_v48  ;;  %2337 = vmatpush.msra.mxu1 %v13450_v11  ;;  %v13504_v48 = vld [vmem:[#allocation161_spill] sm:$0xff]  ;;  %v13505_v11 = vld [vmem:[#allocation162_spill] sm:$0xff] }
 0x5b5   :  { %2357 = vmatpush.msra.mxu2 %v13451_v49  ;;  %2377 = vmatpush.msra.mxu3 %v13452_v43  ;;  %v13506_v49 = vld [vmem:[#allocation174_spill] sm:$0xff]  ;;  %v13507_v43 = vld [vmem:[#allocation175_spill] sm:$0xff] }
 0x5b6   :  { %2318 = vmatmul.f32.vlgmr.msra.gmra.mxu0 %v9633_v2  ;;  %2338 = vmatmul.f32.vlgmr.msra.gmra.mxu1 %v9631_v1 }
 0x5b7   :  { %2358 = vmatmul.f32.vlgmr.msra.gmra.mxu2 %v9633_v2  ;;  %2378 = vmatmul.f32.vlgmr.msra.gmra.mxu3 %v9631_v1 }
 0x5b8   :  { %2382 = vmatpush.msrb.mxu0 %v13453_v9  ;;  %2402 = vmatpush.msrb.mxu1 %v13454_v19  ;;  %v13508_v9 = vld [vmem:[#allocation165_spill] sm:$0xff]  ;;  %v13509_v19 = vld [vmem:[#allocation166_spill] sm:$0xff] }
 0x5b9   :  { %2422 = vmatpush.msrb.mxu2 %v13455_v20  ;;  %2442 = vmatpush.msrb.mxu3 %v13456_v44  ;;  %v13510_v20 = vld [vmem:[#allocation168_spill] sm:$0xff]  ;;  %v13511_v44 = vld [vmem:[#allocation169_spill] sm:$0xff] }
 0x5ba   :  { %2383 = vmatpush.msrb.mxu0 %v13457_v33  ;;  %2403 = vmatpush.msrb.mxu1 %v13458_v34  ;;  %v13512_v33 = vld [vmem:[#allocation172_spill] sm:$0xff]  ;;  %v13513_v34 = vld [vmem:[#allocation173_spill] sm:$0xff] }
 0x5bb   :  { %2423 = vmatpush.msrb.mxu2 %v13459_v31  ;;  %2443 = vmatpush.msrb.mxu3 %v13460_v36  ;;  %v13514_v31 = vld [vmem:[#allocation180_spill] sm:$0xff]  ;;  %v13515_v36 = vld [vmem:[#allocation181_spill] sm:$0xff] }
 0x5bc   :  { %2384 = vmatpush.msrb.mxu0 %v13461_v35  ;;  %2404 = vmatpush.msrb.mxu1 %v13462_v45  ;;  %v13516_v35 = vld [vmem:[#allocation176_spill] sm:$0xff]  ;;  %v13517_v45 = vld [vmem:[#allocation177_spill] sm:$0xff] }
 0x5bd   :  { %2424 = vmatpush.msrb.mxu2 %v13463_v32  ;;  %2444 = vmatpush.msrb.mxu3 %v13464_v30  ;;  %v13519_v32 = vld [vmem:[#allocation185_spill] sm:$0xff]  ;;  %v13520_v30 = vld [vmem:[#allocation178_spill] sm:$0xff] }
 0x5be   :  { %2385 = vmatpush.msrb.mxu0 %v13465_v12  ;;  %2405 = vmatpush.msrb.mxu1 %v13466_v59  ;;  %v13522_v12 = vld [vmem:[#allocation188_spill] sm:$0xff]  ;;  %v13523_v59 = vld [vmem:[#allocation189_spill] sm:$0xff] }
 0x5bf   :  { %2425 = vmatpush.msrb.mxu2 %v13467_v61  ;;  %2445 = vmatpush.msrb.mxu3 %v13468_v62  ;;  %v13526_v61 = vld [vmem:[#allocation192_spill] sm:$0xff]  ;;  %v13527_v62 = vld [vmem:[#allocation193_spill] sm:$0xff] }
 0x5c0   :  { %2386 = vmatpush.msrb.mxu0 %v13469_v42  ;;  %2406 = vmatpush.msrb.mxu1 %v13470_v60  ;;  %v13528_v42 = vld [vmem:[#allocation186_spill] sm:$0xff]  ;;  %v13529_v60 = vld [vmem:[#allocation187_spill] sm:$0xff] }
 0x5c1   :  { %2426 = vmatpush.msrb.mxu2 %v13471_v46  ;;  %2446 = vmatpush.msrb.mxu3 %v13472_v47  ;;  %v13530_v46 = vld [vmem:[#allocation190_spill] sm:$0xff]  ;;  %v13531_v47 = vld [vmem:[#allocation191_spill] sm:$0xff] }
 0x5c2   :  { %2387 = vmatpush.msrb.mxu0 %v13473_v63  ;;  %2407 = vmatpush.msrb.mxu1 %v13474_v58  ;;  %v13532_v63 = vld [vmem:[#allocation194_spill] sm:$0xff] }
 0x5c3   :  { %2427 = vmatpush.msrb.mxu2 %v13475_v56  ;;  %2447 = vmatpush.msrb.mxu3 %v13476_v57  ;;  %v9806_v58 = vld [vmem:[%s11617_s1 + $0x280] sm:$0xff] }
 0x5c4   :  { %2388 = vmatpush.msrb.mxu0 %v13477_v39  ;;  %2408 = vmatpush.msrb.mxu1 %v13478_v29  ;;  %v9812_v56 = vld [vmem:[%s11617_s1 + $0x680] sm:$0xff]  ;;  %v9856_v29 = vld [vmem:[%s11617_s1 + $0x208] sm:$0xff] }
 0x5c5   :  { %2428 = vmatpush.msrb.mxu2 %v13479_v53  ;;  %2448 = vmatpush.msrb.mxu3 %v13480_v18  ;;  %v9844_v57 = vld [vmem:[%s11617_s1 + $0x200] sm:$0xff]  ;;  %v9862_v53 = vld [vmem:[%s11617_s1 + $0x608] sm:$0xff] }
 0x5c6   :  { %2389 = vmatpush.msrb.mxu0 %v13481_v55  ;;  %2409 = vmatpush.msrb.mxu1 %v13482_v54  ;;  %v9850_v39 = vld [vmem:[%s11617_s1 + $0x600] sm:$0xff]  ;;  %v9880_v54 = vld [vmem:[%s11617_s1 + $0x1c8] sm:$0xff] }
 0x5c7   :  { %2429 = vmatpush.msrb.mxu2 %v13483_v52  ;;  %2449 = vmatpush.msrb.mxu3 %v13484_v40  ;;  %v9868_v18 = vld [vmem:[%s11617_s1 + $0x1c0] sm:$0xff]  ;;  %v9886_v52 = vld [vmem:[%s11617_s1 + $0x5c8] sm:$0xff] }
 0x5c8   :  { %2390 = vmatpush.msrb.mxu0 %v13485_v28  ;;  %2410 = vmatpush.msrb.mxu1 %v13486_v17  ;;  %v9874_v55 = vld [vmem:[%s11617_s1 + $0x5c0] sm:$0xff]  ;;  %v9904_v17 = vld [vmem:[%s11617_s1 + $0x188] sm:$0xff] }
 0x5c9   :  { %2430 = vmatpush.msrb.mxu2 %v13487_v3  ;;  %2450 = vmatpush.msrb.mxu3 %v13488_v4  ;;  %v9892_v40 = vld [vmem:[%s11617_s1 + $0x180] sm:$0xff]  ;;  %v9910_v3 = vld [vmem:[%s11617_s1 + $0x588] sm:$0xff] }
 0x5ca   :  { %2391 = vmatpush.msrb.mxu0 %v13489_v6  ;;  %2411 = vmatpush.msrb.mxu1 %v13490_v7  ;;  %v9898_v28 = vld [vmem:[%s11617_s1 + $0x580] sm:$0xff]  ;;  %v9928_v7 = vld [vmem:[%s11617_s1 + $0x148] sm:$0xff] }
 0x5cb   :  { %2431 = vmatpush.msrb.mxu2 %v13491_v8  ;;  %2451 = vmatpush.msrb.mxu3 %v13492_v14  ;;  %v9916_v4 = vld [vmem:[%s11617_s1 + $0x140] sm:$0xff]  ;;  %v9934_v8 = vld [vmem:[%s11617_s1 + $0x548] sm:$0xff] }
 0x5cc   :  { %2392 = vmatpush.msrb.mxu0 %v13493_v15  ;;  %2412 = vmatpush.msrb.mxu1 %v13494_v22  ;;  %v9922_v6 = vld [vmem:[%s11617_s1 + $0x540] sm:$0xff]  ;;  %v9952_v22 = vld [vmem:[%s11617_s1 + $0x108] sm:$0xff] }
 0x5cd   :  { %2432 = vmatpush.msrb.mxu2 %v13495_v23  ;;  %2452 = vmatpush.msrb.mxu3 %v13496_v24  ;;  %v9940_v14 = vld [vmem:[%s11617_s1 + $0x100] sm:$0xff]  ;;  %v9958_v23 = vld [vmem:[%s11617_s1 + $0x508] sm:$0xff] }
 0x5ce   :  { %2393 = vmatpush.msrb.mxu0 %v13497_v25  ;;  %2413 = vmatpush.msrb.mxu1 %v13498_v26  ;;  %v9946_v15 = vld [vmem:[%s11617_s1 + $0x500] sm:$0xff]  ;;  %v9976_v26 = vld [vmem:[%s11617_s1 + $0xc8] sm:$0xff] }
 0x5cf   :  { %2433 = vmatpush.msrb.mxu2 %v13499_v27  ;;  %2453 = vmatpush.msrb.mxu3 %v13500_v50  ;;  %v9964_v24 = vld [vmem:[%s11617_s1 + $0xc0] sm:$0xff]  ;;  %v9982_v27 = vld [vmem:[%s11617_s1 + $0x4c8] sm:$0xff] }
 0x5d0   :  { %2394 = vmatpush.msrb.mxu0 %v13501_v51  ;;  %2414 = vmatpush.msrb.mxu1 %v13502_v21  ;;  %v9970_v25 = vld [vmem:[%s11617_s1 + $0x4c0] sm:$0xff]  ;;  %v10000_v21 = vld [vmem:[%s11617_s1 + $0x88] sm:$0xff] }
 0x5d1   :  { %2434 = vmatpush.msrb.mxu2 %v13503_v37  ;;  %2454 = vmatpush.msrb.mxu3 %v13504_v48  ;;  %v9988_v50 = vld [vmem:[%s11617_s1 + $0x80] sm:$0xff]  ;;  %v10006_v37 = vld [vmem:[%s11617_s1 + $0x488] sm:$0xff] }
 0x5d2   :  { %2395 = vmatpush.msrb.mxu0 %v13505_v11  ;;  %2415 = vmatpush.msrb.mxu1 %v13506_v49  ;;  %v9994_v51 = vld [vmem:[%s11617_s1 + $0x480] sm:$0xff]  ;;  %v10024_v49 = vld [vmem:[%s11617_s1 + $0x48] sm:$0xff] }
 0x5d3   :  { %2435 = vmatpush.msrb.mxu2 %v13507_v43  ;;  %2455 = vmatpush.msrb.mxu3 %v13508_v9  ;;  %v10012_v48 = vld [vmem:[%s11617_s1 + $0x40] sm:$0xff]  ;;  %13533 = vst [vmem:[#allocation2_spill] sm:$0xff] %v10024_v49  ;;  %v10030_v43 = vld [vmem:[%s11617_s1 + $0x448] sm:$0xff] }
 0x5d4   :  { %2396 = vmatpush.msrb.mxu0 %v13509_v19  ;;  %2416 = vmatpush.msrb.mxu1 %v13510_v20  ;;  %v10018_v11 = vld [vmem:[%s11617_s1 + $0x440] sm:$0xff]  ;;  %13534 = vst [vmem:[#allocation7_spill] sm:$0xff] %v10030_v43  ;;  %v10048_v20 = vld [vmem:[%s11617_s1 + $0x8] sm:$0xff] }
 0x5d5   :  { %2436 = vmatpush.msrb.mxu2 %v13511_v44  ;;  %2456 = vmatpush.msrb.mxu3 %v13512_v33  ;;  %v10036_v9 = vld [vmem:[%s11617_s1] sm:$0xff]  ;;  %13537 = vst [vmem:[#allocation4_spill] sm:$0xff] %v10048_v20  ;;  %v10054_v44 = vld [vmem:[%s11617_s1 + $0x408] sm:$0xff]  ;;  %v10060_v33 = vld [vmem:[%s11617_s1 + $0x3d0] sm:$0xff] }
 0x5d6   :  { %2397 = vmatpush.msrb.mxu0 %v9348_v38  ;;  %2417 = vmatpush.msrb.mxu1 %v13513_v34  ;;  %v13518_v38 = vld [vmem:[#allocation184_spill] sm:$0xff]  ;;  %13535 = vst [vmem:[#allocation8_spill] sm:$0xff] %v10036_v9  ;;  %v10042_v19 = vld [vmem:[%s11617_s1 + $0x400] sm:$0xff] }
 0x5d7   :  { %2437 = vmatpush.msrb.mxu2 %v13514_v31  ;;  %2457 = vmatpush.msrb.mxu3 %v9366_v5  ;;  %v13521_v5 = vld [vmem:[#allocation179_spill] sm:$0xff]  ;;  %13536 = vst [vmem:[#allocation3_spill] sm:$0xff] %v10042_v19  ;;  %v10066_v34 = vld [vmem:[%s11617_s1 + $0x7d0] sm:$0xff]  ;;  %v10072_v31 = vld [vmem:[%s11617_s1 + $0x3d8] sm:$0xff] }
 0x5d8   :  { %2398 = vmatmul.f32.vlgmr.msrb.gmra.mxu0 %v9633_v2  ;;  %2418 = vmatmul.f32.vlgmr.msrb.gmra.mxu1 %v9631_v1  ;;  %13538 = vst [vmem:[#allocation11_spill] sm:$0xff] %v10054_v44 }
 0x5d9   :  { %2438 = vmatmul.f32.vlgmr.msrb.gmra.mxu2 %v9633_v2  ;;  %2458 = vmatmul.f32.vlgmr.msrb.gmra.mxu3 %v9631_v1  ;;  %v13524_v2 = vld [vmem:[#allocation182_spill] sm:$0xff]  ;;  %v13525_v1 = vld [vmem:[#allocation183_spill] sm:$0xff]  ;;  %13539 = vst [vmem:[#allocation12_spill] sm:$0xff] %v10060_v33 }
 0x5da   :  { %2515 = vmatpush.msra.mxu0 %v13515_v36  ;;  %2535 = vmatpush.msra.mxu1 %v13516_v35  ;;  %13540 = vst [vmem:[#allocation5_spill] sm:$0xff] %v10066_v34  ;;  %v10078_v36 = vld [vmem:[%s11617_s1 + $0x7d8] sm:$0xff]  ;;  %v10084_v35 = vld [vmem:[%s11617_s1 + $0x390] sm:$0xff] }
 0x5db   :  { %2555 = vmatpush.msra.mxu2 %v13517_v45  ;;  %2575 = vmatpush.msra.mxu3 %v13518_v38  ;;  %13541 = vst [vmem:[#allocation6_spill] sm:$0xff] %v10072_v31  ;;  %v10090_v45 = vld [vmem:[%s11617_s1 + $0x790] sm:$0xff]  ;;  %v10096_v38 = vld [vmem:[%s11617_s1 + $0x398] sm:$0xff] }
 0x5dc   :  { %2516 = vmatpush.msra.mxu0 %v13519_v32  ;;  %2536 = vmatpush.msra.mxu1 %v13520_v30  ;;  %13542 = vst [vmem:[#allocation15_spill] sm:$0xff] %v10078_v36  ;;  %v10102_v32 = vld [vmem:[%s11617_s1 + $0x798] sm:$0xff]  ;;  %v10108_v30 = vld [vmem:[%s11617_s1 + $0x350] sm:$0xff] }
 0x5dd   :  { %2556 = vmatpush.msra.mxu2 %v13521_v5  ;;  %2576 = vmatpush.msra.mxu3 %v13522_v12  ;;  %13543 = vst [vmem:[#allocation16_spill] sm:$0xff] %v10084_v35  ;;  %v10114_v5 = vld [vmem:[%s11617_s1 + $0x750] sm:$0xff]  ;;  %v10120_v12 = vld [vmem:[%s11617_s1 + $0x358] sm:$0xff] }
 0x5de   :  { %2517 = vmatpush.msra.mxu0 %v13523_v59  ;;  %2537 = vmatpush.msra.mxu1 %v13524_v2  ;;  %13544 = vst [vmem:[#allocation9_spill] sm:$0xff] %v10090_v45  ;;  %v10126_v59 = vld [vmem:[%s11617_s1 + $0x758] sm:$0xff]  ;;  %v10132_v2 = vld [vmem:[%s11617_s1 + $0x310] sm:$0xff] }
 0x5df   :  { %2557 = vmatpush.msra.mxu2 %v13525_v1  ;;  %2577 = vmatpush.msra.mxu3 %v13526_v61  ;;  %13545 = vst [vmem:[#allocation10_spill] sm:$0xff] %v10096_v38  ;;  %v10138_v1 = vld [vmem:[%s11617_s1 + $0x710] sm:$0xff]  ;;  %v10144_v61 = vld [vmem:[%s11617_s1 + $0x318] sm:$0xff] }
 0x5e0   :  { %2518 = vmatpush.msra.mxu0 %v13527_v62  ;;  %2538 = vmatpush.msra.mxu1 %v13528_v42  ;;  %13546 = vst [vmem:[#allocation19_spill] sm:$0xff] %v10102_v32  ;;  %v10150_v62 = vld [vmem:[%s11617_s1 + $0x718] sm:$0xff]  ;;  %v10156_v42 = vld [vmem:[%s11617_s1 + $0x2d0] sm:$0xff] }
 0x5e1   :  { %2558 = vmatpush.msra.mxu2 %v13529_v60  ;;  %2578 = vmatpush.msra.mxu3 %v13530_v46  ;;  %13547 = vst [vmem:[#allocation20_spill] sm:$0xff] %v10108_v30  ;;  %v10162_v60 = vld [vmem:[%s11617_s1 + $0x6d0] sm:$0xff]  ;;  %v10168_v46 = vld [vmem:[%s11617_s1 + $0x2d8] sm:$0xff] }
 0x5e2   :  { %2519 = vmatpush.msra.mxu0 %v9472_v41  ;;  %2539 = vmatpush.msra.mxu1 %v13531_v47  ;;  %v9820_v41 = vld [vmem:[%s11617_s1 + $0x240] sm:$0xff]  ;;  %13548 = vst [vmem:[#allocation13_spill] sm:$0xff] %v10114_v5  ;;  %v10174_v47 = vld [vmem:[%s11617_s1 + $0x6d8] sm:$0xff] }
 0x5e3   :  { %2559 = vmatpush.msra.mxu2 %v13532_v63  ;;  %2579 = vmatpush.msra.mxu3 %v9490_v0  ;;  %v9826_v0 = vld [vmem:[%s11617_s1 + $0x640] sm:$0xff]  ;;  %13549 = vst [vmem:[#allocation14_spill] sm:$0xff] %v10120_v12  ;;  %v10180_v63 = vld [vmem:[%s11617_s1 + $0x290] sm:$0xff] }
 0x5e4   :  { %2520 = vmatpush.msra.mxu0 %v9806_v58  ;;  %2540 = vmatpush.msra.mxu1 %v9812_v56  ;;  %13550 = vst [vmem:[#allocation23_spill] sm:$0xff] %v10126_v59 }
 0x5e5   :  { %2560 = vmatpush.msra.mxu2 %v9498_v10  ;;  %2580 = vmatpush.msra.mxu3 %v9504_v13  ;;  %v9832_v10 = vld [vmem:[%s11617_s1 + $0x248] sm:$0xff]  ;;  %13551 = vst [vmem:[#allocation24_spill] sm:$0xff] %v10132_v2 }
 0x5e6   :  { %2521 = vmatpush.msra.mxu0 %v9820_v41  ;;  %2541 = vmatpush.msra.mxu1 %v9826_v0  ;;  %v9838_v13 = vld [vmem:[%s11617_s1 + $0x648] sm:$0xff]  ;;  %13552 = vst [vmem:[#allocation17_spill] sm:$0xff] %v10138_v1 }
 0x5e7   :  { %2561 = vmatpush.msra.mxu2 %v9832_v10  ;;  %2581 = vmatpush.msra.mxu3 %v9838_v13  ;;  %13553 = vst [vmem:[#allocation18_spill] sm:$0xff] %v10144_v61 }
 0x5e8   :  { %2522 = vmatpush.msra.mxu0 %v9844_v57  ;;  %2542 = vmatpush.msra.mxu1 %v9850_v39  ;;  %13554 = vst [vmem:[#allocation27_spill] sm:$0xff] %v10150_v62 }
 0x5e9   :  { %2562 = vmatpush.msra.mxu2 %v9856_v29  ;;  %2582 = vmatpush.msra.mxu3 %v9862_v53  ;;  %13555 = vst [vmem:[#allocation28_spill] sm:$0xff] %v10156_v42 }
 0x5ea   :  { %2523 = vmatpush.msra.mxu0 %v9868_v18  ;;  %2543 = vmatpush.msra.mxu1 %v9874_v55  ;;  %13556 = vst [vmem:[#allocation21_spill] sm:$0xff] %v10162_v60 }
 0x5eb   :  { %2563 = vmatpush.msra.mxu2 %v9880_v54  ;;  %2583 = vmatpush.msra.mxu3 %v9886_v52  ;;  %13557 = vst [vmem:[#allocation22_spill] sm:$0xff] %v10168_v46 }
 0x5ec   :  { %2524 = vmatpush.msra.mxu0 %v9892_v40  ;;  %2544 = vmatpush.msra.mxu1 %v9898_v28  ;;  %13558 = vst [vmem:[#allocation31_spill] sm:$0xff] %v10174_v47 }
 0x5ed   :  { %2564 = vmatpush.msra.mxu2 %v9904_v17  ;;  %2584 = vmatpush.msra.mxu3 %v9910_v3  ;;  %13559 = vst [vmem:[#allocation32_spill] sm:$0xff] %v10180_v63 }
 0x5ee   :  { %2525 = vmatpush.msra.mxu0 %v9916_v4  ;;  %2545 = vmatpush.msra.mxu1 %v9922_v6 }
 0x5ef   :  { %2565 = vmatpush.msra.mxu2 %v9928_v7  ;;  %2585 = vmatpush.msra.mxu3 %v9934_v8 }
 0x5f0   :  { %2526 = vmatpush.msra.mxu0 %v9940_v14  ;;  %2546 = vmatpush.msra.mxu1 %v9946_v15 }
 0x5f1   :  { %2566 = vmatpush.msra.mxu2 %v9952_v22  ;;  %2586 = vmatpush.msra.mxu3 %v9958_v23 }
 0x5f2   :  { %2527 = vmatpush.msra.mxu0 %v9964_v24  ;;  %2547 = vmatpush.msra.mxu1 %v9970_v25 }
 0x5f3   :  { %2567 = vmatpush.msra.mxu2 %v9976_v26  ;;  %2587 = vmatpush.msra.mxu3 %v9982_v27 }
 0x5f4   :  { %2528 = vmatpush.msra.mxu0 %v9988_v50  ;;  %2548 = vmatpush.msra.mxu1 %v9994_v51 }
 0x5f5   :  { %2568 = vmatpush.msra.mxu2 %v10000_v21  ;;  %2588 = vmatpush.msra.mxu3 %v10006_v37 }
 0x5f6   :  { %2529 = vmatpush.msra.mxu0 %v10012_v48  ;;  %2549 = vmatpush.msra.mxu1 %v10018_v11 }
 0x5f7   :  { %2569 = vmatpush.msra.mxu2 %v10024_v49  ;;  %2589 = vmatpush.msra.mxu3 %v10030_v43 }
 0x5f8   :  { %2530 = vmatpush.msra.mxu0 %v10036_v9  ;;  %2550 = vmatpush.msra.mxu1 %v10042_v19 }
 0x5f9   :  { %2570 = vmatpush.msra.mxu2 %v10048_v20  ;;  %2590 = vmatpush.msra.mxu3 %v10054_v44  ;;  %v3267_v20 = vld [vmem:[%s11618_s0 + $0x5] ss:$8 sm:$0xf] }
 0x5fa   :  { %2595 = vmatpush.msrb.mxu0 %v10060_v33  ;;  %2615 = vmatpush.msrb.mxu1 %v10066_v34 }
 0x5fb   :  { %2635 = vmatpush.msrb.mxu2 %v10072_v31  ;;  %2655 = vmatpush.msrb.mxu3 %v10078_v36 }
 0x5fc   :  { %2596 = vmatpush.msrb.mxu0 %v10084_v35  ;;  %2616 = vmatpush.msrb.mxu1 %v10090_v45 }
 0x5fd   :  { %2636 = vmatpush.msrb.mxu2 %v10096_v38  ;;  %2656 = vmatpush.msrb.mxu3 %v10102_v32 }
 0x5fe   :  { %2597 = vmatpush.msrb.mxu0 %v10108_v30  ;;  %2617 = vmatpush.msrb.mxu1 %v10114_v5 }
 0x5ff   :  { %2637 = vmatpush.msrb.mxu2 %v10120_v12  ;;  %2657 = vmatpush.msrb.mxu3 %v10126_v59 }
 0x600   :  { %2598 = vmatpush.msrb.mxu0 %v10132_v2  ;;  %2618 = vmatpush.msrb.mxu1 %v10138_v1 }
 0x601   :  { %2638 = vmatpush.msrb.mxu2 %v10144_v61  ;;  %2658 = vmatpush.msrb.mxu3 %v10150_v62 }
 0x602   :  { %2599 = vmatpush.msrb.mxu0 %v10156_v42  ;;  %2619 = vmatpush.msrb.mxu1 %v10162_v60  ;;  %v10186_v60 = vld [vmem:[%s11617_s1 + $0x690] sm:$0xff] }
 0x603   :  { %2639 = vmatpush.msrb.mxu2 %v10168_v46  ;;  %2659 = vmatpush.msrb.mxu3 %v10174_v47  ;;  %13560 = vst [vmem:[#allocation25_spill] sm:$0xff] %v10186_v60  ;;  %v10192_v46 = vld [vmem:[%s11617_s1 + $0x298] sm:$0xff] }
 0x604   :  { %2600 = vmatpush.msrb.mxu0 %v10180_v63  ;;  %2620 = vmatpush.msrb.mxu1 %v10186_v60  ;;  %13561 = vst [vmem:[#allocation26_spill] sm:$0xff] %v10192_v46  ;;  %v10198_v47 = vld [vmem:[%s11617_s1 + $0x698] sm:$0xff]  ;;  %v10204_v63 = vld [vmem:[%s11617_s1 + $0x250] sm:$0xff] }
 0x605   :  { %2640 = vmatpush.msrb.mxu2 %v10192_v46  ;;  %13562 = vst [vmem:[#allocation35_spill] sm:$0xff] %v10198_v47  ;;  %2660 = vmatpush.msrb.mxu3 %v10198_v47  ;;  %v10210_v60 = vld [vmem:[%s11617_s1 + $0x650] sm:$0xff]  ;;  %v10216_v46 = vld [vmem:[%s11617_s1 + $0x258] sm:$0xff] }
 0x606   :  { %13563 = vst [vmem:[#allocation36_spill] sm:$0xff] %v10204_v63  ;;  %2601 = vmatpush.msrb.mxu0 %v10204_v63  ;;  %2621 = vmatpush.msrb.mxu1 %v10210_v60  ;;  %v10222_v47 = vld [vmem:[%s11617_s1 + $0x658] sm:$0xff]  ;;  %v10228_v63 = vld [vmem:[%s11617_s1 + $0x210] sm:$0xff] }
 0x607   :  { %13564 = vst [vmem:[#allocation29_spill] sm:$0xff] %v10210_v60  ;;  %2641 = vmatpush.msrb.mxu2 %v10216_v46  ;;  %2661 = vmatpush.msrb.mxu3 %v10222_v47  ;;  %v10234_v60 = vld [vmem:[%s11617_s1 + $0x610] sm:$0xff] }
 0x608   :  { %13565 = vst [vmem:[#allocation30_spill] sm:$0xff] %v10216_v46  ;;  %2602 = vmatpush.msrb.mxu0 %v10228_v63  ;;  %2622 = vmatpush.msrb.mxu1 %v10234_v60  ;;  %v10240_v46 = vld [vmem:[%s11617_s1 + $0x218] sm:$0xff] }
 0x609   :  { %13566 = vst [vmem:[#allocation39_spill] sm:$0xff] %v10222_v47  ;;  %2642 = vmatpush.msrb.mxu2 %v10240_v46  ;;  %v10246_v47 = vld [vmem:[%s11617_s1 + $0x618] sm:$0xff] }
 0x60a   :  { %13567 = vst [vmem:[#allocation40_spill] sm:$0xff] %v10228_v63  ;;  %2662 = vmatpush.msrb.mxu3 %v10246_v47  ;;  %v10252_v63 = vld [vmem:[%s11617_s1 + $0x1d0] sm:$0xff] }
 0x60b   :  { %13568 = vst [vmem:[#allocation33_spill] sm:$0xff] %v10234_v60  ;;  %2603 = vmatpush.msrb.mxu0 %v10252_v63  ;;  %v10258_v60 = vld [vmem:[%s11617_s1 + $0x5d0] sm:$0xff] }
 0x60c   :  { %13569 = vst [vmem:[#allocation34_spill] sm:$0xff] %v10240_v46  ;;  %2623 = vmatpush.msrb.mxu1 %v10258_v60  ;;  %v10264_v46 = vld [vmem:[%s11617_s1 + $0x1d8] sm:$0xff] }
 0x60d   :  { %13570 = vst [vmem:[#allocation43_spill] sm:$0xff] %v10246_v47  ;;  %2643 = vmatpush.msrb.mxu2 %v10264_v46  ;;  %v10270_v47 = vld [vmem:[%s11617_s1 + $0x5d8] sm:$0xff] }
 0x60e   :  { %13571 = vst [vmem:[#allocation44_spill] sm:$0xff] %v10252_v63  ;;  %2663 = vmatpush.msrb.mxu3 %v10270_v47  ;;  %v10276_v63 = vld [vmem:[%s11617_s1 + $0x190] sm:$0xff] }
 0x60f   :  { %13572 = vst [vmem:[#allocation37_spill] sm:$0xff] %v10258_v60  ;;  %2604 = vmatpush.msrb.mxu0 %v10276_v63  ;;  %v10282_v60 = vld [vmem:[%s11617_s1 + $0x590] sm:$0xff]  ;;  %v2179_v42 = vpop.f32.mrf.mxu1 }
 0x610   :  { %13573 = vst [vmem:[#allocation38_spill] sm:$0xff] %v10264_v46  ;;  %2624 = vmatpush.msrb.mxu1 %v10282_v60  ;;  %v10288_v46 = vld [vmem:[%s11617_s1 + $0x198] sm:$0xff] }
 0x611   :  { %13574 = vst [vmem:[#allocation49_spill] sm:$0xff] %v10270_v47  ;;  %2644 = vmatpush.msrb.mxu2 %v10288_v46  ;;  %v10294_v47 = vld [vmem:[%s11617_s1 + $0x598] sm:$0xff] }
 0x612   :  { %13575 = vst [vmem:[#allocation50_spill] sm:$0xff] %v10276_v63  ;;  %2664 = vmatpush.msrb.mxu3 %v10294_v47  ;;  %v10300_v63 = vld [vmem:[%s11617_s1 + $0x150] sm:$0xff] }
 0x613   :  { %13576 = vst [vmem:[#allocation41_spill] sm:$0xff] %v10282_v60  ;;  %2605 = vmatpush.msrb.mxu0 %v10300_v63  ;;  %v10306_v60 = vld [vmem:[%s11617_s1 + $0x550] sm:$0xff] }
 0x614   :  { %13577 = vst [vmem:[#allocation42_spill] sm:$0xff] %v10288_v46  ;;  %2625 = vmatpush.msrb.mxu1 %v10306_v60  ;;  %v10312_v46 = vld [vmem:[%s11617_s1 + $0x158] sm:$0xff] }
 0x615   :  { %13578 = vst [vmem:[#allocation53_spill] sm:$0xff] %v10294_v47  ;;  %2645 = vmatpush.msrb.mxu2 %v10312_v46  ;;  %v10318_v47 = vld [vmem:[%s11617_s1 + $0x558] sm:$0xff] }
 0x616   :  { %13579 = vst [vmem:[#allocation54_spill] sm:$0xff] %v10300_v63  ;;  %2665 = vmatpush.msrb.mxu3 %v10318_v47  ;;  %v10324_v63 = vld [vmem:[%s11617_s1 + $0x110] sm:$0xff]  ;;  %v2199_v62 = vpop.f32.mrf.mxu2  ;;  %v2219_v61 = vpop.f32.mrf.mxu3 }
 0x617   :  { %13580 = vst [vmem:[#allocation45_spill] sm:$0xff] %v10306_v60  ;;  %2606 = vmatpush.msrb.mxu0 %v10324_v63  ;;  %v10330_v60 = vld [vmem:[%s11617_s1 + $0x510] sm:$0xff]  ;;  %v2220_v35 = vadd.f32 %v2219_v61, %v2199_v62 }
 0x618   :  { %13581 = vst [vmem:[#allocation46_spill] sm:$0xff] %v10312_v46  ;;  %2626 = vmatpush.msrb.mxu1 %v10330_v60  ;;  %v10336_v46 = vld [vmem:[%s11617_s1 + $0x118] sm:$0xff] }
 0x619   :  { %13582 = vst [vmem:[#allocation57_spill] sm:$0xff] %v10318_v47  ;;  %2646 = vmatpush.msrb.mxu2 %v10336_v46  ;;  %v10342_v47 = vld [vmem:[%s11617_s1 + $0x518] sm:$0xff]  ;;  %v2470_v9 = vrot.slane %v2220_v35, 7 }
 0x61a   :  { %13583 = vst [vmem:[#allocation58_spill] sm:$0xff] %v10324_v63  ;;  %2666 = vmatpush.msrb.mxu3 %v10342_v47  ;;  %v10348_v63 = vld [vmem:[%s11617_s1 + $0xd0] sm:$0xff] }
 0x61b   :  { %13584 = vst [vmem:[#allocation59_spill] sm:$0xff] %v10330_v60  ;;  %2607 = vmatpush.msrb.mxu0 %v10348_v63  ;;  %v10354_v60 = vld [vmem:[%s11617_s1 + $0x4d0] sm:$0xff] }
 0x61c   :  { %13585 = vst [vmem:[#allocation60_spill] sm:$0xff] %v10336_v46  ;;  %2627 = vmatpush.msrb.mxu1 %v10354_v60  ;;  %v10360_v46 = vld [vmem:[%s11617_s1 + $0xd8] sm:$0xff] }
 0x61d   :  { %13586 = vst [vmem:[#allocation47_spill] sm:$0xff] %v10342_v47  ;;  %2647 = vmatpush.msrb.mxu2 %v10360_v46  ;;  %v10366_v47 = vld [vmem:[%s11617_s1 + $0x4d8] sm:$0xff] }
 0x61e   :  { %13587 = vst [vmem:[#allocation48_spill] sm:$0xff] %v10348_v63  ;;  %2667 = vmatpush.msrb.mxu3 %v10366_v47  ;;  %v10372_v63 = vld [vmem:[%s11617_s1 + $0x90] sm:$0xff] }
 0x61f   :  { %13588 = vst [vmem:[#allocation63_spill] sm:$0xff] %v10354_v60  ;;  %2608 = vmatpush.msrb.mxu0 %v10372_v63  ;;  %v10378_v60 = vld [vmem:[%s11617_s1 + $0x490] sm:$0xff] }
 0x620   :  { %13589 = vst [vmem:[#allocation64_spill] sm:$0xff] %v10360_v46  ;;  %2628 = vmatpush.msrb.mxu1 %v10378_v60  ;;  %v10384_v46 = vld [vmem:[%s11617_s1 + $0x98] sm:$0xff]  ;;  %v2279_v2 = vpop.f32.mrf.mxu2  ;;  %v2299_v59 = vpop.f32.mrf.mxu3 }
 0x621   :  { %13590 = vst [vmem:[#allocation51_spill] sm:$0xff] %v10366_v47  ;;  %2648 = vmatpush.msrb.mxu2 %v10384_v46  ;;  %v10390_v47 = vld [vmem:[%s11617_s1 + $0x498] sm:$0xff] }
 0x622   :  { %13591 = vst [vmem:[#allocation52_spill] sm:$0xff] %v10372_v63  ;;  %2668 = vmatpush.msrb.mxu3 %v10390_v47  ;;  %v10396_v63 = vld [vmem:[%s11617_s1 + $0x50] sm:$0xff] }
 0x623   :  { %13592 = vst [vmem:[#allocation67_spill] sm:$0xff] %v10378_v60  ;;  %2609 = vmatpush.msrb.mxu0 %v10396_v63  ;;  %v10402_v60 = vld [vmem:[%s11617_s1 + $0x450] sm:$0xff] }
 0x624   :  { %13593 = vst [vmem:[#allocation68_spill] sm:$0xff] %v10384_v46  ;;  %2629 = vmatpush.msrb.mxu1 %v10402_v60  ;;  %v10408_v46 = vld [vmem:[%s11617_s1 + $0x58] sm:$0xff] }
 0x625   :  { %13594 = vst [vmem:[#allocation55_spill] sm:$0xff] %v10390_v47  ;;  %2649 = vmatpush.msrb.mxu2 %v10408_v46  ;;  %v10414_v47 = vld [vmem:[%s11617_s1 + $0x458] sm:$0xff] }
 0x626   :  { %13595 = vst [vmem:[#allocation56_spill] sm:$0xff] %v10396_v63  ;;  %2669 = vmatpush.msrb.mxu3 %v10414_v47  ;;  %v10420_v63 = vld [vmem:[%s11617_s1 + $0x10] sm:$0xff] }
 0x627   :  { %13596 = vst [vmem:[#allocation71_spill] sm:$0xff] %v10402_v60  ;;  %2610 = vmatpush.msrb.mxu0 %v10420_v63  ;;  %v10426_v60 = vld [vmem:[%s11617_s1 + $0x410] sm:$0xff] }
 0x628   :  { %13597 = vst [vmem:[#allocation72_spill] sm:$0xff] %v10408_v46  ;;  %2630 = vmatpush.msrb.mxu1 %v10426_v60  ;;  %v10432_v46 = vld [vmem:[%s11617_s1 + $0x18] sm:$0xff] }
 0x629   :  { %13598 = vst [vmem:[#allocation61_spill] sm:$0xff] %v10414_v47  ;;  %2650 = vmatpush.msrb.mxu2 %v10432_v46  ;;  %v10438_v47 = vld [vmem:[%s11617_s1 + $0x418] sm:$0xff] }
 0x62a   :  { %13599 = vst [vmem:[#allocation62_spill] sm:$0xff] %v10420_v63  ;;  %2670 = vmatpush.msrb.mxu3 %v10438_v47  ;;  %v2159_v63 = vpop.f32.mrf.mxu0 }
 0x62b   :  { %13600 = vst [vmem:[#allocation75_spill] sm:$0xff] %v10426_v60  ;;  %v2259_v60 = vpop.f32.mrf.mxu1  ;;  %v2180_v61 = vadd.f32 %v2179_v42, %v2159_v63 }
 0x62c   :  { %13601 = vst [vmem:[#allocation76_spill] sm:$0xff] %v10432_v46  ;;  %v2300_v46 = vadd.f32 %v2299_v59, %v2279_v2  ;;  %v3268_v59 = vld [vmem:[%s11618_s0 + $0x5] ss:$8 sm:$0xf0] }
 0x62d   :  { %13602 = vst [vmem:[#allocation65_spill] sm:$0xff] %v10438_v47 }
 0x62e   :  { %v2472_v34 = vrot.slane %v2300_v46, 5 }
 0x632   :  { %v2239_v1 = vpop.f32.mrf.mxu0 }
 0x633   :  { %v2339_v5 = vpop.f32.mrf.mxu1  ;;  %v2260_v36 = vadd.f32 %v2259_v60, %v2239_v1 }
 0x635   :  { %v2471_v43 = vrot.slane %v2260_v36, 6 }
 0x63a   :  { %v2319_v12 = vpop.f32.mrf.mxu0  ;;  %v2359_v30 = vpop.f32.mrf.mxu2 }
 0x63b   :  { %v2379_v32 = vpop.f32.mrf.mxu3  ;;  %v2340_v47 = vadd.f32 %v2339_v5, %v2319_v12  ;;  %v2477_v12 = vsel %vm605_vm1, %v2180_v61, %v2470_v9 }
 0x63c   :  { %v2380_v31 = vadd.f32 %v2379_v32, %v2359_v30  ;;  %v2478_v32 = vsel %vm607_vm0, %v2471_v43, %v2472_v34 }
 0x63d   :  { %v2473_v30 = vrot.slane %v2340_v47, 4 }
 0x63e   :  { %v2474_v49 = vrot.slane %v2380_v31, 3  ;;  %v2479_v31 = vsel %vm609_vm4, %v2477_v12, %v2478_v32  ;;  %v10482_v32 = vld [vmem:[%s11617_s1 + $0x7e0] sm:$0xff]  ;;  %v10512_v12 = vld [vmem:[%s11617_s1 + $0x3a8] sm:$0xff] }
 0x640   :  { %v2480_v1 = vsel %vm611_vm2, %v2473_v30, %v2474_v49  ;;  %v10488_v30 = vld [vmem:[%s11617_s1 + $0x3e8] sm:$0xff] }
 0x655   :  { %v2399_v38 = vpop.f32.mrf.mxu0  ;;  %v2419_v45 = vpop.f32.mrf.mxu1 }
 0x656   :  { %v2420_v33 = vadd.f32 %v2419_v45, %v2399_v38  ;;  %v2139_v38 = vor.u32 %v3268_v59, %v3267_v20 }
 0x658   :  { %v2475_v5 = vrot.slane %v2420_v33, 2 }
 0x65c   :  { %v2439_v44 = vpop.f32.mrf.mxu2  ;;  %v2459_v19 = vpop.f32.mrf.mxu3 }
 0x65d   :  { %v2460_v2 = vadd.f32 %v2459_v19, %v2439_v44 }
 0x65f   :  { %v2476_v45 = vrot.slane %v2460_v2, 1 }
 0x661   :  { %v2481_v35 = vsel %vm613_vm3, %v2475_v5, %v2476_v45  ;;  %v10494_v5 = vld [vmem:[%s11617_s1 + $0x7e8] sm:$0xff]  ;;  %v10500_v45 = vld [vmem:[%s11617_s1 + $0x3a0] sm:$0xff] }
 0x662   :  { %v2482_v36 = vsel %vm615_vm5, %v2480_v1, %v2481_v35  ;;  %v10518_v1 = vld [vmem:[%s11617_s1 + $0x7a8] sm:$0xff]  ;;  %v10524_v35 = vld [vmem:[%s11617_s1 + $0x360] sm:$0xff] }
 0x663   :  { %v2483_v62 = vsel %vm617_vm6, %v2479_v31, %v2482_v36  ;;  %v10530_v31 = vld [vmem:[%s11617_s1 + $0x760] sm:$0xff]  ;;  %v10536_v36 = vld [vmem:[%s11617_s1 + $0x368] sm:$0xff] }
 0x664   :  { %v2485_v19 = vadd.f32 %v2483_v62, %v2139_v38  ;;  %v10506_v38 = vld [vmem:[%s11617_s1 + $0x7a0] sm:$0xff]  ;;  %v10542_v62 = vld [vmem:[%s11617_s1 + $0x768] sm:$0xff] }
 0x666   :  { %v2486_v44 = vmul.f32 0.5, %v2485_v19  ;;  %v2491_v43 = vrot.slane %v2485_v19, 6  ;;  %v10548_v19 = vld [vmem:[%s11617_s1 + $0x320] sm:$0xff] }
 0x668   :  { %3304 = vtanh.f32 %v2486_v44  ;;  %v10554_v44 = vld [vmem:[%s11617_s1 + $0x720] sm:$0xff] }
 0x669   :  { %3306 = vtanh.f32 %v2491_v43  ;;  %v10560_v43 = vld [vmem:[%s11617_s1 + $0x328] sm:$0xff] }
 0x66e   :  { %v3305_v34 = vpop.eup %3304 }
 0x66f   :  { %v2488_v33 = vmul.f32 0.5, %v3305_v34  ;;  %v3307_v9 = vpop.eup %3306  ;;  %v10566_v34 = vld [vmem:[%s11617_s1 + $0x728] sm:$0xff] }
 0x671   :  { %v2489_v20 = vadd.f32 0.5, %v2488_v33  ;;  %v10576_v33 = vld [vmem:[%s11617_s1 + $0x2e0] sm:$0xff] }
 0x673   :  { %v2495_v42 = vrot.slane %v2489_v20, 2  ;;  %v2498_v60 = vmul.f32 %v3307_v9, %v2489_v20  ;;  %v2501_v47 = vrot.slane %v2489_v20, 4  ;;  %v10582_v20 = vld [vmem:[%s11617_s1 + $0x6e0] sm:$0xff]  ;;  %v10594_v9 = vld [vmem:[%s11617_s1 + $0x6e8] sm:$0xff] }
 0x675   :  { %v2497_v49 = vmul.f32 %v2495_v42, %v9625_v16  ;;  %v10476_v16 = vld [vmem:[%s11617_s1 + $0x3e0] sm:$0xff]  ;;  %v10588_v42 = vld [vmem:[%s11617_s1 + $0x2e8] sm:$0xff] }
 0x677   :  { %v10455_v46 = vadd.f32 %v2498_v60, %v2497_v49  ;;  %v10600_v49 = vld [vmem:[%s11617_s1 + $0x2a0] sm:$0xff] }
 0x678   :  { %v10606_v60 = vld [vmem:[%s11617_s1 + $0x6a0] sm:$0xff] }
 0x679   :  { %3308 = vtanh.f32 %v10455_v46  ;;  %13603 = vst [vmem:[#allocation66_spill] sm:$0xff] %v10606_v60 }
 0x67f   :  { %v3309_v63 = vpop.eup %3308 }
 0x680   :  { %v2503_v59 = vmul.f32 %v3309_v63, %v2501_v47  ;;  %v10612_v47 = vld [vmem:[%s11617_s1 + $0x2a8] sm:$0xff] }
 0x681   :  { %13604 = vst [vmem:[#allocation79_spill] sm:$0xff] %v10612_v47  ;;  %v10618_v63 = vld [vmem:[%s11617_s1 + $0x6a8] sm:$0xff] }
 0x682   :  { %2504 = vst [vmem:[%s11619_s2 + $0x5] sm:$0x1] %v2503_v59  ;;  %v10461_v2 = vperm.slane %v2503_v59, 1  ;;  %v10463_v61 = vperm.slane %v2503_v59, 0  ;;  %v10624_v59 = vld [vmem:[%s11617_s1 + $0x260] sm:$0xff] }
 0x683   :  { %13605 = vst [vmem:[#allocation80_spill] sm:$0xff] %v10618_v63 }
 0x684   :  { %2508 = vst [vmem:[%s11619_s2 + $0xa] sm:$0x1] %v10461_v2  ;;  %2531 = vmatmul.f32.vlgmr.msra.gmra.mxu0 %v10463_v61  ;;  %2551 = vmatmul.f32.vlgmr.msra.gmra.mxu1 %v10461_v2 }
 0x685   :  { %2571 = vmatmul.f32.vlgmr.msra.gmra.mxu2 %v10463_v61  ;;  %2591 = vmatmul.f32.vlgmr.msra.gmra.mxu3 %v10461_v2  ;;  %13606 = vst [vmem:[#allocation69_spill] sm:$0xff] %v10624_v59 }
 0x686   :  { %2675 = vmatpush.msra.mxu0 %v10476_v16  ;;  %2695 = vmatpush.msra.mxu1 %v10482_v32 }
 0x687   :  { %2715 = vmatpush.msra.mxu2 %v10488_v30  ;;  %2735 = vmatpush.msra.mxu3 %v10494_v5 }
 0x688   :  { %2676 = vmatpush.msra.mxu0 %v10500_v45  ;;  %2696 = vmatpush.msra.mxu1 %v10506_v38 }
 0x689   :  { %2716 = vmatpush.msra.mxu2 %v10512_v12  ;;  %2736 = vmatpush.msra.mxu3 %v10518_v1 }
 0x68a   :  { %2677 = vmatpush.msra.mxu0 %v10524_v35  ;;  %2697 = vmatpush.msra.mxu1 %v10530_v31 }
 0x68b   :  { %2717 = vmatpush.msra.mxu2 %v10536_v36  ;;  %2737 = vmatpush.msra.mxu3 %v10542_v62 }
 0x68c   :  { %2678 = vmatpush.msra.mxu0 %v10548_v19  ;;  %2698 = vmatpush.msra.mxu1 %v10554_v44 }
 0x68d   :  { %2718 = vmatpush.msra.mxu2 %v10560_v43  ;;  %2738 = vmatpush.msra.mxu3 %v10566_v34 }
 0x68e   :  { %2611 = vmatmul.f32.vlgmr.msrb.gmra.mxu0 %v10463_v61  ;;  %2631 = vmatmul.f32.vlgmr.msrb.gmra.mxu1 %v10461_v2 }
 0x68f   :  { %2651 = vmatmul.f32.vlgmr.msrb.gmra.mxu2 %v10463_v61  ;;  %2671 = vmatmul.f32.vlgmr.msrb.gmra.mxu3 %v10461_v2 }
 0x690   :  { %2679 = vmatpush.msra.mxu0 %v10576_v33  ;;  %2699 = vmatpush.msra.mxu1 %v10582_v20 }
 0x691   :  { %2719 = vmatpush.msra.mxu2 %v10588_v42  ;;  %2739 = vmatpush.msra.mxu3 %v10594_v9 }
 0x692   :  { %2680 = vmatpush.msra.mxu0 %v10600_v49  ;;  %2700 = vmatpush.msra.mxu1 %v10606_v60  ;;  %v10630_v60 = vld [vmem:[%s11617_s1 + $0x660] sm:$0xff] }
 0x693   :  { %2720 = vmatpush.msra.mxu2 %v10612_v47  ;;  %2740 = vmatpush.msra.mxu3 %v10618_v63  ;;  %13607 = vst [vmem:[#allocation70_spill] sm:$0xff] %v10630_v60  ;;  %v10636_v47 = vld [vmem:[%s11617_s1 + $0x268] sm:$0xff] }
 0x694   :  { %2681 = vmatpush.msra.mxu0 %v10624_v59  ;;  %2701 = vmatpush.msra.mxu1 %v10630_v60  ;;  %13608 = vst [vmem:[#allocation83_spill] sm:$0xff] %v10636_v47  ;;  %v10642_v63 = vld [vmem:[%s11617_s1 + $0x668] sm:$0xff]  ;;  %v10648_v59 = vld [vmem:[%s11617_s1 + $0x220] sm:$0xff] }
 0x695   :  { %2721 = vmatpush.msra.mxu2 %v10636_v47  ;;  %13609 = vst [vmem:[#allocation84_spill] sm:$0xff] %v10642_v63  ;;  %2741 = vmatpush.msra.mxu3 %v10642_v63  ;;  %v10654_v60 = vld [vmem:[%s11617_s1 + $0x620] sm:$0xff]  ;;  %v10660_v47 = vld [vmem:[%s11617_s1 + $0x228] sm:$0xff] }
 0x696   :  { %13610 = vst [vmem:[#allocation73_spill] sm:$0xff] %v10648_v59  ;;  %2682 = vmatpush.msra.mxu0 %v10648_v59  ;;  %2702 = vmatpush.msra.mxu1 %v10654_v60  ;;  %v10666_v63 = vld [vmem:[%s11617_s1 + $0x628] sm:$0xff]  ;;  %v10672_v59 = vld [vmem:[%s11617_s1 + $0x1e0] sm:$0xff] }
 0x697   :  { %13611 = vst [vmem:[#allocation74_spill] sm:$0xff] %v10654_v60  ;;  %2722 = vmatpush.msra.mxu2 %v10660_v47  ;;  %2742 = vmatpush.msra.mxu3 %v10666_v63  ;;  %v10678_v60 = vld [vmem:[%s11617_s1 + $0x5e0] sm:$0xff] }
 0x698   :  { %13612 = vst [vmem:[#allocation87_spill] sm:$0xff] %v10660_v47  ;;  %2683 = vmatpush.msra.mxu0 %v10672_v59  ;;  %2703 = vmatpush.msra.mxu1 %v10678_v60  ;;  %v10684_v47 = vld [vmem:[%s11617_s1 + $0x1e8] sm:$0xff] }
 0x699   :  { %13613 = vst [vmem:[#allocation88_spill] sm:$0xff] %v10666_v63  ;;  %2723 = vmatpush.msra.mxu2 %v10684_v47  ;;  %v10690_v63 = vld [vmem:[%s11617_s1 + $0x5e8] sm:$0xff] }
 0x69a   :  { %13614 = vst [vmem:[#allocation77_spill] sm:$0xff] %v10672_v59  ;;  %2743 = vmatpush.msra.mxu3 %v10690_v63  ;;  %v10696_v59 = vld [vmem:[%s11617_s1 + $0x1a0] sm:$0xff] }
 0x69b   :  { %13615 = vst [vmem:[#allocation78_spill] sm:$0xff] %v10678_v60  ;;  %2684 = vmatpush.msra.mxu0 %v10696_v59  ;;  %v10702_v60 = vld [vmem:[%s11617_s1 + $0x5a0] sm:$0xff] }
 0x69c   :  { %13616 = vst [vmem:[#allocation91_spill] sm:$0xff] %v10684_v47  ;;  %2704 = vmatpush.msra.mxu1 %v10702_v60  ;;  %v10708_v47 = vld [vmem:[%s11617_s1 + $0x1a8] sm:$0xff] }
 0x69d   :  { %13617 = vst [vmem:[#allocation92_spill] sm:$0xff] %v10690_v63  ;;  %2724 = vmatpush.msra.mxu2 %v10708_v47  ;;  %v10714_v63 = vld [vmem:[%s11617_s1 + $0x5a8] sm:$0xff] }
 0x69e   :  { %13618 = vst [vmem:[#allocation81_spill] sm:$0xff] %v10696_v59  ;;  %2744 = vmatpush.msra.mxu3 %v10714_v63  ;;  %v10720_v59 = vld [vmem:[%s11617_s1 + $0x160] sm:$0xff] }
 0x69f   :  { %13619 = vst [vmem:[#allocation82_spill] sm:$0xff] %v10702_v60  ;;  %2685 = vmatpush.msra.mxu0 %v10720_v59  ;;  %v10726_v60 = vld [vmem:[%s11617_s1 + $0x560] sm:$0xff] }
 0x6a0   :  { %13620 = vst [vmem:[#allocation95_spill] sm:$0xff] %v10708_v47  ;;  %2705 = vmatpush.msra.mxu1 %v10726_v60  ;;  %v10732_v47 = vld [vmem:[%s11617_s1 + $0x168] sm:$0xff] }
 0x6a1   :  { %13621 = vst [vmem:[#allocation96_spill] sm:$0xff] %v10714_v63  ;;  %2725 = vmatpush.msra.mxu2 %v10732_v47  ;;  %v10738_v63 = vld [vmem:[%s11617_s1 + $0x568] sm:$0xff] }
 0x6a2   :  { %13622 = vst [vmem:[#allocation85_spill] sm:$0xff] %v10720_v59  ;;  %2745 = vmatpush.msra.mxu3 %v10738_v63  ;;  %v10744_v59 = vld [vmem:[%s11617_s1 + $0x120] sm:$0xff] }
 0x6a3   :  { %13623 = vst [vmem:[#allocation86_spill] sm:$0xff] %v10726_v60  ;;  %2686 = vmatpush.msra.mxu0 %v10744_v59  ;;  %v10750_v60 = vld [vmem:[%s11617_s1 + $0x520] sm:$0xff] }
 0x6a4   :  { %13624 = vst [vmem:[#allocation99_spill] sm:$0xff] %v10732_v47  ;;  %2706 = vmatpush.msra.mxu1 %v10750_v60  ;;  %v10756_v47 = vld [vmem:[%s11617_s1 + $0x128] sm:$0xff] }
 0x6a5   :  { %13625 = vst [vmem:[#allocation100_spill] sm:$0xff] %v10738_v63  ;;  %2726 = vmatpush.msra.mxu2 %v10756_v47  ;;  %v10762_v63 = vld [vmem:[%s11617_s1 + $0x528] sm:$0xff] }
 0x6a6   :  { %13626 = vst [vmem:[#allocation89_spill] sm:$0xff] %v10744_v59  ;;  %2746 = vmatpush.msra.mxu3 %v10762_v63  ;;  %v10768_v59 = vld [vmem:[%s11617_s1 + $0xe0] sm:$0xff] }
 0x6a7   :  { %13627 = vst [vmem:[#allocation90_spill] sm:$0xff] %v10750_v60  ;;  %2687 = vmatpush.msra.mxu0 %v10768_v59  ;;  %v10774_v60 = vld [vmem:[%s11617_s1 + $0x4e0] sm:$0xff] }
 0x6a8   :  { %13628 = vst [vmem:[#allocation103_spill] sm:$0xff] %v10756_v47  ;;  %2707 = vmatpush.msra.mxu1 %v10774_v60  ;;  %v10780_v47 = vld [vmem:[%s11617_s1 + $0xe8] sm:$0xff] }
 0x6a9   :  { %13629 = vst [vmem:[#allocation104_spill] sm:$0xff] %v10762_v63  ;;  %2727 = vmatpush.msra.mxu2 %v10780_v47  ;;  %v10786_v63 = vld [vmem:[%s11617_s1 + $0x4e8] sm:$0xff] }
 0x6aa   :  { %13630 = vst [vmem:[#allocation93_spill] sm:$0xff] %v10768_v59  ;;  %2747 = vmatpush.msra.mxu3 %v10786_v63  ;;  %v10792_v59 = vld [vmem:[%s11617_s1 + $0xa0] sm:$0xff] }
 0x6ab   :  { %13631 = vst [vmem:[#allocation94_spill] sm:$0xff] %v10774_v60  ;;  %2688 = vmatpush.msra.mxu0 %v10792_v59  ;;  %v10798_v60 = vld [vmem:[%s11617_s1 + $0x4a0] sm:$0xff] }
 0x6ac   :  { %13632 = vst [vmem:[#allocation107_spill] sm:$0xff] %v10780_v47  ;;  %2708 = vmatpush.msra.mxu1 %v10798_v60  ;;  %v10804_v47 = vld [vmem:[%s11617_s1 + $0xa8] sm:$0xff] }
 0x6ad   :  { %13633 = vst [vmem:[#allocation108_spill] sm:$0xff] %v10786_v63  ;;  %2728 = vmatpush.msra.mxu2 %v10804_v47  ;;  %v10810_v63 = vld [vmem:[%s11617_s1 + $0x4a8] sm:$0xff] }
 0x6ae   :  { %13634 = vst [vmem:[#allocation97_spill] sm:$0xff] %v10792_v59  ;;  %2748 = vmatpush.msra.mxu3 %v10810_v63  ;;  %v10816_v59 = vld [vmem:[%s11617_s1 + $0x60] sm:$0xff] }
 0x6af   :  { %13635 = vst [vmem:[#allocation98_spill] sm:$0xff] %v10798_v60  ;;  %2689 = vmatpush.msra.mxu0 %v10816_v59  ;;  %v10822_v60 = vld [vmem:[%s11617_s1 + $0x460] sm:$0xff] }
 0x6b0   :  { %13636 = vst [vmem:[#allocation113_spill] sm:$0xff] %v10804_v47  ;;  %2709 = vmatpush.msra.mxu1 %v10822_v60  ;;  %v10828_v47 = vld [vmem:[%s11617_s1 + $0x68] sm:$0xff] }
 0x6b1   :  { %13637 = vst [vmem:[#allocation114_spill] sm:$0xff] %v10810_v63  ;;  %2729 = vmatpush.msra.mxu2 %v10828_v47  ;;  %v10834_v63 = vld [vmem:[%s11617_s1 + $0x468] sm:$0xff] }
 0x6b2   :  { %13638 = vst [vmem:[#allocation101_spill] sm:$0xff] %v10816_v59  ;;  %2749 = vmatpush.msra.mxu3 %v10834_v63  ;;  %v10840_v59 = vld [vmem:[%s11617_s1 + $0x20] sm:$0xff] }
 0x6b3   :  { %13639 = vst [vmem:[#allocation102_spill] sm:$0xff] %v10822_v60  ;;  %2690 = vmatpush.msra.mxu0 %v10840_v59  ;;  %v10846_v60 = vld [vmem:[%s11617_s1 + $0x420] sm:$0xff] }
 0x6b4   :  { %13640 = vst [vmem:[#allocation117_spill] sm:$0xff] %v10828_v47  ;;  %2710 = vmatpush.msra.mxu1 %v10846_v60  ;;  %v10852_v47 = vld [vmem:[%s11617_s1 + $0x28] sm:$0xff]  ;;  %2691 = vmatmul.f32.vlgmr.msra.gmra.mxu0 %v10463_v61 }
 0x6b5   :  { %13641 = vst [vmem:[#allocation118_spill] sm:$0xff] %v10834_v63  ;;  %2730 = vmatpush.msra.mxu2 %v10852_v47  ;;  %v10858_v63 = vld [vmem:[%s11617_s1 + $0x428] sm:$0xff]  ;;  %2711 = vmatmul.f32.vlgmr.msra.gmra.mxu1 %v10461_v2 }
 0x6b6   :  { %13642 = vst [vmem:[#allocation105_spill] sm:$0xff] %v10840_v59  ;;  %2750 = vmatpush.msra.mxu3 %v10858_v63  ;;  %2731 = vmatmul.f32.vlgmr.msra.gmra.mxu2 %v10463_v61  ;;  %v10886_v59 = vld [vmem:[%s11617_s1 + $0x7f8] sm:$0xff] }
 0x6b7   :  { %13643 = vst [vmem:[#allocation106_spill] sm:$0xff] %v10846_v60  ;;  %2751 = vmatmul.f32.vlgmr.msra.gmra.mxu3 %v10461_v2  ;;  %v10868_v60 = vld [vmem:[%s11617_s1 + $0x3f0] sm:$0xff] }
 0x6b8   :  { %13644 = vst [vmem:[#allocation121_spill] sm:$0xff] %v10852_v47  ;;  %2755 = vmatpush.msrb.mxu0 %v10868_v60  ;;  %v10874_v47 = vld [vmem:[%s11617_s1 + $0x7f0] sm:$0xff]  ;;  %2815 = vmatpush.msrb.mxu3 %v10886_v59 }
 0x6b9   :  { %13645 = vst [vmem:[#allocation122_spill] sm:$0xff] %v10858_v63  ;;  %2775 = vmatpush.msrb.mxu1 %v10874_v47  ;;  %v10880_v63 = vld [vmem:[%s11617_s1 + $0x3f8] sm:$0xff] }
 0x6ba   :  { %13646 = vst [vmem:[#allocation109_spill] sm:$0xff] %v10868_v60  ;;  %2795 = vmatpush.msrb.mxu2 %v10880_v63  ;;  %v10892_v60 = vld [vmem:[%s11617_s1 + $0x3b0] sm:$0xff] }
 0x6bb   :  { %13647 = vst [vmem:[#allocation110_spill] sm:$0xff] %v10874_v47  ;;  %2756 = vmatpush.msrb.mxu0 %v10892_v60  ;;  %v10898_v47 = vld [vmem:[%s11617_s1 + $0x7b0] sm:$0xff] }
 0x6bc   :  { %13648 = vst [vmem:[#allocation123_spill] sm:$0xff] %v10880_v63  ;;  %2776 = vmatpush.msrb.mxu1 %v10898_v47  ;;  %v10904_v63 = vld [vmem:[%s11617_s1 + $0x3b8] sm:$0xff] }
 0x6bd   :  { %13649 = vst [vmem:[#allocation124_spill] sm:$0xff] %v10886_v59  ;;  %2796 = vmatpush.msrb.mxu2 %v10904_v63  ;;  %v10910_v59 = vld [vmem:[%s11617_s1 + $0x7b8] sm:$0xff] }
 0x6be   :  { %13650 = vst [vmem:[#allocation111_spill] sm:$0xff] %v10892_v60  ;;  %2816 = vmatpush.msrb.mxu3 %v10910_v59  ;;  %v10916_v60 = vld [vmem:[%s11617_s1 + $0x370] sm:$0xff] }
 0x6bf   :  { %13651 = vst [vmem:[#allocation112_spill] sm:$0xff] %v10898_v47  ;;  %2757 = vmatpush.msrb.mxu0 %v10916_v60  ;;  %v10922_v47 = vld [vmem:[%s11617_s1 + $0x770] sm:$0xff] }
 0x6c0   :  { %13652 = vst [vmem:[#allocation127_spill] sm:$0xff] %v10904_v63  ;;  %2777 = vmatpush.msrb.mxu1 %v10922_v47  ;;  %v10928_v63 = vld [vmem:[%s11617_s1 + $0x378] sm:$0xff] }
 0x6c1   :  { %13653 = vst [vmem:[#allocation128_spill] sm:$0xff] %v10910_v59  ;;  %2797 = vmatpush.msrb.mxu2 %v10928_v63  ;;  %v10934_v59 = vld [vmem:[%s11617_s1 + $0x778] sm:$0xff] }
 0x6c2   :  { %13654 = vst [vmem:[#allocation115_spill] sm:$0xff] %v10916_v60  ;;  %2817 = vmatpush.msrb.mxu3 %v10934_v59  ;;  %v10940_v60 = vld [vmem:[%s11617_s1 + $0x330] sm:$0xff] }
 0x6c3   :  { %13655 = vst [vmem:[#allocation116_spill] sm:$0xff] %v10922_v47  ;;  %2758 = vmatpush.msrb.mxu0 %v10940_v60  ;;  %v10946_v47 = vld [vmem:[%s11617_s1 + $0x730] sm:$0xff] }
 0x6c4   :  { %13656 = vst [vmem:[#allocation131_spill] sm:$0xff] %v10928_v63  ;;  %2778 = vmatpush.msrb.mxu1 %v10946_v47  ;;  %v10952_v63 = vld [vmem:[%s11617_s1 + $0x338] sm:$0xff] }
 0x6c5   :  { %13657 = vst [vmem:[#allocation132_spill] sm:$0xff] %v10934_v59  ;;  %2798 = vmatpush.msrb.mxu2 %v10952_v63  ;;  %v10958_v59 = vld [vmem:[%s11617_s1 + $0x738] sm:$0xff] }
 0x6c6   :  { %13658 = vst [vmem:[#allocation119_spill] sm:$0xff] %v10940_v60  ;;  %2818 = vmatpush.msrb.mxu3 %v10958_v59  ;;  %v10964_v60 = vld [vmem:[%s11617_s1 + $0x2f0] sm:$0xff] }
 0x6c7   :  { %13659 = vst [vmem:[#allocation120_spill] sm:$0xff] %v10946_v47  ;;  %2759 = vmatpush.msrb.mxu0 %v10964_v60  ;;  %v10970_v47 = vld [vmem:[%s11617_s1 + $0x6f0] sm:$0xff] }
 0x6c8   :  { %13660 = vst [vmem:[#allocation135_spill] sm:$0xff] %v10952_v63  ;;  %2779 = vmatpush.msrb.mxu1 %v10970_v47  ;;  %v10976_v63 = vld [vmem:[%s11617_s1 + $0x2f8] sm:$0xff] }
 0x6c9   :  { %13661 = vst [vmem:[#allocation136_spill] sm:$0xff] %v10958_v59  ;;  %2799 = vmatpush.msrb.mxu2 %v10976_v63  ;;  %v10982_v59 = vld [vmem:[%s11617_s1 + $0x6f8] sm:$0xff] }
 0x6ca   :  { %13662 = vst [vmem:[#allocation125_spill] sm:$0xff] %v10964_v60  ;;  %2819 = vmatpush.msrb.mxu3 %v10982_v59  ;;  %v10988_v60 = vld [vmem:[%s11617_s1 + $0x2b0] sm:$0xff] }
 0x6cb   :  { %13663 = vst [vmem:[#allocation126_spill] sm:$0xff] %v10970_v47  ;;  %2760 = vmatpush.msrb.mxu0 %v10988_v60  ;;  %v10994_v47 = vld [vmem:[%s11617_s1 + $0x6b0] sm:$0xff] }
 0x6cc   :  { %13664 = vst [vmem:[#allocation139_spill] sm:$0xff] %v10976_v63  ;;  %2780 = vmatpush.msrb.mxu1 %v10994_v47  ;;  %v11000_v63 = vld [vmem:[%s11617_s1 + $0x2b8] sm:$0xff] }
 0x6cd   :  { %13665 = vst [vmem:[#allocation140_spill] sm:$0xff] %v10982_v59  ;;  %2800 = vmatpush.msrb.mxu2 %v11000_v63  ;;  %v11006_v59 = vld [vmem:[%s11617_s1 + $0x6b8] sm:$0xff] }
 0x6ce   :  { %13666 = vst [vmem:[#allocation129_spill] sm:$0xff] %v10988_v60  ;;  %2820 = vmatpush.msrb.mxu3 %v11006_v59  ;;  %v11012_v60 = vld [vmem:[%s11617_s1 + $0x270] sm:$0xff] }
 0x6cf   :  { %13667 = vst [vmem:[#allocation130_spill] sm:$0xff] %v10994_v47  ;;  %2761 = vmatpush.msrb.mxu0 %v11012_v60  ;;  %v11018_v47 = vld [vmem:[%s11617_s1 + $0x670] sm:$0xff] }
 0x6d0   :  { %13668 = vst [vmem:[#allocation143_spill] sm:$0xff] %v11000_v63  ;;  %2781 = vmatpush.msrb.mxu1 %v11018_v47  ;;  %v11024_v63 = vld [vmem:[%s11617_s1 + $0x278] sm:$0xff] }
 0x6d1   :  { %13669 = vst [vmem:[#allocation144_spill] sm:$0xff] %v11006_v59  ;;  %2801 = vmatpush.msrb.mxu2 %v11024_v63  ;;  %v11030_v59 = vld [vmem:[%s11617_s1 + $0x678] sm:$0xff] }
 0x6d2   :  { %13670 = vst [vmem:[#allocation133_spill] sm:$0xff] %v11012_v60  ;;  %2821 = vmatpush.msrb.mxu3 %v11030_v59  ;;  %v11036_v60 = vld [vmem:[%s11617_s1 + $0x230] sm:$0xff] }
 0x6d3   :  { %13671 = vst [vmem:[#allocation134_spill] sm:$0xff] %v11018_v47  ;;  %2762 = vmatpush.msrb.mxu0 %v11036_v60  ;;  %v11042_v47 = vld [vmem:[%s11617_s1 + $0x630] sm:$0xff] }
 0x6d4   :  { %13672 = vst [vmem:[#allocation147_spill] sm:$0xff] %v11024_v63  ;;  %2782 = vmatpush.msrb.mxu1 %v11042_v47  ;;  %v11048_v63 = vld [vmem:[%s11617_s1 + $0x238] sm:$0xff] }
 0x6d5   :  { %13673 = vst [vmem:[#allocation148_spill] sm:$0xff] %v11030_v59  ;;  %2802 = vmatpush.msrb.mxu2 %v11048_v63  ;;  %v11054_v59 = vld [vmem:[%s11617_s1 + $0x638] sm:$0xff] }
 0x6d6   :  { %13674 = vst [vmem:[#allocation137_spill] sm:$0xff] %v11036_v60  ;;  %2822 = vmatpush.msrb.mxu3 %v11054_v59  ;;  %v11060_v60 = vld [vmem:[%s11617_s1 + $0x1f0] sm:$0xff] }
 0x6d7   :  { %13675 = vst [vmem:[#allocation138_spill] sm:$0xff] %v11042_v47  ;;  %2763 = vmatpush.msrb.mxu0 %v11060_v60  ;;  %v11066_v47 = vld [vmem:[%s11617_s1 + $0x5f0] sm:$0xff] }
 0x6d8   :  { %13676 = vst [vmem:[#allocation151_spill] sm:$0xff] %v11048_v63  ;;  %2783 = vmatpush.msrb.mxu1 %v11066_v47  ;;  %v11072_v63 = vld [vmem:[%s11617_s1 + $0x1f8] sm:$0xff] }
 0x6d9   :  { %13677 = vst [vmem:[#allocation152_spill] sm:$0xff] %v11054_v59  ;;  %2803 = vmatpush.msrb.mxu2 %v11072_v63  ;;  %v11078_v59 = vld [vmem:[%s11617_s1 + $0x5f8] sm:$0xff] }
 0x6da   :  { %13678 = vst [vmem:[#allocation141_spill] sm:$0xff] %v11060_v60  ;;  %2823 = vmatpush.msrb.mxu3 %v11078_v59  ;;  %v11084_v60 = vld [vmem:[%s11617_s1 + $0x1b0] sm:$0xff] }
 0x6db   :  { %13679 = vst [vmem:[#allocation142_spill] sm:$0xff] %v11066_v47  ;;  %2764 = vmatpush.msrb.mxu0 %v11084_v60  ;;  %v11090_v47 = vld [vmem:[%s11617_s1 + $0x5b0] sm:$0xff] }
 0x6dc   :  { %13680 = vst [vmem:[#allocation155_spill] sm:$0xff] %v11072_v63  ;;  %2784 = vmatpush.msrb.mxu1 %v11090_v47  ;;  %v11096_v63 = vld [vmem:[%s11617_s1 + $0x1b8] sm:$0xff] }
 0x6dd   :  { %13681 = vst [vmem:[#allocation156_spill] sm:$0xff] %v11078_v59  ;;  %2804 = vmatpush.msrb.mxu2 %v11096_v63  ;;  %v11102_v59 = vld [vmem:[%s11617_s1 + $0x5b8] sm:$0xff] }
 0x6de   :  { %13682 = vst [vmem:[#allocation145_spill] sm:$0xff] %v11084_v60  ;;  %2824 = vmatpush.msrb.mxu3 %v11102_v59  ;;  %v11108_v60 = vld [vmem:[%s11617_s1 + $0x170] sm:$0xff] }
 0x6df   :  { %13683 = vst [vmem:[#allocation146_spill] sm:$0xff] %v11090_v47  ;;  %2765 = vmatpush.msrb.mxu0 %v11108_v60  ;;  %v11114_v47 = vld [vmem:[%s11617_s1 + $0x570] sm:$0xff] }
 0x6e0   :  { %13684 = vst [vmem:[#allocation159_spill] sm:$0xff] %v11096_v63  ;;  %2785 = vmatpush.msrb.mxu1 %v11114_v47  ;;  %v11120_v63 = vld [vmem:[%s11617_s1 + $0x178] sm:$0xff] }
 0x6e1   :  { %13685 = vst [vmem:[#allocation160_spill] sm:$0xff] %v11102_v59  ;;  %2805 = vmatpush.msrb.mxu2 %v11120_v63  ;;  %v11126_v59 = vld [vmem:[%s11617_s1 + $0x578] sm:$0xff] }
 0x6e2   :  { %13686 = vst [vmem:[#allocation149_spill] sm:$0xff] %v11108_v60  ;;  %2825 = vmatpush.msrb.mxu3 %v11126_v59  ;;  %v11132_v60 = vld [vmem:[%s11617_s1 + $0x130] sm:$0xff] }
 0x6e3   :  { %13687 = vst [vmem:[#allocation150_spill] sm:$0xff] %v11114_v47  ;;  %2766 = vmatpush.msrb.mxu0 %v11132_v60  ;;  %v11138_v47 = vld [vmem:[%s11617_s1 + $0x530] sm:$0xff] }
 0x6e4   :  { %13688 = vst [vmem:[#allocation163_spill] sm:$0xff] %v11120_v63  ;;  %2786 = vmatpush.msrb.mxu1 %v11138_v47  ;;  %v11144_v63 = vld [vmem:[%s11617_s1 + $0x138] sm:$0xff] }
 0x6e5   :  { %13689 = vst [vmem:[#allocation164_spill] sm:$0xff] %v11126_v59  ;;  %2806 = vmatpush.msrb.mxu2 %v11144_v63  ;;  %v11150_v59 = vld [vmem:[%s11617_s1 + $0x538] sm:$0xff] }
 0x6e6   :  { %13690 = vst [vmem:[#allocation153_spill] sm:$0xff] %v11132_v60  ;;  %2826 = vmatpush.msrb.mxu3 %v11150_v59  ;;  %v11156_v60 = vld [vmem:[%s11617_s1 + $0xf0] sm:$0xff] }
 0x6e7   :  { %13691 = vst [vmem:[#allocation154_spill] sm:$0xff] %v11138_v47  ;;  %2767 = vmatpush.msrb.mxu0 %v11156_v60  ;;  %v11162_v47 = vld [vmem:[%s11617_s1 + $0x4f0] sm:$0xff] }
 0x6e8   :  { %13692 = vst [vmem:[#allocation167_spill] sm:$0xff] %v11144_v63  ;;  %2787 = vmatpush.msrb.mxu1 %v11162_v47  ;;  %v11168_v63 = vld [vmem:[%s11617_s1 + $0xf8] sm:$0xff] }
 0x6e9   :  { %13693 = vst [vmem:[#allocation157_spill] sm:$0xff] %v11150_v59  ;;  %2807 = vmatpush.msrb.mxu2 %v11168_v63  ;;  %v11174_v59 = vld [vmem:[%s11617_s1 + $0x4f8] sm:$0xff] }
 0x6ea   :  { %13694 = vst [vmem:[#allocation158_spill] sm:$0xff] %v11156_v60  ;;  %2827 = vmatpush.msrb.mxu3 %v11174_v59  ;;  %v11180_v60 = vld [vmem:[%s11617_s1 + $0xb0] sm:$0xff] }
 0x6eb   :  { %13695 = vst [vmem:[#allocation170_spill] sm:$0xff] %v11162_v47  ;;  %2768 = vmatpush.msrb.mxu0 %v11180_v60  ;;  %v11186_v47 = vld [vmem:[%s11617_s1 + $0x4b0] sm:$0xff] }
 0x6ec   :  { %13696 = vst [vmem:[#allocation171_spill] sm:$0xff] %v11168_v63  ;;  %2788 = vmatpush.msrb.mxu1 %v11186_v47  ;;  %v11192_v63 = vld [vmem:[%s11617_s1 + $0xb8] sm:$0xff] }
 0x6ed   :  { %13697 = vst [vmem:[#allocation161_spill] sm:$0xff] %v11174_v59  ;;  %2808 = vmatpush.msrb.mxu2 %v11192_v63  ;;  %v11198_v59 = vld [vmem:[%s11617_s1 + $0x4b8] sm:$0xff] }
 0x6ee   :  { %13698 = vst [vmem:[#allocation162_spill] sm:$0xff] %v11180_v60  ;;  %2828 = vmatpush.msrb.mxu3 %v11198_v59  ;;  %v11204_v60 = vld [vmem:[%s11617_s1 + $0x70] sm:$0xff] }
 0x6ef   :  { %13699 = vst [vmem:[#allocation174_spill] sm:$0xff] %v11186_v47  ;;  %2769 = vmatpush.msrb.mxu0 %v11204_v60  ;;  %v11210_v47 = vld [vmem:[%s11617_s1 + $0x470] sm:$0xff] }
 0x6f0   :  { %13700 = vst [vmem:[#allocation175_spill] sm:$0xff] %v11192_v63  ;;  %2789 = vmatpush.msrb.mxu1 %v11210_v47  ;;  %v11216_v63 = vld [vmem:[%s11617_s1 + $0x78] sm:$0xff] }
 0x6f1   :  { %13701 = vst [vmem:[#allocation165_spill] sm:$0xff] %v11198_v59  ;;  %2809 = vmatpush.msrb.mxu2 %v11216_v63  ;;  %v11222_v59 = vld [vmem:[%s11617_s1 + $0x478] sm:$0xff] }
 0x6f2   :  { %13702 = vst [vmem:[#allocation166_spill] sm:$0xff] %v11204_v60  ;;  %2829 = vmatpush.msrb.mxu3 %v11222_v59  ;;  %v11228_v60 = vld [vmem:[%s11617_s1 + $0x30] sm:$0xff] }
 0x6f3   :  { %13703 = vst [vmem:[#allocation168_spill] sm:$0xff] %v11210_v47  ;;  %2770 = vmatpush.msrb.mxu0 %v11228_v60  ;;  %v11234_v47 = vld [vmem:[%s11617_s1 + $0x430] sm:$0xff] }
 0x6f4   :  { %13704 = vst [vmem:[#allocation169_spill] sm:$0xff] %v11216_v63  ;;  %2790 = vmatpush.msrb.mxu1 %v11234_v47  ;;  %v11240_v63 = vld [vmem:[%s11617_s1 + $0x38] sm:$0xff]  ;;  %2771 = vmatmul.f32.vlgmr.msrb.gmra.mxu0 %v10463_v61 }
 0x6f5   :  { %13705 = vst [vmem:[#allocation172_spill] sm:$0xff] %v11222_v59  ;;  %2810 = vmatpush.msrb.mxu2 %v11240_v63  ;;  %v11246_v59 = vld [vmem:[%s11617_s1 + $0x438] sm:$0xff]  ;;  %2791 = vmatmul.f32.vlgmr.msrb.gmra.mxu1 %v10461_v2 }
 0x6f6   :  { %13706 = vst [vmem:[#allocation173_spill] sm:$0xff] %v11234_v47  ;;  %2830 = vmatpush.msrb.mxu3 %v11246_v59  ;;  %2811 = vmatmul.f32.vlgmr.msrb.gmra.mxu2 %v10463_v61  ;;  %v4090_v47 = vld [vmem:[%s11617_s1 + $0x3c0] sm:$0xff]  ;;  %v4093_v61 = vld [vmem:[%s11617_s1 + $0x7c8] sm:$0xff] }
 0x6f7   :  { %13707 = vst [vmem:[#allocation180_spill] sm:$0xff] %v11240_v63  ;;  %2831 = vmatmul.f32.vlgmr.msrb.gmra.mxu3 %v10461_v2  ;;  %2888 = vmatpush.msra.mxu0 %v4090_v47  ;;  %v4091_v63 = vld [vmem:[%s11617_s1 + $0x7c0] sm:$0xff] }
 0x6f8   :  { %13708 = vst [vmem:[#allocation181_spill] sm:$0xff] %v11246_v59  ;;  %2908 = vmatpush.msra.mxu1 %v4091_v63  ;;  %v4092_v59 = vld [vmem:[%s11617_s1 + $0x3c8] sm:$0xff]  ;;  %2948 = vmatpush.msra.mxu3 %v4093_v61  ;;  %v4094_v2 = vld [vmem:[%s11617_s1 + $0x380] sm:$0xff] }
 0x6f9   :  { %2928 = vmatpush.msra.mxu2 %v4092_v59  ;;  %2889 = vmatpush.msra.mxu0 %v4094_v2  ;;  %v4095_v47 = vld [vmem:[%s11617_s1 + $0x780] sm:$0xff]  ;;  %v4096_v63 = vld [vmem:[%s11617_s1 + $0x388] sm:$0xff] }
 0x6fa   :  { %2909 = vmatpush.msra.mxu1 %v4095_v47  ;;  %v4097_v59 = vld [vmem:[%s11617_s1 + $0x788] sm:$0xff]  ;;  %v4098_v61 = vld [vmem:[%s11617_s1 + $0x340] sm:$0xff] }
 0x6fb   :  { %2929 = vmatpush.msra.mxu2 %v4096_v63  ;;  %2949 = vmatpush.msra.mxu3 %v4097_v59  ;;  %v4099_v2 = vld [vmem:[%s11617_s1 + $0x740] sm:$0xff]  ;;  %v4100_v47 = vld [vmem:[%s11617_s1 + $0x348] sm:$0xff] }
 0x6fc   :  { %2890 = vmatpush.msra.mxu0 %v4098_v61  ;;  %2910 = vmatpush.msra.mxu1 %v4099_v2  ;;  %v4101_v63 = vld [vmem:[%s11617_s1 + $0x748] sm:$0xff]  ;;  %v4102_v59 = vld [vmem:[%s11617_s1 + $0x300] sm:$0xff] }
 0x6fd   :  { %2930 = vmatpush.msra.mxu2 %v4100_v47  ;;  %2950 = vmatpush.msra.mxu3 %v4101_v63  ;;  %v4103_v61 = vld [vmem:[%s11617_s1 + $0x700] sm:$0xff]  ;;  %v4104_v2 = vld [vmem:[%s11617_s1 + $0x308] sm:$0xff] }
 0x6fe   :  { %2891 = vmatpush.msra.mxu0 %v4102_v59  ;;  %2911 = vmatpush.msra.mxu1 %v4103_v61  ;;  %v4105_v47 = vld [vmem:[%s11617_s1 + $0x708] sm:$0xff]  ;;  %v4106_v63 = vld [vmem:[%s11617_s1 + $0x2c0] sm:$0xff] }
 0x6ff   :  { %2931 = vmatpush.msra.mxu2 %v4104_v2  ;;  %2951 = vmatpush.msra.mxu3 %v4105_v47  ;;  %v4107_v59 = vld [vmem:[%s11617_s1 + $0x6c0] sm:$0xff]  ;;  %v4108_v61 = vld [vmem:[%s11617_s1 + $0x2c8] sm:$0xff] }
 0x700   :  { %2892 = vmatpush.msra.mxu0 %v4106_v63  ;;  %2912 = vmatpush.msra.mxu1 %v4107_v59  ;;  %v4109_v2 = vld [vmem:[%s11617_s1 + $0x6c8] sm:$0xff]  ;;  %v13745_v59 = vld [vmem:[#allocation34_spill] sm:$0xff] }
 0x701   :  { %2932 = vmatpush.msra.mxu2 %v4108_v61  ;;  %2952 = vmatpush.msra.mxu3 %v4109_v2  ;;  %v4110_v47 = vld [vmem:[%s11617_s1 + $0x288] sm:$0xff]  ;;  %v13747_v2 = vld [vmem:[#allocation44_spill] sm:$0xff] }
 0x702   :  { %2893 = vmatpush.msra.mxu0 %v9806_v58  ;;  %2913 = vmatpush.msra.mxu1 %v9812_v56  ;;  %v4111_v63 = vld [vmem:[%s11617_s1 + $0x688] sm:$0xff]  ;;  %v13709_v58 = vld [vmem:[#allocation2_spill] sm:$0xff] }
 0x703   :  { %2933 = vmatpush.msra.mxu2 %v4110_v47  ;;  %2953 = vmatpush.msra.mxu3 %v4111_v63  ;;  %v13710_v56 = vld [vmem:[#allocation7_spill] sm:$0xff]  ;;  %v13748_v47 = vld [vmem:[#allocation37_spill] sm:$0xff]  ;;  %v13749_v63 = vld [vmem:[#allocation38_spill] sm:$0xff] }
 0x704   :  { %2894 = vmatpush.msra.mxu0 %v9820_v41  ;;  %2914 = vmatpush.msra.mxu1 %v9826_v0  ;;  %v13711_v41 = vld [vmem:[#allocation8_spill] sm:$0xff]  ;;  %v13712_v0 = vld [vmem:[#allocation3_spill] sm:$0xff] }
 0x705   :  { %2934 = vmatpush.msra.mxu2 %v9832_v10  ;;  %2954 = vmatpush.msra.mxu3 %v9838_v13  ;;  %v13713_v10 = vld [vmem:[#allocation4_spill] sm:$0xff]  ;;  %v13714_v13 = vld [vmem:[#allocation11_spill] sm:$0xff] }
 0x706   :  { %2895 = vmatpush.msra.mxu0 %v9844_v57  ;;  %2915 = vmatpush.msra.mxu1 %v9850_v39  ;;  %v13715_v57 = vld [vmem:[#allocation12_spill] sm:$0xff]  ;;  %v13716_v39 = vld [vmem:[#allocation5_spill] sm:$0xff]  ;;  %v13746_v61 = vld [vmem:[#allocation43_spill] sm:$0xff] }
 0x707   :  { %2935 = vmatpush.msra.mxu2 %v9856_v29  ;;  %2955 = vmatpush.msra.mxu3 %v9862_v53  ;;  %v13717_v29 = vld [vmem:[#allocation6_spill] sm:$0xff]  ;;  %v13718_v53 = vld [vmem:[#allocation15_spill] sm:$0xff] }
 0x708   :  { %2896 = vmatpush.msra.mxu0 %v9868_v18  ;;  %2916 = vmatpush.msra.mxu1 %v9874_v55  ;;  %v13719_v18 = vld [vmem:[#allocation16_spill] sm:$0xff]  ;;  %v13720_v55 = vld [vmem:[#allocation9_spill] sm:$0xff] }
 0x709   :  { %2936 = vmatpush.msra.mxu2 %v9880_v54  ;;  %2956 = vmatpush.msra.mxu3 %v9886_v52  ;;  %v13721_v54 = vld [vmem:[#allocation10_spill] sm:$0xff]  ;;  %v13722_v52 = vld [vmem:[#allocation19_spill] sm:$0xff] }
 0x70a   :  { %2897 = vmatpush.msra.mxu0 %v9892_v40  ;;  %2917 = vmatpush.msra.mxu1 %v9898_v28  ;;  %v13723_v40 = vld [vmem:[#allocation20_spill] sm:$0xff]  ;;  %v13724_v28 = vld [vmem:[#allocation13_spill] sm:$0xff] }
 0x70b   :  { %2937 = vmatpush.msra.mxu2 %v9904_v17  ;;  %2957 = vmatpush.msra.mxu3 %v9910_v3  ;;  %v13725_v17 = vld [vmem:[#allocation14_spill] sm:$0xff]  ;;  %v13726_v3 = vld [vmem:[#allocation23_spill] sm:$0xff] }
 0x70c   :  { %2898 = vmatpush.msra.mxu0 %v9916_v4  ;;  %2918 = vmatpush.msra.mxu1 %v9922_v6  ;;  %v13727_v4 = vld [vmem:[#allocation24_spill] sm:$0xff]  ;;  %v13728_v6 = vld [vmem:[#allocation17_spill] sm:$0xff] }
 0x70d   :  { %2938 = vmatpush.msra.mxu2 %v9928_v7  ;;  %2958 = vmatpush.msra.mxu3 %v9934_v8  ;;  %v13729_v7 = vld [vmem:[#allocation18_spill] sm:$0xff]  ;;  %v13730_v8 = vld [vmem:[#allocation27_spill] sm:$0xff] }
 0x70e   :  { %2899 = vmatpush.msra.mxu0 %v9940_v14  ;;  %2919 = vmatpush.msra.mxu1 %v9946_v15  ;;  %v13731_v14 = vld [vmem:[#allocation28_spill] sm:$0xff]  ;;  %v13732_v15 = vld [vmem:[#allocation21_spill] sm:$0xff] }
 0x70f   :  { %2939 = vmatpush.msra.mxu2 %v9952_v22  ;;  %2959 = vmatpush.msra.mxu3 %v9958_v23  ;;  %v13733_v22 = vld [vmem:[#allocation22_spill] sm:$0xff]  ;;  %v13734_v23 = vld [vmem:[#allocation31_spill] sm:$0xff] }
 0x710   :  { %2900 = vmatpush.msra.mxu0 %v9964_v24  ;;  %2920 = vmatpush.msra.mxu1 %v9970_v25  ;;  %v13735_v24 = vld [vmem:[#allocation32_spill] sm:$0xff]  ;;  %v13736_v25 = vld [vmem:[#allocation25_spill] sm:$0xff] }
 0x711   :  { %2940 = vmatpush.msra.mxu2 %v9976_v26  ;;  %2960 = vmatpush.msra.mxu3 %v9982_v27  ;;  %v13737_v26 = vld [vmem:[#allocation26_spill] sm:$0xff]  ;;  %v13738_v27 = vld [vmem:[#allocation35_spill] sm:$0xff] }
 0x712   :  { %2901 = vmatpush.msra.mxu0 %v9988_v50  ;;  %2921 = vmatpush.msra.mxu1 %v9994_v51  ;;  %v13739_v50 = vld [vmem:[#allocation36_spill] sm:$0xff]  ;;  %v13740_v51 = vld [vmem:[#allocation29_spill] sm:$0xff] }
 0x713   :  { %2941 = vmatpush.msra.mxu2 %v10000_v21  ;;  %2961 = vmatpush.msra.mxu3 %v10006_v37  ;;  %v13741_v21 = vld [vmem:[#allocation30_spill] sm:$0xff]  ;;  %v13742_v37 = vld [vmem:[#allocation39_spill] sm:$0xff] }
 0x714   :  { %2902 = vmatpush.msra.mxu0 %v10012_v48  ;;  %2922 = vmatpush.msra.mxu1 %v10018_v11  ;;  %v13743_v48 = vld [vmem:[#allocation40_spill] sm:$0xff]  ;;  %v13744_v11 = vld [vmem:[#allocation33_spill] sm:$0xff] }
 0x715   :  { %2942 = vmatpush.msra.mxu2 %v13709_v58  ;;  %2962 = vmatpush.msra.mxu3 %v13710_v56  ;;  %v13750_v58 = vld [vmem:[#allocation49_spill] sm:$0xff]  ;;  %v13751_v56 = vld [vmem:[#allocation50_spill] sm:$0xff] }
 0x716   :  { %2903 = vmatpush.msra.mxu0 %v13711_v41  ;;  %2923 = vmatpush.msra.mxu1 %v13712_v0  ;;  %v13752_v41 = vld [vmem:[#allocation41_spill] sm:$0xff]  ;;  %v13753_v0 = vld [vmem:[#allocation42_spill] sm:$0xff] }
 0x717   :  { %2943 = vmatpush.msra.mxu2 %v13713_v10  ;;  %2963 = vmatpush.msra.mxu3 %v13714_v13  ;;  %v13754_v10 = vld [vmem:[#allocation53_spill] sm:$0xff]  ;;  %v13755_v13 = vld [vmem:[#allocation54_spill] sm:$0xff] }
 0x718   :  { %2968 = vmatpush.msrb.mxu0 %v13715_v57  ;;  %2988 = vmatpush.msrb.mxu1 %v13716_v39  ;;  %v13756_v57 = vld [vmem:[#allocation45_spill] sm:$0xff]  ;;  %v13757_v39 = vld [vmem:[#allocation46_spill] sm:$0xff] }
 0x719   :  { %3008 = vmatpush.msrb.mxu2 %v13717_v29  ;;  %3028 = vmatpush.msrb.mxu3 %v13718_v53  ;;  %v13758_v29 = vld [vmem:[#allocation57_spill] sm:$0xff]  ;;  %v13759_v53 = vld [vmem:[#allocation58_spill] sm:$0xff] }
 0x71a   :  { %2969 = vmatpush.msrb.mxu0 %v13719_v18  ;;  %2989 = vmatpush.msrb.mxu1 %v13720_v55  ;;  %v13760_v18 = vld [vmem:[#allocation59_spill] sm:$0xff]  ;;  %v13761_v55 = vld [vmem:[#allocation60_spill] sm:$0xff] }
 0x71b   :  { %3009 = vmatpush.msrb.mxu2 %v13721_v54  ;;  %3029 = vmatpush.msrb.mxu3 %v13722_v52  ;;  %v13762_v54 = vld [vmem:[#allocation47_spill] sm:$0xff]  ;;  %v13763_v52 = vld [vmem:[#allocation48_spill] sm:$0xff] }
 0x71c   :  { %2970 = vmatpush.msrb.mxu0 %v13723_v40  ;;  %2990 = vmatpush.msrb.mxu1 %v13724_v28  ;;  %v13764_v40 = vld [vmem:[#allocation63_spill] sm:$0xff]  ;;  %v13765_v28 = vld [vmem:[#allocation64_spill] sm:$0xff] }
 0x71d   :  { %3010 = vmatpush.msrb.mxu2 %v13725_v17  ;;  %3030 = vmatpush.msrb.mxu3 %v13726_v3  ;;  %v13766_v17 = vld [vmem:[#allocation51_spill] sm:$0xff]  ;;  %v13767_v3 = vld [vmem:[#allocation52_spill] sm:$0xff] }
 0x71e   :  { %2971 = vmatpush.msrb.mxu0 %v13727_v4  ;;  %2991 = vmatpush.msrb.mxu1 %v13728_v6  ;;  %v13768_v4 = vld [vmem:[#allocation67_spill] sm:$0xff]  ;;  %v13769_v6 = vld [vmem:[#allocation68_spill] sm:$0xff] }
 0x71f   :  { %3011 = vmatpush.msrb.mxu2 %v13729_v7  ;;  %3031 = vmatpush.msrb.mxu3 %v13730_v8  ;;  %v13770_v7 = vld [vmem:[#allocation55_spill] sm:$0xff]  ;;  %v13771_v8 = vld [vmem:[#allocation56_spill] sm:$0xff] }
 0x720   :  { %2972 = vmatpush.msrb.mxu0 %v13731_v14  ;;  %2992 = vmatpush.msrb.mxu1 %v13732_v15  ;;  %v13772_v14 = vld [vmem:[#allocation71_spill] sm:$0xff]  ;;  %v13773_v15 = vld [vmem:[#allocation72_spill] sm:$0xff] }
 0x721   :  { %3012 = vmatpush.msrb.mxu2 %v13733_v22  ;;  %3032 = vmatpush.msrb.mxu3 %v13734_v23  ;;  %v13774_v22 = vld [vmem:[#allocation61_spill] sm:$0xff]  ;;  %v13775_v23 = vld [vmem:[#allocation62_spill] sm:$0xff] }
 0x722   :  { %2973 = vmatpush.msrb.mxu0 %v13735_v24  ;;  %2993 = vmatpush.msrb.mxu1 %v13736_v25  ;;  %v13776_v24 = vld [vmem:[#allocation75_spill] sm:$0xff]  ;;  %v13777_v25 = vld [vmem:[#allocation76_spill] sm:$0xff] }
 0x723   :  { %3013 = vmatpush.msrb.mxu2 %v13737_v26  ;;  %3033 = vmatpush.msrb.mxu3 %v13738_v27  ;;  %v13778_v26 = vld [vmem:[#allocation65_spill] sm:$0xff]  ;;  %v2532_v27 = vpop.f32.mrf.mxu0 }
 0x724   :  { %2974 = vmatpush.msrb.mxu0 %v13739_v50  ;;  %2994 = vmatpush.msrb.mxu1 %v13740_v51  ;;  %v2552_v50 = vpop.f32.mrf.mxu1  ;;  %v2572_v51 = vpop.f32.mrf.mxu2 }
 0x725   :  { %3014 = vmatpush.msrb.mxu2 %v13741_v21  ;;  %3034 = vmatpush.msrb.mxu3 %v13742_v37  ;;  %v2592_v21 = vpop.f32.mrf.mxu3 }
 0x726   :  { %2975 = vmatpush.msrb.mxu0 %v13743_v48  ;;  %2995 = vmatpush.msrb.mxu1 %v13744_v11 }
 0x727   :  { %3015 = vmatpush.msrb.mxu2 %v13745_v59  ;;  %3035 = vmatpush.msrb.mxu3 %v13746_v61 }
 0x728   :  { %2976 = vmatpush.msrb.mxu0 %v13747_v2  ;;  %2996 = vmatpush.msrb.mxu1 %v13748_v47 }
 0x729   :  { %3016 = vmatpush.msrb.mxu2 %v13749_v63  ;;  %3036 = vmatpush.msrb.mxu3 %v13750_v58 }
 0x72a   :  { %2977 = vmatpush.msrb.mxu0 %v13751_v56  ;;  %2997 = vmatpush.msrb.mxu1 %v13752_v41 }
 0x72b   :  { %3017 = vmatpush.msrb.mxu2 %v13753_v0  ;;  %3037 = vmatpush.msrb.mxu3 %v13754_v10  ;;  %v2612_v37 = vpop.f32.mrf.mxu0  ;;  %v2593_v0 = vadd.f32 %v2592_v21, %v2572_v51 }
 0x72c   :  { %2978 = vmatpush.msrb.mxu0 %v13755_v13  ;;  %2998 = vmatpush.msrb.mxu1 %v13756_v57  ;;  %v2632_v48 = vpop.f32.mrf.mxu1  ;;  %v2652_v11 = vpop.f32.mrf.mxu2 }
 0x72d   :  { %3018 = vmatpush.msrb.mxu2 %v13757_v39  ;;  %3038 = vmatpush.msrb.mxu3 %v13758_v29  ;;  %v2672_v59 = vpop.f32.mrf.mxu3  ;;  %v2633_v10 = vadd.f32 %v2632_v48, %v2612_v37 }
 0x72e   :  { %2979 = vmatpush.msrb.mxu0 %v13759_v53  ;;  %2999 = vmatpush.msrb.mxu1 %v13760_v18  ;;  %v2673_v58 = vadd.f32 %v2672_v59, %v2652_v11  ;;  %v3269_v18 = vld [vmem:[%s11618_s0 + $0x6] ss:$8 sm:$0xf] }
 0x72f   :  { %3019 = vmatpush.msrb.mxu2 %v13761_v55  ;;  %3039 = vmatpush.msrb.mxu3 %v13762_v54  ;;  %v2843_v54 = vrot.slane %v2593_v0, 7 }
 0x730   :  { %2980 = vmatpush.msrb.mxu0 %v13763_v52  ;;  %3000 = vmatpush.msrb.mxu1 %v13764_v40  ;;  %v2845_v57 = vrot.slane %v2673_v58, 5  ;;  %v2844_v52 = vrot.slane %v2633_v10, 6  ;;  %v13801_v10 = vld [vmem:[#allocation100_spill] sm:$0xff] }
 0x731   :  { %3020 = vmatpush.msrb.mxu2 %v13765_v28  ;;  %3040 = vmatpush.msrb.mxu3 %v13766_v17  ;;  %v3270_v28 = vld [vmem:[%s11618_s0 + $0x6] ss:$8 sm:$0xf0] }
 0x732   :  { %2981 = vmatpush.msrb.mxu0 %v13767_v3  ;;  %3001 = vmatpush.msrb.mxu1 %v13768_v4  ;;  %v2553_v3 = vadd.f32 %v2552_v50, %v2532_v27  ;;  %v2851_v4 = vsel %vm607_vm0, %v2844_v52, %v2845_v57  ;;  %v13803_v57 = vld [vmem:[#allocation90_spill] sm:$0xff]  ;;  %v13810_v52 = vld [vmem:[#allocation97_spill] sm:$0xff] }
 0x733   :  { %3021 = vmatpush.msrb.mxu2 %v13769_v6  ;;  %3041 = vmatpush.msrb.mxu3 %v13770_v7  ;;  %v2692_v61 = vpop.f32.mrf.mxu0 }
 0x734   :  { %2982 = vmatpush.msrb.mxu0 %v13771_v8  ;;  %3002 = vmatpush.msrb.mxu1 %v13772_v14  ;;  %v2712_v2 = vpop.f32.mrf.mxu1  ;;  %v2512_v14 = vor.u32 %v3270_v28, %v3269_v18  ;;  %v13807_v18 = vld [vmem:[#allocation94_spill] sm:$0xff]  ;;  %v13812_v28 = vld [vmem:[#allocation113_spill] sm:$0xff] }
 0x735   :  { %3022 = vmatpush.msrb.mxu2 %v13773_v15  ;;  %3042 = vmatpush.msrb.mxu3 %v13774_v22  ;;  %v2713_v39 = vadd.f32 %v2712_v2, %v2692_v61  ;;  %v2850_v15 = vsel %vm605_vm1, %v2553_v3, %v2843_v54  ;;  %v13809_v54 = vld [vmem:[#allocation108_spill] sm:$0xff]  ;;  %v13814_v3 = vld [vmem:[#allocation101_spill] sm:$0xff] }
 0x736   :  { %2983 = vmatpush.msrb.mxu0 %v13775_v23  ;;  %3003 = vmatpush.msrb.mxu1 %v13776_v24  ;;  %v2852_v24 = vsel %vm609_vm4, %v2850_v15, %v2851_v4  ;;  %v13815_v4 = vld [vmem:[#allocation102_spill] sm:$0xff]  ;;  %v13820_v15 = vld [vmem:[#allocation121_spill] sm:$0xff] }
 0x737   :  { %3023 = vmatpush.msrb.mxu2 %v13777_v25  ;;  %3043 = vmatpush.msrb.mxu3 %v13778_v26  ;;  %v2846_v6 = vrot.slane %v2713_v39, 4  ;;  %v13804_v39 = vld [vmem:[#allocation103_spill] sm:$0xff] }
 0x739   :  { %v2732_v47 = vpop.f32.mrf.mxu2 }
 0x73a   :  { %v2752_v63 = vpop.f32.mrf.mxu3 }
 0x73b   :  { %v2753_v13 = vadd.f32 %v2752_v63, %v2732_v47 }
 0x73d   :  { %v2847_v40 = vrot.slane %v2753_v13, 3  ;;  %v13802_v13 = vld [vmem:[#allocation89_spill] sm:$0xff] }
 0x73f   :  { %v2853_v22 = vsel %vm611_vm2, %v2846_v6, %v2847_v40  ;;  %v13811_v40 = vld [vmem:[#allocation98_spill] sm:$0xff]  ;;  %v13816_v6 = vld [vmem:[#allocation117_spill] sm:$0xff] }
 0x771   :  { %v2772_v56 = vpop.f32.mrf.mxu0 }
 0x772   :  { %v2792_v41 = vpop.f32.mrf.mxu1 }
 0x773   :  { %v2793_v29 = vadd.f32 %v2792_v41, %v2772_v56 }
 0x775   :  { %v2848_v7 = vrot.slane %v2793_v29, 2  ;;  %v13805_v29 = vld [vmem:[#allocation104_spill] sm:$0xff] }
 0x779   :  { %v2812_v53 = vpop.f32.mrf.mxu2 }
 0x77a   :  { %v2832_v55 = vpop.f32.mrf.mxu3 }
 0x77b   :  { %v2833_v17 = vadd.f32 %v2832_v55, %v2812_v53  ;;  %v13806_v53 = vld [vmem:[#allocation93_spill] sm:$0xff]  ;;  %v13808_v55 = vld [vmem:[#allocation107_spill] sm:$0xff] }
 0x77d   :  { %v2849_v8 = vrot.slane %v2833_v17, 1  ;;  %v13813_v17 = vld [vmem:[#allocation114_spill] sm:$0xff] }
 0x77f   :  { %v2854_v23 = vsel %vm613_vm3, %v2848_v7, %v2849_v8  ;;  %v13817_v7 = vld [vmem:[#allocation118_spill] sm:$0xff]  ;;  %v13818_v8 = vld [vmem:[#allocation105_spill] sm:$0xff] }
 0x780   :  { %v2855_v25 = vsel %vm615_vm5, %v2853_v22, %v2854_v23  ;;  %v13821_v22 = vld [vmem:[#allocation122_spill] sm:$0xff]  ;;  %v13822_v23 = vld [vmem:[#allocation109_spill] sm:$0xff] }
 0x781   :  { %v2856_v26 = vsel %vm617_vm6, %v2852_v24, %v2855_v25  ;;  %v13823_v24 = vld [vmem:[#allocation110_spill] sm:$0xff]  ;;  %v13824_v25 = vld [vmem:[#allocation123_spill] sm:$0xff] }
 0x782   :  { %v2858_v51 = vadd.f32 %v2856_v26, %v2512_v14  ;;  %v13819_v14 = vld [vmem:[#allocation106_spill] sm:$0xff]  ;;  %v13825_v26 = vld [vmem:[#allocation124_spill] sm:$0xff] }
 0x784   :  { %v2859_v27 = vmul.f32 0.5, %v2858_v51  ;;  %v2864_v50 = vrot.slane %v2858_v51, 6  ;;  %v13826_v51 = vld [vmem:[#allocation111_spill] sm:$0xff] }
 0x786   :  { %3310 = vtanh.f32 %v2859_v27  ;;  %v13827_v27 = vld [vmem:[#allocation112_spill] sm:$0xff] }
 0x787   :  { %3312 = vtanh.f32 %v2864_v50  ;;  %v13828_v50 = vld [vmem:[#allocation127_spill] sm:$0xff] }
 0x78c   :  { %v3311_v21 = vpop.eup %3310 }
 0x78d   :  { %v2861_v37 = vmul.f32 0.5, %v3311_v21  ;;  %v3313_v59 = vpop.eup %3312  ;;  %v13829_v21 = vld [vmem:[#allocation128_spill] sm:$0xff] }
 0x78f   :  { %v2862_v48 = vadd.f32 0.5, %v2861_v37  ;;  %v13830_v37 = vld [vmem:[#allocation115_spill] sm:$0xff] }
 0x791   :  { %v2868_v11 = vrot.slane %v2862_v48, 2  ;;  %v2871_v2 = vmul.f32 %v3313_v59, %v2862_v48  ;;  %v2874_v63 = vrot.slane %v2862_v48, 4  ;;  %v13831_v48 = vld [vmem:[#allocation116_spill] sm:$0xff] }
 0x792   :  { %v13833_v59 = vld [vmem:[#allocation132_spill] sm:$0xff] }
 0x793   :  { %v2870_v61 = vmul.f32 %v2868_v11, %v10455_v46  ;;  %v13779_v46 = vld [vmem:[#allocation66_spill] sm:$0xff]  ;;  %v13832_v11 = vld [vmem:[#allocation131_spill] sm:$0xff] }
 0x795   :  { %v11439_v47 = vadd.f32 %v2871_v2, %v2870_v61  ;;  %v13834_v61 = vld [vmem:[#allocation119_spill] sm:$0xff]  ;;  %v13835_v2 = vld [vmem:[#allocation120_spill] sm:$0xff] }
 0x797   :  { %3314 = vtanh.f32 %v11439_v47 }
 0x79d   :  { %v3315_v58 = vpop.eup %3314 }
 0x79e   :  { %v2876_v56 = vmul.f32 %v3315_v58, %v2874_v63  ;;  %v13836_v63 = vld [vmem:[#allocation135_spill] sm:$0xff]  ;;  %v13837_v58 = vld [vmem:[#allocation136_spill] sm:$0xff] }
 0x7a0   :  { %2877 = vst [vmem:[%s11619_s2 + $0x6] sm:$0x1] %v2876_v56  ;;  %v11445_v41 = vperm.slane %v2876_v56, 1  ;;  %v11447_v0 = vperm.slane %v2876_v56, 0  ;;  %v13838_v56 = vld [vmem:[#allocation125_spill] sm:$0xff] }
 0x7a2   :  { %2881 = vst [vmem:[%s11619_s2 + $0x9] sm:$0x1] %v11445_v41  ;;  %2904 = vmatmul.f32.vlgmr.msra.gmra.mxu0 %v11447_v0  ;;  %2924 = vmatmul.f32.vlgmr.msra.gmra.mxu1 %v11445_v41 }
 0x7a3   :  { %2944 = vmatmul.f32.vlgmr.msra.gmra.mxu2 %v11447_v0  ;;  %2964 = vmatmul.f32.vlgmr.msra.gmra.mxu3 %v11445_v41 }
 0x7a4   :  { %3048 = vmatpush.msra.mxu0 %v10476_v16  ;;  %3068 = vmatpush.msra.mxu1 %v10482_v32  ;;  %v13780_v16 = vld [vmem:[#allocation79_spill] sm:$0xff]  ;;  %v13781_v32 = vld [vmem:[#allocation80_spill] sm:$0xff] }
 0x7a5   :  { %3088 = vmatpush.msra.mxu2 %v10488_v30  ;;  %3108 = vmatpush.msra.mxu3 %v10494_v5  ;;  %v13782_v30 = vld [vmem:[#allocation69_spill] sm:$0xff]  ;;  %v13783_v5 = vld [vmem:[#allocation70_spill] sm:$0xff] }
 0x7a6   :  { %3049 = vmatpush.msra.mxu0 %v10500_v45  ;;  %3069 = vmatpush.msra.mxu1 %v10506_v38  ;;  %v13784_v45 = vld [vmem:[#allocation83_spill] sm:$0xff]  ;;  %v13785_v38 = vld [vmem:[#allocation84_spill] sm:$0xff] }
 0x7a7   :  { %3089 = vmatpush.msra.mxu2 %v10512_v12  ;;  %3109 = vmatpush.msra.mxu3 %v10518_v1  ;;  %v13786_v12 = vld [vmem:[#allocation73_spill] sm:$0xff]  ;;  %v13787_v1 = vld [vmem:[#allocation74_spill] sm:$0xff] }
 0x7a8   :  { %3050 = vmatpush.msra.mxu0 %v10524_v35  ;;  %3070 = vmatpush.msra.mxu1 %v10530_v31  ;;  %v13788_v35 = vld [vmem:[#allocation87_spill] sm:$0xff]  ;;  %v13789_v31 = vld [vmem:[#allocation88_spill] sm:$0xff] }
 0x7a9   :  { %3090 = vmatpush.msra.mxu2 %v10536_v36  ;;  %3110 = vmatpush.msra.mxu3 %v10542_v62  ;;  %v13790_v36 = vld [vmem:[#allocation77_spill] sm:$0xff]  ;;  %v13791_v62 = vld [vmem:[#allocation78_spill] sm:$0xff] }
 0x7aa   :  { %3051 = vmatpush.msra.mxu0 %v10548_v19  ;;  %3071 = vmatpush.msra.mxu1 %v10554_v44  ;;  %v13792_v19 = vld [vmem:[#allocation91_spill] sm:$0xff]  ;;  %v13793_v44 = vld [vmem:[#allocation92_spill] sm:$0xff] }
 0x7ab   :  { %3091 = vmatpush.msra.mxu2 %v10560_v43  ;;  %3111 = vmatpush.msra.mxu3 %v10566_v34  ;;  %v13794_v43 = vld [vmem:[#allocation81_spill] sm:$0xff]  ;;  %v13795_v34 = vld [vmem:[#allocation82_spill] sm:$0xff] }
 0x7ac   :  { %2984 = vmatmul.f32.vlgmr.msrb.gmra.mxu0 %v11447_v0  ;;  %3004 = vmatmul.f32.vlgmr.msrb.gmra.mxu1 %v11445_v41 }
 0x7ad   :  { %3024 = vmatmul.f32.vlgmr.msrb.gmra.mxu2 %v11447_v0  ;;  %3044 = vmatmul.f32.vlgmr.msrb.gmra.mxu3 %v11445_v41 }
 0x7ae   :  { %3052 = vmatpush.msra.mxu0 %v10576_v33  ;;  %3072 = vmatpush.msra.mxu1 %v10582_v20  ;;  %v13796_v33 = vld [vmem:[#allocation95_spill] sm:$0xff]  ;;  %v13797_v20 = vld [vmem:[#allocation96_spill] sm:$0xff] }
 0x7af   :  { %3092 = vmatpush.msra.mxu2 %v10588_v42  ;;  %3112 = vmatpush.msra.mxu3 %v10594_v9  ;;  %v13798_v42 = vld [vmem:[#allocation85_spill] sm:$0xff]  ;;  %v13799_v9 = vld [vmem:[#allocation86_spill] sm:$0xff] }
 0x7b0   :  { %3053 = vmatpush.msra.mxu0 %v10600_v49  ;;  %3073 = vmatpush.msra.mxu1 %v13779_v46  ;;  %v13800_v49 = vld [vmem:[#allocation99_spill] sm:$0xff]  ;;  %v13839_v46 = vld [vmem:[#allocation126_spill] sm:$0xff] }
 0x7b1   :  { %3093 = vmatpush.msra.mxu2 %v13780_v16  ;;  %3113 = vmatpush.msra.mxu3 %v13781_v32  ;;  %v13840_v16 = vld [vmem:[#allocation139_spill] sm:$0xff]  ;;  %v13841_v32 = vld [vmem:[#allocation140_spill] sm:$0xff] }
 0x7b2   :  { %3054 = vmatpush.msra.mxu0 %v13782_v30  ;;  %3074 = vmatpush.msra.mxu1 %v13783_v5  ;;  %v13842_v30 = vld [vmem:[#allocation129_spill] sm:$0xff]  ;;  %v13843_v5 = vld [vmem:[#allocation130_spill] sm:$0xff] }
 0x7b3   :  { %3094 = vmatpush.msra.mxu2 %v13784_v45  ;;  %3114 = vmatpush.msra.mxu3 %v13785_v38  ;;  %v13844_v45 = vld [vmem:[#allocation143_spill] sm:$0xff]  ;;  %v13845_v38 = vld [vmem:[#allocation144_spill] sm:$0xff] }
 0x7b4   :  { %3055 = vmatpush.msra.mxu0 %v13786_v12  ;;  %3075 = vmatpush.msra.mxu1 %v13787_v1  ;;  %v13846_v12 = vld [vmem:[#allocation133_spill] sm:$0xff]  ;;  %v13847_v1 = vld [vmem:[#allocation134_spill] sm:$0xff] }
 0x7b5   :  { %3095 = vmatpush.msra.mxu2 %v13788_v35  ;;  %3115 = vmatpush.msra.mxu3 %v13789_v31  ;;  %v13848_v35 = vld [vmem:[#allocation147_spill] sm:$0xff]  ;;  %v13849_v31 = vld [vmem:[#allocation148_spill] sm:$0xff] }
 0x7b6   :  { %3056 = vmatpush.msra.mxu0 %v13790_v36  ;;  %3076 = vmatpush.msra.mxu1 %v13791_v62  ;;  %v13850_v36 = vld [vmem:[#allocation137_spill] sm:$0xff]  ;;  %v13851_v62 = vld [vmem:[#allocation138_spill] sm:$0xff] }
 0x7b7   :  { %3096 = vmatpush.msra.mxu2 %v13792_v19  ;;  %3116 = vmatpush.msra.mxu3 %v13793_v44  ;;  %v13852_v19 = vld [vmem:[#allocation151_spill] sm:$0xff]  ;;  %v13853_v44 = vld [vmem:[#allocation152_spill] sm:$0xff] }
 0x7b8   :  { %3057 = vmatpush.msra.mxu0 %v13794_v43  ;;  %3077 = vmatpush.msra.mxu1 %v13795_v34  ;;  %v13854_v43 = vld [vmem:[#allocation141_spill] sm:$0xff]  ;;  %v13855_v34 = vld [vmem:[#allocation142_spill] sm:$0xff] }
 0x7b9   :  { %3097 = vmatpush.msra.mxu2 %v13796_v33  ;;  %3117 = vmatpush.msra.mxu3 %v13797_v20  ;;  %v13856_v33 = vld [vmem:[#allocation155_spill] sm:$0xff]  ;;  %v13857_v20 = vld [vmem:[#allocation156_spill] sm:$0xff] }
 0x7ba   :  { %3058 = vmatpush.msra.mxu0 %v13798_v42  ;;  %3078 = vmatpush.msra.mxu1 %v13799_v9  ;;  %v13858_v42 = vld [vmem:[#allocation145_spill] sm:$0xff]  ;;  %v13859_v9 = vld [vmem:[#allocation146_spill] sm:$0xff] }
 0x7bb   :  { %3098 = vmatpush.msra.mxu2 %v13800_v49  ;;  %3118 = vmatpush.msra.mxu3 %v13801_v10  ;;  %v13860_v49 = vld [vmem:[#allocation159_spill] sm:$0xff]  ;;  %v13861_v10 = vld [vmem:[#allocation160_spill] sm:$0xff] }
 0x7bc   :  { %3059 = vmatpush.msra.mxu0 %v13802_v13  ;;  %3079 = vmatpush.msra.mxu1 %v13803_v57  ;;  %v13862_v13 = vld [vmem:[#allocation149_spill] sm:$0xff]  ;;  %v13863_v57 = vld [vmem:[#allocation150_spill] sm:$0xff] }
 0x7bd   :  { %3099 = vmatpush.msra.mxu2 %v13804_v39  ;;  %3119 = vmatpush.msra.mxu3 %v13805_v29  ;;  %v13864_v39 = vld [vmem:[#allocation163_spill] sm:$0xff]  ;;  %v13865_v29 = vld [vmem:[#allocation164_spill] sm:$0xff] }
 0x7be   :  { %3060 = vmatpush.msra.mxu0 %v13806_v53  ;;  %3080 = vmatpush.msra.mxu1 %v13807_v18  ;;  %v13866_v53 = vld [vmem:[#allocation153_spill] sm:$0xff]  ;;  %v13867_v18 = vld [vmem:[#allocation154_spill] sm:$0xff] }
 0x7bf   :  { %3100 = vmatpush.msra.mxu2 %v13808_v55  ;;  %3120 = vmatpush.msra.mxu3 %v13809_v54  ;;  %v13868_v55 = vld [vmem:[#allocation167_spill] sm:$0xff]  ;;  %v13869_v54 = vld [vmem:[#allocation157_spill] sm:$0xff] }
 0x7c0   :  { %3061 = vmatpush.msra.mxu0 %v13810_v52  ;;  %3081 = vmatpush.msra.mxu1 %v13811_v40  ;;  %v13870_v52 = vld [vmem:[#allocation158_spill] sm:$0xff] }
 0x7c1   :  { %3101 = vmatpush.msra.mxu2 %v13812_v28  ;;  %3121 = vmatpush.msra.mxu3 %v13813_v17  ;;  %v13871_v40 = vld [vmem:[#allocation170_spill] sm:$0xff]  ;;  %v13872_v28 = vld [vmem:[#allocation171_spill] sm:$0xff]  ;;  %v13873_v17 = vld [vmem:[#allocation161_spill] sm:$0xff] }
 0x7c2   :  { %3062 = vmatpush.msra.mxu0 %v13814_v3  ;;  %3082 = vmatpush.msra.mxu1 %v13815_v4  ;;  %v13874_v3 = vld [vmem:[#allocation162_spill] sm:$0xff] }
 0x7c3   :  { %3102 = vmatpush.msra.mxu2 %v13816_v6  ;;  %3122 = vmatpush.msra.mxu3 %v13817_v7  ;;  %v13875_v4 = vld [vmem:[#allocation174_spill] sm:$0xff]  ;;  %v13876_v6 = vld [vmem:[#allocation175_spill] sm:$0xff]  ;;  %v13877_v7 = vld [vmem:[#allocation165_spill] sm:$0xff] }
 0x7c4   :  { %3063 = vmatpush.msra.mxu0 %v13818_v8  ;;  %3083 = vmatpush.msra.mxu1 %v13819_v14  ;;  %v13878_v8 = vld [vmem:[#allocation166_spill] sm:$0xff]  ;;  %v13879_v14 = vld [vmem:[#allocation168_spill] sm:$0xff] }
 0x7c5   :  { %3103 = vmatpush.msra.mxu2 %v13820_v15  ;;  %3123 = vmatpush.msra.mxu3 %v13821_v22  ;;  %v13880_v15 = vld [vmem:[#allocation169_spill] sm:$0xff]  ;;  %v13881_v22 = vld [vmem:[#allocation172_spill] sm:$0xff] }
 0x7c6   :  { %3064 = vmatmul.f32.vlgmr.msra.gmra.mxu0 %v11447_v0  ;;  %3084 = vmatmul.f32.vlgmr.msra.gmra.mxu1 %v11445_v41 }
 0x7c7   :  { %3104 = vmatmul.f32.vlgmr.msra.gmra.mxu2 %v11447_v0  ;;  %3124 = vmatmul.f32.vlgmr.msra.gmra.mxu3 %v11445_v41 }
 0x7c8   :  { %3128 = vmatpush.msrb.mxu0 %v13822_v23  ;;  %3148 = vmatpush.msrb.mxu1 %v13823_v24  ;;  %v13882_v23 = vld [vmem:[#allocation173_spill] sm:$0xff]  ;;  %v13883_v24 = vld [vmem:[#allocation180_spill] sm:$0xff] }
 0x7c9   :  { %3168 = vmatpush.msrb.mxu2 %v13824_v25  ;;  %3188 = vmatpush.msrb.mxu3 %v13825_v26  ;;  %v13884_v25 = vld [vmem:[#allocation181_spill] sm:$0xff] }
 0x7ca   :  { %3129 = vmatpush.msrb.mxu0 %v13826_v51  ;;  %3149 = vmatpush.msrb.mxu1 %v13827_v27 }
 0x7cb   :  { %3169 = vmatpush.msrb.mxu2 %v13828_v50  ;;  %3189 = vmatpush.msrb.mxu3 %v13829_v21 }
 0x7cc   :  { %3130 = vmatpush.msrb.mxu0 %v13830_v37  ;;  %3150 = vmatpush.msrb.mxu1 %v13831_v48 }
 0x7cd   :  { %3170 = vmatpush.msrb.mxu2 %v13832_v11  ;;  %3190 = vmatpush.msrb.mxu3 %v13833_v59 }
 0x7ce   :  { %3131 = vmatpush.msrb.mxu0 %v13834_v61  ;;  %3151 = vmatpush.msrb.mxu1 %v13835_v2 }
 0x7cf   :  { %3171 = vmatpush.msrb.mxu2 %v13836_v63  ;;  %3191 = vmatpush.msrb.mxu3 %v13837_v58 }
 0x7d0   :  { %3132 = vmatpush.msrb.mxu0 %v13838_v56  ;;  %3152 = vmatpush.msrb.mxu1 %v13839_v46 }
 0x7d1   :  { %3172 = vmatpush.msrb.mxu2 %v13840_v16  ;;  %3192 = vmatpush.msrb.mxu3 %v13841_v32 }
 0x7d2   :  { %3133 = vmatpush.msrb.mxu0 %v13842_v30  ;;  %3153 = vmatpush.msrb.mxu1 %v13843_v5 }
 0x7d3   :  { %3173 = vmatpush.msrb.mxu2 %v13844_v45  ;;  %3193 = vmatpush.msrb.mxu3 %v13845_v38  ;;  %v3271_v45 = vld [vmem:[%s11618_s0 + $0x7] ss:$8 sm:$0xf] }
 0x7d4   :  { %3134 = vmatpush.msrb.mxu0 %v13846_v12  ;;  %3154 = vmatpush.msrb.mxu1 %v13847_v1 }
 0x7d5   :  { %3174 = vmatpush.msrb.mxu2 %v13848_v35  ;;  %3194 = vmatpush.msrb.mxu3 %v13849_v31  ;;  %v3272_v31 = vld [vmem:[%s11618_s0 + $0x7] ss:$8 sm:$0xf0] }
 0x7d6   :  { %3135 = vmatpush.msrb.mxu0 %v13850_v36  ;;  %3155 = vmatpush.msrb.mxu1 %v13851_v62 }
 0x7d7   :  { %3175 = vmatpush.msrb.mxu2 %v13852_v19  ;;  %3195 = vmatpush.msrb.mxu3 %v13853_v44 }
 0x7d8   :  { %3136 = vmatpush.msrb.mxu0 %v13854_v43  ;;  %3156 = vmatpush.msrb.mxu1 %v13855_v34 }
 0x7d9   :  { %3176 = vmatpush.msrb.mxu2 %v13856_v33  ;;  %3196 = vmatpush.msrb.mxu3 %v13857_v20  ;;  %v2885_v33 = vor.u32 %v3272_v31, %v3271_v45 }
 0x7da   :  { %3137 = vmatpush.msrb.mxu0 %v13858_v42  ;;  %3157 = vmatpush.msrb.mxu1 %v13859_v9 }
 0x7db   :  { %3177 = vmatpush.msrb.mxu2 %v13860_v49  ;;  %3197 = vmatpush.msrb.mxu3 %v13861_v10 }
 0x7dc   :  { %3138 = vmatpush.msrb.mxu0 %v13862_v13  ;;  %3158 = vmatpush.msrb.mxu1 %v13863_v57 }
 0x7dd   :  { %3178 = vmatpush.msrb.mxu2 %v13864_v39  ;;  %3198 = vmatpush.msrb.mxu3 %v13865_v29 }
 0x7de   :  { %3139 = vmatpush.msrb.mxu0 %v13866_v53  ;;  %3159 = vmatpush.msrb.mxu1 %v13867_v18 }
 0x7df   :  { %3179 = vmatpush.msrb.mxu2 %v13868_v55  ;;  %3199 = vmatpush.msrb.mxu3 %v13869_v54 }
 0x7e0   :  { %3140 = vmatpush.msrb.mxu0 %v13870_v52  ;;  %3160 = vmatpush.msrb.mxu1 %v13871_v40 }
 0x7e1   :  { %3180 = vmatpush.msrb.mxu2 %v13872_v28  ;;  %3200 = vmatpush.msrb.mxu3 %v13873_v17 }
 0x7e2   :  { %3141 = vmatpush.msrb.mxu0 %v13874_v3  ;;  %3161 = vmatpush.msrb.mxu1 %v13875_v4 }
 0x7e3   :  { %3181 = vmatpush.msrb.mxu2 %v13876_v6  ;;  %3201 = vmatpush.msrb.mxu3 %v13877_v7 }
 0x7e4   :  { %3142 = vmatpush.msrb.mxu0 %v13878_v8  ;;  %3162 = vmatpush.msrb.mxu1 %v13879_v14 }
 0x7e5   :  { %3182 = vmatpush.msrb.mxu2 %v13880_v15  ;;  %3202 = vmatpush.msrb.mxu3 %v13881_v22 }
 0x7e6   :  { %3143 = vmatpush.msrb.mxu0 %v11228_v60  ;;  %3163 = vmatpush.msrb.mxu1 %v13882_v23 }
 0x7e7   :  { %3183 = vmatpush.msrb.mxu2 %v13883_v24  ;;  %3203 = vmatpush.msrb.mxu3 %v13884_v25 }
 0x7e8   :  { %3144 = vmatmul.f32.vlgmr.msrb.gmra.mxu0 %v11447_v0  ;;  %3164 = vmatmul.f32.vlgmr.msrb.gmra.mxu1 %v11445_v41 }
 0x7e9   :  { %3184 = vmatmul.f32.vlgmr.msrb.gmra.mxu2 %v11447_v0  ;;  %3204 = vmatmul.f32.vlgmr.msrb.gmra.mxu3 %v11445_v41 }
 0x81f   :  { %v2905_v26 = vpop.f32.mrf.mxu0  ;;  %v2925_v51 = vpop.f32.mrf.mxu1 }
 0x820   :  { %v2926_v62 = vadd.f32 %v2925_v51, %v2905_v26 }
 0x826   :  { %v2945_v27 = vpop.f32.mrf.mxu2  ;;  %v2965_v50 = vpop.f32.mrf.mxu3 }
 0x827   :  { %v2966_v46 = vadd.f32 %v2965_v50, %v2945_v27 }
 0x829   :  { %v2985_v21 = vpop.f32.mrf.mxu0  ;;  %v3005_v60 = vpop.f32.mrf.mxu1  ;;  %v3216_v12 = vrot.slane %v2966_v46, 7 }
 0x82a   :  { %v3006_v16 = vadd.f32 %v3005_v60, %v2985_v21 }
 0x82b   :  { %v3223_v20 = vsel %vm605_vm1, %v2926_v62, %v3216_v12 }
 0x82c   :  { %v3217_v1 = vrot.slane %v3006_v16, 6 }
 0x830   :  { %v3025_v37 = vpop.f32.mrf.mxu2  ;;  %v3045_v48 = vpop.f32.mrf.mxu3 }
 0x831   :  { %v3046_v63 = vadd.f32 %v3045_v48, %v3025_v37 }
 0x833   :  { %v3218_v32 = vrot.slane %v3046_v63, 5 }
 0x835   :  { %v3224_v19 = vsel %vm607_vm0, %v3217_v1, %v3218_v32 }
 0x836   :  { %v3225_v49 = vsel %vm609_vm4, %v3223_v20, %v3224_v19 }
 0x843   :  { %v3065_v11 = vpop.f32.mrf.mxu0  ;;  %v3085_v59 = vpop.f32.mrf.mxu1 }
 0x844   :  { %v3086_v41 = vadd.f32 %v3085_v59, %v3065_v11 }
 0x846   :  { %v3219_v44 = vrot.slane %v3086_v41, 4 }
 0x84a   :  { %v3105_v61 = vpop.f32.mrf.mxu2  ;;  %v3125_v2 = vpop.f32.mrf.mxu3 }
 0x84b   :  { %v3126_v0 = vadd.f32 %v3125_v2, %v3105_v61 }
 0x84d   :  { %v3220_v35 = vrot.slane %v3126_v0, 3 }
 0x84f   :  { %v3226_v42 = vsel %vm611_vm2, %v3219_v44, %v3220_v35 }
 0x865   :  { %v3145_v58 = vpop.f32.mrf.mxu0  ;;  %v3165_v56 = vpop.f32.mrf.mxu1 }
 0x866   :  { %v3166_v30 = vadd.f32 %v3165_v56, %v3145_v58 }
 0x868   :  { %v3221_v43 = vrot.slane %v3166_v30, 2 }
 0x86c   :  { %v3185_v5 = vpop.f32.mrf.mxu2  ;;  %v3205_v38 = vpop.f32.mrf.mxu3 }
 0x86d   :  { %v3206_v36 = vadd.f32 %v3205_v38, %v3185_v5 }
 0x86f   :  { %v3222_v34 = vrot.slane %v3206_v36, 1 }
 0x871   :  { %v3227_v9 = vsel %vm613_vm3, %v3221_v43, %v3222_v34 }
 0x872   :  { %v3228_v10 = vsel %vm615_vm5, %v3226_v42, %v3227_v9 }
 0x873   :  { %v3229_v13 = vsel %vm617_vm6, %v3225_v49, %v3228_v10 }
 0x874   :  { %v3231_v57 = vadd.f32 %v3229_v13, %v2885_v33 }
 0x876   :  { %v3232_v39 = vmul.f32 0.5, %v3231_v57  ;;  %v3237_v29 = vrot.slane %v3231_v57, 6 }
 0x878   :  { %3316 = vtanh.f32 %v3232_v39 }
 0x879   :  { %3318 = vtanh.f32 %v3237_v29 }
 0x87e   :  { %v3317_v53 = vpop.eup %3316 }
 0x87f   :  { %v3234_v18 = vmul.f32 0.5, %v3317_v53  ;;  %v3319_v52 = vpop.eup %3318 }
 0x881   :  { %v3235_v55 = vadd.f32 0.5, %v3234_v18 }
 0x883   :  { %v3241_v54 = vrot.slane %v3235_v55, 2  ;;  %v3244_v28 = vmul.f32 %v3319_v52, %v3235_v55  ;;  %v3247_v3 = vrot.slane %v3235_v55, 4 }
 0x885   :  { %v3243_v40 = vmul.f32 %v3241_v54, %v11439_v47 }
 0x887   :  { %v3245_v17 = vadd.f32 %v3244_v28, %v3243_v40 }
 0x889   :  { %3320 = vtanh.f32 %v3245_v17 }
 0x88f   :  { %v3321_v4 = vpop.eup %3320 }
 0x890   :  { %v3249_v6 = vmul.f32 %v3321_v4, %v3247_v3 }
 0x892   :  { %3250 = vst [vmem:[%s11619_s2 + $0x7] sm:$0x1] %v3249_v6  ;;  %v3252_v7 = vperm.slane %v3249_v6, 1 }
 0x894   :  { %3254 = vst [vmem:[%s11619_s2 + $0x8] sm:$0x1] %v3252_v7 }

</bundles_post_ra>
